<compile_context>
chip_gen: v7x
topology: tpu7x:2x2x1
jax: 0.10.0
libtpu: 0.0.40
codegen_flags: <defaults>
</compile_context>

<pallas_src>
import jax
import jax.numpy as jnp
from jax.experimental import pallas as pl
from jax.experimental.pallas import tpu as pltpu

C_IN = 704
C_IN_PAD = 768      # 704 padded to a 256-multiple; column 704 carries the layer-1 bias
C_H1 = 512
C_H2 = 256
C_H3 = 128
C_OUT = 8           # 4 quat + 3 transl + 1 conf, fused output channels
Q_EPS = 1e-12       # epsilon inside the quaternion rsqrt (avoids NaN on zero points)


def _pick_tile_n():
    """Generation-aware default tile: 1024 where VMEM is plentiful (v5e/v6e,
    128 MiB), 512 otherwise (v7x, 64 MiB/TC).  Falls back to 512 on any
    query failure."""
    try:
        info = pltpu.get_tpu_info()
        if int(info.vmem_capacity_bytes) >= (100 << 20):
            return 1024
    except Exception:
        pass
    return 512


def _pose_kernel(x_ref,
                 w1_ref,
                 w2_ref, b2_ref,
                 w3_ref, b3_ref,
                 wh_ref, bh_ref,
                 out_ref):
    """One (768, TILE_N) tile of points through all branches + fused heads.

    Channels live on sublanes, points on lanes: every layer is
    `W(c_out, c_in) @ h(c_in, n)` on the MXU with f32 accumulation.
    """
    x = x_ref[...]                                            # (768, T) bf16

    # Fused first layer of all three branches; bias already folded into w1's
    # column 704 (x's row 704 is the constant-1 row).
    h1 = jnp.dot(w1_ref[...], x, preferred_element_type=jnp.float32)   # (1536, T)
    h1 = jnp.maximum(h1, 0.0).astype(jnp.bfloat16)

    # Branch order: 0 = quat, 1 = transl, 2 = conf.  The tiny heads are
    # accumulated per-branch into one lane-dense (8, T) f32 buffer.
    head = jnp.zeros(out_ref.shape, jnp.float32)
    for i in range(3):
        hi = h1[i * C_H1:(i + 1) * C_H1, :]                   # (512, T) bf16
        h2 = jnp.dot(w2_ref[i], hi, preferred_element_type=jnp.float32)
        h2 = jnp.maximum(h2 + b2_ref[i], 0.0).astype(jnp.bfloat16)     # (256, T)
        h3 = jnp.dot(w3_ref[i], h2, preferred_element_type=jnp.float32)
        h3 = jnp.maximum(h3 + b3_ref[i], 0.0).astype(jnp.bfloat16)     # (128, T)
        head = head + jnp.dot(wh_ref[:, i * C_H3:(i + 1) * C_H3], h3,
                              preferred_element_type=jnp.float32)      # (8, T)
    head = head + bh_ref[...]

    # Epilogue via sublane masks (no lane shuffles): rows 0..3 = quat,
    # rows 4..6 = transl, row 7 = confidence.
    ch = jax.lax.broadcasted_iota(jnp.int32, head.shape, 0)
    is_q = ch < 4
    is_c = ch == 7
    q_sq = jnp.where(is_q, head * head, 0.0)
    inv_norm = jax.lax.rsqrt(jnp.sum(q_sq, axis=0, keepdims=True) + Q_EPS)  # (1, T)
    sig = pl.reciprocal(1.0 + jnp.exp(-head), approx=True)                  # EUP
    out_ref[...] = jnp.where(is_q, head * inv_norm,
                             jnp.where(is_c, sig, head))


def pose_pipeline_pallas(pixel_features, params, tile_n=None):
    """pixel_features: (B, 704, N) float32.  Returns (q, t, conf) as in PyTorch:
       q: (B, N, 4) L2-normalized, t: (B, N, 3), conf: (B, N, 1) in (0,1)."""
    B, C, N = pixel_features.shape
    assert C == C_IN

    (w1, w2, b2, w3, b3, wh, bh) = params

    if tile_n is None:
        tile_n = _pick_tile_n()
    # Clamp the tile to the 128-aligned point count so tiny inputs stay tiny
    # (also keeps both v7x TensorCores busy for small B*N).
    n_aligned = max(128, ((N + 127) // 128) * 128)
    tile_n = min(tile_n, n_aligned)

    pad_n = (-N) % tile_n
    Np = N + pad_n

    # bf16 input, points padded to the tile, channels padded 704 -> 768 with a
    # constant-1 row at index 704 (carries the folded layer-1 bias).
    x = pixel_features
    if pad_n:
        x = jnp.pad(x, ((0, 0), (0, 0), (0, pad_n)))
    x = x.astype(jnp.bfloat16)
    x = jnp.concatenate(
        [x,
         jnp.ones((B, 1, Np), jnp.bfloat16),
         jnp.zeros((B, C_IN_PAD - C_IN - 1, Np), jnp.bfloat16)], axis=1)

    grid = (B, Np // tile_n)

    in_specs = [
        pl.BlockSpec((None, C_IN_PAD, tile_n), lambda b, n: (b, 0, n)),
        pl.BlockSpec(w1.shape, lambda b, n: (0, 0)),
        pl.BlockSpec(w2.shape, lambda b, n: (0, 0, 0)),
        pl.BlockSpec(b2.shape, lambda b, n: (0, 0, 0)),
        pl.BlockSpec(w3.shape, lambda b, n: (0, 0, 0)),
        pl.BlockSpec(b3.shape, lambda b, n: (0, 0, 0)),
        pl.BlockSpec(wh.shape, lambda b, n: (0, 0)),
        pl.BlockSpec(bh.shape, lambda b, n: (0, 0)),
    ]
    out_specs = pl.BlockSpec((None, C_OUT, tile_n), lambda b, n: (b, 0, n))
    out_shape = jax.ShapeDtypeStruct((B, C_OUT, Np), jnp.float32)

    # Advisory cost estimate so XLA can schedule surrounding ops sensibly.
    m_tot = B * Np
    flops_per_pt = (2 * C_IN_PAD * 3 * C_H1
                    + 3 * 2 * (C_H1 * C_H2 + C_H2 * C_H3)
                    + 3 * 2 * C_H3 * C_OUT)
    param_bytes = sum(int(a.size) * a.dtype.itemsize for a in params)
    cost = pl.CostEstimate(
        flops=m_tot * flops_per_pt,
        transcendentals=m_tot * (2 * C_OUT + 1),
        bytes_accessed=int(x.size) * 2 + B * C_OUT * Np * 4 + param_bytes,
    )

    vmem_limit = (64 << 20) if tile_n >= 1024 else (48 << 20)

    out = pl.pallas_call(
        _pose_kernel,
        out_shape=out_shape,
        grid_spec=pltpu.PrefetchScalarGridSpec(
            num_scalar_prefetch=0,
            grid=grid,
            in_specs=in_specs,
            out_specs=out_specs,
        ),
        compiler_params=pltpu.CompilerParams(
            dimension_semantics=("parallel", "parallel"),
            vmem_limit_bytes=vmem_limit,
        ),
        cost_estimate=cost,
    )(x, w1, w2, b2, w3, b3, wh, bh)

    # Split fused channels and convert to the PyTorch post-transpose layout.
    q = jnp.transpose(out[:, 0:4, :N], (0, 2, 1))
    t = jnp.transpose(out[:, 4:7, :N], (0, 2, 1))
    c = jnp.transpose(out[:, 7:8, :N], (0, 2, 1))
    return q, t, c


def _init_params(key):
    """Deterministic init of the three MLP branches + heads with BN folded.

    Conv1d(k=1) weight (out, in, 1) is kept as (out, in) for channels-first
    matmuls.  BatchNorm (eval mode, running_mean=0, running_var=1) is folded:
    W' = diag(gamma/sqrt(var+eps)) W,  b' = (b - mean)*scale + beta.
    Layer-1 weights of the three branches are concatenated over c_out and the
    folded layer-1 biases become column 704 of the (1536, 768) matrix; the
    three heads are packed into one block-diagonal (8, 384) matrix.
    """
    eps = 1e-5
    keys = list(jax.random.split(key, 64))
    kidx = [0]

    def nxt():
        k = keys[kidx[0]]
        kidx[0] += 1
        return k

    def conv_bn(cin, cout):
        w = jax.random.normal(nxt(), (cout, cin), jnp.float32) * (1.0 / jnp.sqrt(cin))
        b = jax.random.normal(nxt(), (cout,), jnp.float32) * 0.01
        gamma = 1.0 + 0.1 * jax.random.normal(nxt(), (cout,), jnp.float32)
        beta = 0.05 * jax.random.normal(nxt(), (cout,), jnp.float32)
        scale = gamma / jnp.sqrt(1.0 + eps)      # running_var = 1, running_mean = 0
        return w * scale[:, None], ((b * scale + beta)[:, None])   # (cout,cin),(cout,1)

    W1, B1, W2, B2, W3, B3 = [], [], [], [], [], []
    for _ in range(3):                          # branch order: quat, transl, conf
        w, b = conv_bn(C_IN, C_H1); W1.append(w); B1.append(b)
        w, b = conv_bn(C_H1, C_H2); W2.append(w); B2.append(b)
        w, b = conv_bn(C_H2, C_H3); W3.append(w); B3.append(b)

    # Layer 1: (1536, 704) weights, bias as column 704, zeros to column 767.
    w1_w = jnp.concatenate(W1, axis=0)                       # (1536, 704)
    w1_b = jnp.concatenate(B1, axis=0)                       # (1536, 1)
    w1 = jnp.concatenate(
        [w1_w, w1_b, jnp.zeros((3 * C_H1, C_IN_PAD - C_IN - 1), jnp.float32)],
        axis=1).astype(jnp.bfloat16)                         # (1536, 768)

    w2 = jnp.stack(W2).astype(jnp.bfloat16)                  # (3, 256, 512)
    b2 = jnp.stack(B2)                                       # (3, 256, 1) f32
    w3 = jnp.stack(W3).astype(jnp.bfloat16)                  # (3, 128, 256)
    b3 = jnp.stack(B3)                                       # (3, 128, 1) f32

    def head(cout):
        w = jax.random.normal(nxt(), (cout, C_H3), jnp.float32) * (1.0 / jnp.sqrt(C_H3))
        b = jax.random.normal(nxt(), (cout, 1), jnp.float32) * 0.01
        return w, b

    whq, bhq = head(4)   # rotation_head
    wht, bht = head(3)   # translation_head
    whc, bhc = head(1)   # confidence_head

    wh = jnp.zeros((C_OUT, 3 * C_H3), jnp.float32)
    wh = wh.at[0:4, 0:C_H3].set(whq)
    wh = wh.at[4:7, C_H3:2 * C_H3].set(wht)
    wh = wh.at[7:8, 2 * C_H3:3 * C_H3].set(whc)
    wh = wh.astype(jnp.bfloat16)                             # (8, 384)
    bh = jnp.concatenate([bhq, bht, bhc], axis=0)            # (8, 1) f32

    return (w1, w2, b2, w3, b3, wh, bh)


def _reference(pixel_features, params):
    """Pure-JAX reference with the same bf16-weights / f32-accumulation math."""
    (w1, w2, b2, w3, b3, wh, bh) = params
    B, _, N = pixel_features.shape
    x = jnp.concatenate(
        [pixel_features.astype(jnp.bfloat16),
         jnp.ones((B, 1, N), jnp.bfloat16),
         jnp.zeros((B, C_IN_PAD - C_IN - 1, N), jnp.bfloat16)], axis=1)
    h = jnp.einsum('oc,bcn->bon', w1, x, preferred_element_type=jnp.float32)
    h = jnp.maximum(h, 0.0).astype(jnp.bfloat16)              # (B, 1536, N)
    head = jnp.zeros((B, C_OUT, N), jnp.float32)
    for i in range(3):
        hi = h[:, i * C_H1:(i + 1) * C_H1, :]
        g = jnp.einsum('oc,bcn->bon', w2[i], hi, preferred_element_type=jnp.float32)
        g = jnp.maximum(g + b2[i][None], 0.0).astype(jnp.bfloat16)
        g = jnp.einsum('oc,bcn->bon', w3[i], g, preferred_element_type=jnp.float32)
        g = jnp.maximum(g + b3[i][None], 0.0).astype(jnp.bfloat16)
        head = head + jnp.einsum('oc,bcn->bon', wh[:, i * C_H3:(i + 1) * C_H3], g,
                                 preferred_element_type=jnp.float32)
    head = head + bh[None]                                    # (B, 8, N)
    q = head[:, 0:4]
    t = head[:, 4:7]
    c = head[:, 7:8]
    q = q * jax.lax.rsqrt(jnp.sum(q * q, axis=1, keepdims=True) + Q_EPS)
    c = 1.0 / (1.0 + jnp.exp(-c))
    return (jnp.transpose(q, (0, 2, 1)),
            jnp.transpose(t, (0, 2, 1)),
            jnp.transpose(c, (0, 2, 1)))


if __name__ == "__main__":
    key = jax.random.PRNGKey(0)
    kp, kx = jax.random.split(key)

    params = _init_params(kp)

    # Small example consistent with the module: cropped_img (B,3,H,W) with
    # B=2, H=W=4 -> fusion network yields pixel_features (B, 704, H*W=16).
    B, H, W = 2, 4, 4
    N = H * W
    pixel_features = jax.random.normal(kx, (B, C_IN, N), jnp.float32)

    q, t, c = pose_pipeline_pallas(pixel_features, params)
    jax.block_until_ready((q, t, c))

    q_ref, t_ref, c_ref = _reference(pixel_features, params)
    assert q.shape == (B, N, 4) and t.shape == (B, N, 3) and c.shape == (B, N, 1)
    assert jnp.allclose(q, q_ref, atol=2e-2, rtol=2e-2)
    assert jnp.allclose(t, t_ref, atol=2e-2, rtol=2e-2)
    assert jnp.allclose(c, c_ref, atol=2e-2, rtol=2e-2)

    print("KERNEL_OK")
</pallas_src>

<mosaic_0001>
module attributes {stable_mosaic.version = 11 : i64} {
  func.func @_pose_kernel(%arg0: i32, %arg1: i32, %arg2: memref<1x768x128xbf16, #tpu.memory_space<vmem>>, %arg3: memref<1536x768xbf16, #tpu.memory_space<vmem>>, %arg4: memref<3x256x512xbf16, #tpu.memory_space<vmem>>, %arg5: memref<3x256x1xf32, #tpu.memory_space<vmem>>, %arg6: memref<3x128x256xbf16, #tpu.memory_space<vmem>>, %arg7: memref<3x128x1xf32, #tpu.memory_space<vmem>>, %arg8: memref<8x384xbf16, #tpu.memory_space<vmem>>, %arg9: memref<8x1xf32, #tpu.memory_space<vmem>>, %arg10: memref<1x8x128xf32, #tpu.memory_space<vmem>>) attributes {dimension_semantics = [#tpu.dimension_semantics<parallel>, #tpu.dimension_semantics<parallel>], iteration_bounds = array<i64: 2, 1>, scalar_prefetch = 0 : i64, scratch_operands = 0 : i64, tpu.core_type = #tpu.core_type<tc>, window_params = [{transform_indices = @transform_0, window_bounds = array<i64: 1, 768, 128>}, {pipeline_mode = #tpu.pipeline_mode<synchronous>, transform_indices = @transform_1, window_bounds = array<i64: 1536, 768>}, {pipeline_mode = #tpu.pipeline_mode<synchronous>, transform_indices = @transform_2, window_bounds = array<i64: 3, 256, 512>}, {pipeline_mode = #tpu.pipeline_mode<synchronous>, transform_indices = @transform_3, window_bounds = array<i64: 3, 256, 1>}, {pipeline_mode = #tpu.pipeline_mode<synchronous>, transform_indices = @transform_4, window_bounds = array<i64: 3, 128, 256>}, {pipeline_mode = #tpu.pipeline_mode<synchronous>, transform_indices = @transform_5, window_bounds = array<i64: 3, 128, 1>}, {pipeline_mode = #tpu.pipeline_mode<synchronous>, transform_indices = @transform_6, window_bounds = array<i64: 8, 384>}, {pipeline_mode = #tpu.pipeline_mode<synchronous>, transform_indices = @transform_7, window_bounds = array<i64: 8, 1>}, {transform_indices = @transform_8, window_bounds = array<i64: 1, 8, 128>}]} {
    %c0 = arith.constant 0 : index
    %c0_0 = arith.constant 0 : index
    %c0_1 = arith.constant 0 : index
    %0 = vector.load %arg2[%c0, %c0_0, %c0_1] : memref<1x768x128xbf16, #tpu.memory_space<vmem>>, vector<1x768x128xbf16>
    %1 = vector.shape_cast %0 : vector<1x768x128xbf16> to vector<768x128xbf16>
    %c0_2 = arith.constant 0 : index
    %c0_3 = arith.constant 0 : index
    %2 = vector.load %arg3[%c0_2, %c0_3] : memref<1536x768xbf16, #tpu.memory_space<vmem>>, vector<1536x768xbf16>
    %cst = arith.constant dense<0.000000e+00> : vector<1536x128xf32>
    %3 = tpu.matmul %2, %1, %cst {dimension_numbers = #tpu.dot_dimension_numbers<[1], [0], [0], [1], [0, 0, 1, 1], [], []>} : vector<1536x768xbf16>, vector<768x128xbf16>, vector<1536x128xf32> -> vector<1536x128xf32>
    %cst_4 = arith.constant 0.000000e+00 : f32
    %4 = vector.broadcast %cst_4 : f32 to vector<1536x128xf32>
    %5 = arith.maximumf %3, %4 : vector<1536x128xf32>
    %6 = arith.truncf %5 : vector<1536x128xf32> to vector<1536x128xbf16>
    %cst_5 = arith.constant 0.000000e+00 : f32
    %7 = vector.broadcast %cst_5 : f32 to vector<8x128xf32>
    %8 = vector.extract_strided_slice %6 {offsets = [0, 0], sizes = [512, 128], strides = [1, 1]} : vector<1536x128xbf16> to vector<512x128xbf16>
    %c0_6 = arith.constant 0 : index
    %c0_7 = arith.constant 0 : index
    %c0_8 = arith.constant 0 : index
    %9 = vector.load %arg4[%c0_6, %c0_7, %c0_8] : memref<3x256x512xbf16, #tpu.memory_space<vmem>>, vector<1x256x512xbf16>
    %10 = vector.shape_cast %9 : vector<1x256x512xbf16> to vector<256x512xbf16>
    %cst_9 = arith.constant dense<0.000000e+00> : vector<256x128xf32>
    %11 = tpu.matmul %10, %8, %cst_9 {dimension_numbers = #tpu.dot_dimension_numbers<[1], [0], [0], [1], [0, 0, 1, 1], [], []>} : vector<256x512xbf16>, vector<512x128xbf16>, vector<256x128xf32> -> vector<256x128xf32>
    %c0_10 = arith.constant 0 : index
    %c0_11 = arith.constant 0 : index
    %c0_12 = arith.constant 0 : index
    %12 = vector.load %arg5[%c0_10, %c0_11, %c0_12] : memref<3x256x1xf32, #tpu.memory_space<vmem>>, vector<1x256x1xf32>
    %13 = vector.shape_cast %12 : vector<1x256x1xf32> to vector<256x1xf32>
    %14 = vector.broadcast %13 : vector<256x1xf32> to vector<256x128xf32>
    %15 = arith.addf %11, %14 : vector<256x128xf32>
    %cst_13 = arith.constant 0.000000e+00 : f32
    %16 = vector.broadcast %cst_13 : f32 to vector<256x128xf32>
    %17 = arith.maximumf %15, %16 : vector<256x128xf32>
    %18 = arith.truncf %17 : vector<256x128xf32> to vector<256x128xbf16>
    %c0_14 = arith.constant 0 : index
    %c0_15 = arith.constant 0 : index
    %c0_16 = arith.constant 0 : index
    %19 = vector.load %arg6[%c0_14, %c0_15, %c0_16] : memref<3x128x256xbf16, #tpu.memory_space<vmem>>, vector<1x128x256xbf16>
    %20 = vector.shape_cast %19 : vector<1x128x256xbf16> to vector<128x256xbf16>
    %cst_17 = arith.constant dense<0.000000e+00> : vector<128x128xf32>
    %21 = tpu.matmul %20, %18, %cst_17 {dimension_numbers = #tpu.dot_dimension_numbers<[1], [0], [0], [1], [0, 0, 1, 1], [], []>} : vector<128x256xbf16>, vector<256x128xbf16>, vector<128x128xf32> -> vector<128x128xf32>
    %c0_18 = arith.constant 0 : index
    %c0_19 = arith.constant 0 : index
    %c0_20 = arith.constant 0 : index
    %22 = vector.load %arg7[%c0_18, %c0_19, %c0_20] : memref<3x128x1xf32, #tpu.memory_space<vmem>>, vector<1x128x1xf32>
    %23 = vector.shape_cast %22 : vector<1x128x1xf32> to vector<128x1xf32>
    %24 = vector.broadcast %23 : vector<128x1xf32> to vector<128x128xf32>
    %25 = arith.addf %21, %24 : vector<128x128xf32>
    %cst_21 = arith.constant 0.000000e+00 : f32
    %26 = vector.broadcast %cst_21 : f32 to vector<128x128xf32>
    %27 = arith.maximumf %25, %26 : vector<128x128xf32>
    %28 = arith.truncf %27 : vector<128x128xf32> to vector<128x128xbf16>
    %c0_22 = arith.constant 0 : index
    %c0_23 = arith.constant 0 : index
    %29 = vector.load %arg8[%c0_22, %c0_23] : memref<8x384xbf16, #tpu.memory_space<vmem>>, vector<8x128xbf16>
    %cst_24 = arith.constant dense<0.000000e+00> : vector<8x128xf32>
    %30 = tpu.matmul %29, %28, %cst_24 {dimension_numbers = #tpu.dot_dimension_numbers<[1], [0], [0], [1], [0, 0, 1, 1], [], []>} : vector<8x128xbf16>, vector<128x128xbf16>, vector<8x128xf32> -> vector<8x128xf32>
    %31 = arith.addf %7, %30 : vector<8x128xf32>
    %32 = vector.extract_strided_slice %6 {offsets = [512, 0], sizes = [512, 128], strides = [1, 1]} : vector<1536x128xbf16> to vector<512x128xbf16>
    %c1 = arith.constant 1 : index
    %c0_25 = arith.constant 0 : index
    %c0_26 = arith.constant 0 : index
    %33 = vector.load %arg4[%c1, %c0_25, %c0_26] : memref<3x256x512xbf16, #tpu.memory_space<vmem>>, vector<1x256x512xbf16>
    %34 = vector.shape_cast %33 : vector<1x256x512xbf16> to vector<256x512xbf16>
    %cst_27 = arith.constant dense<0.000000e+00> : vector<256x128xf32>
    %35 = tpu.matmul %34, %32, %cst_27 {dimension_numbers = #tpu.dot_dimension_numbers<[1], [0], [0], [1], [0, 0, 1, 1], [], []>} : vector<256x512xbf16>, vector<512x128xbf16>, vector<256x128xf32> -> vector<256x128xf32>
    %c1_28 = arith.constant 1 : index
    %c0_29 = arith.constant 0 : index
    %c0_30 = arith.constant 0 : index
    %36 = vector.load %arg5[%c1_28, %c0_29, %c0_30] : memref<3x256x1xf32, #tpu.memory_space<vmem>>, vector<1x256x1xf32>
    %37 = vector.shape_cast %36 : vector<1x256x1xf32> to vector<256x1xf32>
    %38 = vector.broadcast %37 : vector<256x1xf32> to vector<256x128xf32>
    %39 = arith.addf %35, %38 : vector<256x128xf32>
    %cst_31 = arith.constant 0.000000e+00 : f32
    %40 = vector.broadcast %cst_31 : f32 to vector<256x128xf32>
    %41 = arith.maximumf %39, %40 : vector<256x128xf32>
    %42 = arith.truncf %41 : vector<256x128xf32> to vector<256x128xbf16>
    %c1_32 = arith.constant 1 : index
    %c0_33 = arith.constant 0 : index
    %c0_34 = arith.constant 0 : index
    %43 = vector.load %arg6[%c1_32, %c0_33, %c0_34] : memref<3x128x256xbf16, #tpu.memory_space<vmem>>, vector<1x128x256xbf16>
    %44 = vector.shape_cast %43 : vector<1x128x256xbf16> to vector<128x256xbf16>
    %cst_35 = arith.constant dense<0.000000e+00> : vector<128x128xf32>
    %45 = tpu.matmul %44, %42, %cst_35 {dimension_numbers = #tpu.dot_dimension_numbers<[1], [0], [0], [1], [0, 0, 1, 1], [], []>} : vector<128x256xbf16>, vector<256x128xbf16>, vector<128x128xf32> -> vector<128x128xf32>
    %c1_36 = arith.constant 1 : index
    %c0_37 = arith.constant 0 : index
    %c0_38 = arith.constant 0 : index
    %46 = vector.load %arg7[%c1_36, %c0_37, %c0_38] : memref<3x128x1xf32, #tpu.memory_space<vmem>>, vector<1x128x1xf32>
    %47 = vector.shape_cast %46 : vector<1x128x1xf32> to vector<128x1xf32>
    %48 = vector.broadcast %47 : vector<128x1xf32> to vector<128x128xf32>
    %49 = arith.addf %45, %48 : vector<128x128xf32>
    %cst_39 = arith.constant 0.000000e+00 : f32
    %50 = vector.broadcast %cst_39 : f32 to vector<128x128xf32>
    %51 = arith.maximumf %49, %50 : vector<128x128xf32>
    %52 = arith.truncf %51 : vector<128x128xf32> to vector<128x128xbf16>
    %c0_40 = arith.constant 0 : index
    %c128 = arith.constant 128 : index
    %53 = vector.load %arg8[%c0_40, %c128] : memref<8x384xbf16, #tpu.memory_space<vmem>>, vector<8x128xbf16>
    %cst_41 = arith.constant dense<0.000000e+00> : vector<8x128xf32>
    %54 = tpu.matmul %53, %52, %cst_41 {dimension_numbers = #tpu.dot_dimension_numbers<[1], [0], [0], [1], [0, 0, 1, 1], [], []>} : vector<8x128xbf16>, vector<128x128xbf16>, vector<8x128xf32> -> vector<8x128xf32>
    %55 = arith.addf %31, %54 : vector<8x128xf32>
    %56 = vector.extract_strided_slice %6 {offsets = [1024, 0], sizes = [512, 128], strides = [1, 1]} : vector<1536x128xbf16> to vector<512x128xbf16>
    %c2 = arith.constant 2 : index
    %c0_42 = arith.constant 0 : index
    %c0_43 = arith.constant 0 : index
    %57 = vector.load %arg4[%c2, %c0_42, %c0_43] : memref<3x256x512xbf16, #tpu.memory_space<vmem>>, vector<1x256x512xbf16>
    %58 = vector.shape_cast %57 : vector<1x256x512xbf16> to vector<256x512xbf16>
    %cst_44 = arith.constant dense<0.000000e+00> : vector<256x128xf32>
    %59 = tpu.matmul %58, %56, %cst_44 {dimension_numbers = #tpu.dot_dimension_numbers<[1], [0], [0], [1], [0, 0, 1, 1], [], []>} : vector<256x512xbf16>, vector<512x128xbf16>, vector<256x128xf32> -> vector<256x128xf32>
    %c2_45 = arith.constant 2 : index
    %c0_46 = arith.constant 0 : index
    %c0_47 = arith.constant 0 : index
    %60 = vector.load %arg5[%c2_45, %c0_46, %c0_47] : memref<3x256x1xf32, #tpu.memory_space<vmem>>, vector<1x256x1xf32>
    %61 = vector.shape_cast %60 : vector<1x256x1xf32> to vector<256x1xf32>
    %62 = vector.broadcast %61 : vector<256x1xf32> to vector<256x128xf32>
    %63 = arith.addf %59, %62 : vector<256x128xf32>
    %cst_48 = arith.constant 0.000000e+00 : f32
    %64 = vector.broadcast %cst_48 : f32 to vector<256x128xf32>
    %65 = arith.maximumf %63, %64 : vector<256x128xf32>
    %66 = arith.truncf %65 : vector<256x128xf32> to vector<256x128xbf16>
    %c2_49 = arith.constant 2 : index
    %c0_50 = arith.constant 0 : index
    %c0_51 = arith.constant 0 : index
    %67 = vector.load %arg6[%c2_49, %c0_50, %c0_51] : memref<3x128x256xbf16, #tpu.memory_space<vmem>>, vector<1x128x256xbf16>
    %68 = vector.shape_cast %67 : vector<1x128x256xbf16> to vector<128x256xbf16>
    %cst_52 = arith.constant dense<0.000000e+00> : vector<128x128xf32>
    %69 = tpu.matmul %68, %66, %cst_52 {dimension_numbers = #tpu.dot_dimension_numbers<[1], [0], [0], [1], [0, 0, 1, 1], [], []>} : vector<128x256xbf16>, vector<256x128xbf16>, vector<128x128xf32> -> vector<128x128xf32>
    %c2_53 = arith.constant 2 : index
    %c0_54 = arith.constant 0 : index
    %c0_55 = arith.constant 0 : index
    %70 = vector.load %arg7[%c2_53, %c0_54, %c0_55] : memref<3x128x1xf32, #tpu.memory_space<vmem>>, vector<1x128x1xf32>
    %71 = vector.shape_cast %70 : vector<1x128x1xf32> to vector<128x1xf32>
    %72 = vector.broadcast %71 : vector<128x1xf32> to vector<128x128xf32>
    %73 = arith.addf %69, %72 : vector<128x128xf32>
    %cst_56 = arith.constant 0.000000e+00 : f32
    %74 = vector.broadcast %cst_56 : f32 to vector<128x128xf32>
    %75 = arith.maximumf %73, %74 : vector<128x128xf32>
    %76 = arith.truncf %75 : vector<128x128xf32> to vector<128x128xbf16>
    %c0_57 = arith.constant 0 : index
    %c256 = arith.constant 256 : index
    %77 = vector.load %arg8[%c0_57, %c256] : memref<8x384xbf16, #tpu.memory_space<vmem>>, vector<8x128xbf16>
    %cst_58 = arith.constant dense<0.000000e+00> : vector<8x128xf32>
    %78 = tpu.matmul %77, %76, %cst_58 {dimension_numbers = #tpu.dot_dimension_numbers<[1], [0], [0], [1], [0, 0, 1, 1], [], []>} : vector<8x128xbf16>, vector<128x128xbf16>, vector<8x128xf32> -> vector<8x128xf32>
    %79 = arith.addf %55, %78 : vector<8x128xf32>
    %c0_59 = arith.constant 0 : index
    %c0_60 = arith.constant 0 : index
    %80 = vector.load %arg9[%c0_59, %c0_60] : memref<8x1xf32, #tpu.memory_space<vmem>>, vector<8x1xf32>
    %81 = vector.broadcast %80 : vector<8x1xf32> to vector<8x128xf32>
    %82 = arith.addf %79, %81 : vector<8x128xf32>
    %83 = tpu.iota {dimensions = array<i32: 0>} : vector<8x128xi32>
    %c4_i32 = arith.constant 4 : i32
    %84 = vector.broadcast %c4_i32 : i32 to vector<8x128xi32>
    %85 = arith.cmpi slt, %83, %84 : vector<8x128xi32>
    %c7_i32 = arith.constant 7 : i32
    %86 = vector.broadcast %c7_i32 : i32 to vector<8x128xi32>
    %87 = arith.cmpi eq, %83, %86 : vector<8x128xi32>
    %88 = arith.mulf %82, %82 : vector<8x128xf32>
    %cst_61 = arith.constant 0.000000e+00 : f32
    %89 = vector.broadcast %cst_61 : f32 to vector<8x128xf32>
    %90 = arith.select %85, %88, %89 : vector<8x128xi1>, vector<8x128xf32>
    %cst_62 = arith.constant dense<0.000000e+00> : vector<128xf32>
    %91 = vector.multi_reduction <add>, %90, %cst_62 [0] : vector<8x128xf32> to vector<128xf32>
    %92 = vector.shape_cast %91 : vector<128xf32> to vector<1x128xf32>
    %cst_63 = arith.constant 9.99999996E-13 : f32
    %93 = vector.broadcast %cst_63 : f32 to vector<1x128xf32>
    %94 = arith.addf %92, %93 : vector<1x128xf32>
    %95 = math.rsqrt %94 : vector<1x128xf32>
    %cst_64 = arith.constant 0.000000e+00 : f32
    %96 = vector.broadcast %cst_64 : f32 to vector<8x128xf32>
    %97 = arith.subf %96, %82 : vector<8x128xf32>
    %98 = math.exp %97 : vector<8x128xf32>
    %cst_65 = arith.constant 1.000000e+00 : f32
    %99 = vector.broadcast %cst_65 : f32 to vector<8x128xf32>
    %100 = arith.addf %99, %98 : vector<8x128xf32>
    %101 = tpu.reciprocal %100 {approx = true} : vector<8x128xf32> -> vector<8x128xf32>
    %102 = vector.broadcast %95 : vector<1x128xf32> to vector<8x128xf32>
    %103 = arith.mulf %82, %102 : vector<8x128xf32>
    %104 = arith.select %87, %101, %82 : vector<8x128xi1>, vector<8x128xf32>
    %105 = arith.select %85, %103, %104 : vector<8x128xi1>, vector<8x128xf32>
    %c0_66 = arith.constant 0 : index
    %c0_67 = arith.constant 0 : index
    %c0_68 = arith.constant 0 : index
    %106 = vector.load %arg10[%c0_66, %c0_67, %c0_68] : memref<1x8x128xf32, #tpu.memory_space<vmem>>, vector<1x8x128xf32>
    %107 = vector.shape_cast %106 : vector<1x8x128xf32> to vector<8x128xf32>
    %108 = vector.shape_cast %105 : vector<8x128xf32> to vector<1x8x128xf32>
    tpu.vector_store %arg10[%c0_66, %c0_67, %c0_68], %108 {strides = array<i32>} : memref<1x8x128xf32, #tpu.memory_space<vmem>>, vector<1x8x128xf32>,
    return
  }
  func.func @transform_0(%arg0: i32, %arg1: i32) -> (i32, i32, i32) {
    %c0_i32 = arith.constant 0 : i32
    %c0_i32_0 = arith.constant 0 : i32
    return %arg0, %c0_i32, %arg1 : i32, i32, i32
  }
  func.func @transform_1(%arg0: i32, %arg1: i32) -> (i32, i32) {
    %c0_i32 = arith.constant 0 : i32
    %c0_i32_0 = arith.constant 0 : i32
    %c0_i32_1 = arith.constant 0 : i32
    return %c0_i32, %c0_i32_0 : i32, i32
  }
  func.func @transform_2(%arg0: i32, %arg1: i32) -> (i32, i32, i32) {
    %c0_i32 = arith.constant 0 : i32
    %c0_i32_0 = arith.constant 0 : i32
    %c0_i32_1 = arith.constant 0 : i32
    %c0_i32_2 = arith.constant 0 : i32
    return %c0_i32, %c0_i32_0, %c0_i32_1 : i32, i32, i32
  }
  func.func @transform_3(%arg0: i32, %arg1: i32) -> (i32, i32, i32) {
    %c0_i32 = arith.constant 0 : i32
    %c0_i32_0 = arith.constant 0 : i32
    %c0_i32_1 = arith.constant 0 : i32
    %c0_i32_2 = arith.constant 0 : i32
    return %c0_i32, %c0_i32_0, %c0_i32_1 : i32, i32, i32
  }
  func.func @transform_4(%arg0: i32, %arg1: i32) -> (i32, i32, i32) {
    %c0_i32 = arith.constant 0 : i32
    %c0_i32_0 = arith.constant 0 : i32
    %c0_i32_1 = arith.constant 0 : i32
    %c0_i32_2 = arith.constant 0 : i32
    return %c0_i32, %c0_i32_0, %c0_i32_1 : i32, i32, i32
  }
  func.func @transform_5(%arg0: i32, %arg1: i32) -> (i32, i32, i32) {
    %c0_i32 = arith.constant 0 : i32
    %c0_i32_0 = arith.constant 0 : i32
    %c0_i32_1 = arith.constant 0 : i32
    %c0_i32_2 = arith.constant 0 : i32
    return %c0_i32, %c0_i32_0, %c0_i32_1 : i32, i32, i32
  }
  func.func @transform_6(%arg0: i32, %arg1: i32) -> (i32, i32) {
    %c0_i32 = arith.constant 0 : i32
    %c0_i32_0 = arith.constant 0 : i32
    %c0_i32_1 = arith.constant 0 : i32
    return %c0_i32, %c0_i32_0 : i32, i32
  }
  func.func @transform_7(%arg0: i32, %arg1: i32) -> (i32, i32) {
    %c0_i32 = arith.constant 0 : i32
    %c0_i32_0 = arith.constant 0 : i32
    %c0_i32_1 = arith.constant 0 : i32
    return %c0_i32, %c0_i32_0 : i32, i32
  }
  func.func @transform_8(%arg0: i32, %arg1: i32) -> (i32, i32, i32) {
    %c0_i32 = arith.constant 0 : i32
    %c0_i32_0 = arith.constant 0 : i32
    return %arg0, %c0_i32, %arg1 : i32, i32, i32
  }
}

</mosaic_0001>

<bundles_post_ra>
// kernel: tpu_custom_call.1
= control target key start
LH: loop header
LB: loop body
LE: loop exit
PB: predicated region body
PF: predicated region fallthrough
CT: control target
= control target key end

     0   :  { %s17659_s0 = inlined_call_operand.hbm [shape: bf16[2,768,128], index: 0, kind: input, shape index: {}]   ;;  %s17660_s1 = inlined_call_operand.hbm [shape: bf16[1536,768], index: 1, kind: input, shape index: {}]   ;;  %s17661_s2 = inlined_call_operand.hbm [shape: bf16[3,256,512], index: 2, kind: input, shape index: {}]   ;;  %s17662_s3 = inlined_call_operand.vmem [shape: f32[3,256,1], index: 3, kind: input, shape index: {}]   ;;  %s17663_s4 = inlined_call_operand.hbm [shape: bf16[3,128,256], index: 4, kind: input, shape index: {}]   ;;  %s17664_s5 = inlined_call_operand.vmem [shape: f32[3,128,1], index: 5, kind: input, shape index: {}]   ;;  %s17665_s6 = inlined_call_operand.hbm [shape: bf16[8,384], index: 6, kind: input, shape index: {}]   ;;  %s17666_s7 = inlined_call_operand.vmem [shape: f32[8,1], index: 7, kind: input, shape index: {}]   ;;  %s17667_s8 = inlined_call_operand.hbm [shape: f32[2,8,128], index: 8, kind: output, shape index: {}]  }
   0x1   :  { %17679 = sst [smem:[#allocation154_spill]] %s17660_s1 }
   0x2   :  { %17680 = sst [smem:[#allocation155_spill]] %s17667_s8 }
   0x3   :  { %13 = vsyncpa [#allocation3], 0 }
   0x4   :  { %15 = vsyncpa [#allocation3 + $0x1], 0 }
   0x5   :  { %16 = vsyncpa [#allocation6], 0 }
   0x6   :  { %17 = vsyncpa [#allocation9], 0 }
   0x7   :  { %18 = vsyncpa [#allocation4], 0 }
   0x8   :  { %20 = vsyncpa [#allocation4 + $0x1], 0  ;;  %s15203_s27 = smov 0   ;;  %s15205_s28 = smov 0  }
   0x9   :  { %s15207_s29 = smov 0   ;;  %s15209_s30 = smov 0  }
   0xa   :  { %s15211_s9 = smov 0   ;;  %s15213_s10 = smov 0  }
   0xb LB: > { %17681 = sst [smem:[#allocation16_spill]] %s15119_s27  ;;  %s11002_s11 = sadd.s32 4294967295, %s15139_s10   ;;  %s15139_s10 = sphi %s15213_s10, %s26_s10   ;;  %s15135_s9 = sphi %s15211_s9, %s18214_s9   ;;  %s15131_s30 = sphi %s15209_s30, %s18213_s30   ;;  %s15127_s29 = sphi %s15207_s29, %s18212_s29   ;;  %s15123_s28 = sphi %s15205_s28, %s18211_s28   ;;  %s15119_s27 = sphi %s15203_s27, %s18210_s27  }
   0xc   : > { %17682 = sst [smem:[#allocation17_spill]] %s15131_s30  ;;  %s11003_s12 = sadd.s32 4294967294, %s15139_s10  }
   0xd   : > { %p60_p0 = scmp.ne.s32.totalorder %s15123_s28, %s15119_s27  ;;  %p15237_p1 = scmp.eq.s32.totalorder %s11002_s11, 0 }
   0xe   : > { %p15241_p2 = scmp.eq.s32.totalorder %s11002_s11, 1  ;;  %p239_p3 = scmp.eq.s32.totalorder %s11003_s12, 1 }
   0xf   : > { %s17683_s13 = scalar_select %p15237_p1, 1, 0 }
  0x10   : > { %s17684_s14 = scalar_select %p15241_p2, 1, 0 }
  0x11   : > { %p15247_p4 = por %p15237_p1, %p60_p0  ;;  %p11004_p5 = scmp.ge.s32.totalorder %s15139_s10, 1 }
  0x12   : > { %p15252_p6 = por %p239_p3, %p60_p0  ;;  %p246_p7 = scmp.lt.s32.totalorder %s15139_s10, 3 }
  0x13   : > { %s17685_s15 = scalar_select %p15247_p4, 1, 0 }
  0x14   : > { %s17686_s16 = scalar_select %p15252_p6, 1, 0 }
  0x15   : > { %p15257_p8 = pnand %p11004_p5, %p246_p7  ;;  %s15141_s18 = smov [#allocation5]  }
  0x16   : > { %17687 = sst [smem:[#allocation18_spill]] %s17686_s16  ;;  %s258_s19 = sshll.u32 %s15141_s18, 4  ;;  %s15261_s19 = int_to_ptr.vmem [resolvable:$true] %s258_s19 }
  0x17   : > { %s17688_s17 = scalar_select %p15257_p8, 1, 0 }
  0x18   : > { %p13533_p9 = pneg %p15257_p8  ;;  %s15142_s21 = smov [#allocation8]  }
  0x19   : > { %s287_s22 = sshll.u32 %s15142_s21, 4  ;;  %s17690_s1 = sld [smem:[#allocation154_spill]]  ;;  %s15272_s22 = int_to_ptr.vmem [resolvable:$true] %s287_s22 }
  0x1a   : > { %p15268_p11 = pnand %p13533_p9, %p15237_p1 }
  0x1c   : > { %p15282_p13 = pneg %p15268_p11 }
  0x1f   : > { %s14907_s25 = scalar_lea.hbm %s17690_s1, 73728 }
  0x20   : > { %p14908_p12 = scmp.ne.s32.totalorder %s17690_s1, %s14907_s25  ;;  %p14914_p5 = scmp.lt.u32.totalorder %s14907_s25, %s17690_s1 }
  0x22   : > { %p14910_p0 = pnand %p15282_p13, %p14908_p12 }
  0x24   : > { %p14911_p3 = pneg %p14910_p0 }
  0x26   : > { %p14916_p7 = pnand %p14914_p5, %p14911_p3 }
  0x28   : > { %14919 = shalt.err (!%p14916_p7)
}
  0x29   : > { %s14920_s23 = scalar_lea.vmem %s15261_s19, 73728  ;;  %p14928_p1 = scmp.lt.s32.totalorder %s15261_s19, %s15261_s19 }
  0x2a   : > { %p14921_p9 = scmp.ne.s32.totalorder %s15261_s19, %s14920_s23  ;;  %p14929_p4 = scmp.lt.s32.totalorder %s14920_s23, %s14920_s23 }
  0x2c   : > { %p14923_p10 = pnand %p14921_p9, %p15282_p13  ;;  %p14930_p12 = por %p14929_p4, %p14928_p1 }
  0x2e   : > { %p14924_p6 = pneg %p14923_p10 }
  0x30   : > { %p14931_p0 = pnand %p14930_p12, %p14924_p6 }
  0x32   : > { %14934 = shalt.err (!%p14931_p0)
}
  0x33   : > { %s15143_s24 = smov 384   ;;  %s15144_s25 = smov 24  }
  0x34   : > { %13536 = dma.hbm_to_vmem [thread:$0]  (!%p15268_p11), %s17690_s1, 73728, %s15261_s19, [#allocation6], %s15143_s24, %s15143_s24, %s15144_s25  }
  0x35   : > { %s14935_s16 = scalar_lea.hbm %s17663_s4, 6144 }
  0x36   : > { %p14936_p1 = scmp.ne.s32.totalorder %s17663_s4, %s14935_s16  ;;  %p14942_p10 = scmp.lt.u32.totalorder %s14935_s16, %s17663_s4 }
  0x38   : > { %p14938_p4 = pnand %p14936_p1, %p15282_p13 }
  0x3a   : > { %p14939_p6 = pneg %p14938_p4 }
  0x3c   : > { %p14944_p3 = pnand %p14942_p10, %p14939_p6 }
  0x3e   : > { %14947 = shalt.err (!%p14944_p3)
}
  0x3f   : > { %s14948_s19 = scalar_lea.vmem %s15272_s22, 6144  ;;  %p14956_p12 = scmp.lt.s32.totalorder %s15272_s22, %s15272_s22 }
  0x40   : > { %p14949_p5 = scmp.ne.s32.totalorder %s15272_s22, %s14948_s19  ;;  %p14957_p0 = scmp.lt.s32.totalorder %s14948_s19, %s14948_s19 }
  0x42   : > { %p14951_p7 = pnand %p14949_p5, %p15282_p13  ;;  %p14958_p1 = por %p14957_p0, %p14956_p12 }
  0x44   : > { %p14952_p9 = pneg %p14951_p7 }
  0x46   : > { %p14959_p4 = pnand %p14958_p1, %p14952_p9 }
  0x48   : > { %14962 = shalt.err (!%p14959_p4)
}
  0x49   : > { %s15145_s8 = smov 128   ;;  %s15146_s27 = smov 8  }
  0x4a   : > { %13542 = dma.hbm_to_vmem [thread:$0]  (!%p15268_p11), %s17663_s4, 6144, %s15272_s22, [#allocation9], %s15145_s8, %s15145_s8, %s15146_s27  }
  0x4b   : > { %s15147_s24 = smov [#allocation7]   ;;  %s14963_s18 = scalar_lea.hbm %s17661_s2, 24576 }
  0x4c   : > { %s271_s25 = sshll.u32 %s15147_s24, 4  ;;  %p14964_p6 = scmp.ne.s32.totalorder %s17661_s2, %s14963_s18  ;;  %s272_s25 = int_to_ptr.vmem [resolvable:$true] %s271_s25 }
  0x4d   : > { %p14970_p5 = scmp.lt.u32.totalorder %s14963_s18, %s17661_s2 }
  0x4e   : > { %p14966_p10 = pnand %p14964_p6, %p15282_p13 }
  0x50   : > { %p14967_p3 = pneg %p14966_p10 }
  0x52   : > { %p14972_p7 = pnand %p14970_p5, %p14967_p3 }
  0x54   : > { %14975 = shalt.err (!%p14972_p7)
}
  0x55   : > { %s14976_s22 = scalar_lea.vmem %s272_s25, 24576  ;;  %p14984_p1 = scmp.lt.s32.totalorder %s272_s25, %s272_s25 }
  0x56   : > { %p14977_p9 = scmp.ne.s32.totalorder %s272_s25, %s14976_s22  ;;  %p14985_p4 = scmp.lt.s32.totalorder %s14976_s22, %s14976_s22 }
  0x58   : > { %p14979_p12 = pnand %p14977_p9, %p15282_p13  ;;  %p14986_p8 = por %p14985_p4, %p14984_p1 }
  0x5a   : > { %p14980_p0 = pneg %p14979_p12 }
  0x5c   : > { %p14987_p2 = pnand %p14986_p8, %p14980_p0 }
  0x5e   : > { %14990 = shalt.err (!%p14987_p2)
}
  0x5f   : > { %s15148_s8 = smov 256   ;;  %s15149_s27 = smov 16  }
  0x60   : > { %13539 = dma.hbm_to_vmem [thread:$0]  (!%p15268_p11), %s17661_s2, 24576, %s272_s25, [#allocation6], %s15148_s8, %s15148_s8, %s15149_s27  }
  0x61   : > { %s15150_s16 = smov [#allocation10]   ;;  %s14991_s18 = scalar_lea.hbm %s17665_s6, 192 }
  0x62   : > { %s304_s24 = sshll.u32 %s15150_s16, 4  ;;  %p14992_p2 = scmp.ne.s32.totalorder %s17665_s6, %s14991_s18  ;;  %s305_s24 = int_to_ptr.vmem [resolvable:$true] %s304_s24 }
  0x63   : > { %p14998_p10 = scmp.lt.u32.totalorder %s14991_s18, %s17665_s6 }
  0x64   : > { %p14994_p8 = pnand %p14992_p2, %p15282_p13 }
  0x66   : > { %p14995_p6 = pneg %p14994_p8 }
  0x68   : > { %p15000_p3 = pnand %p14998_p10, %p14995_p6 }
  0x6a   : > { %15003 = shalt.err (!%p15000_p3)
}
  0x6b   : > { %s15004_s25 = scalar_lea.vmem %s305_s24, 192  ;;  %p15012_p12 = scmp.lt.s32.totalorder %s305_s24, %s305_s24 }
  0x6c   : > { %p15005_p5 = scmp.ne.s32.totalorder %s305_s24, %s15004_s25  ;;  %p15013_p0 = scmp.lt.s32.totalorder %s15004_s25, %s15004_s25 }
  0x6e   : > { %p15007_p7 = pnand %p15005_p5, %p15282_p13  ;;  %p15014_p1 = por %p15013_p0, %p15012_p12 }
  0x70   : > { %p15008_p9 = pneg %p15007_p7 }
  0x72   : > { %p15015_p4 = pnand %p15014_p1, %p15008_p9 }
  0x74   : > { %15018 = shalt.err (!%p15015_p4)
}
  0x75   : > { %13545 = dma.hbm_to_vmem [thread:$0]  (!%p15268_p11), %s17665_s6, 192, %s305_s24, [#allocation9]  }
  0x76   : > { %s38_s12 = sadd.s32 1, %s15135_s9  ;;  %s47_s1 = sadd.s32 1, %s15127_s29 }
  0x77   : > { %p40_p13 = scmp.ge.s32.totalorder %s38_s12, 2  ;;  %p54_p2 = scmp.ne.s32.totalorder %s15127_s29, %s15123_s28 }
  0x78   : > { %p55_p8 = scmp.eq.s32.totalorder %s15139_s10, 0  ;;  %p13558_p6 = scmp.lt.s32.totalorder %s15139_s10, 2 }
  0x79   : > { %s18216_s12 = smov (%p40_p13, %s38_s12), 0  ;;  %p17692_p3 = scmp.ne.s32.totalorder %s17684_s14, 0 }
  0x7a   : > { %p56_p10 = por %p55_p8, %p54_p2  ;;  %s42_s30 = ssub.s32 %s15135_s9, %s18216_s12 }
  0x7b   : > { %p15372_p5 = por %p17692_p3, %p54_p2  ;;  %s318_s16 = sand.u32 1, %s15127_s29  }
  0x7c   : > { %p45_p7 = scmp.eq.s32.totalorder %s42_s30, 0  ;;  %s13510_s24 = smul.u32 384, %s318_s16 }
  0x7d   : > { %p15379_p11 = pnand %p13558_p6, %p56_p10  ;;  %s13511_s18 = smul.u32 6144, %s15135_s9 }
  0x7e   : > { %s15384_s11 = scalar_select %p45_p7, %s15127_s29, %s47_s1  }
  0x7f   : > { %s322_s21 = scalar_lea.vmem [#allocation2], %s13510_s24  ;;  %s15390_s22 = scalar_lea.hbm %s17659_s0, %s13511_s18 }
  0x80   : > { %s330_s23 = sshll.u32 %s322_s21, 4  ;;  %s15394_s25 = scalar_lea.sflag [#allocation3], %s318_s16  ;;  %s15392_s23 = int_to_ptr.vmem [resolvable:$true] %s330_s23 }
  0x81   : > { %s15019_s8 = scalar_lea.hbm %s15390_s22, 6144  ;;  %p15021_p12 = pneg %p15379_p11 }
  0x82   : > { %p15020_p9 = scmp.ne.s32.totalorder %s15390_s22, %s15019_s8  ;;  %s15024_s30 = scalar_lea.hbm %s17659_s0, 12288 }
  0x83   : > { %p15025_p4 = scmp.lt.u32.totalorder %s15390_s22, %s17659_s0  ;;  %p15026_p13 = scmp.lt.u32.totalorder %s15024_s30, %s15019_s8 }
  0x84   : > { %p15022_p0 = pnand %p15021_p12, %p15020_p9  ;;  %p15028_p8 = scmp.lt.u32.totalorder %s15019_s8, %s15390_s22 }
  0x85   : > { %p15027_p2 = por %p15026_p13, %p15025_p4 }
  0x86   : > { %p15023_p1 = pneg %p15022_p0 }
  0x87   : > { %p15029_p6 = por %p15028_p8, %p15027_p2 }
  0x89   : > { %p15030_p10 = pnand %p15029_p6, %p15023_p1 }
  0x8b   : > { %15033 = shalt.err (!%p15030_p10)
}
  0x8c   : > { %s15034_s16 = scalar_lea.vmem %s15392_s23, 6144  ;;  %s15151_s21 = smov [#allocation2]  }
  0x8d   : > { %p15035_p3 = scmp.ne.s32.totalorder %s15392_s23, %s15034_s16  ;;  %s15039_s14 = sshll.u32 %s15151_s21, 4  ;;  %s15040_s14 = int_to_ptr.vmem [resolvable:$false] %s15039_s14 }
  0x8e   : > { %s15041_s19 = scalar_lea.vmem %s15040_s14, 12288  ;;  %p15042_p0 = scmp.lt.s32.totalorder %s15392_s23, %s15040_s14 }
  0x8f   : > { %p15037_p7 = pnand %p15035_p3, %p15021_p12  ;;  %p15043_p4 = scmp.lt.s32.totalorder %s15041_s19, %s15034_s16 }
  0x91   : > { %p15038_p9 = pneg %p15037_p7  ;;  %p15044_p13 = por %p15043_p4, %p15042_p0 }
  0x93   : > { %p15045_p2 = pnand %p15044_p13, %p15038_p9 }
  0x95   : > { %15048 = shalt.err (!%p15045_p2)
}
  0x96   : > { %s15152_s8 = smov 64   ;;  %s15153_s27 = smov 4  }
  0x97   : > { %13549 = dma.hbm_to_vmem [thread:$0]  (!%p15379_p11), %s15390_s22, 6144, %s15392_s23, %s15394_s25, %s15152_s8, %s15152_s8, %s15153_s27  }
  0x98   : > { %p17695_p12 = scmp.ne.s32.totalorder %s17688_s17, 0 }
  0x9a   : > { %342 = sbr.rel (%p17695_p12) target bundleno = 3864 (0xf18), region = 52 }
  0xa1   : > { %s15425_s1 = sand.u32 1, %s15123_s28   ;;  %p17696_p1 = scmp.ne.s32.totalorder %s17685_s15, 0 }
  0xa2   : > { %s13512_s30 = smul.u32 384, %s15425_s1  ;;  %s345_s24 = scalar_lea.sflag [#allocation3], %s15425_s1 }
  0xa4   : > { %s15429_s18 = scalar_lea.vmem [#allocation2], %s13512_s30 }
  0xa5   : > { %15102 = dma.done.wait (%p17696_p1), %s345_s24, 6144  }
  0xa6   : > { %15104 = vsyncadd (%p17696_p1), %s345_s24, 4294961152  ;;  %p17697_p11 = scmp.ne.s32.totalorder %s17683_s13, 0 }
  0xa8   : > { %15106 = dma.done.wait (%p17697_p11), [#allocation6], 98304  }
  0xa9   : > { %15108 = vsyncadd (%p17697_p11), [#allocation6], 4294868992 }
  0xaa   : > { %15110 = dma.done.wait (%p17697_p11), [#allocation9], 6336  }
  0xab   : > { %15112 = vsyncadd (%p17697_p11), [#allocation9], 4294960960  ;;  %v17675_v0 = vmov 0   ;;  %v13629_v1 = vld [vmem:[%s15429_s18] sm:$0xff]   ;;  %v13630_v2 = vld [vmem:[%s15429_s18 + $0x8] sm:$0xff]   ;;  %vm15156_vm0 = vmmov 0  }
  0xac   : > { %4238 = vmatprep.subr.bf16.mxu0 %v17675_v0  ;;  %12932 = vmatprep.subr.bf16.mxu1 %v17675_v0  ;;  %v13631_v3 = vld [vmem:[%s15429_s18 + $0x10] sm:$0xff]   ;;  %v13632_v4 = vld [vmem:[%s15429_s18 + $0x18] sm:$0xff]   ;;  %v13633_v5 = vld [vmem:[%s15429_s18 + $0x20] sm:$0xff]   ;;  %s18204_s17 = sld [smem:[#allocation17_spill]]  ;;  %s11016_s26 = sshll.u32 %s15425_s1, 3 }
  0xad   : > { %13628 = vset.pattern.permute.xlu1 %v17675_v0  ;;  %13627 = vset.pattern.permute.xlu0 %v17675_v0  ;;  %v13647_v6 = vld [vmem:[#allocation5 + $0x4] ss:$24 sps:$4 sm:$0xff]   ;;  %v13634_v7 = vld [vmem:[%s15429_s18 + $0x28] sm:$0xff]   ;;  %v13635_v8 = vld [vmem:[%s15429_s18 + $0x30] sm:$0xff]   ;;  %s396_s22 = scalar_lea.vmem [#allocation11], %s11016_s26  ;;  %s18205_s14 = sld [smem:[#allocation155_spill]] }
  0xae   : > { %4239 = vmatpush1.bf16.msra.mxu0 %v13629_v1  ;;  %12948 = vmatpush1.bf16.msra.mxu1 %v13629_v1  ;;  %v13636_v9 = vld [vmem:[%s15429_s18 + $0x38] sm:$0xff]   ;;  %v13637_v10 = vld [vmem:[%s15429_s18 + $0x40] sm:$0xff]   ;;  %v13638_v11 = vld [vmem:[%s15429_s18 + $0x48] sm:$0xff]   ;;  %s10883_s25 = sshll.u32 %s396_s22, 4  ;;  %s10869_s8 = scalar_lea.sflag [#allocation4], %s15425_s1  ;;  %s17611_s25 = int_to_ptr.vmem [resolvable:$true] %s10883_s25 }
  0xaf   : > { %4240 = vmatprep.subr.bf16.mxu0 %v17675_v0  ;;  %12933 = vmatprep.subr.bf16.mxu1 %v17675_v0  ;;  %v13639_v12 = vld [vmem:[%s15429_s18 + $0x50] sm:$0xff]   ;;  %v13640_v13 = vld [vmem:[%s15429_s18 + $0x58] sm:$0xff]   ;;  %v13641_v14 = vld [vmem:[%s15429_s18 + $0x60] sm:$0xff]   ;;  %s15049_s27 = scalar_lea.vmem %s17611_s25, 128  ;;  %s15157_s30 = smov [#allocation11]  }
  0xb0   : > { %4270 = vmatprep.mubr.bf16.mxu0 %v13647_v6  ;;  %v13642_v15 = vld [vmem:[%s15429_s18 + $0x68] sm:$0xff]   ;;  %v13643_v16 = vld [vmem:[%s15429_s18 + $0x70] sm:$0xff]   ;;  %v13644_v17 = vld [vmem:[%s15429_s18 + $0x78] sm:$0xff]   ;;  %p15050_p8 = scmp.ne.s32.totalorder %s17611_s25, %s15049_s27  ;;  %s15053_s24 = sshll.u32 %s15157_s30, 4  ;;  %s15054_s24 = int_to_ptr.vmem [resolvable:$false] %s15053_s24 }
  0xb1   : > { %v13645_v18 = vld [vmem:[#allocation5] ss:$24 sps:$4 sm:$0xff]   ;;  %v13648_v19 = vld [vmem:[#allocation5 + $0x34] ss:$24 sps:$4 sm:$0xff]   ;;  %v13650_v22 = vld [vmem:[#allocation5 + $0x30] ss:$24 sps:$4 sm:$0xff]   ;;  %p15056_p3 = scmp.lt.s32.totalorder %s17611_s25, %s15054_s24 }
  0xb2   : > { %4241 = vmatpush1.bf16.msra.mxu0 %v13630_v2  ;;  %12949 = vmatpush1.bf16.msra.mxu1 %v13630_v2  ;;  %v13675_v20 = vld [vmem:[%s15429_s18 + $0x80] sm:$0xff]   ;;  %v13676_v21 = vld [vmem:[%s15429_s18 + $0x88] sm:$0xff]   ;;  %v13680_v24 = vld [vmem:[%s15429_s18 + $0x90] sm:$0xff]   ;;  %s11978_s23 = sshll.u32 %s18204_s17, 7  ;;  %p15051_p6 = pnand %p15050_p8, %p15372_p5 }
  0xb3   : > { %4242 = vmatprep.subr.bf16.mxu0 %v17675_v0  ;;  %12934 = vmatprep.subr.bf16.mxu1 %v17675_v0  ;;  %v13651_v23 = vld [vmem:[#allocation5 + $0x64] ss:$24 sps:$4 sm:$0xff]   ;;  %v13653_v26 = vld [vmem:[#allocation5 + $0x60] ss:$24 sps:$4 sm:$0xff]   ;;  %v13654_v27 = vld [vmem:[#allocation5 + $0x94] ss:$24 sps:$4 sm:$0xff]   ;;  %s17609_s19 = scalar_lea.hbm %s18205_s14, %s11978_s23 }
  0xb4   : > { %v13681_v25 = vld [vmem:[%s15429_s18 + $0x98] sm:$0xff]   ;;  %v13685_v28 = vld [vmem:[%s15429_s18 + $0xa0] sm:$0xff]   ;;  %v13686_v29 = vld [vmem:[%s15429_s18 + $0xa8] sm:$0xff]   ;;  %p15052_p10 = pneg %p15051_p6 }
  0xb5   : > { %v13656_v30 = vld [vmem:[#allocation5 + $0x90] ss:$24 sps:$4 sm:$0xff]   ;;  %v13657_v31 = vld [vmem:[#allocation5 + $0xc4] ss:$24 sps:$4 sm:$0xff]   ;;  %v13659_v34 = vld [vmem:[#allocation5 + $0xc0] ss:$24 sps:$4 sm:$0xff]  }
  0xb6   : > { %4243 = vmatpush1.bf16.msra.mxu0 %v13631_v3  ;;  %12950 = vmatpush1.bf16.msra.mxu1 %v13631_v3  ;;  %v13690_v32 = vld [vmem:[%s15429_s18 + $0xb0] sm:$0xff]   ;;  %v13691_v33 = vld [vmem:[%s15429_s18 + $0xb8] sm:$0xff]   ;;  %v13695_v36 = vld [vmem:[%s15429_s18 + $0xc0] sm:$0xff]  }
  0xb7   : > { %4244 = vmatprep.subr.bf16.mxu0 %v17675_v0  ;;  %12935 = vmatprep.subr.bf16.mxu1 %v17675_v0  ;;  %v13660_v35 = vld [vmem:[#allocation5 + $0xf4] ss:$24 sps:$4 sm:$0xff]   ;;  %v13662_v38 = vld [vmem:[#allocation5 + $0xf0] ss:$24 sps:$4 sm:$0xff]   ;;  %v13663_v39 = vld [vmem:[#allocation5 + $0x124] ss:$24 sps:$4 sm:$0xff]  }
  0xb8   : > { %v13696_v37 = vld [vmem:[%s15429_s18 + $0xc8] sm:$0xff]   ;;  %v13700_v40 = vld [vmem:[%s15429_s18 + $0xd0] sm:$0xff]   ;;  %v13701_v41 = vld [vmem:[%s15429_s18 + $0xd8] sm:$0xff]  }
  0xb9   : > { %v13665_v42 = vld [vmem:[#allocation5 + $0x120] ss:$24 sps:$4 sm:$0xff]   ;;  %v13666_v43 = vld [vmem:[#allocation5 + $0x154] ss:$24 sps:$4 sm:$0xff]   ;;  %v13668_v46 = vld [vmem:[#allocation5 + $0x150] ss:$24 sps:$4 sm:$0xff]  }
  0xba   : > { %4245 = vmatpush1.bf16.msra.mxu0 %v13632_v4  ;;  %12951 = vmatpush1.bf16.msra.mxu1 %v13632_v4  ;;  %v13705_v44 = vld [vmem:[%s15429_s18 + $0xe0] sm:$0xff]   ;;  %v13706_v45 = vld [vmem:[%s15429_s18 + $0xe8] sm:$0xff]   ;;  %v13710_v48 = vld [vmem:[%s15429_s18 + $0xf0] sm:$0xff]  }
  0xbb   : > { %4246 = vmatprep.subr.bf16.mxu0 %v17675_v0  ;;  %12936 = vmatprep.subr.bf16.mxu1 %v17675_v0  ;;  %v13669_v47 = vld [vmem:[#allocation5 + $0x184] ss:$24 sps:$4 sm:$0xff]   ;;  %v13671_v50 = vld [vmem:[#allocation5 + $0x180] ss:$24 sps:$4 sm:$0xff]   ;;  %v13672_v51 = vld [vmem:[#allocation5 + $0x1b4] ss:$24 sps:$4 sm:$0xff]  }
  0xbc   : > { %v13711_v49 = vld [vmem:[%s15429_s18 + $0xf8] sm:$0xff]   ;;  %v13674_v52 = vld [vmem:[#allocation5 + $0x1b0] ss:$24 sps:$4 sm:$0xff]   ;;  %v13682_v55 = vld [vmem:[#allocation5 + $0x214] ss:$24 sps:$4 sm:$0xff]  }
  0xbd   : > { %v13677_v53 = vld [vmem:[#allocation5 + $0x1e4] ss:$24 sps:$4 sm:$0xff]   ;;  %v13679_v54 = vld [vmem:[#allocation5 + $0x1e0] ss:$24 sps:$4 sm:$0xff]   ;;  %v13684_v56 = vld [vmem:[#allocation5 + $0x210] ss:$24 sps:$4 sm:$0xff]  }
  0xbe   : > { %4247 = vmatpush1.bf16.msra.mxu0 %v13633_v5  ;;  %12952 = vmatpush1.bf16.msra.mxu1 %v13633_v5  ;;  %v13687_v57 = vld [vmem:[#allocation5 + $0x244] ss:$24 sps:$4 sm:$0xff]   ;;  %v13689_v58 = vld [vmem:[#allocation5 + $0x240] ss:$24 sps:$4 sm:$0xff]   ;;  %v13692_v59 = vld [vmem:[#allocation5 + $0x274] ss:$24 sps:$4 sm:$0xff]  }
  0xbf   : > { %4248 = vmatprep.subr.bf16.mxu0 %v17675_v0  ;;  %12937 = vmatprep.subr.bf16.mxu1 %v17675_v0  ;;  %v13694_v60 = vld [vmem:[#allocation5 + $0x270] ss:$24 sps:$4 sm:$0xff]   ;;  %v13697_v61 = vld [vmem:[#allocation5 + $0x2a4] ss:$24 sps:$4 sm:$0xff]   ;;  %v13699_v62 = vld [vmem:[#allocation5 + $0x2a0] ss:$24 sps:$4 sm:$0xff]  }
  0xc0   : > { %v13702_v63 = vld [vmem:[#allocation5 + $0x2d4] ss:$24 sps:$4 sm:$0xff]   ;;  %v13704_v1 = vld [vmem:[#allocation5 + $0x2d0] ss:$24 sps:$4 sm:$0xff]   ;;  %v13707_v2 = vld [vmem:[#allocation5 + $0x304] ss:$24 sps:$4 sm:$0xff]  }
  0xc1   : > { %v13709_v3 = vld [vmem:[#allocation5 + $0x300] ss:$24 sps:$4 sm:$0xff]   ;;  %v13714_v4 = vld [vmem:[#allocation5 + $0xc] ss:$24 sps:$4 sm:$0xff]   ;;  %v13715_v6 = vld [vmem:[#allocation5 + $0x3c] ss:$24 sps:$4 sm:$0xff]  }
  0xc2   : > { %4249 = vmatpush1.bf16.msra.mxu0 %v13634_v7  ;;  %12953 = vmatpush1.bf16.msra.mxu1 %v13634_v7  ;;  %v13712_v5 = vld [vmem:[#allocation5 + $0x8] ss:$24 sps:$4 sm:$0xff]  }
  0xc3   : > { %4250 = vmatprep.subr.bf16.mxu0 %v17675_v0  ;;  %12938 = vmatprep.subr.bf16.mxu1 %v17675_v0  ;;  %v13763_v7 = vld [vmem:[#allocation5 + $0x330] ss:$24 sps:$4 sm:$0xff]  }
  0xc6   : > { %4251 = vmatpush1.bf16.msra.mxu0 %v13635_v8  ;;  %12954 = vmatpush1.bf16.msra.mxu1 %v13635_v8  ;;  %v13765_v8 = vld [vmem:[#allocation5 + $0x334] ss:$24 sps:$4 sm:$0xff]  }
  0xc7   : > { %4252 = vmatprep.subr.bf16.mxu0 %v17675_v0  ;;  %12939 = vmatprep.subr.bf16.mxu1 %v17675_v0 }
  0xc8   : > { %4406 = vmatprep.mubr.bf16.mxu1 %v13765_v8  ;;  %v13859_v8 = vld [vmem:[#allocation5 + $0x634] ss:$24 sps:$4 sm:$0xff]  }
  0xca   : > { %4253 = vmatpush1.bf16.msra.mxu0 %v13636_v9  ;;  %12955 = vmatpush1.bf16.msra.mxu1 %v13636_v9  ;;  %v13717_v9 = vld [vmem:[#allocation5 + $0x38] ss:$24 sps:$4 sm:$0xff]  }
  0xcb   : > { %4254 = vmatprep.subr.bf16.mxu0 %v17675_v0  ;;  %12940 = vmatprep.subr.bf16.mxu1 %v17675_v0 }
  0xce   : > { %4255 = vmatpush1.bf16.msra.mxu0 %v13637_v10  ;;  %12956 = vmatpush1.bf16.msra.mxu1 %v13637_v10  ;;  %v13718_v10 = vld [vmem:[#allocation5 + $0x6c] ss:$24 sps:$4 sm:$0xff]  }
  0xcf   : > { %4256 = vmatprep.subr.bf16.mxu0 %v17675_v0  ;;  %12941 = vmatprep.subr.bf16.mxu1 %v17675_v0 }
  0xd2   : > { %4257 = vmatpush1.bf16.msra.mxu0 %v13638_v11  ;;  %12957 = vmatpush1.bf16.msra.mxu1 %v13638_v11  ;;  %v13769_v11 = vld [vmem:[#allocation5 + $0x364] ss:$24 sps:$4 sm:$0xff]  }
  0xd3   : > { %4258 = vmatprep.subr.bf16.mxu0 %v17675_v0  ;;  %12942 = vmatprep.subr.bf16.mxu1 %v17675_v0 }
  0xd6   : > { %4259 = vmatpush1.bf16.msra.mxu0 %v13639_v12  ;;  %12958 = vmatpush1.bf16.msra.mxu1 %v13639_v12  ;;  %v13773_v12 = vld [vmem:[#allocation5 + $0x360] ss:$24 sps:$4 sm:$0xff]  }
  0xd7   : > { %4260 = vmatprep.subr.bf16.mxu0 %v17675_v0  ;;  %12943 = vmatprep.subr.bf16.mxu1 %v17675_v0 }
  0xda   : > { %4261 = vmatpush1.bf16.msra.mxu0 %v13640_v13  ;;  %12959 = vmatpush1.bf16.msra.mxu1 %v13640_v13  ;;  %v13720_v13 = vld [vmem:[#allocation5 + $0x68] ss:$24 sps:$4 sm:$0xff]  }
  0xdb   : > { %4262 = vmatprep.subr.bf16.mxu0 %v17675_v0  ;;  %12944 = vmatprep.subr.bf16.mxu1 %v17675_v0 }
  0xde   : > { %4263 = vmatpush1.bf16.msra.mxu0 %v13641_v14  ;;  %12960 = vmatpush1.bf16.msra.mxu1 %v13641_v14  ;;  %v13721_v14 = vld [vmem:[#allocation5 + $0x9c] ss:$24 sps:$4 sm:$0xff]  }
  0xdf   : > { %4264 = vmatprep.subr.bf16.mxu0 %v17675_v0  ;;  %12945 = vmatprep.subr.bf16.mxu1 %v17675_v0 }
  0xe2   : > { %4265 = vmatpush1.bf16.msra.mxu0 %v13642_v15  ;;  %12961 = vmatpush1.bf16.msra.mxu1 %v13642_v15  ;;  %v13775_v15 = vld [vmem:[#allocation5 + $0x394] ss:$24 sps:$4 sm:$0xff]  }
  0xe3   : > { %4266 = vmatprep.subr.bf16.mxu0 %v17675_v0  ;;  %12946 = vmatprep.subr.bf16.mxu1 %v17675_v0 }
  0xe6   : > { %4267 = vmatpush1.bf16.msra.mxu0 %v13643_v16  ;;  %12962 = vmatpush1.bf16.msra.mxu1 %v13643_v16  ;;  %v13779_v16 = vld [vmem:[#allocation5 + $0x390] ss:$24 sps:$4 sm:$0xff]  }
  0xe7   : > { %4268 = vmatprep.subr.bf16.mxu0 %v17675_v0  ;;  %12947 = vmatprep.subr.bf16.mxu1 %v17675_v0 }
  0xea   : > { %4269 = vmatpush1.bf16.msra.mxu0 %v13644_v17  ;;  %12963 = vmatpush1.bf16.msra.mxu1 %v13644_v17  ;;  %v13723_v17 = vld [vmem:[#allocation5 + $0x98] ss:$24 sps:$4 sm:$0xff]  }
  0xeb   : > { %5039 = vmatprep.subr.bf16.mxu0 %v17675_v0 }
  0xed   : > { %4271 = vmatmul.mubr.bf16.vlgmr.msra.gmra.mrb[0].mxu0 %v13645_v18  ;;  %4407 = vmatmul.mubr.bf16.vlgmr.msra.gmra.mrb[0].mxu1 %v13763_v7  ;;  %v13724_v18 = vld [vmem:[#allocation5 + $0xcc] ss:$24 sps:$4 sm:$0xff]   ;;  %v13766_v7 = vld [vmem:[#allocation5 + $0x33c] ss:$24 sps:$4 sm:$0xff]  }
  0xee   : > { %4278 = vmatprep.mubr.bf16.mxu0 %v13648_v19  ;;  %5040 = vmatpush1.bf16.msra.mxu0 %v13675_v20  ;;  %v13781_v19 = vld [vmem:[#allocation5 + $0x3c4] ss:$24 sps:$4 sm:$0xff]   ;;  %v13785_v20 = vld [vmem:[#allocation5 + $0x3c0] ss:$24 sps:$4 sm:$0xff]  }
  0xef   : > { %5041 = vmatprep.subr.bf16.mxu0 %v17675_v0  ;;  %4414 = vmatprep.mubr.bf16.mxu1 %v13769_v11  ;;  %v13771_v11 = vld [vmem:[#allocation5 + $0x36c] ss:$24 sps:$4 sm:$0xff]  }
  0xf2   : > { %5042 = vmatpush1.bf16.msra.mxu0 %v13676_v21  ;;  %v13726_v21 = vld [vmem:[#allocation5 + $0xc8] ss:$24 sps:$4 sm:$0xff]  }
  0xf3   : > { %5043 = vmatprep.subr.bf16.mxu0 %v17675_v0 }
  0xf5   : > { %4279 = vmatmul.mubr.bf16.gmra.mrb[4].mxu0 %v13650_v22  ;;  %4415 = vmatmul.mubr.bf16.gmra.mrb[4].mxu1 %v13773_v12  ;;  %v13727_v22 = vld [vmem:[#allocation5 + $0xfc] ss:$24 sps:$4 sm:$0xff]  }
  0xf6   : > { %4286 = vmatprep.mubr.bf16.mxu0 %v13651_v23  ;;  %5044 = vmatpush1.bf16.msra.mxu0 %v13680_v24  ;;  %v13787_v23 = vld [vmem:[#allocation5 + $0x3f4] ss:$24 sps:$4 sm:$0xff]   ;;  %v13791_v24 = vld [vmem:[#allocation5 + $0x3f0] ss:$24 sps:$4 sm:$0xff]   ;;  %v13865_v12 = vld [vmem:[#allocation5 + $0x664] ss:$24 sps:$4 sm:$0xff]  }
  0xf7   : > { %5045 = vmatprep.subr.bf16.mxu0 %v17675_v0  ;;  %4422 = vmatprep.mubr.bf16.mxu1 %v13775_v15  ;;  %v13777_v15 = vld [vmem:[#allocation5 + $0x39c] ss:$24 sps:$4 sm:$0xff]  }
  0xfa   : > { %5046 = vmatpush1.bf16.msra.mxu0 %v13681_v25  ;;  %v13729_v25 = vld [vmem:[#allocation5 + $0xf8] ss:$24 sps:$4 sm:$0xff]  }
  0xfb   : > { %5047 = vmatprep.subr.bf16.mxu0 %v17675_v0 }
  0xfd   : > { %4287 = vmatmul.mubr.bf16.gmra.mrb[8].mxu0 %v13653_v26  ;;  %4423 = vmatmul.mubr.bf16.gmra.mrb[8].mxu1 %v13779_v16  ;;  %v13730_v26 = vld [vmem:[#allocation5 + $0x12c] ss:$24 sps:$4 sm:$0xff]  }
  0xfe   : > { %4294 = vmatprep.mubr.bf16.mxu0 %v13654_v27  ;;  %5048 = vmatpush1.bf16.msra.mxu0 %v13685_v28  ;;  %v13793_v27 = vld [vmem:[#allocation5 + $0x424] ss:$24 sps:$4 sm:$0xff]   ;;  %v13797_v28 = vld [vmem:[#allocation5 + $0x420] ss:$24 sps:$4 sm:$0xff]   ;;  %v13871_v16 = vld [vmem:[#allocation5 + $0x694] ss:$24 sps:$4 sm:$0xff]  }
  0xff   : > { %5049 = vmatprep.subr.bf16.mxu0 %v17675_v0  ;;  %4430 = vmatprep.mubr.bf16.mxu1 %v13781_v19  ;;  %v13783_v19 = vld [vmem:[#allocation5 + $0x3cc] ss:$24 sps:$4 sm:$0xff]  }
 0x102   : > { %5050 = vmatpush1.bf16.msra.mxu0 %v13686_v29  ;;  %v13732_v29 = vld [vmem:[#allocation5 + $0x128] ss:$24 sps:$4 sm:$0xff]  }
 0x103   : > { %5051 = vmatprep.subr.bf16.mxu0 %v17675_v0 }
 0x105   : > { %4295 = vmatmul.mubr.bf16.gmra.mrb[12].mxu0 %v13656_v30  ;;  %4431 = vmatmul.mubr.bf16.gmra.mrb[12].mxu1 %v13785_v20  ;;  %v13733_v30 = vld [vmem:[#allocation5 + $0x15c] ss:$24 sps:$4 sm:$0xff]  }
 0x106   : > { %4302 = vmatprep.mubr.bf16.mxu0 %v13657_v31  ;;  %5052 = vmatpush1.bf16.msra.mxu0 %v13690_v32  ;;  %v13799_v31 = vld [vmem:[#allocation5 + $0x454] ss:$24 sps:$4 sm:$0xff]   ;;  %v13803_v32 = vld [vmem:[#allocation5 + $0x450] ss:$24 sps:$4 sm:$0xff]   ;;  %v13877_v20 = vld [vmem:[#allocation5 + $0x6c4] ss:$24 sps:$4 sm:$0xff]  }
 0x107   : > { %5053 = vmatprep.subr.bf16.mxu0 %v17675_v0  ;;  %4438 = vmatprep.mubr.bf16.mxu1 %v13787_v23  ;;  %v13789_v23 = vld [vmem:[#allocation5 + $0x3fc] ss:$24 sps:$4 sm:$0xff]  }
 0x10a   : > { %5054 = vmatpush1.bf16.msra.mxu0 %v13691_v33  ;;  %v13735_v33 = vld [vmem:[#allocation5 + $0x158] ss:$24 sps:$4 sm:$0xff]  }
 0x10b   : > { %5055 = vmatprep.subr.bf16.mxu0 %v17675_v0 }
 0x10d   : > { %4303 = vmatmul.mubr.bf16.gmra.mrb[16].mxu0 %v13659_v34  ;;  %4439 = vmatmul.mubr.bf16.gmra.mrb[16].mxu1 %v13791_v24  ;;  %v13736_v34 = vld [vmem:[#allocation5 + $0x18c] ss:$24 sps:$4 sm:$0xff]  }
 0x10e   : > { %4310 = vmatprep.mubr.bf16.mxu0 %v13660_v35  ;;  %5056 = vmatpush1.bf16.msra.mxu0 %v13695_v36  ;;  %v13805_v35 = vld [vmem:[#allocation5 + $0x484] ss:$24 sps:$4 sm:$0xff]   ;;  %v13809_v36 = vld [vmem:[#allocation5 + $0x480] ss:$24 sps:$4 sm:$0xff]   ;;  %v13883_v24 = vld [vmem:[#allocation5 + $0x6f4] ss:$24 sps:$4 sm:$0xff]  }
 0x10f   : > { %5057 = vmatprep.subr.bf16.mxu0 %v17675_v0  ;;  %4446 = vmatprep.mubr.bf16.mxu1 %v13793_v27  ;;  %v13795_v27 = vld [vmem:[#allocation5 + $0x42c] ss:$24 sps:$4 sm:$0xff]  }
 0x112   : > { %5058 = vmatpush1.bf16.msra.mxu0 %v13696_v37  ;;  %v13738_v37 = vld [vmem:[#allocation5 + $0x188] ss:$24 sps:$4 sm:$0xff]  }
 0x113   : > { %5059 = vmatprep.subr.bf16.mxu0 %v17675_v0 }
 0x115   : > { %4311 = vmatmul.mubr.bf16.gmra.mrb[20].mxu0 %v13662_v38  ;;  %4447 = vmatmul.mubr.bf16.gmra.mrb[20].mxu1 %v13797_v28  ;;  %v13739_v38 = vld [vmem:[#allocation5 + $0x1bc] ss:$24 sps:$4 sm:$0xff]  }
 0x116   : > { %4318 = vmatprep.mubr.bf16.mxu0 %v13663_v39  ;;  %5060 = vmatpush1.bf16.msra.mxu0 %v13700_v40  ;;  %v13811_v39 = vld [vmem:[#allocation5 + $0x4b4] ss:$24 sps:$4 sm:$0xff]   ;;  %v13815_v40 = vld [vmem:[#allocation5 + $0x4b0] ss:$24 sps:$4 sm:$0xff]   ;;  %v13889_v28 = vld [vmem:[#allocation5 + $0x724] ss:$24 sps:$4 sm:$0xff]  }
 0x117   : > { %5061 = vmatprep.subr.bf16.mxu0 %v17675_v0  ;;  %4454 = vmatprep.mubr.bf16.mxu1 %v13799_v31  ;;  %v13801_v31 = vld [vmem:[#allocation5 + $0x45c] ss:$24 sps:$4 sm:$0xff]  }
 0x11a   : > { %5062 = vmatpush1.bf16.msra.mxu0 %v13701_v41  ;;  %v13741_v41 = vld [vmem:[#allocation5 + $0x1b8] ss:$24 sps:$4 sm:$0xff]  }
 0x11b   : > { %5063 = vmatprep.subr.bf16.mxu0 %v17675_v0 }
 0x11d   : > { %4319 = vmatmul.mubr.bf16.gmra.mrb[24].mxu0 %v13665_v42  ;;  %4455 = vmatmul.mubr.bf16.gmra.mrb[24].mxu1 %v13803_v32  ;;  %v13742_v42 = vld [vmem:[#allocation5 + $0x1ec] ss:$24 sps:$4 sm:$0xff]  }
 0x11e   : > { %4326 = vmatprep.mubr.bf16.mxu0 %v13666_v43  ;;  %5064 = vmatpush1.bf16.msra.mxu0 %v13705_v44  ;;  %v13817_v43 = vld [vmem:[#allocation5 + $0x4e4] ss:$24 sps:$4 sm:$0xff]   ;;  %v13821_v44 = vld [vmem:[#allocation5 + $0x4e0] ss:$24 sps:$4 sm:$0xff]   ;;  %v13895_v32 = vld [vmem:[#allocation5 + $0x754] ss:$24 sps:$4 sm:$0xff]  }
 0x11f   : > { %5065 = vmatprep.subr.bf16.mxu0 %v17675_v0  ;;  %4462 = vmatprep.mubr.bf16.mxu1 %v13805_v35  ;;  %v13807_v35 = vld [vmem:[#allocation5 + $0x48c] ss:$24 sps:$4 sm:$0xff]  }
 0x122   : > { %5066 = vmatpush1.bf16.msra.mxu0 %v13706_v45  ;;  %v13744_v45 = vld [vmem:[#allocation5 + $0x1e8] ss:$24 sps:$4 sm:$0xff]  }
 0x123   : > { %5067 = vmatprep.subr.bf16.mxu0 %v17675_v0 }
 0x125   : > { %4327 = vmatmul.mubr.bf16.gmra.mrb[28].mxu0 %v13668_v46  ;;  %4463 = vmatmul.mubr.bf16.gmra.mrb[28].mxu1 %v13809_v36  ;;  %v13745_v46 = vld [vmem:[#allocation5 + $0x21c] ss:$24 sps:$4 sm:$0xff]  }
 0x126   : > { %4334 = vmatprep.mubr.bf16.mxu0 %v13669_v47  ;;  %5068 = vmatpush1.bf16.msra.mxu0 %v13710_v48  ;;  %v13823_v47 = vld [vmem:[#allocation5 + $0x514] ss:$24 sps:$4 sm:$0xff]   ;;  %v13827_v48 = vld [vmem:[#allocation5 + $0x510] ss:$24 sps:$4 sm:$0xff]   ;;  %v13901_v36 = vld [vmem:[#allocation5 + $0x784] ss:$24 sps:$4 sm:$0xff]  }
 0x127   : > { %5069 = vmatprep.subr.bf16.mxu0 %v17675_v0  ;;  %4470 = vmatprep.mubr.bf16.mxu1 %v13811_v39  ;;  %v13813_v39 = vld [vmem:[#allocation5 + $0x4bc] ss:$24 sps:$4 sm:$0xff]  }
 0x12a   : > { %5070 = vmatpush1.bf16.msra.mxu0 %v13711_v49  ;;  %v13747_v49 = vld [vmem:[#allocation5 + $0x218] ss:$24 sps:$4 sm:$0xff]  }
 0x12b   : > { %5840 = vmatprep.subr.bf16.mxu0 %v17675_v0  ;;  %v13990_v0 = vld [vmem:[#allocation5 + $0xa28] ss:$24 sps:$4 sm:$0xff]  }
 0x12d   : > { %4335 = vmatmul.mubr.bf16.gmra.mrb[32].mxu0 %v13671_v50  ;;  %4471 = vmatmul.mubr.bf16.gmra.mrb[32].mxu1 %v13815_v40  ;;  %v13748_v50 = vld [vmem:[#allocation5 + $0x24c] ss:$24 sps:$4 sm:$0xff]  }
 0x12e   : > { %4342 = vmatprep.mubr.bf16.mxu0 %v13672_v51  ;;  %4478 = vmatprep.mubr.bf16.mxu1 %v13817_v43  ;;  %v13829_v51 = vld [vmem:[#allocation5 + $0x544] ss:$24 sps:$4 sm:$0xff]   ;;  %v13907_v40 = vld [vmem:[#allocation5 + $0x7b4] ss:$24 sps:$4 sm:$0xff]  }
 0x12f   : > { %v13819_v43 = vld [vmem:[#allocation5 + $0x4ec] ss:$24 sps:$4 sm:$0xff]  }
 0x135   : > { %4343 = vmatmul.mubr.bf16.gmra.mrb[36].mxu0 %v13674_v52  ;;  %4479 = vmatmul.mubr.bf16.gmra.mrb[36].mxu1 %v13821_v44  ;;  %v13833_v52 = vld [vmem:[#allocation5 + $0x540] ss:$24 sps:$4 sm:$0xff]   ;;  %v13913_v44 = vld [vmem:[#allocation5 + $0x7e4] ss:$24 sps:$4 sm:$0xff]  }
 0x136   : > { %4350 = vmatprep.mubr.bf16.mxu0 %v13677_v53  ;;  %4486 = vmatprep.mubr.bf16.mxu1 %v13823_v47  ;;  %v13750_v53 = vld [vmem:[#allocation5 + $0x248] ss:$24 sps:$4 sm:$0xff]   ;;  %v13825_v47 = vld [vmem:[#allocation5 + $0x51c] ss:$24 sps:$4 sm:$0xff]  }
 0x13d   : > { %4351 = vmatmul.mubr.bf16.gmra.mrb[40].mxu0 %v13679_v54  ;;  %4487 = vmatmul.mubr.bf16.gmra.mrb[40].mxu1 %v13827_v48  ;;  %v13751_v54 = vld [vmem:[#allocation5 + $0x27c] ss:$24 sps:$4 sm:$0xff]  }
 0x13e   : > { %4358 = vmatprep.mubr.bf16.mxu0 %v13682_v55  ;;  %4494 = vmatprep.mubr.bf16.mxu1 %v13829_v51  ;;  %v13835_v55 = vld [vmem:[#allocation5 + $0x574] ss:$24 sps:$4 sm:$0xff]  }
 0x13f   : > { %v13919_v48 = vld [vmem:[#allocation5 + $0x814] ss:$24 sps:$4 sm:$0xff]  }
 0x140   : > { %v13831_v51 = vld [vmem:[#allocation5 + $0x54c] ss:$24 sps:$4 sm:$0xff]  }
 0x145   : > { %4359 = vmatmul.mubr.bf16.gmra.mrb[44].mxu0 %v13684_v56  ;;  %4495 = vmatmul.mubr.bf16.gmra.mrb[44].mxu1 %v13833_v52  ;;  %v13839_v56 = vld [vmem:[#allocation5 + $0x570] ss:$24 sps:$4 sm:$0xff]   ;;  %v13925_v52 = vld [vmem:[#allocation5 + $0x844] ss:$24 sps:$4 sm:$0xff]  }
 0x146   : > { %4366 = vmatprep.mubr.bf16.mxu0 %v13687_v57  ;;  %v13753_v57 = vld [vmem:[#allocation5 + $0x278] ss:$24 sps:$4 sm:$0xff]   ;;  %4502 = vmatprep.mubr.bf16.mxu1 %v13835_v55  ;;  %v13837_v55 = vld [vmem:[#allocation5 + $0x57c] ss:$24 sps:$4 sm:$0xff]  }
 0x14d   : > { %4367 = vmatmul.mubr.bf16.gmra.mrb[48].mxu0 %v13689_v58  ;;  %v13754_v58 = vld [vmem:[#allocation5 + $0x2ac] ss:$24 sps:$4 sm:$0xff]   ;;  %4503 = vmatmul.mubr.bf16.gmra.mrb[48].mxu1 %v13839_v56 }
 0x14e   : > { %4374 = vmatprep.mubr.bf16.mxu0 %v13692_v59  ;;  %v13841_v59 = vld [vmem:[#allocation5 + $0x5a4] ss:$24 sps:$4 sm:$0xff]   ;;  %v13931_v56 = vld [vmem:[#allocation5 + $0x874] ss:$24 sps:$4 sm:$0xff]  }
 0x14f   : > { %4510 = vmatprep.mubr.bf16.mxu1 %v13841_v59  ;;  %v13843_v59 = vld [vmem:[#allocation5 + $0x5ac] ss:$24 sps:$4 sm:$0xff]  }
 0x155   : > { %4375 = vmatmul.mubr.bf16.gmra.mrb[52].mxu0 %v13694_v60  ;;  %v13845_v60 = vld [vmem:[#allocation5 + $0x5a0] ss:$24 sps:$4 sm:$0xff]  }
 0x156   : > { %4382 = vmatprep.mubr.bf16.mxu0 %v13697_v61  ;;  %v13756_v61 = vld [vmem:[#allocation5 + $0x2a8] ss:$24 sps:$4 sm:$0xff]   ;;  %4511 = vmatmul.mubr.bf16.gmra.mrb[52].mxu1 %v13845_v60  ;;  %v13937_v60 = vld [vmem:[#allocation5 + $0x8a4] ss:$24 sps:$4 sm:$0xff]  }
 0x15d   : > { %4383 = vmatmul.mubr.bf16.gmra.mrb[56].mxu0 %v13699_v62  ;;  %v13757_v62 = vld [vmem:[#allocation5 + $0x2dc] ss:$24 sps:$4 sm:$0xff]  }
 0x15e   : > { %4390 = vmatprep.mubr.bf16.mxu0 %v13702_v63  ;;  %v13847_v63 = vld [vmem:[#allocation5 + $0x5d4] ss:$24 sps:$4 sm:$0xff]  }
 0x15f   : > { %4518 = vmatprep.mubr.bf16.mxu1 %v13847_v63  ;;  %v13849_v63 = vld [vmem:[#allocation5 + $0x5dc] ss:$24 sps:$4 sm:$0xff]  }
 0x165   : > { %4391 = vmatmul.mubr.bf16.gmra.mrb[60].mxu0 %v13704_v1  ;;  %v13851_v1 = vld [vmem:[#allocation5 + $0x5d0] ss:$24 sps:$4 sm:$0xff]  }
 0x166   : > { %4398 = vmatprep.mubr.bf16.mxu0 %v13707_v2  ;;  %v13759_v2 = vld [vmem:[#allocation5 + $0x2d8] ss:$24 sps:$4 sm:$0xff]   ;;  %4519 = vmatmul.mubr.bf16.gmra.mrb[56].mxu1 %v13851_v1  ;;  %v13943_v1 = vld [vmem:[#allocation5 + $0x8d4] ss:$24 sps:$4 sm:$0xff]  }
 0x16d   : > { %4399 = vmatmul.mubr.bf16.gmra.mrb[64].mxu0 %v13709_v3  ;;  %v13760_v3 = vld [vmem:[#allocation5 + $0x30c] ss:$24 sps:$4 sm:$0xff]  }
 0x16e   : > { %5071 = vmatprep.mubr.bf16.mxu0 %v13714_v4  ;;  %v13853_v4 = vld [vmem:[#allocation5 + $0x604] ss:$24 sps:$4 sm:$0xff]  }
 0x16f   : > { %4526 = vmatprep.mubr.bf16.mxu1 %v13853_v4  ;;  %v13855_v4 = vld [vmem:[#allocation5 + $0x60c] ss:$24 sps:$4 sm:$0xff]  }
 0x175   : > { %5072 = vmatmul.mubr.bf16.vlgmr.msra.gmra.mrb[0].mxu0 %v13712_v5  ;;  %v13857_v5 = vld [vmem:[#allocation5 + $0x600] ss:$24 sps:$4 sm:$0xff]  }
 0x176   : > { %5079 = vmatprep.mubr.bf16.mxu0 %v13715_v6  ;;  %v13762_v6 = vld [vmem:[#allocation5 + $0x308] ss:$24 sps:$4 sm:$0xff]   ;;  %4527 = vmatmul.mubr.bf16.gmra.mrb[60].mxu1 %v13857_v5  ;;  %v13949_v5 = vld [vmem:[#allocation5 + $0x904] ss:$24 sps:$4 sm:$0xff]  }
 0x177   : > { %4534 = vmatprep.mubr.bf16.mxu1 %v13859_v8  ;;  %v13861_v8 = vld [vmem:[#allocation5 + $0x63c] ss:$24 sps:$4 sm:$0xff]  }
 0x17d   : > { %5080 = vmatmul.mubr.bf16.gmra.mrb[4].mxu0 %v13717_v9  ;;  %v13863_v9 = vld [vmem:[#allocation5 + $0x630] ss:$24 sps:$4 sm:$0xff]  }
 0x17e   : > { %5087 = vmatprep.mubr.bf16.mxu0 %v13718_v10  ;;  %v13768_v10 = vld [vmem:[#allocation5 + $0x338] ss:$24 sps:$4 sm:$0xff]   ;;  %4535 = vmatmul.mubr.bf16.gmra.mrb[64].mxu1 %v13863_v9  ;;  %v13955_v9 = vld [vmem:[#allocation5 + $0x934] ss:$24 sps:$4 sm:$0xff]  }
 0x17f   : > { %4542 = vmatprep.mubr.bf16.mxu1 %v13865_v12  ;;  %v13867_v12 = vld [vmem:[#allocation5 + $0x66c] ss:$24 sps:$4 sm:$0xff]  }
 0x185   : > { %5088 = vmatmul.mubr.bf16.gmra.mrb[8].mxu0 %v13720_v13  ;;  %v13869_v13 = vld [vmem:[#allocation5 + $0x660] ss:$24 sps:$4 sm:$0xff]  }
 0x186   : > { %5095 = vmatprep.mubr.bf16.mxu0 %v13721_v14  ;;  %v13774_v14 = vld [vmem:[#allocation5 + $0x368] ss:$24 sps:$4 sm:$0xff]   ;;  %4543 = vmatmul.mubr.bf16.gmra.mrb[68].mxu1 %v13869_v13  ;;  %v13961_v13 = vld [vmem:[#allocation5 + $0x964] ss:$24 sps:$4 sm:$0xff]  }
 0x187   : > { %4550 = vmatprep.mubr.bf16.mxu1 %v13871_v16  ;;  %v13873_v16 = vld [vmem:[#allocation5 + $0x69c] ss:$24 sps:$4 sm:$0xff]  }
 0x18d   : > { %5096 = vmatmul.mubr.bf16.gmra.mrb[12].mxu0 %v13723_v17  ;;  %v13875_v17 = vld [vmem:[#allocation5 + $0x690] ss:$24 sps:$4 sm:$0xff]  }
 0x18e   : > { %5103 = vmatprep.mubr.bf16.mxu0 %v13724_v18  ;;  %v13780_v18 = vld [vmem:[#allocation5 + $0x398] ss:$24 sps:$4 sm:$0xff]   ;;  %4551 = vmatmul.mubr.bf16.gmra.mrb[72].mxu1 %v13875_v17  ;;  %v13967_v17 = vld [vmem:[#allocation5 + $0x994] ss:$24 sps:$4 sm:$0xff]  }
 0x18f   : > { %4558 = vmatprep.mubr.bf16.mxu1 %v13877_v20  ;;  %v13879_v20 = vld [vmem:[#allocation5 + $0x6cc] ss:$24 sps:$4 sm:$0xff]  }
 0x195   : > { %5104 = vmatmul.mubr.bf16.gmra.mrb[16].mxu0 %v13726_v21  ;;  %v13881_v21 = vld [vmem:[#allocation5 + $0x6c0] ss:$24 sps:$4 sm:$0xff]  }
 0x196   : > { %5111 = vmatprep.mubr.bf16.mxu0 %v13727_v22  ;;  %v13786_v22 = vld [vmem:[#allocation5 + $0x3c8] ss:$24 sps:$4 sm:$0xff]   ;;  %4559 = vmatmul.mubr.bf16.gmra.mrb[76].mxu1 %v13881_v21  ;;  %v13973_v21 = vld [vmem:[#allocation5 + $0x9c4] ss:$24 sps:$4 sm:$0xff]  }
 0x197   : > { %4566 = vmatprep.mubr.bf16.mxu1 %v13883_v24  ;;  %v13885_v24 = vld [vmem:[#allocation5 + $0x6fc] ss:$24 sps:$4 sm:$0xff]  }
 0x19d   : > { %5112 = vmatmul.mubr.bf16.gmra.mrb[20].mxu0 %v13729_v25  ;;  %v13887_v25 = vld [vmem:[#allocation5 + $0x6f0] ss:$24 sps:$4 sm:$0xff]  }
 0x19e   : > { %5119 = vmatprep.mubr.bf16.mxu0 %v13730_v26  ;;  %4567 = vmatmul.mubr.bf16.gmra.mrb[80].mxu1 %v13887_v25  ;;  %v13792_v26 = vld [vmem:[#allocation5 + $0x3f8] ss:$24 sps:$4 sm:$0xff]   ;;  %v13979_v25 = vld [vmem:[#allocation5 + $0x9f4] ss:$24 sps:$4 sm:$0xff]  }
 0x19f   : > { %4574 = vmatprep.mubr.bf16.mxu1 %v13889_v28  ;;  %v13891_v28 = vld [vmem:[#allocation5 + $0x72c] ss:$24 sps:$4 sm:$0xff]  }
 0x1a5   : > { %5120 = vmatmul.mubr.bf16.gmra.mrb[24].mxu0 %v13732_v29  ;;  %v13893_v29 = vld [vmem:[#allocation5 + $0x720] ss:$24 sps:$4 sm:$0xff]  }
 0x1a6   : > { %5127 = vmatprep.mubr.bf16.mxu0 %v13733_v30  ;;  %4575 = vmatmul.mubr.bf16.gmra.mrb[84].mxu1 %v13893_v29  ;;  %v13798_v30 = vld [vmem:[#allocation5 + $0x428] ss:$24 sps:$4 sm:$0xff]  }
 0x1a7   : > { %4582 = vmatprep.mubr.bf16.mxu1 %v13895_v32  ;;  %v13989_v32 = vld [vmem:[#allocation5 + $0xa20] ss:$24 sps:$4 sm:$0xff]  }
 0x1ad   : > { %5128 = vmatmul.mubr.bf16.gmra.mrb[28].mxu0 %v13735_v33  ;;  %v13899_v33 = vld [vmem:[#allocation5 + $0x750] ss:$24 sps:$4 sm:$0xff]  }
 0x1ae   : > { %5135 = vmatprep.mubr.bf16.mxu0 %v13736_v34  ;;  %4583 = vmatmul.mubr.bf16.gmra.mrb[88].mxu1 %v13899_v33  ;;  %v13804_v34 = vld [vmem:[#allocation5 + $0x458] ss:$24 sps:$4 sm:$0xff]  }
 0x1af   : > { %4590 = vmatprep.mubr.bf16.mxu1 %v13901_v36 }
 0x1b5   : > { %5136 = vmatmul.mubr.bf16.gmra.mrb[32].mxu0 %v13738_v37  ;;  %v13905_v37 = vld [vmem:[#allocation5 + $0x780] ss:$24 sps:$4 sm:$0xff]  }
 0x1b6   : > { %5143 = vmatprep.mubr.bf16.mxu0 %v13739_v38  ;;  %4591 = vmatmul.mubr.bf16.gmra.mrb[92].mxu1 %v13905_v37  ;;  %v13810_v38 = vld [vmem:[#allocation5 + $0x488] ss:$24 sps:$4 sm:$0xff]   ;;  %v13897_v37 = vld [vmem:[#allocation5 + $0x75c] ss:$24 sps:$4 sm:$0xff]  }
 0x1b7   : > { %4598 = vmatprep.mubr.bf16.mxu1 %v13907_v40  ;;  %v13991_v40 = vld [vmem:[#allocation5 + $0xa54] ss:$24 sps:$4 sm:$0xff]  }
 0x1bd   : > { %5144 = vmatmul.mubr.bf16.gmra.mrb[36].mxu0 %v13741_v41  ;;  %v13911_v41 = vld [vmem:[#allocation5 + $0x7b0] ss:$24 sps:$4 sm:$0xff]  }
 0x1be   : > { %5151 = vmatprep.mubr.bf16.mxu0 %v13742_v42  ;;  %4599 = vmatmul.mubr.bf16.gmra.mrb[96].mxu1 %v13911_v41  ;;  %v13816_v42 = vld [vmem:[#allocation5 + $0x4b8] ss:$24 sps:$4 sm:$0xff]  }
 0x1bf   : > { %4606 = vmatprep.mubr.bf16.mxu1 %v13913_v44 }
 0x1c0   : > { %v15526_v29 = vpop.f32.mrb[0].mxu1 }
 0x1c5   : > { %5152 = vmatmul.mubr.bf16.gmra.mrb[40].mxu0 %v13744_v45  ;;  %v13917_v45 = vld [vmem:[#allocation5 + $0x7e0] ss:$24 sps:$4 sm:$0xff]  }
 0x1c6   : > { %5159 = vmatprep.mubr.bf16.mxu0 %v13745_v46  ;;  %4607 = vmatmul.mubr.bf16.gmra.mrb[100].mxu1 %v13917_v45  ;;  %v13822_v46 = vld [vmem:[#allocation5 + $0x4e8] ss:$24 sps:$4 sm:$0xff]   ;;  %v13900_v45 = vld [vmem:[#allocation5 + $0x758] ss:$24 sps:$4 sm:$0xff]  }
 0x1c7   : > { %4614 = vmatprep.mubr.bf16.mxu1 %v13919_v48 }
 0x1cd   : > { %5160 = vmatmul.mubr.bf16.gmra.mrb[44].mxu0 %v13747_v49  ;;  %v13923_v49 = vld [vmem:[#allocation5 + $0x810] ss:$24 sps:$4 sm:$0xff]  }
 0x1ce   : > { %5167 = vmatprep.mubr.bf16.mxu0 %v13748_v50  ;;  %4615 = vmatmul.mubr.bf16.gmra.mrb[104].mxu1 %v13923_v49  ;;  %v13828_v50 = vld [vmem:[#allocation5 + $0x518] ss:$24 sps:$4 sm:$0xff]  }
 0x1cf   : > { %4622 = vmatprep.mubr.bf16.mxu1 %v13925_v52  ;;  %v13997_v52 = vld [vmem:[#allocation5 + $0xa84] ss:$24 sps:$4 sm:$0xff]  }
 0x1d5   : > { %5168 = vmatmul.mubr.bf16.gmra.mrb[48].mxu0 %v13750_v53  ;;  %v13929_v53 = vld [vmem:[#allocation5 + $0x840] ss:$24 sps:$4 sm:$0xff]  }
 0x1d6   : > { %5175 = vmatprep.mubr.bf16.mxu0 %v13751_v54  ;;  %4623 = vmatmul.mubr.bf16.gmra.mrb[108].mxu1 %v13929_v53  ;;  %v13834_v54 = vld [vmem:[#allocation5 + $0x548] ss:$24 sps:$4 sm:$0xff]  }
 0x1d7   : > { %4630 = vmatprep.mubr.bf16.mxu1 %v13931_v56 }
 0x1dd   : > { %5176 = vmatmul.mubr.bf16.gmra.mrb[52].mxu0 %v13753_v57  ;;  %v13935_v57 = vld [vmem:[#allocation5 + $0x870] ss:$24 sps:$4 sm:$0xff]  }
 0x1de   : > { %5183 = vmatprep.mubr.bf16.mxu0 %v13754_v58  ;;  %4631 = vmatmul.mubr.bf16.gmra.mrb[112].mxu1 %v13935_v57  ;;  %v13840_v58 = vld [vmem:[#allocation5 + $0x578] ss:$24 sps:$4 sm:$0xff]   ;;  %v13906_v57 = vld [vmem:[#allocation5 + $0x788] ss:$24 sps:$4 sm:$0xff]  }
 0x1df   : > { %4638 = vmatprep.mubr.bf16.mxu1 %v13937_v60 }
 0x1e5   : > { %5184 = vmatmul.mubr.bf16.gmra.mrb[56].mxu0 %v13756_v61  ;;  %v13941_v61 = vld [vmem:[#allocation5 + $0x8a0] ss:$24 sps:$4 sm:$0xff]  }
 0x1e6   : > { %5191 = vmatprep.mubr.bf16.mxu0 %v13757_v62  ;;  %4639 = vmatmul.mubr.bf16.gmra.mrb[116].mxu1 %v13941_v61  ;;  %v13846_v62 = vld [vmem:[#allocation5 + $0x5a8] ss:$24 sps:$4 sm:$0xff]  }
 0x1e7   : > { %4646 = vmatprep.mubr.bf16.mxu1 %v13943_v1  ;;  %v14003_v1 = vld [vmem:[#allocation5 + $0xab4] ss:$24 sps:$4 sm:$0xff]  }
 0x1ed   : > { %5192 = vmatmul.mubr.bf16.gmra.mrb[60].mxu0 %v13759_v2  ;;  %v13947_v2 = vld [vmem:[#allocation5 + $0x8d0] ss:$24 sps:$4 sm:$0xff]  }
 0x1ee   : > { %5199 = vmatprep.mubr.bf16.mxu0 %v13760_v3  ;;  %4647 = vmatmul.mubr.bf16.gmra.mrb[120].mxu1 %v13947_v2  ;;  %v13852_v3 = vld [vmem:[#allocation5 + $0x5d8] ss:$24 sps:$4 sm:$0xff]  }
 0x1ef   : > { %4654 = vmatprep.mubr.bf16.mxu1 %v13949_v5 }
 0x1f5   : > { %5200 = vmatmul.mubr.bf16.gmra.mrb[64].mxu0 %v13762_v6  ;;  %v13953_v6 = vld [vmem:[#allocation5 + $0x900] ss:$24 sps:$4 sm:$0xff]  }
 0x1f6   : > { %5207 = vmatprep.mubr.bf16.mxu0 %v13766_v7  ;;  %4655 = vmatmul.mubr.bf16.gmra.mrb[124].mxu1 %v13953_v6  ;;  %v13858_v7 = vld [vmem:[#allocation5 + $0x608] ss:$24 sps:$4 sm:$0xff]   ;;  %v13912_v6 = vld [vmem:[#allocation5 + $0x7b8] ss:$24 sps:$4 sm:$0xff]  }
 0x1f7   : > { %4662 = vmatprep.mubr.bf16.mxu1 %v13955_v9 }
 0x1fd   : > { %5208 = vmatmul.mubr.bf16.gmra.mrb[68].mxu0 %v13768_v10  ;;  %v13959_v10 = vld [vmem:[#allocation5 + $0x930] ss:$24 sps:$4 sm:$0xff]  }
 0x1fe   : > { %5215 = vmatprep.mubr.bf16.mxu0 %v13771_v11  ;;  %4663 = vmatmul.mubr.bf16.gmra.mrb[128].mxu1 %v13959_v10  ;;  %v13864_v11 = vld [vmem:[#allocation5 + $0x638] ss:$24 sps:$4 sm:$0xff]  }
 0x1ff   : > { %4670 = vmatprep.mubr.bf16.mxu1 %v13961_v13  ;;  %v14009_v13 = vld [vmem:[#allocation5 + $0xae4] ss:$24 sps:$4 sm:$0xff]  }
 0x205   : > { %5216 = vmatmul.mubr.bf16.gmra.mrb[72].mxu0 %v13774_v14  ;;  %v13965_v14 = vld [vmem:[#allocation5 + $0x960] ss:$24 sps:$4 sm:$0xff]  }
 0x206   : > { %5223 = vmatprep.mubr.bf16.mxu0 %v13777_v15  ;;  %4671 = vmatmul.mubr.bf16.gmra.mrb[132].mxu1 %v13965_v14  ;;  %v13870_v15 = vld [vmem:[#allocation5 + $0x668] ss:$24 sps:$4 sm:$0xff]  }
 0x207   : > { %4678 = vmatprep.mubr.bf16.mxu1 %v13967_v17 }
 0x20d   : > { %5224 = vmatmul.mubr.bf16.gmra.mrb[76].mxu0 %v13780_v18  ;;  %v13971_v18 = vld [vmem:[#allocation5 + $0x990] ss:$24 sps:$4 sm:$0xff]  }
 0x20e   : > { %5231 = vmatprep.mubr.bf16.mxu0 %v13783_v19  ;;  %4679 = vmatmul.mubr.bf16.gmra.mrb[136].mxu1 %v13971_v18  ;;  %v13876_v19 = vld [vmem:[#allocation5 + $0x698] ss:$24 sps:$4 sm:$0xff]   ;;  %v13918_v18 = vld [vmem:[#allocation5 + $0x7e8] ss:$24 sps:$4 sm:$0xff]  }
 0x20f   : > { %4686 = vmatprep.mubr.bf16.mxu1 %v13973_v21 }
 0x215   : > { %5232 = vmatmul.mubr.bf16.gmra.mrb[80].mxu0 %v13786_v22  ;;  %v13977_v22 = vld [vmem:[#allocation5 + $0x9c0] ss:$24 sps:$4 sm:$0xff]  }
 0x216   : > { %5239 = vmatprep.mubr.bf16.mxu0 %v13789_v23  ;;  %4687 = vmatmul.mubr.bf16.gmra.mrb[140].mxu1 %v13977_v22  ;;  %v13882_v23 = vld [vmem:[#allocation5 + $0x6c8] ss:$24 sps:$4 sm:$0xff]  }
 0x217   : > { %4694 = vmatprep.mubr.bf16.mxu1 %v13979_v25  ;;  %v14015_v25 = vld [vmem:[#allocation5 + $0xb14] ss:$24 sps:$4 sm:$0xff]  }
 0x21d   : > { %5240 = vmatmul.mubr.bf16.gmra.mrb[84].mxu0 %v13792_v26  ;;  %v13983_v26 = vld [vmem:[#allocation5 + $0x9f0] ss:$24 sps:$4 sm:$0xff]  }
 0x21e   : > { %5247 = vmatprep.mubr.bf16.mxu0 %v13795_v27  ;;  %4695 = vmatmul.mubr.bf16.gmra.mrb[144].mxu1 %v13983_v26  ;;  %v13888_v27 = vld [vmem:[#allocation5 + $0x6f8] ss:$24 sps:$4 sm:$0xff]  }
 0x225   : > { %5248 = vmatmul.mubr.bf16.gmra.mrb[88].mxu0 %v13798_v30  ;;  %v13985_v30 = vld [vmem:[#allocation5 + $0xa24] ss:$24 sps:$4 sm:$0xff]  }
 0x226   : > { %5255 = vmatprep.mubr.bf16.mxu0 %v13801_v31  ;;  %v4410_v31 = vpop.f32.mrb[1].mxu1  ;;  %4702 = vmatprep.mubr.bf16.mxu1 %v13985_v30 }
 0x227   : > { %v15528_v33 = vpop.f32.mrb[2].mxu1  ;;  %4703 = vmatmul.mubr.bf16.gmra.mrb[148].mxu1 %v13989_v32  ;;  %v13924_v31 = vld [vmem:[#allocation5 + $0x818] ss:$24 sps:$4 sm:$0xff]  }
 0x228   : > { %4710 = vmatprep.mubr.bf16.mxu1 %v13991_v40 }
 0x22d   : > { %5256 = vmatmul.mubr.bf16.gmra.mrb[92].mxu0 %v13804_v34  ;;  %v4413_v34 = vpop.f32.mrb[3].mxu1 }
 0x22e   : > { %5263 = vmatprep.mubr.bf16.mxu0 %v13807_v35  ;;  %v13894_v35 = vld [vmem:[#allocation5 + $0x728] ss:$24 sps:$4 sm:$0xff]   ;;  %v15530_v36 = vpop.f32.mrb[4].mxu1  ;;  %v13927_v34 = vld [vmem:[#allocation5 + $0x84c] ss:$24 sps:$4 sm:$0xff]  }
 0x235   : > { %5264 = vmatmul.mubr.bf16.gmra.mrb[96].mxu0 %v13810_v38  ;;  %v4418_v38 = vpop.f32.mrb[5].mxu1 }
 0x236   : > { %5271 = vmatprep.mubr.bf16.mxu0 %v13813_v39  ;;  %v15532_v39 = vpop.f32.mrb[6].mxu1 }
 0x237   : > { %v4421_v41 = vpop.f32.mrb[7].mxu1 }
 0x238   : > { %v14021_v41 = vld [vmem:[#allocation5 + $0xb44] ss:$24 sps:$4 sm:$0xff]  }
 0x23d   : > { %5272 = vmatmul.mubr.bf16.gmra.mrb[100].mxu0 %v13816_v42  ;;  %v13995_v42 = vld [vmem:[#allocation5 + $0xa50] ss:$24 sps:$4 sm:$0xff]  }
 0x23e   : > { %5279 = vmatprep.mubr.bf16.mxu0 %v13819_v43  ;;  %v15534_v43 = vpop.f32.mrb[8].mxu1  ;;  %4711 = vmatmul.mubr.bf16.gmra.mrb[152].mxu1 %v13995_v42 }
 0x23f   : > { %v4426_v44 = vpop.f32.mrb[9].mxu1  ;;  %4718 = vmatprep.mubr.bf16.mxu1 %v13997_v52  ;;  %v13933_v52 = vld [vmem:[#allocation5 + $0x87c] ss:$24 sps:$4 sm:$0xff]  }
 0x240   : > { %v14025_v44 = vld [vmem:[#allocation5 + $0xb40] ss:$24 sps:$4 sm:$0xff]  }
 0x245   : > { %5280 = vmatmul.mubr.bf16.gmra.mrb[104].mxu0 %v13822_v46  ;;  %v15536_v46 = vpop.f32.mrb[10].mxu1 }
 0x246   : > { %5287 = vmatprep.mubr.bf16.mxu0 %v13825_v47  ;;  %v13903_v47 = vld [vmem:[#allocation5 + $0x78c] ss:$24 sps:$4 sm:$0xff]   ;;  %v4429_v48 = vpop.f32.mrb[11].mxu1 }
 0x247   : > { %v15538_v49 = vpop.f32.mrb[12].mxu1  ;;  %v13930_v48 = vld [vmem:[#allocation5 + $0x848] ss:$24 sps:$4 sm:$0xff]  }
 0x24d   : > { %5288 = vmatmul.mubr.bf16.gmra.mrb[108].mxu0 %v13828_v50  ;;  %v4434_v50 = vpop.f32.mrb[13].mxu1 }
 0x24e   : > { %5295 = vmatprep.mubr.bf16.mxu0 %v13831_v51  ;;  %v15540_v51 = vpop.f32.mrb[14].mxu1 }
 0x24f   : > { %v4437_v53 = vpop.f32.mrb[15].mxu1 }
 0x255   : > { %5296 = vmatmul.mubr.bf16.gmra.mrb[112].mxu0 %v13834_v54  ;;  %v14001_v54 = vld [vmem:[#allocation5 + $0xa80] ss:$24 sps:$4 sm:$0xff]  }
 0x256   : > { %5303 = vmatprep.mubr.bf16.mxu0 %v13837_v55  ;;  %v15542_v55 = vpop.f32.mrb[16].mxu1  ;;  %4719 = vmatmul.mubr.bf16.gmra.mrb[156].mxu1 %v14001_v54 }
 0x257   : > { %v4442_v56 = vpop.f32.mrb[17].mxu1  ;;  %4726 = vmatprep.mubr.bf16.mxu1 %v14003_v1 }
 0x25d   : > { %5304 = vmatmul.mubr.bf16.gmra.mrb[116].mxu0 %v13840_v58  ;;  %v15544_v58 = vpop.f32.mrb[18].mxu1 }
 0x25e   : > { %5311 = vmatprep.mubr.bf16.mxu0 %v13843_v59  ;;  %v13909_v59 = vld [vmem:[#allocation5 + $0x7bc] ss:$24 sps:$4 sm:$0xff]   ;;  %v4445_v60 = vpop.f32.mrb[19].mxu1 }
 0x25f   : > { %v15546_v61 = vpop.f32.mrb[20].mxu1 }
 0x265   : > { %5312 = vmatmul.mubr.bf16.gmra.mrb[120].mxu0 %v13846_v62  ;;  %v4450_v62 = vpop.f32.mrb[21].mxu1 }
 0x266   : > { %5319 = vmatprep.mubr.bf16.mxu0 %v13849_v63  ;;  %v15548_v63 = vpop.f32.mrb[22].mxu1  ;;  %v14031_v62 = vld [vmem:[#allocation5 + $0xb70] ss:$24 sps:$4 sm:$0xff]  }
 0x267   : > { %v4453_v2 = vpop.f32.mrb[23].mxu1 }
 0x26d   : > { %5320 = vmatmul.mubr.bf16.gmra.mrb[124].mxu0 %v13852_v3  ;;  %v14007_v3 = vld [vmem:[#allocation5 + $0xab0] ss:$24 sps:$4 sm:$0xff]  }
 0x26e   : > { %5327 = vmatprep.mubr.bf16.mxu0 %v13855_v4  ;;  %v15550_v4 = vpop.f32.mrb[24].mxu1  ;;  %4727 = vmatmul.mubr.bf16.gmra.mrb[160].mxu1 %v14007_v3  ;;  %v13936_v3 = vld [vmem:[#allocation5 + $0x878] ss:$24 sps:$4 sm:$0xff]  }
 0x26f   : > { %v4458_v5 = vpop.f32.mrb[25].mxu1  ;;  %4734 = vmatprep.mubr.bf16.mxu1 %v14009_v13 }
 0x275   : > { %5328 = vmatmul.mubr.bf16.gmra.mrb[128].mxu0 %v13858_v7  ;;  %v15552_v7 = vpop.f32.mrb[26].mxu1 }
 0x276   : > { %5335 = vmatprep.mubr.bf16.mxu0 %v13861_v8  ;;  %v13915_v8 = vld [vmem:[#allocation5 + $0x7ec] ss:$24 sps:$4 sm:$0xff]   ;;  %v4461_v9 = vpop.f32.mrb[27].mxu1 }
 0x277   : > { %v15554_v10 = vpop.f32.mrb[28].mxu1 }
 0x278   : > { %17698 = vst [vmem:[#allocation19_spill] sm:$0xff] %v15554_v10 }
 0x27d   : > { %5336 = vmatmul.mubr.bf16.gmra.mrb[132].mxu0 %v13864_v11  ;;  %v4466_v11 = vpop.f32.mrb[29].mxu1 }
 0x27e   : > { %5343 = vmatprep.mubr.bf16.mxu0 %v13867_v12  ;;  %v15556_v12 = vpop.f32.mrb[30].mxu1 }
 0x27f   : > { %17699 = vst [vmem:[#allocation20_spill] sm:$0xff] %v15556_v12  ;;  %v4469_v14 = vpop.f32.mrb[31].mxu1 }
 0x280   : > { %v14033_v14 = vld [vmem:[#allocation5 + $0xba4] ss:$24 sps:$4 sm:$0xff]  }
 0x285   : > { %5344 = vmatmul.mubr.bf16.gmra.mrb[136].mxu0 %v13870_v15  ;;  %v14013_v15 = vld [vmem:[#allocation5 + $0xae0] ss:$24 sps:$4 sm:$0xff]  }
 0x286   : > { %5351 = vmatprep.mubr.bf16.mxu0 %v13873_v16  ;;  %v15558_v16 = vpop.f32.mrb[32].mxu1  ;;  %4735 = vmatmul.mubr.bf16.gmra.mrb[164].mxu1 %v14013_v15 }
 0x287   : > { %17700 = vst [vmem:[#allocation21_spill] sm:$0xff] %v15558_v16  ;;  %v4474_v17 = vpop.f32.mrb[33].mxu1  ;;  %4742 = vmatprep.mubr.bf16.mxu1 %v14015_v25  ;;  %v13945_v25 = vld [vmem:[#allocation5 + $0x8dc] ss:$24 sps:$4 sm:$0xff]  }
 0x288   : > { %v14037_v17 = vld [vmem:[#allocation5 + $0xba0] ss:$24 sps:$4 sm:$0xff]  }
 0x28d   : > { %5352 = vmatmul.mubr.bf16.gmra.mrb[140].mxu0 %v13876_v19  ;;  %v15560_v19 = vpop.f32.mrb[34].mxu1 }
 0x28e   : > { %5359 = vmatprep.mubr.bf16.mxu0 %v13879_v20  ;;  %17701 = vst [vmem:[#allocation22_spill] sm:$0xff] %v15560_v19  ;;  %v13921_v20 = vld [vmem:[#allocation5 + $0x81c] ss:$24 sps:$4 sm:$0xff]   ;;  %v4477_v21 = vpop.f32.mrb[35].mxu1 }
 0x28f   : > { %v15562_v22 = vpop.f32.mrb[36].mxu1  ;;  %v13942_v21 = vld [vmem:[#allocation5 + $0x8a8] ss:$24 sps:$4 sm:$0xff]  }
 0x290   : > { %17702 = vst [vmem:[#allocation23_spill] sm:$0xff] %v15562_v22 }
 0x295   : > { %5360 = vmatmul.mubr.bf16.gmra.mrb[144].mxu0 %v13882_v23  ;;  %v4482_v23 = vpop.f32.mrb[37].mxu1 }
 0x296   : > { %5367 = vmatprep.mubr.bf16.mxu0 %v13885_v24  ;;  %v15564_v24 = vpop.f32.mrb[38].mxu1 }
 0x297   : > { %17703 = vst [vmem:[#allocation24_spill] sm:$0xff] %v15564_v24  ;;  %v4485_v26 = vpop.f32.mrb[39].mxu1 }
 0x29d   : > { %5368 = vmatmul.mubr.bf16.gmra.mrb[148].mxu0 %v13888_v27  ;;  %v14019_v27 = vld [vmem:[#allocation5 + $0xb10] ss:$24 sps:$4 sm:$0xff]  }
 0x29e   : > { %5375 = vmatprep.mubr.bf16.mxu0 %v13891_v28  ;;  %v15566_v28 = vpop.f32.mrb[40].mxu1  ;;  %4743 = vmatmul.mubr.bf16.gmra.mrb[168].mxu1 %v14019_v27 }
 0x29f   : > { %17704 = vst [vmem:[#allocation25_spill] sm:$0xff] %v15566_v28  ;;  %v4490_v30 = vpop.f32.mrb[41].mxu1  ;;  %4750 = vmatprep.mubr.bf16.mxu1 %v14021_v41 }
 0x2a0   : > { %v15568_v32 = vpop.f32.mrb[42].mxu1 }
 0x2a1   : > { %17705 = vst [vmem:[#allocation26_spill] sm:$0xff] %v15568_v32 }
 0x2a5   : > { %5376 = vmatmul.mubr.bf16.gmra.mrb[152].mxu0 %v13894_v35  ;;  %v4493_v35 = vpop.f32.mrb[43].mxu1 }
 0x2a6   : > { %5383 = vmatprep.mubr.bf16.mxu0 %v13897_v37  ;;  %v15570_v37 = vpop.f32.mrb[44].mxu1  ;;  %4751 = vmatmul.mubr.bf16.gmra.mrb[172].mxu1 %v14025_v44  ;;  %v13948_v44 = vld [vmem:[#allocation5 + $0x8d8] ss:$24 sps:$4 sm:$0xff]  }
 0x2a7   : > { %17706 = vst [vmem:[#allocation27_spill] sm:$0xff] %v15570_v37  ;;  %v4498_v38 = vpop.f32.mrb[45].mxu1  ;;  %v14049_v37 = vld [vmem:[#allocation5 + $0xc0c] ss:$24 sps:$4 sm:$0xff]  }
 0x2a8   : > { %v15572_v40 = vpop.f32.mrb[46].mxu1  ;;  %v14043_v38 = vld [vmem:[#allocation5 + $0xbd0] ss:$24 sps:$4 sm:$0xff]  }
 0x2a9   : > { %17707 = vst [vmem:[#allocation28_spill] sm:$0xff] %v15572_v40  ;;  %v4501_v42 = vpop.f32.mrb[47].mxu1 }
 0x2ad   : > { %5384 = vmatmul.mubr.bf16.gmra.mrb[156].mxu0 %v13900_v45  ;;  %v15574_v45 = vpop.f32.mrb[48].mxu1 }
 0x2ae   : > { %5391 = vmatprep.mubr.bf16.mxu0 %v13903_v47  ;;  %17708 = vst [vmem:[#allocation29_spill] sm:$0xff] %v15574_v45  ;;  %v4506_v47 = vpop.f32.mrb[49].mxu1  ;;  %v14038_v45 = vld [vmem:[#allocation5 + $0xba8] ss:$24 sps:$4 sm:$0xff]  }
 0x2af   : > { %v15576_v50 = vpop.f32.mrb[50].mxu1 }
 0x2b0   : > { %17709 = vst [vmem:[#allocation30_spill] sm:$0xff] %v15576_v50  ;;  %v4509_v53 = vpop.f32.mrb[51].mxu1 }
 0x2b1   : > { %v15578_v54 = vpop.f32.mrb[52].mxu1 }
 0x2b2   : > { %17710 = vst [vmem:[#allocation31_spill] sm:$0xff] %v15578_v54  ;;  %v4514_v56 = vpop.f32.mrb[53].mxu1 }
 0x2b5   : > { %5392 = vmatmul.mubr.bf16.gmra.mrb[160].mxu0 %v13906_v57  ;;  %v15580_v57 = vpop.f32.mrb[54].mxu1 }
 0x2b6   : > { %5399 = vmatprep.mubr.bf16.mxu0 %v13909_v59  ;;  %17711 = vst [vmem:[#allocation32_spill] sm:$0xff] %v15580_v57  ;;  %v14027_v59 = vld [vmem:[#allocation5 + $0xb74] ss:$24 sps:$4 sm:$0xff]   ;;  %v4517_v60 = vpop.f32.mrb[55].mxu1 }
 0x2b7   : > { %v15582_v1 = vpop.f32.mrb[56].mxu1  ;;  %4758 = vmatprep.mubr.bf16.mxu1 %v14027_v59 }
 0x2b8   : > { %17712 = vst [vmem:[#allocation33_spill] sm:$0xff] %v15582_v1  ;;  %v4522_v2 = vpop.f32.mrb[57].mxu1  ;;  %4759 = vmatmul.mubr.bf16.gmra.mrb[176].mxu1 %v14031_v62 }
 0x2b9   : > { %v15584_v5 = vpop.f32.mrb[58].mxu1  ;;  %4766 = vmatprep.mubr.bf16.mxu1 %v14033_v14 }
 0x2ba   : > { %17713 = vst [vmem:[#allocation34_spill] sm:$0xff] %v15584_v5  ;;  %v14023_v5 = vld [vmem:[#allocation5 + $0xb4c] ss:$24 sps:$4 sm:$0xff]  }
 0x2bd   : > { %5400 = vmatmul.mubr.bf16.gmra.mrb[164].mxu0 %v13912_v6  ;;  %v13939_v6 = vld [vmem:[#allocation5 + $0x8ac] ss:$24 sps:$4 sm:$0xff]  }
 0x2be   : > { %5407 = vmatprep.mubr.bf16.mxu0 %v13915_v8  ;;  %v4525_v8 = vpop.f32.mrb[59].mxu1 }
 0x2bf   : > { %v15586_v9 = vpop.f32.mrb[60].mxu1  ;;  %v13957_v8 = vld [vmem:[#allocation5 + $0x93c] ss:$24 sps:$4 sm:$0xff]  }
 0x2c0   : > { %17714 = vst [vmem:[#allocation35_spill] sm:$0xff] %v15586_v9  ;;  %v4530_v11 = vpop.f32.mrb[61].mxu1  ;;  %4767 = vmatmul.mubr.bf16.gmra.mrb[180].mxu1 %v14037_v17 }
 0x2c1   : > { %v15588_v13 = vpop.f32.mrb[62].mxu1  ;;  %v14045_v11 = vld [vmem:[#allocation5 + $0xc04] ss:$24 sps:$4 sm:$0xff]  }
 0x2c2   : > { %17715 = vst [vmem:[#allocation36_spill] sm:$0xff] %v15588_v13  ;;  %v4533_v15 = vpop.f32.mrb[63].mxu1 }
 0x2c3   : > { %v14050_v15 = vld [vmem:[#allocation5 + $0xc00] ss:$24 sps:$4 sm:$0xff]  }
 0x2c5   : > { %5408 = vmatmul.mubr.bf16.gmra.mrb[168].mxu0 %v13918_v18  ;;  %v15590_v18 = vpop.f32.mrb[64].mxu1 }
 0x2c6   : > { %5415 = vmatprep.mubr.bf16.mxu0 %v13921_v20  ;;  %17716 = vst [vmem:[#allocation37_spill] sm:$0xff] %v15590_v18  ;;  %v4538_v20 = vpop.f32.mrb[65].mxu1  ;;  %v14014_v18 = vld [vmem:[#allocation5 + $0xae8] ss:$24 sps:$4 sm:$0xff]  }
 0x2c7   : > { %v15592_v23 = vpop.f32.mrb[66].mxu1 }
 0x2c8   : > { %17717 = vst [vmem:[#allocation38_spill] sm:$0xff] %v15592_v23  ;;  %v4541_v26 = vpop.f32.mrb[67].mxu1 }
 0x2c9   : > { %v15594_v27 = vpop.f32.mrb[68].mxu1  ;;  %v13963_v26 = vld [vmem:[#allocation5 + $0x96c] ss:$24 sps:$4 sm:$0xff]  }
 0x2ca   : > { %17718 = vst [vmem:[#allocation39_spill] sm:$0xff] %v15594_v27  ;;  %v4546_v30 = vpop.f32.mrb[69].mxu1  ;;  %v14011_v27 = vld [vmem:[#allocation5 + $0xaec] ss:$24 sps:$4 sm:$0xff]  }
 0x2cb   : > { %v14051_v30 = vld [vmem:[#allocation5 + $0xc34] ss:$24 sps:$4 sm:$0xff]  }
 0x2cd   : > { %5416 = vmatmul.mubr.bf16.gmra.mrb[172].mxu0 %v13924_v31  ;;  %v15596_v31 = vpop.f32.mrb[70].mxu1 }
 0x2ce   : > { %5423 = vmatprep.mubr.bf16.mxu0 %v13927_v34  ;;  %17719 = vst [vmem:[#allocation40_spill] sm:$0xff] %v15596_v31  ;;  %v14039_v34 = vld [vmem:[#allocation5 + $0xbd4] ss:$24 sps:$4 sm:$0xff]   ;;  %v4549_v35 = vpop.f32.mrb[71].mxu1  ;;  %v17724_v31 = vmov 0  }
 0x2cf   : > { %v15598_v41 = vpop.f32.mrb[72].mxu1  ;;  %4774 = vmatprep.mubr.bf16.mxu1 %v14039_v34  ;;  %v14056_v35 = vld [vmem:[#allocation5 + $0xc30] ss:$24 sps:$4 sm:$0xff]  }
 0x2d0   : > { %17720 = vst [vmem:[#allocation41_spill] sm:$0xff] %v15598_v41  ;;  %v4554_v42 = vpop.f32.mrb[73].mxu1  ;;  %4775 = vmatmul.mubr.bf16.gmra.mrb[184].mxu1 %v14043_v38 }
 0x2d1   : > { %v15600_v47 = vpop.f32.mrb[74].mxu1  ;;  %4782 = vmatprep.mubr.bf16.mxu1 %v14045_v11  ;;  %v13972_v11 = vld [vmem:[#allocation5 + $0x998] ss:$24 sps:$4 sm:$0xff]  }
 0x2d2   : > { %17721 = vst [vmem:[#allocation42_spill] sm:$0xff] %v15600_v47  ;;  %v14002_v47 = vld [vmem:[#allocation5 + $0xa88] ss:$24 sps:$4 sm:$0xff]  }
 0x2d5   : > { %5424 = vmatmul.mubr.bf16.gmra.mrb[176].mxu0 %v13930_v48  ;;  %v13951_v48 = vld [vmem:[#allocation5 + $0x90c] ss:$24 sps:$4 sm:$0xff]  }
 0x2d6   : > { %5431 = vmatprep.mubr.bf16.mxu0 %v13933_v52  ;;  %v4557_v52 = vpop.f32.mrb[75].mxu1 }
 0x2d7   : > { %v15602_v53 = vpop.f32.mrb[76].mxu1  ;;  %v13969_v52 = vld [vmem:[#allocation5 + $0x99c] ss:$24 sps:$4 sm:$0xff]  }
 0x2d8   : > { %17722 = vst [vmem:[#allocation43_spill] sm:$0xff] %v15602_v53  ;;  %v4562_v56 = vpop.f32.mrb[77].mxu1  ;;  %4783 = vmatmul.mubr.bf16.gmra.mrb[188].mxu1 %v14050_v15  ;;  %v13975_v15 = vld [vmem:[#allocation5 + $0x9cc] ss:$24 sps:$4 sm:$0xff]  }
 0x2d9   : > { %v15604_v59 = vpop.f32.mrb[78].mxu1  ;;  %4790 = vmatprep.mubr.bf16.mxu1 %v14051_v30  ;;  %v14057_v56 = vld [vmem:[#allocation5 + $0xc64] ss:$24 sps:$4 sm:$0xff]  }
 0x2da   : > { %17723 = vst [vmem:[#allocation44_spill] sm:$0xff] %v15604_v59  ;;  %v4565_v60 = vpop.f32.mrb[79].mxu1 }
 0x2db   : > { %v15606_v62 = vpop.f32.mrb[80].mxu1 }
 0x2dc   : > { %v4570_v2 = vpop.f32.mrb[81].mxu1 }
 0x2dd   : > { %5432 = vmatmul.mubr.bf16.gmra.mrb[180].mxu0 %v13936_v3  ;;  %v13954_v3 = vld [vmem:[#allocation5 + $0x908] ss:$24 sps:$4 sm:$0xff]  }
 0x2de   : > { %5439 = vmatprep.mubr.bf16.mxu0 %v13939_v6  ;;  %v15608_v6 = vpop.f32.mrb[82].mxu1  ;;  %v14062_v2 = vld [vmem:[#allocation5 + $0xc60] ss:$24 sps:$4 sm:$0xff]  }
 0x2df   : > { %v4573_v14 = vpop.f32.mrb[83].mxu1 }
 0x2e0   : > { %v15610_v17 = vpop.f32.mrb[84].mxu1  ;;  %4791 = vmatmul.mubr.bf16.gmra.mrb[192].mxu1 %v14056_v35  ;;  %v13978_v35 = vld [vmem:[#allocation5 + $0x9c8] ss:$24 sps:$4 sm:$0xff]  }
 0x2e1   : > { %v4578_v20 = vpop.f32.mrb[85].mxu1  ;;  %4798 = vmatprep.mubr.bf16.mxu1 %v14057_v56 }
 0x2e2   : > { %v14063_v20 = vld [vmem:[#allocation5 + $0xc94] ss:$24 sps:$4 sm:$0xff]  }
 0x2e5   : > { %5440 = vmatmul.mubr.bf16.gmra.mrb[184].mxu0 %v13942_v21  ;;  %v13960_v21 = vld [vmem:[#allocation5 + $0x938] ss:$24 sps:$4 sm:$0xff]  }
 0x2e6   : > { %5447 = vmatprep.mubr.bf16.mxu0 %v13945_v25  ;;  %v15612_v25 = vpop.f32.mrb[86].mxu1 }
 0x2e7   : > { %v4581_v34 = vpop.f32.mrb[87].mxu1 }
 0x2e8   : > { %v15614_v38 = vpop.f32.mrb[88].mxu1  ;;  %4799 = vmatmul.mubr.bf16.gmra.mrb[196].mxu1 %v14062_v2 }
 0x2e9   : > { %v4586_v42 = vpop.f32.mrb[89].mxu1  ;;  %4806 = vmatprep.mubr.bf16.mxu1 %v14063_v20 }
 0x2ed   : > { %5448 = vmatmul.mubr.bf16.gmra.mrb[188].mxu0 %v13948_v44  ;;  %v13966_v44 = vld [vmem:[#allocation5 + $0x968] ss:$24 sps:$4 sm:$0xff]  }
 0x2ee   : > { %5455 = vmatprep.mubr.bf16.mxu0 %v13951_v48  ;;  %v15616_v48 = vpop.f32.mrb[90].mxu1 }
 0x2ef   : > { %v4589_v60 = vpop.f32.mrb[91].mxu1 }
 0x2f0   : > { %v14074_v60 = vld [vmem:[#allocation5 + $0xcc0] ss:$24 sps:$4 sm:$0xff]  }
 0x2f5   : > { %5456 = vmatmul.mubr.bf16.gmra.mrb[192].mxu0 %v13954_v3  ;;  %v15618_v3 = vpop.f32.mrb[92].mxu1 }
 0x2f6   : > { %5463 = vmatprep.mubr.bf16.mxu0 %v13957_v8  ;;  %v4594_v8 = vpop.f32.mrb[93].mxu1 }
 0x2f7   : > { %v15620_v14 = vpop.f32.mrb[94].mxu1 }
 0x2fd   : > { %5464 = vmatmul.mubr.bf16.gmra.mrb[196].mxu0 %v13960_v21  ;;  %v4597_v21 = vpop.f32.mrb[95].mxu1 }
 0x2fe   : > { %5471 = vmatprep.mubr.bf16.mxu0 %v13963_v26  ;;  %v14068_v26 = vld [vmem:[#allocation5 + $0xc90] ss:$24 sps:$4 sm:$0xff]   ;;  %v15622_v30 = vpop.f32.mrb[96].mxu1  ;;  %v13987_v21 = vld [vmem:[#allocation5 + $0xa2c] ss:$24 sps:$4 sm:$0xff]  }
 0x2ff   : > { %4807 = vmatmul.mubr.bf16.gmra.mrb[200].mxu1 %v14068_v26  ;;  %v4602_v34 = vpop.f32.mrb[97].mxu1 }
 0x300   : > { %v15624_v42 = vpop.f32.mrb[98].mxu1 }
 0x301   : > { %v4605_v56 = vpop.f32.mrb[99].mxu1 }
 0x302   : > { %v15626_v2 = vpop.f32.mrb[100].mxu1 }
 0x303   : > { %v4610_v8 = vpop.f32.mrb[101].mxu1 }
 0x304   : > { %v15628_v20 = vpop.f32.mrb[102].mxu1  ;;  %v13996_v8 = vld [vmem:[#allocation5 + $0xa58] ss:$24 sps:$4 sm:$0xff]  }
 0x305   : > { %5472 = vmatmul.mubr.bf16.gmra.mrb[200].mxu0 %v13966_v44  ;;  %v13981_v44 = vld [vmem:[#allocation5 + $0x9fc] ss:$24 sps:$4 sm:$0xff]  }
 0x306   : > { %5479 = vmatprep.mubr.bf16.mxu0 %v13969_v52  ;;  %v14069_v52 = vld [vmem:[#allocation5 + $0xcc4] ss:$24 sps:$4 sm:$0xff]  }
 0x307   : > { %4814 = vmatprep.mubr.bf16.mxu1 %v14069_v52 }
 0x308   : > { %4815 = vmatmul.mubr.bf16.gmra.mrb[204].mxu1 %v14074_v60 }
 0x30d   : > { %5480 = vmatmul.mubr.bf16.gmra.mrb[204].mxu0 %v13972_v11  ;;  %v13984_v11 = vld [vmem:[#allocation5 + $0x9f8] ss:$24 sps:$4 sm:$0xff]  }
 0x30e   : > { %5487 = vmatprep.mubr.bf16.mxu0 %v13975_v15  ;;  %v4613_v15 = vpop.f32.mrb[103].mxu1 }
 0x30f   : > { %v15630_v26 = vpop.f32.mrb[104].mxu1  ;;  %v13999_v15 = vld [vmem:[#allocation5 + $0xa8c] ss:$24 sps:$4 sm:$0xff]  }
 0x310   : > { %v4618_v34 = vpop.f32.mrb[105].mxu1 }
 0x311   : > { %v15632_v56 = vpop.f32.mrb[106].mxu1  ;;  %v14084_v34 = vld [vmem:[%s15429_s18 + $0x100] sm:$0xff]  }
 0x312   : > { %v4621_v52 = vpop.f32.mrb[107].mxu1  ;;  %5841 = vmatpush1.bf16.msra.mxu0 %v14084_v34 }
 0x313   : > { %v15634_v60 = vpop.f32.mrb[108].mxu1  ;;  %v14005_v52 = vld [vmem:[#allocation5 + $0xabc] ss:$24 sps:$4 sm:$0xff]   ;;  %5842 = vmatprep.subr.bf16.mxu0 %v17724_v31 }
 0x315   : > { %5488 = vmatmul.mubr.bf16.gmra.mrb[208].mxu0 %v13978_v35  ;;  %v13993_v35 = vld [vmem:[#allocation5 + $0xa5c] ss:$24 sps:$4 sm:$0xff]  }
 0x316   : > { %5495 = vmatprep.mubr.bf16.mxu0 %v13981_v44  ;;  %v4626_v44 = vpop.f32.mrb[109].mxu1 }
 0x317   : > { %v15636_v59 = vpop.f32.mrb[110].mxu1 }
 0x31d   : > { %5496 = vmatmul.mubr.bf16.gmra.mrb[212].mxu0 %v13984_v11  ;;  %v4629_v11 = vpop.f32.mrb[111].mxu1 }
 0x31e   : > { %5503 = vmatprep.mubr.bf16.mxu0 %v13987_v21  ;;  %v15638_v53 = vpop.f32.mrb[112].mxu1  ;;  %v14008_v11 = vld [vmem:[#allocation5 + $0xab8] ss:$24 sps:$4 sm:$0xff]  }
 0x31f   : > { %v4634_v21 = vpop.f32.mrb[113].mxu1 }
 0x320   : > { %v15641_v41 = vpop.f32.mrb[114].mxu1 }
 0x325   : > { %5504 = vmatmul.mubr.bf16.gmra.mrb[216].mxu0 %v13990_v0  ;;  %v4637_v0 = vpop.f32.mrb[115].mxu1 }
 0x326   : > { %5511 = vmatprep.mubr.bf16.mxu0 %v13993_v35  ;;  %v15644_v35 = vpop.f32.mrb[116].mxu1  ;;  %v14017_v0 = vld [vmem:[#allocation5 + $0xb1c] ss:$24 sps:$4 sm:$0xff]  }
 0x327   : > { %v4642_v44 = vpop.f32.mrb[117].mxu1 }
 0x328   : > { %v14020_v44 = vld [vmem:[#allocation5 + $0xb18] ss:$24 sps:$4 sm:$0xff]  }
 0x32d   : > { %5512 = vmatmul.mubr.bf16.gmra.mrb[220].mxu0 %v13996_v8  ;;  %v15646_v8 = vpop.f32.mrb[118].mxu1 }
 0x32e   : > { %5519 = vmatprep.mubr.bf16.mxu0 %v13999_v15  ;;  %v4645_v15 = vpop.f32.mrb[119].mxu1 }
 0x32f   : > { %v15648_v21 = vpop.f32.mrb[120].mxu1 }
 0x330   : > { %v4650_v23 = vpop.f32.mrb[121].mxu1 }
 0x331   : > { %v15650_v34 = vpop.f32.mrb[122].mxu1 }
 0x332   : > { %v4653_v13 = vpop.f32.mrb[123].mxu1 }
 0x333   : > { %v14029_v13 = vld [vmem:[#allocation5 + $0xb7c] ss:$24 sps:$4 sm:$0xff]  }
 0x335   : > { %5520 = vmatmul.mubr.bf16.gmra.mrb[224].mxu0 %v14002_v47  ;;  %v15652_v47 = vpop.f32.mrb[124].mxu1 }
 0x336   : > { %5527 = vmatprep.mubr.bf16.mxu0 %v14005_v52  ;;  %v4658_v52 = vpop.f32.mrb[125].mxu1 }
 0x337   : > { %v15654_v9 = vpop.f32.mrb[126].mxu1  ;;  %v14032_v52 = vld [vmem:[#allocation5 + $0xb78] ss:$24 sps:$4 sm:$0xff]  }
 0x338   : > { %v4661_v15 = vpop.f32.mrb[127].mxu1 }
 0x339   : > { %v14035_v15 = vld [vmem:[#allocation5 + $0xbac] ss:$24 sps:$4 sm:$0xff]  }
 0x33d   : > { %5528 = vmatmul.mubr.bf16.gmra.mrb[228].mxu0 %v14008_v11  ;;  %v15656_v11 = vpop.f32.mrb[128].mxu1 }
 0x33e   : > { %5535 = vmatprep.mubr.bf16.mxu0 %v14011_v27  ;;  %v4666_v23 = vpop.f32.mrb[129].mxu1  ;;  %v14026_v27 = vld [vmem:[#allocation5 + $0xb48] ss:$24 sps:$4 sm:$0xff]  }
 0x33f   : > { %v15658_v1 = vpop.f32.mrb[130].mxu1  ;;  %v14103_v23 = vld [vmem:[%s15429_s18 + $0x108] sm:$0xff]  }
 0x340   : > { %5843 = vmatpush1.bf16.msra.mxu0 %v14103_v23 }
 0x341   : > { %5844 = vmatprep.subr.bf16.mxu0 %v17724_v31 }
 0x345   : > { %5536 = vmatmul.mubr.bf16.gmra.mrb[232].mxu0 %v14014_v18  ;;  %v4669_v18 = vpop.f32.mrb[131].mxu1 }
 0x346   : > { %5543 = vmatprep.mubr.bf16.mxu0 %v14017_v0  ;;  %v15660_v57 = vpop.f32.mrb[132].mxu1  ;;  %v14041_v18 = vld [vmem:[#allocation5 + $0xbdc] ss:$24 sps:$4 sm:$0xff]  }
 0x347   : > { %v4674_v0 = vpop.f32.mrb[133].mxu1 }
 0x348   : > { %v15662_v54 = vpop.f32.mrb[134].mxu1 }
 0x34d   : > { %5544 = vmatmul.mubr.bf16.gmra.mrb[236].mxu0 %v14020_v44  ;;  %v4677_v44 = vpop.f32.mrb[135].mxu1 }
 0x34e   : > { %5551 = vmatprep.mubr.bf16.mxu0 %v14023_v5  ;;  %v15664_v50 = vpop.f32.mrb[136].mxu1  ;;  %v14044_v44 = vld [vmem:[#allocation5 + $0xbd8] ss:$24 sps:$4 sm:$0xff]  }
 0x34f   : > { %v4682_v5 = vpop.f32.mrb[137].mxu1 }
 0x350   : > { %v15667_v40 = vpop.f32.mrb[138].mxu1 }
 0x355   : > { %5552 = vmatmul.mubr.bf16.gmra.mrb[240].mxu0 %v14026_v27  ;;  %v4685_v27 = vpop.f32.mrb[139].mxu1 }
 0x356   : > { %5559 = vmatprep.mubr.bf16.mxu0 %v14029_v13  ;;  %v15670_v13 = vpop.f32.mrb[140].mxu1  ;;  %v14047_v27 = vld [vmem:[#allocation5 + $0xc08] ss:$24 sps:$4 sm:$0xff]  }
 0x357   : > { %v4690_v0 = vpop.f32.mrb[141].mxu1 }
 0x358   : > { %v14055_v0 = vld [vmem:[#allocation5 + $0xc3c] ss:$24 sps:$4 sm:$0xff]  }
 0x35d   : > { %5560 = vmatmul.mubr.bf16.gmra.mrb[244].mxu0 %v14032_v52  ;;  %v15672_v52 = vpop.f32.mrb[142].mxu1 }
 0x35e   : > { %5567 = vmatprep.mubr.bf16.mxu0 %v14035_v15  ;;  %v4693_v15 = vpop.f32.mrb[143].mxu1 }
 0x35f   : > { %v15674_v5 = vpop.f32.mrb[144].mxu1 }
 0x360   : > { %v4698_v32 = vpop.f32.mrb[145].mxu1 }
 0x361   : > { %v15676_v24 = vpop.f32.mrb[146].mxu1 }
 0x362   : > { %v4701_v22 = vpop.f32.mrb[147].mxu1 }
 0x365   : > { %5568 = vmatmul.mubr.bf16.gmra.mrb[248].mxu0 %v14038_v45 }
 0x366   : > { %5575 = vmatprep.mubr.bf16.mxu0 %v14041_v18 }
 0x36d   : > { %5576 = vmatmul.mubr.bf16.gmra.mrb[252].mxu0 %v14044_v44  ;;  %v15684_v44 = vpop.f32.mrb[148].mxu1 }
 0x36e   : > { %5583 = vmatprep.mubr.bf16.mxu0 %v14049_v37  ;;  %v4706_v32 = vpop.f32.mrb[149].mxu1 }
 0x36f   : > { %v15686_v12 = vpop.f32.mrb[150].mxu1 }
 0x370   : > { %v5369_v28 = vpop.f32.mrb[148].mxu0  ;;  %v4709_v22 = vpop.f32.mrb[151].mxu1 }
 0x371   : > { %v5371_v23 = vpop.f32.mrb[149].mxu0  ;;  %v15679_v45 = vadd.f32 %v5369_v28, %v15606_v62 }
 0x372   : > { %v5372_v18 = vpop.f32.mrb[150].mxu0  ;;  %v14053_v23 = vld [vmem:[#allocation5 + $0xc38] ss:$24 sps:$4 sm:$0xff]  }
 0x373   : > { %17725 = vst [vmem:[#allocation45_spill] sm:$0xff] %v15679_v45  ;;  %v5374_v19 = vpop.f32.mrb[151].mxu0  ;;  %v15682_v16 = vadd.f32 %v5372_v18, %v15608_v6  ;;  %v14061_v45 = vld [vmem:[#allocation5 + $0xc6c] ss:$24 sps:$4 sm:$0xff]  }
 0x375   : > { %17726 = vst [vmem:[#allocation46_spill] sm:$0xff] %v15682_v16  ;;  %5584 = vmatmul.mubr.bf16.gmra.mrb[148].mxu0 %v14047_v27  ;;  %v15694_v27 = vpop.f32.mrb[152].mxu1 }
 0x376   : > { %5591 = vmatprep.mubr.bf16.mxu0 %v14055_v0  ;;  %v4714_v18 = vpop.f32.mrb[153].mxu1 }
 0x377   : > { %v15696_v16 = vpop.f32.mrb[154].mxu1 }
 0x378   : > { %v5377_v37 = vpop.f32.mrb[152].mxu0  ;;  %v4717_v22 = vpop.f32.mrb[155].mxu1 }
 0x379   : > { %v5379_v15 = vpop.f32.mrb[153].mxu0  ;;  %v15689_v28 = vadd.f32 %v5377_v37, %v15610_v17  ;;  %v14073_v22 = vld [vmem:[#allocation5 + $0xccc] ss:$24 sps:$4 sm:$0xff]  }
 0x37a   : > { %v5380_v62 = vpop.f32.mrb[154].mxu0  ;;  %v14059_v15 = vld [vmem:[#allocation5 + $0xc68] ss:$24 sps:$4 sm:$0xff]  }
 0x37b   : > { %17727 = vst [vmem:[#allocation47_spill] sm:$0xff] %v15689_v28  ;;  %v5382_v19 = vpop.f32.mrb[155].mxu0  ;;  %v15692_v6 = vadd.f32 %v5380_v62, %v15612_v25  ;;  %v14067_v28 = vld [vmem:[#allocation5 + $0xc9c] ss:$24 sps:$4 sm:$0xff]  }
 0x37d   : > { %17728 = vst [vmem:[#allocation48_spill] sm:$0xff] %v15692_v6  ;;  %5592 = vmatmul.mubr.bf16.gmra.mrb[152].mxu0 %v14053_v23  ;;  %v15704_v23 = vpop.f32.mrb[156].mxu1 }
 0x37e   : > { %5599 = vmatprep.mubr.bf16.mxu0 %v14061_v45  ;;  %v4722_v45 = vpop.f32.mrb[157].mxu1 }
 0x37f   : > { %v15706_v6 = vpop.f32.mrb[158].mxu1  ;;  %v14122_v45 = vld [vmem:[%s15429_s18 + $0x110] sm:$0xff]  }
 0x380   : > { %v5385_v0 = vpop.f32.mrb[156].mxu0  ;;  %5845 = vmatpush1.bf16.msra.mxu0 %v14122_v45 }
 0x381   : > { %v5387_v32 = vpop.f32.mrb[157].mxu0  ;;  %v15699_v17 = vadd.f32 %v5385_v0, %v15614_v38  ;;  %5846 = vmatprep.subr.bf16.mxu0 %v17724_v31 }
 0x382   : > { %v5388_v37 = vpop.f32.mrb[158].mxu0  ;;  %v14065_v32 = vld [vmem:[#allocation5 + $0xc98] ss:$24 sps:$4 sm:$0xff]  }
 0x383   : > { %17729 = vst [vmem:[#allocation49_spill] sm:$0xff] %v15699_v17  ;;  %v5390_v19 = vpop.f32.mrb[159].mxu0  ;;  %v15702_v25 = vadd.f32 %v5388_v37, %v15616_v48 }
 0x384   : > { %v4725_v19 = vpop.f32.mrb[159].mxu1 }
 0x385   : > { %17730 = vst [vmem:[#allocation50_spill] sm:$0xff] %v15702_v25  ;;  %5600 = vmatmul.mubr.bf16.gmra.mrb[156].mxu0 %v14059_v15  ;;  %v15714_v15 = vpop.f32.mrb[160].mxu1  ;;  %v14071_v25 = vld [vmem:[#allocation5 + $0xcc8] ss:$24 sps:$4 sm:$0xff]   ;;  %v14077_v19 = vld [vmem:[#allocation5 + $0xcfc] ss:$24 sps:$4 sm:$0xff]  }
 0x386   : > { %5607 = vmatprep.mubr.bf16.mxu0 %v14067_v28  ;;  %v4730_v28 = vpop.f32.mrb[161].mxu1 }
 0x387   : > { %v15717_v10 = vpop.f32.mrb[162].mxu1 }
 0x388   : > { %v5393_v62 = vpop.f32.mrb[160].mxu0 }
 0x389   : > { %v5395_v18 = vpop.f32.mrb[161].mxu0  ;;  %v15709_v38 = vadd.f32 %v5393_v62, %v15618_v3 }
 0x38a   : > { %v5396_v0 = vpop.f32.mrb[162].mxu0 }
 0x38b   : > { %17731 = vst [vmem:[#allocation51_spill] sm:$0xff] %v15709_v38  ;;  %v5398_v17 = vpop.f32.mrb[163].mxu0  ;;  %v15712_v48 = vadd.f32 %v5396_v0, %v15620_v14 }
 0x38c   : > { %v4733_v17 = vpop.f32.mrb[163].mxu1 }
 0x38d   : > { %17732 = vst [vmem:[#allocation52_spill] sm:$0xff] %v15712_v48  ;;  %5608 = vmatmul.mubr.bf16.gmra.mrb[160].mxu0 %v14065_v32  ;;  %v15726_v0 = vpop.f32.mrb[164].mxu1  ;;  %v14075_v48 = vld [vmem:[#allocation5 + $0xcf8] ss:$24 sps:$4 sm:$0xff]   ;;  %v14080_v17 = vld [vmem:[#allocation5 + $0xd2c] ss:$24 sps:$4 sm:$0xff]  }
 0x38e   : > { %5615 = vmatprep.mubr.bf16.mxu0 %v14073_v22  ;;  %v4738_v22 = vpop.f32.mrb[165].mxu1 }
 0x390   : > { %v5401_v37 = vpop.f32.mrb[164].mxu0 }
 0x391   : > { %v5403_v18 = vpop.f32.mrb[165].mxu0  ;;  %v15720_v3 = vadd.f32 %v5401_v37, %v15622_v30  ;;  %v15728_v30 = vpop.f32.mrb[166].mxu1 }
 0x392   : > { %v5404_v62 = vpop.f32.mrb[166].mxu0 }
 0x393   : > { %17733 = vst [vmem:[#allocation53_spill] sm:$0xff] %v15720_v3  ;;  %v5406_v14 = vpop.f32.mrb[167].mxu0  ;;  %v15724_v32 = vadd.f32 %v5404_v62, %v15624_v42 }
 0x394   : > { %v4741_v14 = vpop.f32.mrb[167].mxu1 }
 0x395   : > { %17734 = vst [vmem:[#allocation54_spill] sm:$0xff] %v15724_v32  ;;  %5616 = vmatmul.mubr.bf16.gmra.mrb[164].mxu0 %v14071_v25  ;;  %v15736_v25 = vpop.f32.mrb[168].mxu1 }
 0x396   : > { %5623 = vmatprep.mubr.bf16.mxu0 %v14077_v19  ;;  %v4746_v62 = vpop.f32.mrb[169].mxu1 }
 0x397   : > { %v15738_v32 = vpop.f32.mrb[170].mxu1 }
 0x398   : > { %v5409_v28 = vpop.f32.mrb[168].mxu0  ;;  %v4749_v14 = vpop.f32.mrb[171].mxu1 }
 0x399   : > { %v5411_v18 = vpop.f32.mrb[169].mxu0  ;;  %v15731_v37 = vadd.f32 %v5409_v28, %v15626_v2 }
 0x39a   : > { %v5412_v45 = vpop.f32.mrb[170].mxu0  ;;  %v14078_v18 = vld [vmem:[#allocation5 + $0xd28] ss:$24 sps:$4 sm:$0xff]  }
 0x39b   : > { %17735 = vst [vmem:[#allocation55_spill] sm:$0xff] %v15731_v37  ;;  %v5414_v3 = vpop.f32.mrb[171].mxu0  ;;  %v15734_v42 = vadd.f32 %v5412_v45, %v15628_v20  ;;  %v14083_v37 = vld [vmem:[#allocation5 + $0xd5c] ss:$24 sps:$4 sm:$0xff]  }
 0x39d   : > { %17736 = vst [vmem:[#allocation56_spill] sm:$0xff] %v15734_v42  ;;  %5624 = vmatmul.mubr.bf16.gmra.mrb[168].mxu0 %v14075_v48  ;;  %v15746_v48 = vpop.f32.mrb[172].mxu1 }
 0x39e   : > { %5631 = vmatprep.mubr.bf16.mxu0 %v14080_v17  ;;  %v4754_v45 = vpop.f32.mrb[173].mxu1 }
 0x39f   : > { %v15748_v42 = vpop.f32.mrb[174].mxu1 }
 0x3a0   : > { %v5417_v19 = vpop.f32.mrb[172].mxu0  ;;  %v4757_v14 = vpop.f32.mrb[175].mxu1 }
 0x3a1   : > { %v5419_v22 = vpop.f32.mrb[173].mxu0  ;;  %v15741_v2 = vadd.f32 %v5417_v19, %v15630_v26 }
 0x3a2   : > { %v5420_v28 = vpop.f32.mrb[174].mxu0  ;;  %v14081_v22 = vld [vmem:[#allocation5 + $0xd58] ss:$24 sps:$4 sm:$0xff]  }
 0x3a3   : > { %17737 = vst [vmem:[#allocation57_spill] sm:$0xff] %v15741_v2  ;;  %v5422_v3 = vpop.f32.mrb[175].mxu0  ;;  %v15744_v20 = vadd.f32 %v5420_v28, %v15632_v56  ;;  %v14087_v2 = vld [vmem:[#allocation5 + $0xd8c] ss:$24 sps:$4 sm:$0xff]  }
 0x3a5   : > { %17738 = vst [vmem:[#allocation58_spill] sm:$0xff] %v15744_v20  ;;  %5632 = vmatmul.mubr.bf16.gmra.mrb[172].mxu0 %v14078_v18  ;;  %v15756_v18 = vpop.f32.mrb[176].mxu1 }
 0x3a6   : > { %5639 = vmatprep.mubr.bf16.mxu0 %v14083_v37  ;;  %v4762_v37 = vpop.f32.mrb[177].mxu1 }
 0x3a7   : > { %v15758_v20 = vpop.f32.mrb[178].mxu1 }
 0x3a8   : > { %v5425_v17 = vpop.f32.mrb[176].mxu0  ;;  %v4765_v14 = vpop.f32.mrb[179].mxu1 }
 0x3a9   : > { %v5427_v62 = vpop.f32.mrb[177].mxu0  ;;  %v15751_v26 = vadd.f32 %v5425_v17, %v15634_v60  ;;  %v14093_v14 = vld [vmem:[#allocation5 + $0xdec] ss:$24 sps:$4 sm:$0xff]  }
 0x3aa   : > { %v5428_v19 = vpop.f32.mrb[178].mxu0  ;;  %v14085_v62 = vld [vmem:[#allocation5 + $0xd88] ss:$24 sps:$4 sm:$0xff]  }
 0x3ab   : > { %17739 = vst [vmem:[#allocation59_spill] sm:$0xff] %v15751_v26  ;;  %v5430_v3 = vpop.f32.mrb[179].mxu0  ;;  %v15754_v56 = vadd.f32 %v5428_v19, %v15636_v59  ;;  %v14090_v26 = vld [vmem:[#allocation5 + $0xdbc] ss:$24 sps:$4 sm:$0xff]  }
 0x3ad   : > { %17740 = vst [vmem:[#allocation60_spill] sm:$0xff] %v15754_v56  ;;  %5640 = vmatmul.mubr.bf16.gmra.mrb[176].mxu0 %v14081_v22  ;;  %v15766_v22 = vpop.f32.mrb[180].mxu1 }
 0x3ae   : > { %5647 = vmatprep.mubr.bf16.mxu0 %v14087_v2  ;;  %v4770_v2 = vpop.f32.mrb[181].mxu1 }
 0x3af   : > { %v15768_v56 = vpop.f32.mrb[182].mxu1  ;;  %v14141_v2 = vld [vmem:[%s15429_s18 + $0x118] sm:$0xff]  }
 0x3b0   : > { %v5433_v28 = vpop.f32.mrb[180].mxu0  ;;  %5847 = vmatpush1.bf16.msra.mxu0 %v14141_v2  ;;  %v14094_v2 = vld [vmem:[#allocation5 + $0xe18] ss:$24 sps:$4 sm:$0xff]  }
 0x3b1   : > { %v5435_v45 = vpop.f32.mrb[181].mxu0  ;;  %v15761_v60 = vadd.f32 %v5433_v28, %v15638_v53  ;;  %5848 = vmatprep.subr.bf16.mxu0 %v17724_v31 }
 0x3b2   : > { %v5436_v17 = vpop.f32.mrb[182].mxu0  ;;  %v14088_v45 = vld [vmem:[#allocation5 + $0xdb8] ss:$24 sps:$4 sm:$0xff]  }
 0x3b3   : > { %17741 = vst [vmem:[#allocation61_spill] sm:$0xff] %v15761_v60  ;;  %v5438_v3 = vpop.f32.mrb[183].mxu0  ;;  %v15764_v59 = vadd.f32 %v5436_v17, %v15641_v41 }
 0x3b4   : > { %v4773_v3 = vpop.f32.mrb[183].mxu1 }
 0x3b5   : > { %17742 = vst [vmem:[#allocation62_spill] sm:$0xff] %v15764_v59  ;;  %5648 = vmatmul.mubr.bf16.gmra.mrb[180].mxu0 %v14085_v62  ;;  %v15776_v62 = vpop.f32.mrb[184].mxu1  ;;  %v14091_v59 = vld [vmem:[#allocation5 + $0xde8] ss:$24 sps:$4 sm:$0xff]  }
 0x3b6   : > { %5655 = vmatprep.mubr.bf16.mxu0 %v14090_v26  ;;  %v4778_v26 = vpop.f32.mrb[185].mxu1 }
 0x3b7   : > { %v15779_v38 = vpop.f32.mrb[186].mxu1  ;;  %v14146_v26 = vld [vmem:[%s15429_s18 + $0x128] sm:$0xff]  }
 0x3b8   : > { %v5441_v19 = vpop.f32.mrb[184].mxu0 }
 0x3b9   : > { %v5443_v37 = vpop.f32.mrb[185].mxu0  ;;  %v15771_v53 = vadd.f32 %v5441_v19, %v15644_v35  ;;  %v14096_v19 = vld [vmem:[#allocation5 + $0xe1c] ss:$24 sps:$4 sm:$0xff]  }
 0x3ba   : > { %v5444_v28 = vpop.f32.mrb[186].mxu0 }
 0x3bb   : > { %v5446_v60 = vpop.f32.mrb[187].mxu0  ;;  %v15774_v41 = vadd.f32 %v5444_v28, %v15646_v8  ;;  %v4781_v8 = vpop.f32.mrb[187].mxu1 }
 0x3bd   : > { %5656 = vmatmul.mubr.bf16.gmra.mrb[184].mxu0 %v14088_v45 }
 0x3be   : > { %5663 = vmatprep.mubr.bf16.mxu0 %v14093_v14  ;;  %v14145_v14 = vld [vmem:[%s15429_s18 + $0x120] sm:$0xff]  }
 0x3bf   : > { %5849 = vmatpush1.bf16.msra.mxu0 %v14145_v14 }
 0x3c0   : > { %v5449_v17 = vpop.f32.mrb[188].mxu0  ;;  %5850 = vmatprep.subr.bf16.mxu0 %v17724_v31 }
 0x3c1   : > { %v5451_v37 = vpop.f32.mrb[189].mxu0  ;;  %v15782_v35 = vadd.f32 %v5449_v17, %v15648_v21  ;;  %v15790_v21 = vpop.f32.mrb[188].mxu1 }
 0x3c2   : > { %v5452_v60 = vpop.f32.mrb[190].mxu0  ;;  %v4786_v37 = vpop.f32.mrb[189].mxu1 }
 0x3c3   : > { %v5454_v45 = vpop.f32.mrb[191].mxu0  ;;  %v15786_v28 = vadd.f32 %v5452_v60, %v15650_v34  ;;  %v14099_v60 = vld [vmem:[#allocation5 + $0xe4c] ss:$24 sps:$4 sm:$0xff]   ;;  %5851 = vmatpush1.bf16.msra.mxu0 %v14146_v26  ;;  %v14097_v26 = vld [vmem:[#allocation5 + $0xe48] ss:$24 sps:$4 sm:$0xff]  }
 0x3c4   : > { %v15796_v45 = vpop.f32.mrb[190].mxu1  ;;  %5852 = vmatprep.subr.bf16.mxu0 %v17724_v31 }
 0x3c5   : > { %17743 = vst [vmem:[#allocation63_spill] sm:$0xff] %v15786_v28  ;;  %5664 = vmatmul.mubr.bf16.gmra.mrb[188].mxu0 %v14091_v59  ;;  %v14150_v28 = vld [vmem:[%s15429_s18 + $0x130] sm:$0xff]  }
 0x3c6   : > { %5671 = vmatprep.mubr.bf16.mxu0 %v14096_v19  ;;  %v4789_v19 = vpop.f32.mrb[191].mxu1 }
 0x3c7   : > { %5853 = vmatpush1.bf16.msra.mxu0 %v14150_v28 }
 0x3c8   : > { %v5457_v3 = vpop.f32.mrb[192].mxu0  ;;  %5854 = vmatprep.subr.bf16.mxu0 %v17724_v31 }
 0x3c9   : > { %v5459_v17 = vpop.f32.mrb[193].mxu0  ;;  %v15794_v8 = vadd.f32 %v5457_v3, %v15652_v47  ;;  %v15804_v3 = vpop.f32.mrb[192].mxu1 }
 0x3ca   : > { %v5460_v34 = vpop.f32.mrb[194].mxu0  ;;  %v14151_v17 = vld [vmem:[%s15429_s18 + $0x138] sm:$0xff]  }
 0x3cb   : > { %17744 = vst [vmem:[#allocation64_spill] sm:$0xff] %v15794_v8  ;;  %v5462_v59 = vpop.f32.mrb[195].mxu0  ;;  %v15800_v14 = vadd.f32 %v5460_v34, %v15654_v9  ;;  %v14102_v34 = vld [vmem:[#allocation5 + $0xe7c] ss:$24 sps:$4 sm:$0xff]   ;;  %5855 = vmatpush1.bf16.msra.mxu0 %v14151_v17  ;;  %v14100_v17 = vld [vmem:[#allocation5 + $0xe78] ss:$24 sps:$4 sm:$0xff]  }
 0x3cc   : > { %v4794_v59 = vpop.f32.mrb[193].mxu1  ;;  %5856 = vmatprep.subr.bf16.mxu0 %v17724_v31 }
 0x3cd   : > { %17745 = vst [vmem:[#allocation65_spill] sm:$0xff] %v15800_v14  ;;  %5672 = vmatmul.mubr.bf16.gmra.mrb[192].mxu0 %v14094_v2  ;;  %v15810_v19 = vpop.f32.mrb[194].mxu1  ;;  %v14155_v14 = vld [vmem:[%s15429_s18 + $0x140] sm:$0xff]  }
 0x3ce   : > { %5679 = vmatprep.mubr.bf16.mxu0 %v14099_v60  ;;  %v4797_v2 = vpop.f32.mrb[195].mxu1 }
 0x3cf   : > { %5857 = vmatpush1.bf16.msra.mxu0 %v14155_v14 }
 0x3d0   : > { %v5465_v47 = vpop.f32.mrb[196].mxu0  ;;  %5858 = vmatprep.subr.bf16.mxu0 %v17724_v31 }
 0x3d1   : > { %v5467_v37 = vpop.f32.mrb[197].mxu0  ;;  %v15808_v8 = vadd.f32 %v5465_v47, %v15656_v11  ;;  %v15818_v47 = vpop.f32.mrb[196].mxu1 }
 0x3d2   : > { %v5468_v9 = vpop.f32.mrb[198].mxu0  ;;  %v14156_v37 = vld [vmem:[%s15429_s18 + $0x148] sm:$0xff]  }
 0x3d3   : > { %17746 = vst [vmem:[#allocation66_spill] sm:$0xff] %v15808_v8  ;;  %v5470_v28 = vpop.f32.mrb[199].mxu0  ;;  %v15814_v60 = vadd.f32 %v5468_v9, %v15658_v1  ;;  %v14106_v9 = vld [vmem:[#allocation5 + $0xeac] ss:$24 sps:$4 sm:$0xff]   ;;  %5859 = vmatpush1.bf16.msra.mxu0 %v14156_v37  ;;  %v14104_v37 = vld [vmem:[#allocation5 + $0xea8] ss:$24 sps:$4 sm:$0xff]  }
 0x3d4   : > { %v4802_v28 = vpop.f32.mrb[197].mxu1  ;;  %5860 = vmatprep.subr.bf16.mxu0 %v17724_v31 }
 0x3d5   : > { %17747 = vst [vmem:[#allocation67_spill] sm:$0xff] %v15814_v60  ;;  %5680 = vmatmul.mubr.bf16.gmra.mrb[196].mxu0 %v14097_v26  ;;  %v15824_v2 = vpop.f32.mrb[198].mxu1  ;;  %v14160_v60 = vld [vmem:[%s15429_s18 + $0x150] sm:$0xff]  }
 0x3d6   : > { %5687 = vmatprep.mubr.bf16.mxu0 %v14102_v34  ;;  %v4805_v26 = vpop.f32.mrb[199].mxu1 }
 0x3d7   : > { %5861 = vmatpush1.bf16.msra.mxu0 %v14160_v60 }
 0x3d8   : > { %v5473_v11 = vpop.f32.mrb[200].mxu0  ;;  %5862 = vmatprep.subr.bf16.mxu0 %v17724_v31 }
 0x3d9   : > { %v5475_v59 = vpop.f32.mrb[201].mxu0  ;;  %v15822_v8 = vadd.f32 %v5473_v11, %v15660_v57  ;;  %v15832_v11 = vpop.f32.mrb[200].mxu1 }
 0x3da   : > { %v5476_v1 = vpop.f32.mrb[202].mxu0  ;;  %v14161_v59 = vld [vmem:[%s15429_s18 + $0x158] sm:$0xff]  }
 0x3db   : > { %17748 = vst [vmem:[#allocation68_spill] sm:$0xff] %v15822_v8  ;;  %v5478_v14 = vpop.f32.mrb[203].mxu0  ;;  %v15828_v34 = vadd.f32 %v5476_v1, %v15662_v54  ;;  %v14109_v1 = vld [vmem:[#allocation5 + $0xedc] ss:$24 sps:$4 sm:$0xff]   ;;  %5863 = vmatpush1.bf16.msra.mxu0 %v14161_v59  ;;  %v14107_v59 = vld [vmem:[#allocation5 + $0xed8] ss:$24 sps:$4 sm:$0xff]  }
 0x3dc   : > { %v4810_v14 = vpop.f32.mrb[201].mxu1  ;;  %5864 = vmatprep.subr.bf16.mxu0 %v17724_v31 }
 0x3dd   : > { %17749 = vst [vmem:[#allocation69_spill] sm:$0xff] %v15828_v34  ;;  %5688 = vmatmul.mubr.bf16.gmra.mrb[200].mxu0 %v14100_v17  ;;  %v15838_v26 = vpop.f32.mrb[202].mxu1  ;;  %v14165_v34 = vld [vmem:[%s15429_s18 + $0x160] sm:$0xff]  }
 0x3de   : > { %5695 = vmatprep.mubr.bf16.mxu0 %v14106_v9  ;;  %v4813_v17 = vpop.f32.mrb[203].mxu1 }
 0x3df   : > { %5865 = vmatpush1.bf16.msra.mxu0 %v14165_v34 }
 0x3e0   : > { %v5481_v57 = vpop.f32.mrb[204].mxu0  ;;  %5866 = vmatprep.subr.bf16.mxu0 %v17724_v31 }
 0x3e1   : > { %v5483_v28 = vpop.f32.mrb[205].mxu0  ;;  %v15836_v8 = vadd.f32 %v5481_v57, %v15664_v50  ;;  %v15846_v57 = vpop.f32.mrb[204].mxu1 }
 0x3e2   : > { %v5484_v54 = vpop.f32.mrb[206].mxu0  ;;  %v14166_v28 = vld [vmem:[%s15429_s18 + $0x168] sm:$0xff]  }
 0x3e3   : > { %17750 = vst [vmem:[#allocation70_spill] sm:$0xff] %v15836_v8  ;;  %v5486_v60 = vpop.f32.mrb[207].mxu0  ;;  %v15842_v9 = vadd.f32 %v5484_v54, %v15667_v40  ;;  %v14112_v54 = vld [vmem:[#allocation5 + $0xf0c] ss:$24 sps:$4 sm:$0xff]   ;;  %5867 = vmatpush1.bf16.msra.mxu0 %v14166_v28  ;;  %v14170_v8 = vld [vmem:[%s15429_s18 + $0x170] sm:$0xff]  }
 0x3e4   : > { %v4818_v60 = vpop.f32.mrb[205].mxu1  ;;  %5868 = vmatprep.subr.bf16.mxu0 %v17724_v31 }
 0x3e5   : > { %17751 = vst [vmem:[#allocation71_spill] sm:$0xff] %v15842_v9  ;;  %5696 = vmatmul.mubr.bf16.gmra.mrb[204].mxu0 %v14104_v37  ;;  %v15852_v9 = vpop.f32.mrb[206].mxu1  ;;  %v14110_v60 = vld [vmem:[#allocation5 + $0xf08] ss:$24 sps:$4 sm:$0xff]  }
 0x3e6   : > { %5703 = vmatprep.mubr.bf16.mxu0 %v14109_v1  ;;  %v4821_v37 = vpop.f32.mrb[207].mxu1 }
 0x3e7   : > { %5869 = vmatpush1.bf16.msra.mxu0 %v14170_v8 }
 0x3e8   : > { %v5489_v50 = vpop.f32.mrb[208].mxu0  ;;  %5870 = vmatprep.subr.bf16.mxu0 %v17724_v31 }
 0x3e9   : > { %v5491_v14 = vpop.f32.mrb[209].mxu0  ;;  %v15850_v17 = vadd.f32 %v5489_v50, %v15670_v13 }
 0x3ea   : > { %v5492_v40 = vpop.f32.mrb[210].mxu0  ;;  %v14171_v14 = vld [vmem:[%s15429_s18 + $0x178] sm:$0xff]   ;;  %s15055_s18 = scalar_lea.vmem %s15054_s24, 256 }
 0x3eb   : > { %17752 = vst [vmem:[#allocation72_spill] sm:$0xff] %v15850_v17  ;;  %v5494_v34 = vpop.f32.mrb[211].mxu0  ;;  %v15856_v1 = vadd.f32 %v5492_v40, %v15672_v52  ;;  %5871 = vmatpush1.bf16.msra.mxu0 %v14171_v14  ;;  %v14113_v40 = vld [vmem:[#allocation5 + $0xf38] ss:$24 sps:$4 sm:$0xff]   ;;  %p15057_p7 = scmp.lt.s32.totalorder %s15055_s18, %s15049_s27 }
 0x3ec   : > { %v14115_v34 = vld [vmem:[#allocation5 + $0xf3c] ss:$24 sps:$4 sm:$0xff]  }
 0x3ed   : > { %17753 = vst [vmem:[#allocation73_spill] sm:$0xff] %v15856_v1  ;;  %5704 = vmatmul.mubr.bf16.gmra.mrb[208].mxu0 %v14107_v59  ;;  %p15058_p9 = por %p15057_p7, %p15056_p3 }
 0x3ee   : > { %5711 = vmatprep.mubr.bf16.mxu0 %v14112_v54 }
 0x3ef   : > { %p15059_p0 = pnand %p15058_p9, %p15052_p10 }
 0x3f0   : > { %v5497_v13 = vpop.f32.mrb[212].mxu0 }
 0x3f1   : > { %v5499_v50 = vpop.f32.mrb[213].mxu0  ;;  %v15862_v17 = vadd.f32 %v5497_v13, %v15674_v5 }
 0x3f2   : > { %v5500_v28 = vpop.f32.mrb[214].mxu0  ;;  %v14118_v50 = vld [vmem:[#allocation5 + $0xf6c] ss:$24 sps:$4 sm:$0xff]  }
 0x3f3   : > { %v5502_v37 = vpop.f32.mrb[215].mxu0  ;;  %v15865_v52 = vadd.f32 %v5500_v28, %v15676_v24  ;;  %v14116_v24 = vld [vmem:[#allocation5 + $0xf68] ss:$24 sps:$4 sm:$0xff]  }
 0x3f5   : > { %5712 = vmatmul.mubr.bf16.gmra.mrb[212].mxu0 %v14110_v60 }
 0x3f6   : > { %5719 = vmatprep.mubr.bf16.mxu0 %v14115_v34  ;;  %v14121_v34 = vld [vmem:[#allocation5 + $0xf9c] ss:$24 sps:$4 sm:$0xff]  }
 0x3f8   : > { %v5505_v59 = vpop.f32.mrb[216].mxu0 }
 0x3f9   : > { %v5507_v8 = vpop.f32.mrb[217].mxu0  ;;  %v15868_v31 = vadd.f32 %v5505_v59, %v15684_v44 }
 0x3fa   : > { %v5508_v54 = vpop.f32.mrb[218].mxu0 }
 0x3fb   : > { %v5510_v1 = vpop.f32.mrb[219].mxu0  ;;  %v15871_v5 = vadd.f32 %v5508_v54, %v15686_v12  ;;  %v14119_v12 = vld [vmem:[#allocation5 + $0xf98] ss:$24 sps:$4 sm:$0xff]   ;;  %v14125_v54 = vld [vmem:[#allocation5 + $0xfcc] ss:$24 sps:$4 sm:$0xff]  }
 0x3fd   : > { %5720 = vmatmul.mubr.bf16.gmra.mrb[216].mxu0 %v14113_v40 }
 0x3fe   : > { %5727 = vmatprep.mubr.bf16.mxu0 %v14118_v50 }
 0x400   : > { %v5513_v14 = vpop.f32.mrb[220].mxu0 }
 0x401   : > { %v5515_v13 = vpop.f32.mrb[221].mxu0  ;;  %v15874_v60 = vadd.f32 %v5513_v14, %v15694_v27 }
 0x402   : > { %v5516_v28 = vpop.f32.mrb[222].mxu0 }
 0x403   : > { %v5518_v37 = vpop.f32.mrb[223].mxu0  ;;  %v15877_v44 = vadd.f32 %v5516_v28, %v15696_v16  ;;  %v14123_v16 = vld [vmem:[#allocation5 + $0xfc8] ss:$24 sps:$4 sm:$0xff]  }
 0x405   : > { %5728 = vmatmul.mubr.bf16.gmra.mrb[220].mxu0 %v14116_v24 }
 0x406   : > { %5735 = vmatprep.mubr.bf16.mxu0 %v14121_v34  ;;  %v14128_v34 = vld [vmem:[#allocation5 + $0xffc] ss:$24 sps:$4 sm:$0xff]  }
 0x408   : > { %v5521_v1 = vpop.f32.mrb[224].mxu0 }
 0x409   : > { %v5523_v59 = vpop.f32.mrb[225].mxu0  ;;  %v15880_v8 = vadd.f32 %v5521_v1, %v15704_v23 }
 0x40a   : > { %v5524_v40 = vpop.f32.mrb[226].mxu0 }
 0x40b   : > { %v5526_v50 = vpop.f32.mrb[227].mxu0  ;;  %v15883_v27 = vadd.f32 %v5524_v40, %v15706_v6  ;;  %v14126_v6 = vld [vmem:[#allocation5 + $0xff8] ss:$24 sps:$4 sm:$0xff]  }
 0x40d   : > { %5736 = vmatmul.mubr.bf16.gmra.mrb[224].mxu0 %v14119_v12 }
 0x40e   : > { %5743 = vmatprep.mubr.bf16.mxu0 %v14125_v54  ;;  %v14131_v54 = vld [vmem:[#allocation5 + $0x102c] ss:$24 sps:$4 sm:$0xff]  }
 0x410   : > { %v5529_v14 = vpop.f32.mrb[228].mxu0 }
 0x411   : > { %v5531_v13 = vpop.f32.mrb[229].mxu0  ;;  %v15886_v24 = vadd.f32 %v5529_v14, %v15714_v15 }
 0x412   : > { %v5532_v28 = vpop.f32.mrb[230].mxu0 }
 0x413   : > { %v5534_v37 = vpop.f32.mrb[231].mxu0  ;;  %v15889_v23 = vadd.f32 %v5532_v28, %v15717_v10  ;;  %v14129_v10 = vld [vmem:[#allocation5 + $0x1028] ss:$24 sps:$4 sm:$0xff]  }
 0x415   : > { %5744 = vmatmul.mubr.bf16.gmra.mrb[228].mxu0 %v14123_v16 }
 0x416   : > { %5751 = vmatprep.mubr.bf16.mxu0 %v14128_v34  ;;  %v14134_v34 = vld [vmem:[#allocation5 + $0x105c] ss:$24 sps:$4 sm:$0xff]  }
 0x418   : > { %v5537_v1 = vpop.f32.mrb[232].mxu0 }
 0x419   : > { %v5539_v59 = vpop.f32.mrb[233].mxu0  ;;  %v15892_v12 = vadd.f32 %v5537_v1, %v15726_v0 }
 0x41a   : > { %v5540_v40 = vpop.f32.mrb[234].mxu0 }
 0x41b   : > { %v5542_v50 = vpop.f32.mrb[235].mxu0  ;;  %v15895_v15 = vadd.f32 %v5540_v40, %v15728_v30  ;;  %v14132_v30 = vld [vmem:[#allocation5 + $0x1058] ss:$24 sps:$4 sm:$0xff]  }
 0x41d   : > { %5752 = vmatmul.mubr.bf16.gmra.mrb[232].mxu0 %v14126_v6 }
 0x41e   : > { %5759 = vmatprep.mubr.bf16.mxu0 %v14131_v54  ;;  %v14137_v54 = vld [vmem:[#allocation5 + $0x108c] ss:$24 sps:$4 sm:$0xff]  }
 0x420   : > { %v5545_v14 = vpop.f32.mrb[236].mxu0 }
 0x421   : > { %v5547_v13 = vpop.f32.mrb[237].mxu0  ;;  %v15898_v16 = vadd.f32 %v5545_v14, %v15736_v25 }
 0x422   : > { %v5548_v28 = vpop.f32.mrb[238].mxu0 }
 0x423   : > { %v5550_v37 = vpop.f32.mrb[239].mxu0  ;;  %v15901_v0 = vadd.f32 %v5548_v28, %v15738_v32  ;;  %v14135_v32 = vld [vmem:[#allocation5 + $0x1088] ss:$24 sps:$4 sm:$0xff]  }
 0x425   : > { %5760 = vmatmul.mubr.bf16.gmra.mrb[236].mxu0 %v14129_v10 }
 0x426   : > { %5767 = vmatprep.mubr.bf16.mxu0 %v14134_v34  ;;  %v14140_v34 = vld [vmem:[#allocation5 + $0x10bc] ss:$24 sps:$4 sm:$0xff]  }
 0x428   : > { %v5553_v1 = vpop.f32.mrb[240].mxu0 }
 0x429   : > { %v5555_v59 = vpop.f32.mrb[241].mxu0  ;;  %v15904_v6 = vadd.f32 %v5553_v1, %v15746_v48 }
 0x42a   : > { %v5556_v40 = vpop.f32.mrb[242].mxu0 }
 0x42b   : > { %v5558_v50 = vpop.f32.mrb[243].mxu0  ;;  %v15907_v25 = vadd.f32 %v5556_v40, %v15748_v42  ;;  %v14138_v42 = vld [vmem:[#allocation5 + $0x10b8] ss:$24 sps:$4 sm:$0xff]  }
 0x42d   : > { %5768 = vmatmul.mubr.bf16.gmra.mrb[240].mxu0 %v14132_v30 }
 0x42e   : > { %5775 = vmatprep.mubr.bf16.mxu0 %v14137_v54  ;;  %v14144_v54 = vld [vmem:[#allocation5 + $0x10ec] ss:$24 sps:$4 sm:$0xff]  }
 0x430   : > { %v5561_v14 = vpop.f32.mrb[244].mxu0 }
 0x431   : > { %v5563_v13 = vpop.f32.mrb[245].mxu0  ;;  %v15910_v10 = vadd.f32 %v5561_v14, %v15756_v18 }
 0x432   : > { %v5564_v28 = vpop.f32.mrb[246].mxu0 }
 0x433   : > { %v5566_v37 = vpop.f32.mrb[247].mxu0  ;;  %v15913_v48 = vadd.f32 %v5564_v28, %v15758_v20  ;;  %v14142_v20 = vld [vmem:[#allocation5 + $0x10e8] ss:$24 sps:$4 sm:$0xff]  }
 0x435   : > { %5776 = vmatmul.mubr.bf16.gmra.mrb[244].mxu0 %v14135_v32 }
 0x436   : > { %5783 = vmatprep.mubr.bf16.mxu0 %v14140_v34  ;;  %v14149_v34 = vld [vmem:[#allocation5 + $0x111c] ss:$24 sps:$4 sm:$0xff]  }
 0x438   : > { %v5569_v1 = vpop.f32.mrb[248].mxu0 }
 0x439   : > { %v5571_v59 = vpop.f32.mrb[249].mxu0  ;;  %v15916_v30 = vadd.f32 %v5569_v1, %v15766_v22 }
 0x43a   : > { %v5572_v40 = vpop.f32.mrb[250].mxu0 }
 0x43b   : > { %v5574_v50 = vpop.f32.mrb[251].mxu0  ;;  %v15919_v18 = vadd.f32 %v5572_v40, %v15768_v56  ;;  %v14147_v56 = vld [vmem:[#allocation5 + $0x1118] ss:$24 sps:$4 sm:$0xff]  }
 0x43d   : > { %5784 = vmatmul.mubr.bf16.gmra.mrb[248].mxu0 %v14138_v42 }
 0x43e   : > { %5791 = vmatprep.mubr.bf16.mxu0 %v14144_v54  ;;  %v14154_v54 = vld [vmem:[#allocation5 + $0x114c] ss:$24 sps:$4 sm:$0xff]  }
 0x440   : > { %v5577_v14 = vpop.f32.mrb[252].mxu0 }
 0x441   : > { %v5579_v13 = vpop.f32.mrb[253].mxu0  ;;  %v15922_v32 = vadd.f32 %v5577_v14, %v15776_v62 }
 0x442   : > { %v5580_v28 = vpop.f32.mrb[254].mxu0 }
 0x443   : > { %v5582_v37 = vpop.f32.mrb[255].mxu0  ;;  %v15925_v22 = vadd.f32 %v5580_v28, %v15779_v38  ;;  %v14152_v38 = vld [vmem:[#allocation5 + $0x1148] ss:$24 sps:$4 sm:$0xff]  }
 0x445   : > { %5792 = vmatmul.mubr.bf16.gmra.mrb[252].mxu0 %v14142_v20 }
 0x446   : > { %5799 = vmatprep.mubr.bf16.mxu0 %v14149_v34  ;;  %v14159_v34 = vld [vmem:[#allocation5 + $0x117c] ss:$24 sps:$4 sm:$0xff]  }
 0x448   : > { %v5585_v1 = vpop.f32.mrb[148].mxu0 }
 0x449   : > { %v5587_v59 = vpop.f32.mrb[149].mxu0  ;;  %v15928_v42 = vadd.f32 %v5585_v1, %v15790_v21 }
 0x44a   : > { %v5588_v40 = vpop.f32.mrb[150].mxu0 }
 0x44b   : > { %v5590_v50 = vpop.f32.mrb[151].mxu0  ;;  %v15931_v62 = vadd.f32 %v5588_v40, %v15796_v45  ;;  %v14157_v45 = vld [vmem:[#allocation5 + $0x1178] ss:$24 sps:$4 sm:$0xff]  }
 0x44d   : > { %17754 = vst [vmem:[#allocation74_spill] sm:$0xff] %v15931_v62  ;;  %5800 = vmatmul.mubr.bf16.gmra.mrb[148].mxu0 %v14147_v56 }
 0x44e   : > { %5807 = vmatprep.mubr.bf16.mxu0 %v14154_v54  ;;  %v14164_v54 = vld [vmem:[#allocation5 + $0x11ac] ss:$24 sps:$4 sm:$0xff]  }
 0x450   : > { %v5593_v14 = vpop.f32.mrb[152].mxu0 }
 0x451   : > { %v5595_v13 = vpop.f32.mrb[153].mxu0  ;;  %v15934_v20 = vadd.f32 %v5593_v14, %v15804_v3 }
 0x452   : > { %v5596_v28 = vpop.f32.mrb[154].mxu0 }
 0x453   : > { %17755 = vst [vmem:[#allocation75_spill] sm:$0xff] %v15934_v20  ;;  %v5598_v37 = vpop.f32.mrb[155].mxu0  ;;  %v15937_v21 = vadd.f32 %v5596_v28, %v15810_v19  ;;  %v14162_v19 = vld [vmem:[#allocation5 + $0x11a8] ss:$24 sps:$4 sm:$0xff]  }
 0x454   : > { %v14556_v20 = vld [vmem:[#allocation5 + $0xd90] ss:$24 sps:$4 sm:$0xff]  }
 0x455   : > { %17756 = vst [vmem:[#allocation76_spill] sm:$0xff] %v15937_v21  ;;  %5808 = vmatmul.mubr.bf16.gmra.mrb[152].mxu0 %v14152_v38 }
 0x456   : > { %5815 = vmatprep.mubr.bf16.mxu0 %v14159_v34  ;;  %v14169_v34 = vld [vmem:[#allocation5 + $0x11dc] ss:$24 sps:$4 sm:$0xff]  }
 0x458   : > { %v5601_v1 = vpop.f32.mrb[156].mxu0 }
 0x459   : > { %v5603_v59 = vpop.f32.mrb[157].mxu0  ;;  %v15940_v56 = vadd.f32 %v5601_v1, %v15818_v47 }
 0x45a   : > { %v5604_v40 = vpop.f32.mrb[158].mxu0 }
 0x45b   : > { %17757 = vst [vmem:[#allocation77_spill] sm:$0xff] %v15940_v56  ;;  %v5606_v50 = vpop.f32.mrb[159].mxu0  ;;  %v15943_v3 = vadd.f32 %v5604_v40, %v15824_v2  ;;  %v14167_v2 = vld [vmem:[#allocation5 + $0x11d8] ss:$24 sps:$4 sm:$0xff]  }
 0x45c   : > { %v14333_v56 = vld [vmem:[#allocation5 + $0x670] ss:$24 sps:$4 sm:$0xff]  }
 0x45d   : > { %17758 = vst [vmem:[#allocation78_spill] sm:$0xff] %v15943_v3  ;;  %5816 = vmatmul.mubr.bf16.gmra.mrb[156].mxu0 %v14157_v45 }
 0x45e   : > { %5823 = vmatprep.mubr.bf16.mxu0 %v14164_v54  ;;  %v14174_v54 = vld [vmem:[#allocation5 + $0x14] ss:$24 sps:$4 sm:$0xff]  }
 0x460   : > { %v5609_v14 = vpop.f32.mrb[160].mxu0 }
 0x461   : > { %v5611_v13 = vpop.f32.mrb[161].mxu0  ;;  %v15946_v38 = vadd.f32 %v5609_v14, %v15832_v11  ;;  %v14220_v14 = vld [vmem:[#allocation5 + $0xcf4] ss:$24 sps:$4 sm:$0xff]  }
 0x462   : > { %v5612_v28 = vpop.f32.mrb[162].mxu0  ;;  %v14224_v13 = vld [vmem:[#allocation5 + $0xcf0] ss:$24 sps:$4 sm:$0xff]   ;;  %4822 = vmatprep.mubr.bf16.mxu1 %v14220_v14  ;;  %v14184_v14 = vld [vmem:[#allocation5 + $0xd4] ss:$24 sps:$4 sm:$0xff]  }
 0x463   : > { %17759 = vst [vmem:[#allocation79_spill] sm:$0xff] %v15946_v38  ;;  %v5614_v37 = vpop.f32.mrb[163].mxu0  ;;  %v15949_v47 = vadd.f32 %v5612_v28, %v15838_v26  ;;  %4823 = vmatmul.mubr.bf16.gmra.mrb[208].mxu1 %v14224_v13  ;;  %v14172_v26 = vld [vmem:[#allocation5 + $0x10] ss:$24 sps:$4 sm:$0xff]   ;;  %v14226_v28 = vld [vmem:[#allocation5 + $0xd24] ss:$24 sps:$4 sm:$0xff]  }
 0x464   : > { %4830 = vmatprep.mubr.bf16.mxu1 %v14226_v28  ;;  %v14178_v37 = vld [vmem:[#allocation5 + $0x74] ss:$24 sps:$4 sm:$0xff]   ;;  %v14187_v28 = vld [vmem:[#allocation5 + $0x104] ss:$24 sps:$4 sm:$0xff]  }
 0x465   : > { %17760 = vst [vmem:[#allocation80_spill] sm:$0xff] %v15949_v47  ;;  %5824 = vmatmul.mubr.bf16.gmra.mrb[160].mxu0 %v14162_v19  ;;  %v14175_v19 = vld [vmem:[#allocation5 + $0x44] ss:$24 sps:$4 sm:$0xff]   ;;  %v14244_v13 = vld [vmem:[#allocation5 + $0xdb4] ss:$24 sps:$4 sm:$0xff]  }
 0x466   : > { %5831 = vmatprep.mubr.bf16.mxu0 %v14169_v34  ;;  %v14230_v34 = vld [vmem:[#allocation5 + $0xd20] ss:$24 sps:$4 sm:$0xff]  }
 0x468   : > { %v5617_v1 = vpop.f32.mrb[164].mxu0 }
 0x469   : > { %v5619_v59 = vpop.f32.mrb[165].mxu0  ;;  %v15952_v45 = vadd.f32 %v5617_v1, %v15846_v57  ;;  %v14177_v57 = vld [vmem:[#allocation5 + $0x40] ss:$24 sps:$4 sm:$0xff]   ;;  %v14232_v1 = vld [vmem:[#allocation5 + $0xd54] ss:$24 sps:$4 sm:$0xff]  }
 0x46a   : > { %v5620_v40 = vpop.f32.mrb[166].mxu0  ;;  %v14180_v59 = vld [vmem:[#allocation5 + $0x70] ss:$24 sps:$4 sm:$0xff]  }
 0x46b   : > { %17761 = vst [vmem:[#allocation81_spill] sm:$0xff] %v15952_v45  ;;  %v5622_v50 = vpop.f32.mrb[167].mxu0  ;;  %v15955_v11 = vadd.f32 %v5620_v40, %v15852_v9  ;;  %4831 = vmatmul.mubr.bf16.gmra.mrb[212].mxu1 %v14230_v34  ;;  %v14236_v9 = vld [vmem:[#allocation5 + $0xd50] ss:$24 sps:$4 sm:$0xff]   ;;  %v14238_v40 = vld [vmem:[#allocation5 + $0xd84] ss:$24 sps:$4 sm:$0xff]  }
 0x46c   : > { %4838 = vmatprep.mubr.bf16.mxu1 %v14232_v1  ;;  %v14183_v50 = vld [vmem:[#allocation5 + $0xa0] ss:$24 sps:$4 sm:$0xff]   ;;  %v14250_v34 = vld [vmem:[#allocation5 + $0xde4] ss:$24 sps:$4 sm:$0xff]   ;;  %v14190_v1 = vld [vmem:[#allocation5 + $0x134] ss:$24 sps:$4 sm:$0xff]  }
 0x46d   : > { %17762 = vst [vmem:[#allocation82_spill] sm:$0xff] %v15955_v11  ;;  %5832 = vmatmul.mubr.bf16.gmra.mrb[164].mxu0 %v14167_v2  ;;  %v14181_v2 = vld [vmem:[#allocation5 + $0xa4] ss:$24 sps:$4 sm:$0xff]  }
 0x46e   : > { %5872 = vmatprep.mubr.bf16.mxu0 %v14174_v54  ;;  %v14242_v54 = vld [vmem:[#allocation5 + $0xd80] ss:$24 sps:$4 sm:$0xff]  }
 0x473   : > { %4839 = vmatmul.mubr.bf16.gmra.mrb[216].mxu1 %v14236_v9  ;;  %v14256_v9 = vld [vmem:[#allocation5 + $0xe14] ss:$24 sps:$4 sm:$0xff]  }
 0x474   : > { %4846 = vmatprep.mubr.bf16.mxu1 %v14238_v40  ;;  %v14193_v40 = vld [vmem:[#allocation5 + $0x164] ss:$24 sps:$4 sm:$0xff]  }
 0x475   : > { %5873 = vmatmul.mubr.bf16.vlgmr.msra.gmra.mrb[0].mxu0 %v14172_v26  ;;  %v14248_v26 = vld [vmem:[#allocation5 + $0xdb0] ss:$24 sps:$4 sm:$0xff]  }
 0x476   : > { %5880 = vmatprep.mubr.bf16.mxu0 %v14175_v19  ;;  %v14186_v19 = vld [vmem:[#allocation5 + $0xd0] ss:$24 sps:$4 sm:$0xff]  }
 0x47b   : > { %4847 = vmatmul.mubr.bf16.gmra.mrb[220].mxu1 %v14242_v54  ;;  %v14262_v54 = vld [vmem:[#allocation5 + $0xe44] ss:$24 sps:$4 sm:$0xff]  }
 0x47c   : > { %4854 = vmatprep.mubr.bf16.mxu1 %v14244_v13  ;;  %v14196_v13 = vld [vmem:[#allocation5 + $0x194] ss:$24 sps:$4 sm:$0xff]  }
 0x47d   : > { %5881 = vmatmul.mubr.bf16.gmra.mrb[4].mxu0 %v14177_v57  ;;  %v14254_v57 = vld [vmem:[#allocation5 + $0xde0] ss:$24 sps:$4 sm:$0xff]  }
 0x47e   : > { %5888 = vmatprep.mubr.bf16.mxu0 %v14178_v37  ;;  %v14189_v37 = vld [vmem:[#allocation5 + $0x100] ss:$24 sps:$4 sm:$0xff]  }
 0x483   : > { %4855 = vmatmul.mubr.bf16.gmra.mrb[224].mxu1 %v14248_v26  ;;  %v14268_v26 = vld [vmem:[#allocation5 + $0xe74] ss:$24 sps:$4 sm:$0xff]  }
 0x484   : > { %4862 = vmatprep.mubr.bf16.mxu1 %v14250_v34  ;;  %v14199_v34 = vld [vmem:[#allocation5 + $0x1c4] ss:$24 sps:$4 sm:$0xff]  }
 0x485   : > { %5889 = vmatmul.mubr.bf16.gmra.mrb[8].mxu0 %v14180_v59  ;;  %v14260_v59 = vld [vmem:[#allocation5 + $0xe10] ss:$24 sps:$4 sm:$0xff]  }
 0x486   : > { %5896 = vmatprep.mubr.bf16.mxu0 %v14181_v2  ;;  %v14192_v2 = vld [vmem:[#allocation5 + $0x130] ss:$24 sps:$4 sm:$0xff]  }
 0x48b   : > { %4863 = vmatmul.mubr.bf16.gmra.mrb[228].mxu1 %v14254_v57  ;;  %v14274_v57 = vld [vmem:[#allocation5 + $0xea4] ss:$24 sps:$4 sm:$0xff]  }
 0x48c   : > { %4870 = vmatprep.mubr.bf16.mxu1 %v14256_v9  ;;  %v14202_v9 = vld [vmem:[#allocation5 + $0x1f4] ss:$24 sps:$4 sm:$0xff]  }
 0x48d   : > { %5897 = vmatmul.mubr.bf16.gmra.mrb[12].mxu0 %v14183_v50  ;;  %v14266_v50 = vld [vmem:[#allocation5 + $0xe40] ss:$24 sps:$4 sm:$0xff]  }
 0x48e   : > { %5904 = vmatprep.mubr.bf16.mxu0 %v14184_v14  ;;  %v14195_v14 = vld [vmem:[#allocation5 + $0x160] ss:$24 sps:$4 sm:$0xff]  }
 0x493   : > { %4871 = vmatmul.mubr.bf16.gmra.mrb[232].mxu1 %v14260_v59  ;;  %v14280_v59 = vld [vmem:[#allocation5 + $0xed4] ss:$24 sps:$4 sm:$0xff]  }
 0x494   : > { %4878 = vmatprep.mubr.bf16.mxu1 %v14262_v54  ;;  %v14205_v54 = vld [vmem:[#allocation5 + $0x224] ss:$24 sps:$4 sm:$0xff]  }
 0x495   : > { %5905 = vmatmul.mubr.bf16.gmra.mrb[16].mxu0 %v14186_v19  ;;  %v14272_v19 = vld [vmem:[#allocation5 + $0xe70] ss:$24 sps:$4 sm:$0xff]  }
 0x496   : > { %5912 = vmatprep.mubr.bf16.mxu0 %v14187_v28  ;;  %v14198_v28 = vld [vmem:[#allocation5 + $0x190] ss:$24 sps:$4 sm:$0xff]  }
 0x49b   : > { %4879 = vmatmul.mubr.bf16.gmra.mrb[236].mxu1 %v14266_v50  ;;  %v14286_v50 = vld [vmem:[#allocation5 + $0xf04] ss:$24 sps:$4 sm:$0xff]  }
 0x49c   : > { %4886 = vmatprep.mubr.bf16.mxu1 %v14268_v26  ;;  %v14208_v26 = vld [vmem:[#allocation5 + $0x254] ss:$24 sps:$4 sm:$0xff]  }
 0x49d   : > { %5913 = vmatmul.mubr.bf16.gmra.mrb[20].mxu0 %v14189_v37  ;;  %v14278_v37 = vld [vmem:[#allocation5 + $0xea0] ss:$24 sps:$4 sm:$0xff]  }
 0x49e   : > { %5920 = vmatprep.mubr.bf16.mxu0 %v14190_v1  ;;  %v14201_v1 = vld [vmem:[#allocation5 + $0x1c0] ss:$24 sps:$4 sm:$0xff]  }
 0x4a3   : > { %4887 = vmatmul.mubr.bf16.gmra.mrb[240].mxu1 %v14272_v19  ;;  %v14294_v19 = vld [vmem:[#allocation5 + $0xf34] ss:$24 sps:$4 sm:$0xff]  }
 0x4a4   : > { %4894 = vmatprep.mubr.bf16.mxu1 %v14274_v57  ;;  %v14211_v57 = vld [vmem:[#allocation5 + $0x284] ss:$24 sps:$4 sm:$0xff]  }
 0x4a5   : > { %5921 = vmatmul.mubr.bf16.gmra.mrb[24].mxu0 %v14192_v2  ;;  %v14284_v2 = vld [vmem:[#allocation5 + $0xed0] ss:$24 sps:$4 sm:$0xff]  }
 0x4a6   : > { %5928 = vmatprep.mubr.bf16.mxu0 %v14193_v40  ;;  %v14204_v40 = vld [vmem:[#allocation5 + $0x1f0] ss:$24 sps:$4 sm:$0xff]  }
 0x4ab   : > { %4895 = vmatmul.mubr.bf16.gmra.mrb[244].mxu1 %v14278_v37  ;;  %v14300_v37 = vld [vmem:[#allocation5 + $0xf64] ss:$24 sps:$4 sm:$0xff]  }
 0x4ac   : > { %4902 = vmatprep.mubr.bf16.mxu1 %v14280_v59  ;;  %v14214_v59 = vld [vmem:[#allocation5 + $0x2b4] ss:$24 sps:$4 sm:$0xff]  }
 0x4ad   : > { %5929 = vmatmul.mubr.bf16.gmra.mrb[28].mxu0 %v14195_v14  ;;  %v14290_v14 = vld [vmem:[#allocation5 + $0xf00] ss:$24 sps:$4 sm:$0xff]  }
 0x4ae   : > { %5936 = vmatprep.mubr.bf16.mxu0 %v14196_v13  ;;  %v14207_v13 = vld [vmem:[#allocation5 + $0x220] ss:$24 sps:$4 sm:$0xff]  }
 0x4b3   : > { %4903 = vmatmul.mubr.bf16.gmra.mrb[248].mxu1 %v14284_v2  ;;  %v14306_v2 = vld [vmem:[#allocation5 + $0xf94] ss:$24 sps:$4 sm:$0xff]  }
 0x4b4   : > { %4910 = vmatprep.mubr.bf16.mxu1 %v14286_v50  ;;  %v14217_v50 = vld [vmem:[#allocation5 + $0x2e4] ss:$24 sps:$4 sm:$0xff]  }
 0x4b5   : > { %5937 = vmatmul.mubr.bf16.gmra.mrb[32].mxu0 %v14198_v28  ;;  %v14292_v28 = vld [vmem:[#allocation5 + $0xf30] ss:$24 sps:$4 sm:$0xff]  }
 0x4b6   : > { %5944 = vmatprep.mubr.bf16.mxu0 %v14199_v34  ;;  %v14210_v34 = vld [vmem:[#allocation5 + $0x250] ss:$24 sps:$4 sm:$0xff]  }
 0x4bb   : > { %4911 = vmatmul.mubr.bf16.gmra.mrb[252].mxu1 %v14290_v14  ;;  %v14312_v14 = vld [vmem:[#allocation5 + $0xfc4] ss:$24 sps:$4 sm:$0xff]  }
 0x4bc   : > { %4918 = vmatprep.mubr.bf16.mxu1 %v14294_v19  ;;  %v14222_v19 = vld [vmem:[#allocation5 + $0x314] ss:$24 sps:$4 sm:$0xff]  }
 0x4bd   : > { %5945 = vmatmul.mubr.bf16.gmra.mrb[36].mxu0 %v14201_v1  ;;  %v14298_v1 = vld [vmem:[#allocation5 + $0xf60] ss:$24 sps:$4 sm:$0xff]  }
 0x4be   : > { %5952 = vmatprep.mubr.bf16.mxu0 %v14202_v9  ;;  %v14213_v9 = vld [vmem:[#allocation5 + $0x280] ss:$24 sps:$4 sm:$0xff]  }
 0x4c3   : > { %4919 = vmatmul.mubr.bf16.gmra.mrb[148].mxu1 %v14292_v28  ;;  %v14318_v28 = vld [vmem:[#allocation5 + $0xff4] ss:$24 sps:$4 sm:$0xff]  }
 0x4c4   : > { %4926 = vmatprep.mubr.bf16.mxu1 %v14300_v37  ;;  %v14228_v37 = vld [vmem:[#allocation5 + $0x344] ss:$24 sps:$4 sm:$0xff]  }
 0x4c5   : > { %5953 = vmatmul.mubr.bf16.gmra.mrb[40].mxu0 %v14204_v40  ;;  %v14304_v40 = vld [vmem:[#allocation5 + $0xf90] ss:$24 sps:$4 sm:$0xff]  }
 0x4c6   : > { %5960 = vmatprep.mubr.bf16.mxu0 %v14205_v54  ;;  %v14216_v54 = vld [vmem:[#allocation5 + $0x2b0] ss:$24 sps:$4 sm:$0xff]  }
 0x4cb   : > { %4927 = vmatmul.mubr.bf16.gmra.mrb[152].mxu1 %v14298_v1  ;;  %v14324_v1 = vld [vmem:[#allocation5 + $0x1024] ss:$24 sps:$4 sm:$0xff]  }
 0x4cc   : > { %4934 = vmatprep.mubr.bf16.mxu1 %v14306_v2  ;;  %v14234_v2 = vld [vmem:[#allocation5 + $0x374] ss:$24 sps:$4 sm:$0xff]  }
 0x4cd   : > { %5961 = vmatmul.mubr.bf16.gmra.mrb[44].mxu0 %v14207_v13  ;;  %v14310_v13 = vld [vmem:[#allocation5 + $0xfc0] ss:$24 sps:$4 sm:$0xff]  }
 0x4ce   : > { %5968 = vmatprep.mubr.bf16.mxu0 %v14208_v26  ;;  %v14219_v26 = vld [vmem:[#allocation5 + $0x2e0] ss:$24 sps:$4 sm:$0xff]  }
 0x4d3   : > { %4935 = vmatmul.mubr.bf16.gmra.mrb[156].mxu1 %v14304_v40  ;;  %v14330_v40 = vld [vmem:[#allocation5 + $0x1054] ss:$24 sps:$4 sm:$0xff]  }
 0x4d4   : > { %4942 = vmatprep.mubr.bf16.mxu1 %v14312_v14  ;;  %v14240_v14 = vld [vmem:[#allocation5 + $0x3a4] ss:$24 sps:$4 sm:$0xff]  }
 0x4d5   : > { %5969 = vmatmul.mubr.bf16.gmra.mrb[48].mxu0 %v14210_v34  ;;  %v14316_v34 = vld [vmem:[#allocation5 + $0xff0] ss:$24 sps:$4 sm:$0xff]  }
 0x4d6   : > { %5976 = vmatprep.mubr.bf16.mxu0 %v14211_v57  ;;  %v14225_v57 = vld [vmem:[#allocation5 + $0x310] ss:$24 sps:$4 sm:$0xff]  }
 0x4db   : > { %4943 = vmatmul.mubr.bf16.gmra.mrb[160].mxu1 %v14310_v13  ;;  %v14336_v13 = vld [vmem:[#allocation5 + $0x1084] ss:$24 sps:$4 sm:$0xff]  }
 0x4dc   : > { %4950 = vmatprep.mubr.bf16.mxu1 %v14318_v28  ;;  %v14246_v28 = vld [vmem:[#allocation5 + $0x3d4] ss:$24 sps:$4 sm:$0xff]  }
 0x4dd   : > { %5977 = vmatmul.mubr.bf16.gmra.mrb[52].mxu0 %v14213_v9  ;;  %v14322_v9 = vld [vmem:[#allocation5 + $0x1020] ss:$24 sps:$4 sm:$0xff]  }
 0x4de   : > { %5984 = vmatprep.mubr.bf16.mxu0 %v14214_v59  ;;  %v14231_v59 = vld [vmem:[#allocation5 + $0x340] ss:$24 sps:$4 sm:$0xff]  }
 0x4e3   : > { %4951 = vmatmul.mubr.bf16.gmra.mrb[164].mxu1 %v14316_v34  ;;  %v14342_v34 = vld [vmem:[#allocation5 + $0x10b4] ss:$24 sps:$4 sm:$0xff]  }
 0x4e4   : > { %4958 = vmatprep.mubr.bf16.mxu1 %v14324_v1  ;;  %v14252_v1 = vld [vmem:[#allocation5 + $0x404] ss:$24 sps:$4 sm:$0xff]  }
 0x4e5   : > { %5985 = vmatmul.mubr.bf16.gmra.mrb[56].mxu0 %v14216_v54  ;;  %v14328_v54 = vld [vmem:[#allocation5 + $0x1050] ss:$24 sps:$4 sm:$0xff]  }
 0x4e6   : > { %5992 = vmatprep.mubr.bf16.mxu0 %v14217_v50  ;;  %v14237_v50 = vld [vmem:[#allocation5 + $0x370] ss:$24 sps:$4 sm:$0xff]  }
 0x4eb   : > { %4959 = vmatmul.mubr.bf16.gmra.mrb[168].mxu1 %v14322_v9  ;;  %v14348_v9 = vld [vmem:[#allocation5 + $0x10e4] ss:$24 sps:$4 sm:$0xff]  }
 0x4ec   : > { %4966 = vmatprep.mubr.bf16.mxu1 %v14330_v40  ;;  %v14258_v40 = vld [vmem:[#allocation5 + $0x434] ss:$24 sps:$4 sm:$0xff]  }
 0x4ed   : > { %5993 = vmatmul.mubr.bf16.gmra.mrb[60].mxu0 %v14219_v26  ;;  %v14334_v26 = vld [vmem:[#allocation5 + $0x1080] ss:$24 sps:$4 sm:$0xff]  }
 0x4ee   : > { %6000 = vmatprep.mubr.bf16.mxu0 %v14222_v19  ;;  %v14243_v19 = vld [vmem:[#allocation5 + $0x3a0] ss:$24 sps:$4 sm:$0xff]  }
 0x4f3   : > { %4967 = vmatmul.mubr.bf16.gmra.mrb[172].mxu1 %v14328_v54  ;;  %v14354_v54 = vld [vmem:[#allocation5 + $0x1114] ss:$24 sps:$4 sm:$0xff]  }
 0x4f4   : > { %4974 = vmatprep.mubr.bf16.mxu1 %v14336_v13  ;;  %v14264_v13 = vld [vmem:[#allocation5 + $0x464] ss:$24 sps:$4 sm:$0xff]  }
 0x4f5   : > { %6001 = vmatmul.mubr.bf16.gmra.mrb[64].mxu0 %v14225_v57  ;;  %v14340_v57 = vld [vmem:[#allocation5 + $0x10b0] ss:$24 sps:$4 sm:$0xff]  }
 0x4f6   : > { %6008 = vmatprep.mubr.bf16.mxu0 %v14228_v37  ;;  %v14249_v37 = vld [vmem:[#allocation5 + $0x3d0] ss:$24 sps:$4 sm:$0xff]  }
 0x4fb   : > { %4975 = vmatmul.mubr.bf16.gmra.mrb[176].mxu1 %v14334_v26  ;;  %v14360_v26 = vld [vmem:[#allocation5 + $0x1144] ss:$24 sps:$4 sm:$0xff]  }
 0x4fc   : > { %4982 = vmatprep.mubr.bf16.mxu1 %v14342_v34  ;;  %v14270_v34 = vld [vmem:[#allocation5 + $0x494] ss:$24 sps:$4 sm:$0xff]  }
 0x4fd   : > { %6009 = vmatmul.mubr.bf16.gmra.mrb[68].mxu0 %v14231_v59  ;;  %v14346_v59 = vld [vmem:[#allocation5 + $0x10e0] ss:$24 sps:$4 sm:$0xff]  }
 0x4fe   : > { %6016 = vmatprep.mubr.bf16.mxu0 %v14234_v2  ;;  %v14255_v2 = vld [vmem:[#allocation5 + $0x400] ss:$24 sps:$4 sm:$0xff]  }
 0x503   : > { %4983 = vmatmul.mubr.bf16.gmra.mrb[180].mxu1 %v14340_v57  ;;  %v14366_v57 = vld [vmem:[#allocation5 + $0x1174] ss:$24 sps:$4 sm:$0xff]  }
 0x504   : > { %4990 = vmatprep.mubr.bf16.mxu1 %v14348_v9  ;;  %v14276_v9 = vld [vmem:[#allocation5 + $0x4c4] ss:$24 sps:$4 sm:$0xff]  }
 0x505   : > { %6017 = vmatmul.mubr.bf16.gmra.mrb[72].mxu0 %v14237_v50  ;;  %v14352_v50 = vld [vmem:[#allocation5 + $0x1110] ss:$24 sps:$4 sm:$0xff]  }
 0x506   : > { %6024 = vmatprep.mubr.bf16.mxu0 %v14240_v14  ;;  %v14261_v14 = vld [vmem:[#allocation5 + $0x430] ss:$24 sps:$4 sm:$0xff]  }
 0x50b   : > { %4991 = vmatmul.mubr.bf16.gmra.mrb[184].mxu1 %v14346_v59  ;;  %v14372_v59 = vld [vmem:[#allocation5 + $0x11a4] ss:$24 sps:$4 sm:$0xff]  }
 0x50c   : > { %4998 = vmatprep.mubr.bf16.mxu1 %v14354_v54  ;;  %v14282_v54 = vld [vmem:[#allocation5 + $0x4f4] ss:$24 sps:$4 sm:$0xff]  }
 0x50d   : > { %6025 = vmatmul.mubr.bf16.gmra.mrb[76].mxu0 %v14243_v19  ;;  %v14358_v19 = vld [vmem:[#allocation5 + $0x1140] ss:$24 sps:$4 sm:$0xff]  }
 0x50e   : > { %6032 = vmatprep.mubr.bf16.mxu0 %v14246_v28  ;;  %v14267_v28 = vld [vmem:[#allocation5 + $0x460] ss:$24 sps:$4 sm:$0xff]  }
 0x513   : > { %4999 = vmatmul.mubr.bf16.gmra.mrb[188].mxu1 %v14352_v50  ;;  %v14378_v50 = vld [vmem:[#allocation5 + $0x11d4] ss:$24 sps:$4 sm:$0xff]  }
 0x514   : > { %5006 = vmatprep.mubr.bf16.mxu1 %v14360_v26  ;;  %v14285_v26 = vld [vmem:[#allocation5 + $0x4f0] ss:$24 sps:$4 sm:$0xff]  }
 0x515   : > { %6033 = vmatmul.mubr.bf16.gmra.mrb[80].mxu0 %v14249_v37  ;;  %v14364_v37 = vld [vmem:[#allocation5 + $0x1170] ss:$24 sps:$4 sm:$0xff]  }
 0x516   : > { %6040 = vmatprep.mubr.bf16.mxu0 %v14252_v1  ;;  %v14273_v1 = vld [vmem:[#allocation5 + $0x490] ss:$24 sps:$4 sm:$0xff]  }
 0x51b   : > { %5007 = vmatmul.mubr.bf16.gmra.mrb[192].mxu1 %v14358_v19  ;;  %v14288_v19 = vld [vmem:[#allocation5 + $0x524] ss:$24 sps:$4 sm:$0xff]  }
 0x51c   : > { %5014 = vmatprep.mubr.bf16.mxu1 %v14366_v57 }
 0x51d   : > { %6041 = vmatmul.mubr.bf16.gmra.mrb[84].mxu0 %v14255_v2  ;;  %v14370_v2 = vld [vmem:[#allocation5 + $0x11a0] ss:$24 sps:$4 sm:$0xff]  }
 0x51e   : > { %6048 = vmatprep.mubr.bf16.mxu0 %v14258_v40  ;;  %v14279_v40 = vld [vmem:[#allocation5 + $0x4c0] ss:$24 sps:$4 sm:$0xff]  }
 0x523   : > { %5015 = vmatmul.mubr.bf16.gmra.mrb[196].mxu1 %v14364_v37 }
 0x524   : > { %5022 = vmatprep.mubr.bf16.mxu1 %v14372_v59  ;;  %v14387_v59 = vld [vmem:[#allocation7 + $0x4] ss:$16 sps:$4 sm:$0xff]  }
 0x525   : > { %6049 = vmatmul.mubr.bf16.gmra.mrb[88].mxu0 %v14261_v14  ;;  %v14376_v14 = vld [vmem:[#allocation5 + $0x11d0] ss:$24 sps:$4 sm:$0xff]  }
 0x526   : > { %6056 = vmatprep.mubr.bf16.mxu0 %v14264_v13  ;;  %v7009_v13 = vld [vmem:[%s17662_s3 + $0x80] sm:$0xff] }
 0x527   : > { %7107 = vperm.xlu0 %13627, %v7009_v13  }
 0x52b   : > { %5023 = vmatmul.mubr.bf16.gmra.mrb[200].mxu1 %v14370_v2 }
 0x52c   : > { %5030 = vmatprep.mubr.bf16.mxu1 %v14378_v50 }
 0x52d   : > { %6057 = vmatmul.mubr.bf16.gmra.mrb[92].mxu0 %v14267_v28  ;;  %v6993_v28 = vld [vmem:[%s17662_s3] sm:$0xff] }
 0x52e   : > { %6064 = vmatprep.mubr.bf16.mxu0 %v14270_v34  ;;  %v7010_v34 = vld [vmem:[%s17662_s3 + $0x88] sm:$0xff]  ;;  %7027 = vperm.xlu1 %13628, %v6993_v28  }
 0x52f   : > { %7112 = vperm.xlu0 %13627, %v7010_v34  }
 0x533   : > { %5031 = vmatmul.mubr.bf16.gmra.mrb[204].mxu1 %v14376_v14  ;;  %v14291_v14 = vld [vmem:[#allocation5 + $0x520] ss:$24 sps:$4 sm:$0xff]  }
 0x534   : > { %7537 = vmatprep.mubr.bf16.mxu1 %v14387_v59 }
 0x535   : > { %6065 = vmatmul.mubr.bf16.gmra.mrb[96].mxu0 %v14273_v1 }
 0x536   : > { %6072 = vmatprep.mubr.bf16.mxu0 %v14276_v9  ;;  %v15966_v57 = vpop.f32.mrb[208].mxu1 }
 0x537   : > { %17763 = vst [vmem:[#allocation83_spill] sm:$0xff] %v15966_v57  ;;  %v4826_v37 = vpop.f32.mrb[209].mxu1 }
 0x538   : > { %v15968_v1 = vpop.f32.mrb[210].mxu1  ;;  %v7012_v37 = vld [vmem:[%s17662_s3 + $0x98] sm:$0xff] }
 0x539   : > { %17764 = vst [vmem:[#allocation84_spill] sm:$0xff] %v15968_v1  ;;  %v4829_v2 = vpop.f32.mrb[211].mxu1 }
 0x53a   : > { %v6995_v2 = vld [vmem:[%s17662_s3 + $0x10] sm:$0xff] }
 0x53d   : > { %6073 = vmatmul.mubr.bf16.gmra.mrb[100].mxu0 %v14279_v40  ;;  %v6994_v40 = vld [vmem:[%s17662_s3 + $0x8] sm:$0xff] }
 0x53e   : > { %6080 = vmatprep.mubr.bf16.mxu0 %v14282_v54  ;;  %v7011_v54 = vld [vmem:[%s17662_s3 + $0x90] sm:$0xff]  ;;  %7032 = vperm.xlu1 %13628, %v6994_v40  }
 0x53f   : > { %7117 = vperm.xlu0 %13627, %v7011_v54  }
 0x542   : > { %7122 = vperm.xlu1 %13628, %v7012_v37   ;;  %v14301_v37 = vld [vmem:[#allocation5 + $0x584] ss:$24 sps:$4 sm:$0xff]  }
 0x543   : > { %7037 = vperm.xlu0 %13627, %v6995_v2  }
 0x545   : > { %6081 = vmatmul.mubr.bf16.gmra.mrb[104].mxu0 %v14285_v26  ;;  %v14295_v26 = vld [vmem:[#allocation5 + $0x554] ss:$24 sps:$4 sm:$0xff]  }
 0x546   : > { %6088 = vmatprep.mubr.bf16.mxu0 %v14288_v19 }
 0x548   : > { %v5874_v9 = vpop.f32.mrb[0].mxu0 }
 0x549   : > { %v5876_v50 = vpop.f32.mrb[1].mxu0  ;;  %v6641_v19 = vmax.f32 %v5874_v9, 0.0 }
 0x54a   : > { %v5877_v13 = vpop.f32.mrb[2].mxu0  ;;  %v15984_v50 = vpop.f32.mrb[212].mxu1 }
 0x54b   : > { %v6642_v28 = vmax.f32 %v5877_v13, 0.0  ;;  %v5879_v34 = vpop.f32.mrb[3].mxu0  ;;  %17765 = vst [vmem:[#allocation85_spill] sm:$0xff] %v15984_v50  ;;  %v4834_v59 = vpop.f32.mrb[213].mxu1  ;;  %v6996_v13 = vld [vmem:[%s17662_s3 + $0x18] sm:$0xff] }
 0x54c   : > { %v15986_v9 = vpop.f32.mrb[214].mxu1  ;;  %7042 = vperm.xlu1 %13628, %v6996_v13  }
 0x54d   : > { %v15982_v1 = vpack.c.bf16 %v6642_v28, %v6641_v19  ;;  %6089 = vmatmul.mubr.bf16.gmra.mrb[108].mxu0 %v14291_v14  ;;  %17766 = vst [vmem:[#allocation86_spill] sm:$0xff] %v15986_v9  ;;  %v4837_v54 = vpop.f32.mrb[215].mxu1  ;;  %v7013_v19 = vld [vmem:[%s17662_s3 + $0xa0] sm:$0xff]  ;;  %v14297_v14 = vld [vmem:[#allocation5 + $0x550] ss:$24 sps:$4 sm:$0xff]  }
 0x54e   : > { %6096 = vmatprep.mubr.bf16.mxu0 %v14295_v26  ;;  %7127 = vperm.xlu0 %13627, %v7013_v19   ;;  %v7014_v54 = vld [vmem:[%s17662_s3 + $0xa8] sm:$0xff]  ;;  %v6997_v9 = vld [vmem:[%s17662_s3 + $0x20] sm:$0xff] }
 0x550   : > { %v5882_v40 = vpop.f32.mrb[4].mxu0  ;;  %7132 = vperm.xlu1 %13628, %v7014_v54   ;;  %v14307_v54 = vld [vmem:[#allocation5 + $0x5b4] ss:$24 sps:$4 sm:$0xff]  }
 0x551   : > { %v5884_v28 = vpop.f32.mrb[5].mxu0  ;;  %v6643_v26 = vmax.f32 %v5882_v40, 0.0 }
 0x552   : > { %v5885_v34 = vpop.f32.mrb[6].mxu0  ;;  %v16002_v28 = vpop.f32.mrb[216].mxu1  ;;  %7047 = vperm.xlu0 %13627, %v6997_v9  }
 0x553   : > { %v6644_v2 = vmax.f32 %v5885_v34, 0.0  ;;  %v5887_v59 = vpop.f32.mrb[7].mxu0  ;;  %17767 = vst [vmem:[#allocation87_spill] sm:$0xff] %v16002_v28  ;;  %v4842_v13 = vpop.f32.mrb[217].mxu1 }
 0x554   : > { %v16004_v40 = vpop.f32.mrb[218].mxu1  ;;  %v6998_v59 = vld [vmem:[%s17662_s3 + $0x28] sm:$0xff] }
 0x555   : > { %v16000_v50 = vpack.c.bf16 %v6644_v2, %v6643_v26  ;;  %6097 = vmatmul.mubr.bf16.gmra.mrb[112].mxu0 %v14297_v14  ;;  %17768 = vst [vmem:[#allocation88_spill] sm:$0xff] %v16004_v40  ;;  %v4845_v34 = vpop.f32.mrb[219].mxu1  ;;  %v7015_v26 = vld [vmem:[%s17662_s3 + $0xb0] sm:$0xff]  ;;  %v14303_v14 = vld [vmem:[#allocation5 + $0x580] ss:$24 sps:$4 sm:$0xff]   ;;  %7052 = vperm.xlu1 %13628, %v6998_v59  }
 0x556   : > { %6104 = vmatprep.mubr.bf16.mxu0 %v14301_v37  ;;  %7137 = vperm.xlu0 %13627, %v7015_v26   ;;  %v7016_v34 = vld [vmem:[%s17662_s3 + $0xb8] sm:$0xff]  ;;  %v6999_v40 = vld [vmem:[%s17662_s3 + $0x30] sm:$0xff] }
 0x558   : > { %v5890_v19 = vpop.f32.mrb[8].mxu0 }
 0x559   : > { %v5892_v2 = vpop.f32.mrb[9].mxu0  ;;  %v6645_v37 = vmax.f32 %v5890_v19, 0.0  ;;  %7142 = vperm.xlu1 %13628, %v7016_v34   ;;  %v14313_v34 = vld [vmem:[#allocation5 + $0x5e4] ss:$24 sps:$4 sm:$0xff]  }
 0x55a   : > { %v5893_v28 = vpop.f32.mrb[10].mxu0  ;;  %v16020_v2 = vpop.f32.mrb[220].mxu1  ;;  %7057 = vperm.xlu0 %13627, %v6999_v40  }
 0x55b   : > { %v6646_v9 = vmax.f32 %v5893_v28, 0.0  ;;  %v5895_v13 = vpop.f32.mrb[11].mxu0  ;;  %17769 = vst [vmem:[#allocation89_spill] sm:$0xff] %v16020_v2  ;;  %v4850_v59 = vpop.f32.mrb[221].mxu1 }
 0x55c   : > { %v16022_v19 = vpop.f32.mrb[222].mxu1  ;;  %v7000_v13 = vld [vmem:[%s17662_s3 + $0x38] sm:$0xff] }
 0x55d   : > { %v16018_v57 = vpack.c.bf16 %v6646_v9, %v6645_v37  ;;  %6105 = vmatmul.mubr.bf16.gmra.mrb[116].mxu0 %v14303_v14  ;;  %17770 = vst [vmem:[#allocation90_spill] sm:$0xff] %v16022_v19  ;;  %v4853_v26 = vpop.f32.mrb[223].mxu1  ;;  %v7017_v37 = vld [vmem:[%s17662_s3 + $0xc0] sm:$0xff]  ;;  %v14309_v14 = vld [vmem:[#allocation5 + $0x5b0] ss:$24 sps:$4 sm:$0xff]   ;;  %7062 = vperm.xlu1 %13628, %v7000_v13  }
 0x55e   : > { %6112 = vmatprep.mubr.bf16.mxu0 %v14307_v54  ;;  %7147 = vperm.xlu0 %13627, %v7017_v37   ;;  %v7018_v26 = vld [vmem:[%s17662_s3 + $0xc8] sm:$0xff]  ;;  %v7001_v19 = vld [vmem:[%s17662_s3 + $0x40] sm:$0xff] }
 0x560   : > { %v5898_v28 = vpop.f32.mrb[12].mxu0 }
 0x561   : > { %v5900_v9 = vpop.f32.mrb[13].mxu0  ;;  %v6647_v54 = vmax.f32 %v5898_v28, 0.0  ;;  %7152 = vperm.xlu1 %13628, %v7018_v26   ;;  %v14319_v26 = vld [vmem:[#allocation5 + $0x614] ss:$24 sps:$4 sm:$0xff]  }
 0x562   : > { %v5901_v2 = vpop.f32.mrb[14].mxu0  ;;  %v16038_v9 = vpop.f32.mrb[224].mxu1  ;;  %7067 = vperm.xlu0 %13627, %v7001_v19  }
 0x563   : > { %v6648_v40 = vmax.f32 %v5901_v2, 0.0  ;;  %v5903_v59 = vpop.f32.mrb[15].mxu0  ;;  %17771 = vst [vmem:[#allocation91_spill] sm:$0xff] %v16038_v9  ;;  %v4858_v13 = vpop.f32.mrb[225].mxu1 }
 0x564   : > { %v16040_v28 = vpop.f32.mrb[226].mxu1  ;;  %v7002_v59 = vld [vmem:[%s17662_s3 + $0x48] sm:$0xff] }
 0x565   : > { %v16036_v11 = vpack.c.bf16 %v6648_v40, %v6647_v54  ;;  %6113 = vmatmul.mubr.bf16.gmra.mrb[120].mxu0 %v14309_v14  ;;  %17772 = vst [vmem:[#allocation92_spill] sm:$0xff] %v16040_v28  ;;  %v4861_v37 = vpop.f32.mrb[227].mxu1  ;;  %v7019_v54 = vld [vmem:[%s17662_s3 + $0xd0] sm:$0xff]  ;;  %v14315_v14 = vld [vmem:[#allocation5 + $0x5e0] ss:$24 sps:$4 sm:$0xff]   ;;  %7072 = vperm.xlu1 %13628, %v7002_v59  }
 0x566   : > { %6120 = vmatprep.mubr.bf16.mxu0 %v14313_v34  ;;  %7157 = vperm.xlu0 %13627, %v7019_v54   ;;  %v7020_v37 = vld [vmem:[%s17662_s3 + $0xd8] sm:$0xff]  ;;  %v7003_v28 = vld [vmem:[%s17662_s3 + $0x50] sm:$0xff] }
 0x568   : > { %v5906_v2 = vpop.f32.mrb[16].mxu0 }
 0x569   : > { %v5908_v40 = vpop.f32.mrb[17].mxu0  ;;  %v6649_v34 = vmax.f32 %v5906_v2, 0.0  ;;  %7162 = vperm.xlu1 %13628, %v7020_v37   ;;  %v14325_v37 = vld [vmem:[#allocation5 + $0x644] ss:$24 sps:$4 sm:$0xff]  }
 0x56a   : > { %v5909_v9 = vpop.f32.mrb[18].mxu0  ;;  %v16056_v40 = vpop.f32.mrb[228].mxu1  ;;  %7077 = vperm.xlu0 %13627, %v7003_v28  }
 0x56b   : > { %v6650_v19 = vmax.f32 %v5909_v9, 0.0  ;;  %v5911_v13 = vpop.f32.mrb[19].mxu0  ;;  %17773 = vst [vmem:[#allocation93_spill] sm:$0xff] %v16056_v40  ;;  %v4866_v59 = vpop.f32.mrb[229].mxu1 }
 0x56c   : > { %v16058_v2 = vpop.f32.mrb[230].mxu1  ;;  %v7004_v13 = vld [vmem:[%s17662_s3 + $0x58] sm:$0xff] }
 0x56d   : > { %v16054_v45 = vpack.c.bf16 %v6650_v19, %v6649_v34  ;;  %6121 = vmatmul.mubr.bf16.gmra.mrb[124].mxu0 %v14315_v14  ;;  %17774 = vst [vmem:[#allocation94_spill] sm:$0xff] %v16058_v2  ;;  %v4869_v54 = vpop.f32.mrb[231].mxu1  ;;  %v7021_v34 = vld [vmem:[%s17662_s3 + $0xe0] sm:$0xff]  ;;  %v14321_v14 = vld [vmem:[#allocation5 + $0x610] ss:$24 sps:$4 sm:$0xff]   ;;  %7082 = vperm.xlu1 %13628, %v7004_v13  }
 0x56e   : > { %6128 = vmatprep.mubr.bf16.mxu0 %v14319_v26  ;;  %7167 = vperm.xlu0 %13627, %v7021_v34   ;;  %v7022_v54 = vld [vmem:[%s17662_s3 + $0xe8] sm:$0xff]  ;;  %v7005_v2 = vld [vmem:[%s17662_s3 + $0x60] sm:$0xff] }
 0x570   : > { %v5914_v9 = vpop.f32.mrb[20].mxu0 }
 0x571   : > { %v5916_v19 = vpop.f32.mrb[21].mxu0  ;;  %v6651_v26 = vmax.f32 %v5914_v9, 0.0  ;;  %7172 = vperm.xlu1 %13628, %v7022_v54   ;;  %v14331_v54 = vld [vmem:[#allocation5 + $0x674] ss:$24 sps:$4 sm:$0xff]  }
 0x572   : > { %v5917_v40 = vpop.f32.mrb[22].mxu0  ;;  %v16074_v19 = vpop.f32.mrb[232].mxu1  ;;  %7087 = vperm.xlu0 %13627, %v7005_v2  }
 0x573   : > { %v6652_v28 = vmax.f32 %v5917_v40, 0.0  ;;  %v5919_v59 = vpop.f32.mrb[23].mxu0  ;;  %17775 = vst [vmem:[#allocation95_spill] sm:$0xff] %v16074_v19  ;;  %v4874_v13 = vpop.f32.mrb[233].mxu1 }
 0x574   : > { %v16076_v9 = vpop.f32.mrb[234].mxu1  ;;  %v7006_v59 = vld [vmem:[%s17662_s3 + $0x68] sm:$0xff] }
 0x575   : > { %v16072_v47 = vpack.c.bf16 %v6652_v28, %v6651_v26  ;;  %6129 = vmatmul.mubr.bf16.gmra.mrb[128].mxu0 %v14321_v14  ;;  %17776 = vst [vmem:[#allocation96_spill] sm:$0xff] %v16076_v9  ;;  %v4877_v34 = vpop.f32.mrb[235].mxu1  ;;  %v7023_v26 = vld [vmem:[%s17662_s3 + $0xf0] sm:$0xff]  ;;  %v14327_v14 = vld [vmem:[#allocation5 + $0x640] ss:$24 sps:$4 sm:$0xff]   ;;  %7092 = vperm.xlu1 %13628, %v7006_v59  }
 0x576   : > { %6136 = vmatprep.mubr.bf16.mxu0 %v14325_v37  ;;  %7177 = vperm.xlu0 %13627, %v7023_v26   ;;  %v7024_v34 = vld [vmem:[%s17662_s3 + $0xf8] sm:$0xff]  ;;  %v7007_v9 = vld [vmem:[%s17662_s3 + $0x70] sm:$0xff] }
 0x578   : > { %v5922_v40 = vpop.f32.mrb[24].mxu0 }
 0x579   : > { %v5924_v28 = vpop.f32.mrb[25].mxu0  ;;  %v6653_v37 = vmax.f32 %v5922_v40, 0.0  ;;  %7182 = vperm.xlu1 %13628, %v7024_v34  }
 0x57a   : > { %v5925_v19 = vpop.f32.mrb[26].mxu0  ;;  %v16092_v28 = vpop.f32.mrb[236].mxu1  ;;  %7097 = vperm.xlu0 %13627, %v7007_v9  }
 0x57b   : > { %v6654_v2 = vmax.f32 %v5925_v19, 0.0  ;;  %v5927_v13 = vpop.f32.mrb[27].mxu0  ;;  %17777 = vst [vmem:[#allocation97_spill] sm:$0xff] %v16092_v28  ;;  %v4882_v59 = vpop.f32.mrb[237].mxu1  ;;  %v14343_v28 = vld [vmem:[#allocation5 + $0x6d4] ss:$24 sps:$4 sm:$0xff]  }
 0x57c   : > { %v16094_v40 = vpop.f32.mrb[238].mxu1  ;;  %v7008_v13 = vld [vmem:[%s17662_s3 + $0x78] sm:$0xff] }
 0x57d   : > { %v16090_v38 = vpack.c.bf16 %v6654_v2, %v6653_v37  ;;  %6137 = vmatmul.mubr.bf16.gmra.mrb[132].mxu0 %v14327_v14  ;;  %17778 = vst [vmem:[#allocation98_spill] sm:$0xff] %v16094_v40  ;;  %v4885_v26 = vpop.f32.mrb[239].mxu1  ;;  %7102 = vperm.xlu1 %13628, %v7008_v13   ;;  %v11737_v14 = vld [vmem:[%s17662_s3 + $0x180] sm:$0xff]  ;;  %v11738_v13 = vld [vmem:[%s17662_s3 + $0x188] sm:$0xff] }
 0x57e   : > { %6144 = vmatprep.mubr.bf16.mxu0 %v14331_v54  ;;  %v14337_v2 = vld [vmem:[#allocation5 + $0x6a4] ss:$24 sps:$4 sm:$0xff]   ;;  %8369 = vperm.xlu0 %13627, %v11737_v14   ;;  %v16104_v26 = vpop.f32.mrb[240].mxu1 }
 0x57f   : > { %17779 = vst [vmem:[#allocation99_spill] sm:$0xff] %v16104_v26  ;;  %v4890_v40 = vpop.f32.mrb[241].mxu1 }
 0x580   : > { %v5930_v19 = vpop.f32.mrb[28].mxu0  ;;  %v16112_v14 = vpop.f32.mrb[242].mxu1 }
 0x581   : > { %v5932_v3 = vpop.f32.mrb[29].mxu0  ;;  %v6655_v54 = vmax.f32 %v5930_v19, 0.0  ;;  %17780 = vst [vmem:[#allocation100_spill] sm:$0xff] %v16112_v14  ;;  %8374 = vperm.xlu1 %13628, %v11738_v13   ;;  %v11740_v14 = vld [vmem:[%s17662_s3 + $0x198] sm:$0xff] }
 0x582   : > { %v5933_v37 = vpop.f32.mrb[30].mxu0  ;;  %v11721_v3 = vld [vmem:[%s17662_s3 + $0x100] sm:$0xff] }
 0x583   : > { %v6656_v9 = vmax.f32 %v5933_v37, 0.0  ;;  %v5935_v34 = vpop.f32.mrb[31].mxu0  ;;  %8289 = vperm.xlu0 %13627, %v11721_v3   ;;  %v4893_v37 = vpop.f32.mrb[243].mxu1 }
 0x584   : > { %v11722_v34 = vld [vmem:[%s17662_s3 + $0x108] sm:$0xff]  ;;  %v16120_v37 = vpop.f32.mrb[244].mxu1 }
 0x585   : > { %v16102_v59 = vpack.c.bf16 %v6656_v9, %v6655_v54  ;;  %6145 = vmatmul.mubr.bf16.gmra.mrb[136].mxu0 %v14333_v56  ;;  %v14339_v56 = vld [vmem:[#allocation5 + $0x6a0] ss:$24 sps:$4 sm:$0xff]   ;;  %v11739_v9 = vld [vmem:[%s17662_s3 + $0x190] sm:$0xff]  ;;  %8294 = vperm.xlu1 %13628, %v11722_v34   ;;  %17781 = vst [vmem:[#allocation101_spill] sm:$0xff] %v16120_v37  ;;  %v4898_v21 = vpop.f32.mrb[245].mxu1 }
 0x586   : > { %6152 = vmatprep.mubr.bf16.mxu0 %v14337_v2  ;;  %v14345_v34 = vld [vmem:[#allocation5 + $0x6d0] ss:$24 sps:$4 sm:$0xff]  }
 0x587   : > { %8379 = vperm.xlu0 %13627, %v11739_v9   ;;  %v7905_v37 = vld [vmem:[%s17664_s5 + $0x70] sm:$0xff] }
 0x588   : > { %v5938_v19 = vpop.f32.mrb[32].mxu0 }
 0x589   : > { %v5940_v54 = vpop.f32.mrb[33].mxu0  ;;  %v6657_v40 = vmax.f32 %v5938_v19, 0.0  ;;  %v16128_v19 = vpop.f32.mrb[246].mxu1  ;;  %8384 = vperm.xlu1 %13628, %v11740_v14  }
 0x58a   : > { %v5941_v26 = vpop.f32.mrb[34].mxu0  ;;  %v11723_v54 = vld [vmem:[%s17662_s3 + $0x110] sm:$0xff]  ;;  %17782 = vst [vmem:[#allocation102_spill] sm:$0xff] %v16128_v19 }
 0x58b   : > { %v6658_v2 = vmax.f32 %v5941_v26, 0.0  ;;  %v5943_v3 = vpop.f32.mrb[35].mxu0  ;;  %8299 = vperm.xlu0 %13627, %v11723_v54  }
 0x58d   : > { %6153 = vmatmul.mubr.bf16.gmra.mrb[140].mxu0 %v14339_v56  ;;  %v6841_v13 = vpack.c.bf16 %v6658_v2, %v6657_v40  ;;  %v4901_v56 = vpop.f32.mrb[247].mxu1  ;;  %v11741_v40 = vld [vmem:[%s17662_s3 + $0x1a0] sm:$0xff] }
 0x58e   : > { %6160 = vmatprep.mubr.bf16.mxu0 %v14343_v28  ;;  %v11724_v28 = vld [vmem:[%s17662_s3 + $0x118] sm:$0xff]  ;;  %v16137_v54 = vpop.f32.mrb[248].mxu1  ;;  %v11725_v56 = vld [vmem:[%s17662_s3 + $0x120] sm:$0xff] }
 0x58f   : > { %11981 = vmatprep.subr.bf16.mxu1 %v6841_v13  ;;  %v14351_v2 = vld [vmem:[#allocation5 + $0x704] ss:$24 sps:$4 sm:$0xff]   ;;  %8389 = vperm.xlu0 %13627, %v11741_v40   ;;  %17783 = vst [vmem:[#allocation103_spill] sm:$0xff] %v16137_v54  ;;  %v4906_v19 = vpop.f32.mrb[249].mxu1  ;;  %v14418_v54 = vld [vmem:[#allocation5 + $0x940] ss:$24 sps:$4 sm:$0xff]  }
 0x590   : > { %v5946_v26 = vpop.f32.mrb[36].mxu0  ;;  %11982 = vmatpush3.bf16.msra.mxu1 %v15982_v1  ;;  %8304 = vperm.xlu1 %13628, %v11724_v28  }
 0x591   : > { %v5948_v9 = vpop.f32.mrb[37].mxu0  ;;  %v6659_v3 = vmax.f32 %v5946_v26, 0.0  ;;  %v16145_v26 = vpop.f32.mrb[250].mxu1 }
 0x592   : > { %v5949_v21 = vpop.f32.mrb[38].mxu0  ;;  %v11742_v9 = vld [vmem:[%s17662_s3 + $0x1a8] sm:$0xff]  ;;  %17784 = vst [vmem:[#allocation104_spill] sm:$0xff] %v16145_v26 }
 0x593   : > { %v6660_v13 = vmax.f32 %v5949_v21, 0.0  ;;  %v5951_v14 = vpop.f32.mrb[39].mxu0  ;;  %8309 = vperm.xlu0 %13627, %v11725_v56   ;;  %v14349_v21 = vld [vmem:[#allocation5 + $0x700] ss:$24 sps:$4 sm:$0xff]  }
 0x594   : > { %8394 = vperm.xlu1 %13628, %v11742_v9  }
 0x595   : > { %6161 = vmatmul.mubr.bf16.gmra.mrb[144].mxu0 %v14345_v34  ;;  %v6842_v1 = vpack.c.bf16 %v6660_v13, %v6659_v3  ;;  %v4909_v34 = vpop.f32.mrb[251].mxu1  ;;  %v11743_v3 = vld [vmem:[%s17662_s3 + $0x1b0] sm:$0xff] }
 0x596   : > { %6168 = vmatprep.mubr.bf16.mxu0 %v14351_v2  ;;  %v11726_v2 = vld [vmem:[%s17662_s3 + $0x128] sm:$0xff]  ;;  %v16154_v9 = vpop.f32.mrb[252].mxu1  ;;  %v11727_v34 = vld [vmem:[%s17662_s3 + $0x130] sm:$0xff] }
 0x597   : > { %11983 = vmatprep.subr.bf16.mxu1 %v6842_v1  ;;  %v14357_v13 = vld [vmem:[#allocation5 + $0x734] ss:$24 sps:$4 sm:$0xff]   ;;  %8399 = vperm.xlu0 %13627, %v11743_v3   ;;  %17785 = vst [vmem:[#allocation105_spill] sm:$0xff] %v16154_v9  ;;  %v4914_v26 = vpop.f32.mrb[253].mxu1 }
 0x598   : > { %v5954_v40 = vpop.f32.mrb[40].mxu0  ;;  %11984 = vmatpush3.bf16.msra.mxu1 %v16000_v50  ;;  %8314 = vperm.xlu1 %13628, %v11726_v2  }
 0x599   : > { %v5956_v28 = vpop.f32.mrb[41].mxu0  ;;  %v6661_v14 = vmax.f32 %v5954_v40, 0.0  ;;  %v16162_v40 = vpop.f32.mrb[254].mxu1 }
 0x59a   : > { %v5957_v19 = vpop.f32.mrb[42].mxu0  ;;  %v11744_v28 = vld [vmem:[%s17662_s3 + $0x1b8] sm:$0xff]  ;;  %17786 = vst [vmem:[#allocation106_spill] sm:$0xff] %v16162_v40 }
 0x59b   : > { %v6662_v1 = vmax.f32 %v5957_v19, 0.0  ;;  %v5959_v56 = vpop.f32.mrb[43].mxu0  ;;  %8319 = vperm.xlu0 %13627, %v11727_v34   ;;  %v14355_v19 = vld [vmem:[#allocation5 + $0x730] ss:$24 sps:$4 sm:$0xff]  }
 0x59c   : > { %8404 = vperm.xlu1 %13628, %v11744_v28  }
 0x59d   : > { %6169 = vmatmul.mubr.bf16.gmra.mrb[0].mxu0 %v14349_v21  ;;  %v6843_v50 = vpack.c.bf16 %v6662_v1, %v6661_v14  ;;  %v4917_v21 = vpop.f32.mrb[255].mxu1  ;;  %v11745_v14 = vld [vmem:[%s17662_s3 + $0x1c0] sm:$0xff] }
 0x59e   : > { %6176 = vmatprep.mubr.bf16.mxu0 %v14357_v13  ;;  %v11728_v13 = vld [vmem:[%s17662_s3 + $0x138] sm:$0xff]  ;;  %v16171_v28 = vpop.f32.mrb[148].mxu1  ;;  %v11729_v21 = vld [vmem:[%s17662_s3 + $0x140] sm:$0xff] }
 0x59f   : > { %11985 = vmatprep.subr.bf16.mxu1 %v6843_v50  ;;  %v14363_v1 = vld [vmem:[#allocation5 + $0x764] ss:$24 sps:$4 sm:$0xff]   ;;  %8409 = vperm.xlu0 %13627, %v11745_v14   ;;  %17787 = vst [vmem:[#allocation107_spill] sm:$0xff] %v16171_v28  ;;  %v4922_v40 = vpop.f32.mrb[149].mxu1  ;;  %v14412_v28 = vld [vmem:[#allocation5 + $0x910] ss:$24 sps:$4 sm:$0xff]  }
 0x5a0   : > { %v5962_v3 = vpop.f32.mrb[44].mxu0  ;;  %11986 = vmatpush3.bf16.msra.mxu1 %v16018_v57  ;;  %8324 = vperm.xlu1 %13628, %v11728_v13  }
 0x5a1   : > { %v5964_v2 = vpop.f32.mrb[45].mxu0  ;;  %v6663_v56 = vmax.f32 %v5962_v3, 0.0  ;;  %v16179_v3 = vpop.f32.mrb[150].mxu1 }
 0x5a2   : > { %v5965_v26 = vpop.f32.mrb[46].mxu0  ;;  %v11746_v2 = vld [vmem:[%s17662_s3 + $0x1c8] sm:$0xff]  ;;  %17788 = vst [vmem:[#allocation108_spill] sm:$0xff] %v16179_v3 }
 0x5a3   : > { %v6664_v50 = vmax.f32 %v5965_v26, 0.0  ;;  %v5967_v34 = vpop.f32.mrb[47].mxu0  ;;  %8329 = vperm.xlu0 %13627, %v11729_v21   ;;  %v14361_v26 = vld [vmem:[#allocation5 + $0x760] ss:$24 sps:$4 sm:$0xff]  }
 0x5a4   : > { %8414 = vperm.xlu1 %13628, %v11746_v2  }
 0x5a5   : > { %6177 = vmatmul.mubr.bf16.gmra.mrb[4].mxu0 %v14355_v19  ;;  %v6844_v57 = vpack.c.bf16 %v6664_v50, %v6663_v56  ;;  %v4925_v19 = vpop.f32.mrb[151].mxu1  ;;  %v11747_v56 = vld [vmem:[%s17662_s3 + $0x1d0] sm:$0xff] }
 0x5a6   : > { %6184 = vmatprep.mubr.bf16.mxu0 %v14363_v1  ;;  %v11730_v1 = vld [vmem:[%s17662_s3 + $0x148] sm:$0xff]  ;;  %v16188_v2 = vpop.f32.mrb[152].mxu1  ;;  %v11731_v19 = vld [vmem:[%s17662_s3 + $0x150] sm:$0xff] }
 0x5a7   : > { %11987 = vmatprep.subr.bf16.mxu1 %v6844_v57  ;;  %v14369_v50 = vld [vmem:[#allocation5 + $0x794] ss:$24 sps:$4 sm:$0xff]   ;;  %8419 = vperm.xlu0 %13627, %v11747_v56   ;;  %17789 = vst [vmem:[#allocation109_spill] sm:$0xff] %v16188_v2  ;;  %v4930_v3 = vpop.f32.mrb[153].mxu1 }
 0x5a8   : > { %v5970_v14 = vpop.f32.mrb[48].mxu0  ;;  %11988 = vmatpush3.bf16.msra.mxu1 %v16036_v11  ;;  %8334 = vperm.xlu1 %13628, %v11730_v1  }
 0x5a9   : > { %v5972_v13 = vpop.f32.mrb[49].mxu0  ;;  %v6665_v34 = vmax.f32 %v5970_v14, 0.0  ;;  %v16196_v14 = vpop.f32.mrb[154].mxu1 }
 0x5aa   : > { %v5973_v40 = vpop.f32.mrb[50].mxu0  ;;  %v11748_v13 = vld [vmem:[%s17662_s3 + $0x1d8] sm:$0xff]  ;;  %17790 = vst [vmem:[#allocation110_spill] sm:$0xff] %v16196_v14 }
 0x5ab   : > { %v6666_v57 = vmax.f32 %v5973_v40, 0.0  ;;  %v5975_v21 = vpop.f32.mrb[51].mxu0  ;;  %8339 = vperm.xlu0 %13627, %v11731_v19   ;;  %v14367_v40 = vld [vmem:[#allocation5 + $0x790] ss:$24 sps:$4 sm:$0xff]  }
 0x5ac   : > { %8424 = vperm.xlu1 %13628, %v11748_v13  }
 0x5ad   : > { %6185 = vmatmul.mubr.bf16.gmra.mrb[8].mxu0 %v14361_v26  ;;  %v6845_v11 = vpack.c.bf16 %v6666_v57, %v6665_v34  ;;  %v4933_v26 = vpop.f32.mrb[155].mxu1  ;;  %v11749_v34 = vld [vmem:[%s17662_s3 + $0x1e0] sm:$0xff] }
 0x5ae   : > { %6192 = vmatprep.mubr.bf16.mxu0 %v14369_v50  ;;  %v11732_v50 = vld [vmem:[%s17662_s3 + $0x158] sm:$0xff]  ;;  %v16205_v13 = vpop.f32.mrb[156].mxu1  ;;  %v11733_v26 = vld [vmem:[%s17662_s3 + $0x160] sm:$0xff] }
 0x5af   : > { %11989 = vmatprep.subr.bf16.mxu1 %v6845_v11  ;;  %v14375_v57 = vld [vmem:[#allocation5 + $0x7c4] ss:$24 sps:$4 sm:$0xff]   ;;  %8429 = vperm.xlu0 %13627, %v11749_v34   ;;  %17791 = vst [vmem:[#allocation111_spill] sm:$0xff] %v16205_v13  ;;  %v4938_v14 = vpop.f32.mrb[157].mxu1  ;;  %v7893_v13 = vld [vmem:[%s17664_s5 + $0x10] sm:$0xff] }
 0x5b0   : > { %v5978_v56 = vpop.f32.mrb[52].mxu0  ;;  %11990 = vmatpush3.bf16.msra.mxu1 %v16054_v45  ;;  %8344 = vperm.xlu1 %13628, %v11732_v50  }
 0x5b1   : > { %v5980_v1 = vpop.f32.mrb[53].mxu0  ;;  %v6667_v21 = vmax.f32 %v5978_v56, 0.0  ;;  %v16213_v56 = vpop.f32.mrb[158].mxu1 }
 0x5b2   : > { %v5981_v3 = vpop.f32.mrb[54].mxu0  ;;  %v11750_v1 = vld [vmem:[%s17662_s3 + $0x1e8] sm:$0xff]  ;;  %17792 = vst [vmem:[#allocation112_spill] sm:$0xff] %v16213_v56 }
 0x5b3   : > { %v6668_v11 = vmax.f32 %v5981_v3, 0.0  ;;  %v5983_v19 = vpop.f32.mrb[55].mxu0  ;;  %8349 = vperm.xlu0 %13627, %v11733_v26   ;;  %v14373_v3 = vld [vmem:[#allocation5 + $0x7c0] ss:$24 sps:$4 sm:$0xff]  }
 0x5b4   : > { %8434 = vperm.xlu1 %13628, %v11750_v1  }
 0x5b5   : > { %6193 = vmatmul.mubr.bf16.gmra.mrb[12].mxu0 %v14367_v40  ;;  %v6846_v45 = vpack.c.bf16 %v6668_v11, %v6667_v21  ;;  %v4941_v40 = vpop.f32.mrb[159].mxu1  ;;  %v11751_v21 = vld [vmem:[%s17662_s3 + $0x1f0] sm:$0xff] }
 0x5b6   : > { %6200 = vmatprep.mubr.bf16.mxu0 %v14375_v57  ;;  %v11734_v57 = vld [vmem:[%s17662_s3 + $0x168] sm:$0xff]  ;;  %v16222_v1 = vpop.f32.mrb[160].mxu1  ;;  %v11735_v40 = vld [vmem:[%s17662_s3 + $0x170] sm:$0xff] }
 0x5b7   : > { %11991 = vmatprep.subr.bf16.mxu1 %v6846_v45  ;;  %v14381_v11 = vld [vmem:[#allocation5 + $0x7f4] ss:$24 sps:$4 sm:$0xff]   ;;  %8439 = vperm.xlu0 %13627, %v11751_v21   ;;  %17793 = vst [vmem:[#allocation113_spill] sm:$0xff] %v16222_v1  ;;  %v4946_v56 = vpop.f32.mrb[161].mxu1  ;;  %v14400_v1 = vld [vmem:[#allocation5 + $0x8b0] ss:$24 sps:$4 sm:$0xff]  }
 0x5b8   : > { %v5986_v34 = vpop.f32.mrb[56].mxu0  ;;  %11992 = vmatpush3.bf16.msra.mxu1 %v16072_v47  ;;  %8354 = vperm.xlu1 %13628, %v11734_v57  }
 0x5b9   : > { %v5988_v50 = vpop.f32.mrb[57].mxu0  ;;  %v6669_v19 = vmax.f32 %v5986_v34, 0.0  ;;  %v16230_v34 = vpop.f32.mrb[162].mxu1 }
 0x5ba   : > { %v5989_v14 = vpop.f32.mrb[58].mxu0  ;;  %v11752_v50 = vld [vmem:[%s17662_s3 + $0x1f8] sm:$0xff]  ;;  %17794 = vst [vmem:[#allocation114_spill] sm:$0xff] %v16230_v34 }
 0x5bb   : > { %v6670_v45 = vmax.f32 %v5989_v14, 0.0  ;;  %v5991_v26 = vpop.f32.mrb[59].mxu0  ;;  %8359 = vperm.xlu0 %13627, %v11735_v40   ;;  %v14379_v14 = vld [vmem:[#allocation5 + $0x7f0] ss:$24 sps:$4 sm:$0xff]  }
 0x5bc   : > { %8444 = vperm.xlu1 %13628, %v11752_v50  }
 0x5bd   : > { %6201 = vmatmul.mubr.bf16.gmra.mrb[16].mxu0 %v14373_v3  ;;  %v6847_v47 = vpack.c.bf16 %v6670_v45, %v6669_v19  ;;  %v4949_v3 = vpop.f32.mrb[163].mxu1  ;;  %v11817_v19 = vld [vmem:[%s17664_s5 + $0x80] sm:$0xff] }
 0x5be   : > { %6208 = vmatprep.mubr.bf16.mxu0 %v14381_v11  ;;  %v11736_v11 = vld [vmem:[%s17662_s3 + $0x178] sm:$0xff]  ;;  %v16239_v50 = vpop.f32.mrb[164].mxu1  ;;  %v11819_v3 = vld [vmem:[%s17664_s5 + $0x90] sm:$0xff] }
 0x5bf   : > { %11993 = vmatprep.subr.bf16.mxu1 %v6847_v47  ;;  %v14384_v45 = vld [vmem:[#allocation5 + $0x824] ss:$24 sps:$4 sm:$0xff]   ;;  %9173 = vperm.xlu0 %13627, %v11817_v19   ;;  %17795 = vst [vmem:[#allocation115_spill] sm:$0xff] %v16239_v50  ;;  %v4954_v34 = vpop.f32.mrb[165].mxu1  ;;  %v11822_v50 = vld [vmem:[%s17664_s5 + $0xa8] sm:$0xff] }
 0x5c0   : > { %v5994_v21 = vpop.f32.mrb[60].mxu0  ;;  %11994 = vmatpush3.bf16.msra.mxu1 %v16090_v38  ;;  %8364 = vperm.xlu1 %13628, %v11736_v11   ;;  %v16247_v19 = vpop.f32.mrb[166].mxu1  ;;  %v14393_v11 = vld [vmem:[#allocation7 + $0x24] ss:$16 sps:$4 sm:$0xff]   ;;  %v11820_v34 = vld [vmem:[%s17664_s5 + $0x98] sm:$0xff] }
 0x5c1   : > { %v5996_v57 = vpop.f32.mrb[61].mxu0  ;;  %v6671_v26 = vmax.f32 %v5994_v21, 0.0  ;;  %v14385_v21 = vld [vmem:[#allocation7] ss:$16 sps:$4 sm:$0xff]   ;;  %17796 = vst [vmem:[#allocation116_spill] sm:$0xff] %v16247_v19 }
 0x5c2   : > { %v5997_v56 = vpop.f32.mrb[62].mxu0  ;;  %v11818_v57 = vld [vmem:[%s17664_s5 + $0x88] sm:$0xff] }
 0x5c3   : > { %v6672_v47 = vmax.f32 %v5997_v56, 0.0  ;;  %v5999_v40 = vpop.f32.mrb[63].mxu0  ;;  %9183 = vperm.xlu0 %13627, %v11819_v3   ;;  %v4957_v56 = vpop.f32.mrb[167].mxu1 }
 0x5c4   : > { %9178 = vperm.xlu1 %13628, %v11818_v57   ;;  %v11821_v40 = vld [vmem:[%s17664_s5 + $0xa0] sm:$0xff]  ;;  %v16258_v56 = vpop.f32.mrb[168].mxu1 }
 0x5c5   : > { %6209 = vmatmul.mubr.bf16.gmra.mrb[20].mxu0 %v14379_v14  ;;  %v6848_v38 = vpack.c.bf16 %v6672_v47, %v6671_v26  ;;  %v14382_v47 = vld [vmem:[#allocation5 + $0x820] ss:$24 sps:$4 sm:$0xff]   ;;  %17797 = vst [vmem:[#allocation117_spill] sm:$0xff] %v16258_v56  ;;  %v11826_v56 = vld [vmem:[%s17664_s5 + $0xc8] sm:$0xff] }
 0x5c6   : > { %6216 = vmatprep.mubr.bf16.mxu0 %v14384_v45 }
 0x5c7   : > { %11995 = vmatprep.subr.bf16.mxu1 %v6848_v38  ;;  %v14390_v38 = vld [vmem:[#allocation5 + $0x854] ss:$24 sps:$4 sm:$0xff]   ;;  %9193 = vperm.xlu0 %13627, %v11821_v40  }
 0x5c8   : > { %v6002_v14 = vpop.f32.mrb[64].mxu0  ;;  %11996 = vmatpush3.bf16.msra.mxu1 %v16102_v59  ;;  %9188 = vperm.xlu1 %13628, %v11820_v34   ;;  %v14399_v40 = vld [vmem:[#allocation7 + $0x44] ss:$16 sps:$4 sm:$0xff]  }
 0x5c9   : > { %v6004_v26 = vpop.f32.mrb[65].mxu0  ;;  %v6673_v3 = vmax.f32 %v6002_v14, 0.0  ;;  %v4962_v14 = vpop.f32.mrb[169].mxu1 }
 0x5ca   : > { %v6005_v45 = vpop.f32.mrb[66].mxu0  ;;  %v11823_v26 = vld [vmem:[%s17664_s5 + $0xb0] sm:$0xff]  ;;  %v14396_v14 = vld [vmem:[#allocation5 + $0x884] ss:$24 sps:$4 sm:$0xff]  }
 0x5cb   : > { %v6674_v57 = vmax.f32 %v6005_v45, 0.0  ;;  %v6007_v19 = vpop.f32.mrb[67].mxu0  ;;  %7538 = vmatmul.mubr.bf16.vlgmr.msra.gmra.mrb[0].mxu1 %v14385_v21  ;;  %9203 = vperm.xlu0 %13627, %v11823_v26   ;;  %v16266_v21 = vpop.f32.mrb[170].mxu1 }
 0x5cc   : > { %7545 = vmatprep.mubr.bf16.mxu1 %v14393_v11  ;;  %v14391_v19 = vld [vmem:[#allocation7 + $0x20] ss:$16 sps:$4 sm:$0xff]   ;;  %17798 = vst [vmem:[#allocation118_spill] sm:$0xff] %v16266_v21  ;;  %9198 = vperm.xlu1 %13628, %v11822_v50  }
 0x5cd   : > { %v16256_v59 = vpack.c.bf16 %v6674_v57, %v6673_v3  ;;  %6217 = vmatmul.mubr.bf16.gmra.mrb[24].mxu0 %v14382_v47  ;;  %v4965_v47 = vpop.f32.mrb[171].mxu1  ;;  %v14388_v3 = vld [vmem:[#allocation5 + $0x850] ss:$24 sps:$4 sm:$0xff]   ;;  %v11825_v57 = vld [vmem:[%s17664_s5 + $0xc0] sm:$0xff] }
 0x5ce   : > { %6224 = vmatprep.mubr.bf16.mxu0 %v14390_v38  ;;  %v11824_v38 = vld [vmem:[%s17664_s5 + $0xb8] sm:$0xff]  ;;  %v16276_v47 = vpop.f32.mrb[172].mxu1 }
 0x5cf   : > { %9213 = vperm.xlu0 %13627, %v11825_v57   ;;  %17799 = vst [vmem:[#allocation119_spill] sm:$0xff] %v16276_v47  ;;  %v4970_v57 = vpop.f32.mrb[173].mxu1  ;;  %v14394_v47 = vld [vmem:[#allocation5 + $0x880] ss:$24 sps:$4 sm:$0xff]  }
 0x5d0   : > { %v6010_v11 = vpop.f32.mrb[68].mxu0  ;;  %9208 = vperm.xlu1 %13628, %v11824_v38  }
 0x5d1   : > { %v12964_v34 = vadd.f32 %v6010_v11, %v15526_v29  ;;  %v6012_v45 = vpop.f32.mrb[69].mxu0 }
 0x5d2   : > { %v6013_v26 = vpop.f32.mrb[70].mxu0  ;;  %v11827_v45 = vld [vmem:[%s17664_s5 + $0xd0] sm:$0xff] }
 0x5d3   : > { %v12965_v50 = vadd.f32 %v6013_v26, %v15528_v33  ;;  %v6015_v21 = vpop.f32.mrb[71].mxu0  ;;  %7546 = vmatmul.mubr.bf16.gmra.mrb[4].mxu1 %v14391_v19  ;;  %v6675_v29 = vmax.f32 %v12964_v34, 0.0  ;;  %9223 = vperm.xlu0 %13627, %v11827_v45   ;;  %v14397_v19 = vld [vmem:[#allocation7 + $0x40] ss:$16 sps:$4 sm:$0xff]   ;;  %v14402_v45 = vld [vmem:[#allocation5 + $0x8b4] ss:$24 sps:$4 sm:$0xff]  }
 0x5d4   : > { %7553 = vmatprep.mubr.bf16.mxu1 %v14399_v40  ;;  %v16286_v21 = vpop.f32.mrb[174].mxu1  ;;  %v16288_v40 = vpop.permute.xlu0 %7107  ;;  %9218 = vperm.xlu1 %13628, %v11826_v56  }
 0x5d5   : > { %v6676_v11 = vmax.f32 %v12965_v50, 0.0  ;;  %6225 = vmatmul.mubr.bf16.gmra.mrb[28].mxu0 %v14388_v3  ;;  %17800 = vst [vmem:[#allocation120_spill] sm:$0xff] %v16286_v21  ;;  %17801 = vst [vmem:[#allocation121_spill] sm:$0xff] %v16288_v40  ;;  %v14405_v3 = vld [vmem:[#allocation7 + $0x64] ss:$16 sps:$4 sm:$0xff]   ;;  %v4973_v38 = vpop.f32.mrb[175].mxu1 }
 0x5d6   : > { %6232 = vmatprep.mubr.bf16.mxu0 %v14396_v14  ;;  %v11829_v14 = vld [vmem:[%s17664_s5 + $0xe0] sm:$0xff]  ;;  %v16298_v38 = vpop.f32.mrb[176].mxu1  ;;  %v11831_v21 = vld [vmem:[%s17664_s5 + $0xf0] sm:$0xff] }
 0x5d7   : > { %v16284_v33 = vpack.c.bf16 %v6676_v11, %v6675_v29  ;;  %v11828_v29 = vld [vmem:[%s17664_s5 + $0xd8] sm:$0xff]  ;;  %9233 = vperm.xlu0 %13627, %v11829_v14   ;;  %17802 = vst [vmem:[#allocation122_spill] sm:$0xff] %v16298_v38  ;;  %v11830_v14 = vld [vmem:[%s17664_s5 + $0xe8] sm:$0xff] }
 0x5d8   : > { %v6018_v34 = vpop.f32.mrb[72].mxu0  ;;  %9228 = vperm.xlu1 %13628, %v11828_v29  }
 0x5d9   : > { %v12966_v26 = vadd.f32 %v6018_v34, %v15530_v36  ;;  %v6020_v50 = vpop.f32.mrb[73].mxu0 }
 0x5da   : > { %v6021_v11 = vpop.f32.mrb[74].mxu0  ;;  %v16300_v50 = vpop.permute.xlu0 %7112 }
 0x5db   : > { %v12967_v56 = vadd.f32 %v6021_v11, %v15532_v39  ;;  %v6023_v57 = vpop.f32.mrb[75].mxu0  ;;  %7554 = vmatmul.mubr.bf16.gmra.mrb[8].mxu1 %v14397_v19  ;;  %v6677_v36 = vmax.f32 %v12966_v26, 0.0  ;;  %17803 = vst [vmem:[#allocation123_spill] sm:$0xff] %v16300_v50  ;;  %v4978_v39 = vpop.f32.mrb[177].mxu1  ;;  %9243 = vperm.xlu0 %13627, %v11831_v21   ;;  %v14411_v11 = vld [vmem:[#allocation7 + $0x84] ss:$16 sps:$4 sm:$0xff]  }
 0x5dc   : > { %7561 = vmatprep.mubr.bf16.mxu1 %v14405_v3  ;;  %v14403_v3 = vld [vmem:[#allocation7 + $0x60] ss:$16 sps:$4 sm:$0xff]   ;;  %v16310_v26 = vpop.f32.mrb[178].mxu1  ;;  %9238 = vperm.xlu1 %13628, %v11830_v14   ;;  %v11832_v21 = vld [vmem:[%s17664_s5 + $0xf8] sm:$0xff] }
 0x5dd   : > { %v6678_v34 = vmax.f32 %v12967_v56, 0.0  ;;  %6233 = vmatmul.mubr.bf16.gmra.mrb[32].mxu0 %v14394_v47  ;;  %17804 = vst [vmem:[#allocation124_spill] sm:$0xff] %v16310_v26  ;;  %v16312_v47 = vpop.permute.xlu1 %7027  ;;  %v4981_v56 = vpop.f32.mrb[179].mxu1 }
 0x5de   : > { %6240 = vmatprep.mubr.bf16.mxu0 %v14402_v45  ;;  %v7891_v45 = vld [vmem:[%s17664_s5] sm:$0xff]  ;;  %v16322_v56 = vpop.permute.xlu0 %7117 }
 0x5df   : > { %v16308_v19 = vpack.c.bf16 %v6678_v34, %v6677_v36  ;;  %v14408_v34 = vld [vmem:[#allocation5 + $0x8e4] ss:$24 sps:$4 sm:$0xff]   ;;  %7909 = vperm.xlu0 %13627, %v7891_v45   ;;  %17805 = vst [vmem:[#allocation125_spill] sm:$0xff] %v16322_v56  ;;  %v14436_v56 = vld [vmem:[#allocation5 + $0x9d0] ss:$24 sps:$4 sm:$0xff]  }
 0x5e0   : > { %v6026_v29 = vpop.f32.mrb[76].mxu0  ;;  %9248 = vperm.xlu1 %13628, %v11832_v21   ;;  %v14417_v21 = vld [vmem:[#allocation7 + $0xa4] ss:$16 sps:$4 sm:$0xff]  }
 0x5e1   : > { %v12968_v57 = vadd.f32 %v6026_v29, %v15534_v43  ;;  %v6028_v38 = vpop.f32.mrb[77].mxu0  ;;  %v16324_v29 = vpop.f32.mrb[180].mxu1 }
 0x5e2   : > { %v6029_v36 = vpop.f32.mrb[78].mxu0  ;;  %17806 = vst [vmem:[#allocation126_spill] sm:$0xff] %v16324_v29  ;;  %v16326_v26 = vpop.permute.xlu1 %7032  ;;  %v14406_v29 = vld [vmem:[#allocation5 + $0x8e0] ss:$24 sps:$4 sm:$0xff]  }
 0x5e3   : > { %v12969_v14 = vadd.f32 %v6029_v36, %v15536_v46  ;;  %v6031_v39 = vpop.f32.mrb[79].mxu0  ;;  %7562 = vmatmul.mubr.bf16.gmra.mrb[12].mxu1 %v14403_v3  ;;  %v6679_v43 = vmax.f32 %v12968_v57, 0.0  ;;  %v7892_v46 = vld [vmem:[%s17664_s5 + $0x8] sm:$0xff]  ;;  %v4986_v3 = vpop.f32.mrb[181].mxu1  ;;  %7919 = vperm.xlu0 %13627, %v7893_v13   ;;  %v7894_v13 = vld [vmem:[%s17664_s5 + $0x18] sm:$0xff] }
 0x5e4   : > { %7569 = vmatprep.mubr.bf16.mxu1 %v14411_v11  ;;  %v14409_v11 = vld [vmem:[#allocation7 + $0x80] ss:$16 sps:$4 sm:$0xff]   ;;  %v16336_v57 = vpop.f32.mrb[182].mxu1  ;;  %7914 = vperm.xlu1 %13628, %v7892_v46   ;;  %v16339_v2 = vpop.permute.xlu0 %7037 }
 0x5e5   : > { %v6680_v38 = vmax.f32 %v12969_v14, 0.0  ;;  %6241 = vmatmul.mubr.bf16.gmra.mrb[36].mxu0 %v14400_v1  ;;  %17807 = vst [vmem:[#allocation127_spill] sm:$0xff] %v16336_v57  ;;  %v4989_v36 = vpop.f32.mrb[183].mxu1  ;;  %v7897_v57 = vld [vmem:[%s17664_s5 + $0x30] sm:$0xff] }
 0x5e6   : > { %6248 = vmatprep.mubr.bf16.mxu0 %v14408_v34  ;;  %v7895_v34 = vld [vmem:[%s17664_s5 + $0x20] sm:$0xff] }
 0x5e7   : > { %v16334_v45 = vpack.c.bf16 %v6680_v38, %v6679_v43  ;;  %v14414_v38 = vld [vmem:[#allocation5 + $0x914] ss:$24 sps:$4 sm:$0xff]   ;;  %7929 = vperm.xlu0 %13627, %v7895_v34  }
 0x5e8   : > { %v6034_v1 = vpop.f32.mrb[80].mxu0  ;;  %7924 = vperm.xlu1 %13628, %v7894_v13   ;;  %v7896_v34 = vld [vmem:[%s17664_s5 + $0x28] sm:$0xff]  ;;  %v14415_v13 = vld [vmem:[#allocation7 + $0xa0] ss:$16 sps:$4 sm:$0xff]  }
 0x5e9   : > { %v12970_v14 = vadd.f32 %v6034_v1, %v15538_v49  ;;  %v6036_v39 = vpop.f32.mrb[81].mxu0  ;;  %v16348_v49 = vpop.permute.xlu1 %7122 }
 0x5ea   : > { %v6037_v43 = vpop.f32.mrb[82].mxu0  ;;  %17808 = vst [vmem:[#allocation128_spill] sm:$0xff] %v16348_v49  ;;  %v16350_v39 = vpop.f32.mrb[184].mxu1 }
 0x5eb   : > { %v12971_v46 = vadd.f32 %v6037_v43, %v15540_v51  ;;  %v6039_v3 = vpop.f32.mrb[83].mxu0  ;;  %7570 = vmatmul.mubr.bf16.gmra.mrb[16].mxu1 %v14409_v11  ;;  %v6681_v1 = vmax.f32 %v12970_v14, 0.0  ;;  %17809 = vst [vmem:[#allocation129_spill] sm:$0xff] %v16350_v39  ;;  %v4994_v51 = vpop.f32.mrb[185].mxu1  ;;  %7939 = vperm.xlu0 %13627, %v7897_v57   ;;  %v14423_v43 = vld [vmem:[#allocation7 + $0xc4] ss:$16 sps:$4 sm:$0xff]  }
 0x5ec   : > { %7577 = vmatprep.mubr.bf16.mxu1 %v14417_v21  ;;  %v16360_v21 = vpop.f32.mrb[186].mxu1  ;;  %v16362_v14 = vpop.permute.xlu0 %7127  ;;  %7934 = vperm.xlu1 %13628, %v7896_v34   ;;  %v7899_v57 = vld [vmem:[%s17664_s5 + $0x40] sm:$0xff] }
 0x5ed   : > { %v6682_v36 = vmax.f32 %v12971_v46, 0.0  ;;  %6249 = vmatmul.mubr.bf16.gmra.mrb[40].mxu0 %v14406_v29  ;;  %17810 = vst [vmem:[#allocation130_spill] sm:$0xff] %v16360_v21  ;;  %17811 = vst [vmem:[#allocation131_spill] sm:$0xff] %v16362_v14  ;;  %v4997_v46 = vpop.f32.mrb[187].mxu1  ;;  %v16365_v9 = vpop.permute.xlu1 %7042  ;;  %v7901_v21 = vld [vmem:[%s17664_s5 + $0x50] sm:$0xff] }
 0x5ee   : > { %6256 = vmatprep.mubr.bf16.mxu0 %v14414_v38  ;;  %v7898_v38 = vld [vmem:[%s17664_s5 + $0x38] sm:$0xff] }
 0x5ef   : > { %v16358_v11 = vpack.c.bf16 %v6682_v36, %v6681_v1  ;;  %v14420_v36 = vld [vmem:[#allocation5 + $0x944] ss:$24 sps:$4 sm:$0xff]   ;;  %7949 = vperm.xlu0 %13627, %v7899_v57   ;;  %v7900_v57 = vld [vmem:[%s17664_s5 + $0x48] sm:$0xff] }
 0x5f0   : > { %v6042_v29 = vpop.f32.mrb[84].mxu0  ;;  %7944 = vperm.xlu1 %13628, %v7898_v38   ;;  %v16376_v46 = vpop.permute.xlu0 %7047 }
 0x5f1   : > { %v12972_v3 = vadd.f32 %v6042_v29, %v15542_v55  ;;  %v6044_v39 = vpop.f32.mrb[85].mxu0  ;;  %v16374_v29 = vpop.f32.mrb[188].mxu1 }
 0x5f2   : > { %v6045_v1 = vpop.f32.mrb[86].mxu0  ;;  %17812 = vst [vmem:[#allocation132_spill] sm:$0xff] %v16374_v29 }
 0x5f3   : > { %v12973_v34 = vadd.f32 %v6045_v1, %v15544_v58  ;;  %v6047_v51 = vpop.f32.mrb[87].mxu0  ;;  %7578 = vmatmul.mubr.bf16.gmra.mrb[20].mxu1 %v14415_v13  ;;  %v6683_v55 = vmax.f32 %v12972_v3, 0.0  ;;  %v5002_v58 = vpop.f32.mrb[189].mxu1  ;;  %7959 = vperm.xlu0 %13627, %v7901_v21   ;;  %v14429_v1 = vld [vmem:[#allocation7 + $0xe4] ss:$16 sps:$4 sm:$0xff]   ;;  %v7902_v21 = vld [vmem:[%s17664_s5 + $0x58] sm:$0xff] }
 0x5f4   : > { %7585 = vmatprep.mubr.bf16.mxu1 %v14423_v43  ;;  %v14421_v43 = vld [vmem:[#allocation7 + $0xc0] ss:$16 sps:$4 sm:$0xff]   ;;  %v16386_v3 = vpop.f32.mrb[190].mxu1  ;;  %7954 = vperm.xlu1 %13628, %v7900_v57  }
 0x5f5   : > { %v6684_v39 = vmax.f32 %v12973_v34, 0.0  ;;  %6257 = vmatmul.mubr.bf16.gmra.mrb[44].mxu0 %v14412_v28  ;;  %17813 = vst [vmem:[#allocation133_spill] sm:$0xff] %v16386_v3  ;;  %v16388_v28 = vpop.permute.xlu1 %7132  ;;  %v5005_v34 = vpop.f32.mrb[191].mxu1 }
 0x5f6   : > { %6264 = vmatprep.mubr.bf16.mxu0 %v14420_v36  ;;  %17814 = vst [vmem:[#allocation134_spill] sm:$0xff] %v16388_v28  ;;  %v7903_v36 = vld [vmem:[%s17664_s5 + $0x60] sm:$0xff]  ;;  %v16398_v34 = vpop.permute.xlu0 %7137 }
 0x5f7   : > { %v16384_v13 = vpack.c.bf16 %v6684_v39, %v6683_v55  ;;  %v14426_v39 = vld [vmem:[#allocation5 + $0x974] ss:$24 sps:$4 sm:$0xff]   ;;  %7969 = vperm.xlu0 %13627, %v7903_v36   ;;  %17815 = vst [vmem:[#allocation135_spill] sm:$0xff] %v16398_v34  ;;  %v14430_v28 = vld [vmem:[#allocation5 + $0x9a0] ss:$24 sps:$4 sm:$0xff]  }
 0x5f8   : > { %v6050_v38 = vpop.f32.mrb[88].mxu0  ;;  %7964 = vperm.xlu1 %13628, %v7902_v21   ;;  %v14435_v21 = vld [vmem:[#allocation7 + $0x104] ss:$16 sps:$4 sm:$0xff]  }
 0x5f9   : > { %v12974_v51 = vadd.f32 %v6050_v38, %v15546_v61  ;;  %v6052_v29 = vpop.f32.mrb[89].mxu0  ;;  %v16400_v38 = vpop.f32.mrb[192].mxu1 }
 0x5fa   : > { %v6053_v55 = vpop.f32.mrb[90].mxu0  ;;  %17816 = vst [vmem:[#allocation136_spill] sm:$0xff] %v16400_v38  ;;  %v16402_v3 = vpop.permute.xlu1 %7052  ;;  %v14424_v38 = vld [vmem:[#allocation5 + $0x970] ss:$24 sps:$4 sm:$0xff]  }
 0x5fb   : > { %v12975_v57 = vadd.f32 %v6053_v55, %v15548_v63  ;;  %v6055_v58 = vpop.f32.mrb[91].mxu0  ;;  %7586 = vmatmul.mubr.bf16.gmra.mrb[24].mxu1 %v14421_v43  ;;  %v6685_v61 = vmax.f32 %v12974_v51, 0.0  ;;  %v7904_v63 = vld [vmem:[%s17664_s5 + $0x68] sm:$0xff]  ;;  %v5010_v43 = vpop.f32.mrb[193].mxu1  ;;  %7979 = vperm.xlu0 %13627, %v7905_v37   ;;  %v7906_v37 = vld [vmem:[%s17664_s5 + $0x78] sm:$0xff] }
 0x5fc   : > { %7593 = vmatprep.mubr.bf16.mxu1 %v14429_v1  ;;  %v14427_v1 = vld [vmem:[#allocation7 + $0xe0] ss:$16 sps:$4 sm:$0xff]   ;;  %v16412_v51 = vpop.f32.mrb[194].mxu1  ;;  %7974 = vperm.xlu1 %13628, %v7904_v63   ;;  %v16415_v34 = vpop.permute.xlu0 %7057 }
 0x5fd   : > { %v6686_v29 = vmax.f32 %v12975_v57, 0.0  ;;  %6265 = vmatmul.mubr.bf16.gmra.mrb[48].mxu0 %v14418_v54  ;;  %17817 = vst [vmem:[#allocation137_spill] sm:$0xff] %v16412_v51  ;;  %v5013_v55 = vpop.f32.mrb[195].mxu1  ;;  %v11849_v51 = vld [vmem:[%s17662_s3 + $0x200] sm:$0xff] }
 0x5fe   : > { %6272 = vmatprep.mubr.bf16.mxu0 %v14426_v39  ;;  %v11865_v39 = vld [vmem:[%s17662_s3 + $0x280] sm:$0xff] }
 0x5ff   : > { %v16410_v36 = vpack.c.bf16 %v6686_v29, %v6685_v61  ;;  %v14432_v29 = vld [vmem:[#allocation5 + $0x9a4] ss:$24 sps:$4 sm:$0xff]   ;;  %9713 = vperm.xlu0 %13627, %v11865_v39   ;;  %v11866_v39 = vld [vmem:[%s17662_s3 + $0x288] sm:$0xff] }
 0x600   : > { %v6058_v54 = vpop.f32.mrb[92].mxu0  ;;  %7984 = vperm.xlu1 %13628, %v7906_v37   ;;  %v14433_v37 = vld [vmem:[#allocation7 + $0x100] ss:$16 sps:$4 sm:$0xff]  }
 0x601   : > { %v12976_v57 = vadd.f32 %v6058_v54, %v15550_v4  ;;  %v6060_v58 = vpop.f32.mrb[93].mxu0  ;;  %v16424_v4 = vpop.permute.xlu1 %7142 }
 0x602   : > { %v6061_v61 = vpop.f32.mrb[94].mxu0  ;;  %17818 = vst [vmem:[#allocation138_spill] sm:$0xff] %v16424_v4  ;;  %v16426_v58 = vpop.f32.mrb[196].mxu1 }
 0x603   : > { %v12977_v63 = vadd.f32 %v6061_v61, %v15552_v7  ;;  %v6063_v43 = vpop.f32.mrb[95].mxu0  ;;  %7594 = vmatmul.mubr.bf16.gmra.mrb[28].mxu1 %v14427_v1  ;;  %v6687_v54 = vmax.f32 %v12976_v57, 0.0  ;;  %17819 = vst [vmem:[#allocation139_spill] sm:$0xff] %v16426_v58  ;;  %v5018_v7 = vpop.f32.mrb[197].mxu1  ;;  %9633 = vperm.xlu0 %13627, %v11849_v51   ;;  %v14441_v61 = vld [vmem:[#allocation7 + $0x124] ss:$16 sps:$4 sm:$0xff]  }
 0x604   : > { %7601 = vmatprep.mubr.bf16.mxu1 %v14435_v21  ;;  %v16436_v21 = vpop.f32.mrb[198].mxu1  ;;  %v16438_v57 = vpop.permute.xlu0 %7147  ;;  %9718 = vperm.xlu1 %13628, %v11866_v39   ;;  %v17822_v43 = vld [vmem:[#allocation19_spill] sm:$0xff]  ;;  %v11867_v51 = vld [vmem:[%s17662_s3 + $0x290] sm:$0xff]  ;;  %v17823_v39 = vld [vmem:[#allocation20_spill] sm:$0xff] }
 0x605   : > { %v6688_v55 = vmax.f32 %v12977_v63, 0.0  ;;  %6273 = vmatmul.mubr.bf16.gmra.mrb[52].mxu0 %v14424_v38  ;;  %17820 = vst [vmem:[#allocation140_spill] sm:$0xff] %v16436_v21  ;;  %17821 = vst [vmem:[#allocation141_spill] sm:$0xff] %v16438_v57  ;;  %v5021_v63 = vpop.f32.mrb[199].mxu1  ;;  %v16441_v14 = vpop.permute.xlu1 %7062  ;;  %v11851_v21 = vld [vmem:[%s17662_s3 + $0x210] sm:$0xff]  ;;  %v11868_v57 = vld [vmem:[%s17662_s3 + $0x298] sm:$0xff] }
 0x606   : > { %6280 = vmatprep.mubr.bf16.mxu0 %v14432_v29  ;;  %v11850_v29 = vld [vmem:[%s17662_s3 + $0x208] sm:$0xff] }
 0x607   : > { %v16434_v1 = vpack.c.bf16 %v6688_v55, %v6687_v54  ;;  %v14438_v55 = vld [vmem:[#allocation5 + $0x9d4] ss:$24 sps:$4 sm:$0xff]   ;;  %9723 = vperm.xlu0 %13627, %v11867_v51  }
 0x608   : > { %v6066_v38 = vpop.f32.mrb[96].mxu0  ;;  %9638 = vperm.xlu1 %13628, %v11850_v29  }
 0x609   : > { %v12978_v58 = vadd.f32 %v6066_v38, %v17822_v43  ;;  %v6068_v4 = vpop.f32.mrb[97].mxu0  ;;  %v16450_v43 = vpop.f32.mrb[200].mxu1 }
 0x60a   : > { %v6069_v54 = vpop.f32.mrb[98].mxu0  ;;  %17824 = vst [vmem:[#allocation19_spill] sm:$0xff] %v16450_v43  ;;  %v5026_v51 = vpop.f32.mrb[201].mxu1 }
 0x60b   : > { %v12979_v7 = vadd.f32 %v6069_v54, %v17823_v39  ;;  %v6071_v63 = vpop.f32.mrb[99].mxu0  ;;  %7602 = vmatmul.mubr.bf16.gmra.mrb[32].mxu1 %v14433_v37  ;;  %v6689_v4 = vmax.f32 %v12978_v58, 0.0  ;;  %v16458_v54 = vpop.permute.xlu0 %7067  ;;  %9643 = vperm.xlu0 %13627, %v11851_v21   ;;  %v14447_v39 = vld [vmem:[#allocation7 + $0x144] ss:$16 sps:$4 sm:$0xff]   ;;  %v11852_v21 = vld [vmem:[%s17662_s3 + $0x218] sm:$0xff] }
 0x60c   : > { %7609 = vmatprep.mubr.bf16.mxu1 %v14441_v61  ;;  %v14439_v61 = vld [vmem:[#allocation7 + $0x120] ss:$16 sps:$4 sm:$0xff]   ;;  %v16460_v58 = vpop.f32.mrb[202].mxu1  ;;  %9728 = vperm.xlu1 %13628, %v11868_v57   ;;  %v14444_v57 = vld [vmem:[#allocation5 + $0xa04] ss:$24 sps:$4 sm:$0xff]  }
 0x60d   : > { %v6690_v38 = vmax.f32 %v12979_v7, 0.0  ;;  %6281 = vmatmul.mubr.bf16.gmra.mrb[56].mxu0 %v14430_v28  ;;  %17825 = vst [vmem:[#allocation20_spill] sm:$0xff] %v16460_v58  ;;  %v16462_v28 = vpop.permute.xlu1 %7152  ;;  %v5029_v7 = vpop.f32.mrb[203].mxu1  ;;  %v17827_v63 = vld [vmem:[#allocation21_spill] sm:$0xff] }
 0x60e   : > { %6288 = vmatprep.mubr.bf16.mxu0 %v14438_v55  ;;  %17826 = vst [vmem:[#allocation142_spill] sm:$0xff] %v16462_v28  ;;  %v11869_v55 = vld [vmem:[%s17662_s3 + $0x2a0] sm:$0xff]  ;;  %v11871_v28 = vld [vmem:[%s17662_s3 + $0x2b0] sm:$0xff] }
 0x60f   : > { %v6857_v37 = vpack.c.bf16 %v6690_v38, %v6689_v4  ;;  %9733 = vperm.xlu0 %13627, %v11869_v55   ;;  %v17828_v38 = vld [vmem:[#allocation22_spill] sm:$0xff]  ;;  %v11870_v55 = vld [vmem:[%s17662_s3 + $0x2a8] sm:$0xff] }
 0x610   : > { %v6074_v29 = vpop.f32.mrb[100].mxu0  ;;  %9648 = vperm.xlu1 %13628, %v11852_v21   ;;  %v14445_v21 = vld [vmem:[#allocation7 + $0x140] ss:$16 sps:$4 sm:$0xff]  }
 0x611   : > { %v12980_v43 = vadd.f32 %v6074_v29, %v17827_v63  ;;  %v6076_v49 = vpop.f32.mrb[101].mxu0  ;;  %12093 = vmatprep.subr.bf16.mxu1 %v6857_v37  ;;  %v16475_v63 = vpop.f32.mrb[204].mxu1 }
 0x612   : > { %v6077_v4 = vpop.f32.mrb[102].mxu0  ;;  %12094 = vmatpush3.bf16.msra.mxu1 %v16256_v59  ;;  %v16473_v49 = vpop.permute.xlu0 %7157  ;;  %17830 = vst [vmem:[#allocation22_spill] sm:$0xff] %v16475_v63  ;;  %v11853_v59 = vld [vmem:[%s17662_s3 + $0x220] sm:$0xff] }
 0x613   : > { %v12981_v51 = vadd.f32 %v6077_v4, %v17828_v38  ;;  %v6079_v7 = vpop.f32.mrb[103].mxu0  ;;  %7610 = vmatmul.mubr.bf16.gmra.mrb[36].mxu1 %v14439_v61  ;;  %17829 = vst [vmem:[#allocation21_spill] sm:$0xff] %v16473_v49  ;;  %v6691_v37 = vmax.f32 %v12980_v43, 0.0  ;;  %v16477_v58 = vpop.permute.xlu1 %7072  ;;  %9653 = vperm.xlu0 %13627, %v11853_v59   ;;  %v14453_v4 = vld [vmem:[#allocation7 + $0x164] ss:$16 sps:$4 sm:$0xff]  }
 0x614   : > { %7617 = vmatprep.mubr.bf16.mxu1 %v14447_v39  ;;  %v5034_v61 = vpop.f32.mrb[205].mxu1  ;;  %9738 = vperm.xlu1 %13628, %v11870_v55   ;;  %v14442_v49 = vld [vmem:[#allocation5 + $0xa00] ss:$24 sps:$4 sm:$0xff]   ;;  %v17834_v55 = vld [vmem:[#allocation24_spill] sm:$0xff] }
 0x615   : > { %v6692_v29 = vmax.f32 %v12981_v51, 0.0  ;;  %6289 = vmatmul.mubr.bf16.gmra.mrb[60].mxu0 %v14436_v56  ;;  %v16485_v43 = vpop.f32.mrb[206].mxu1  ;;  %v17832_v51 = vld [vmem:[#allocation23_spill] sm:$0xff] }
 0x616   : > { %6296 = vmatprep.mubr.bf16.mxu0 %v14444_v57  ;;  %17831 = vst [vmem:[#allocation143_spill] sm:$0xff] %v16485_v43  ;;  %v5037_v38 = vpop.f32.mrb[207].mxu1  ;;  %v11854_v57 = vld [vmem:[%s17662_s3 + $0x228] sm:$0xff]  ;;  %v16495_v59 = vpop.permute.xlu0 %7077  ;;  %v11873_v43 = vld [vmem:[%s17662_s3 + $0x2c0] sm:$0xff] }
 0x617   : > { %v6858_v39 = vpack.c.bf16 %v6692_v29, %v6691_v37  ;;  %v14450_v29 = vld [vmem:[#allocation5 + $0xa34] ss:$24 sps:$4 sm:$0xff]   ;;  %17833 = vst [vmem:[#allocation23_spill] sm:$0xff] %v16495_v59  ;;  %9743 = vperm.xlu0 %13627, %v11871_v28  }
 0x618   : > { %v6082_v56 = vpop.f32.mrb[104].mxu0  ;;  %9658 = vperm.xlu1 %13628, %v11854_v57  }
 0x619   : > { %v12982_v7 = vadd.f32 %v6082_v56, %v17832_v51  ;;  %v6084_v63 = vpop.f32.mrb[105].mxu0  ;;  %12095 = vmatprep.subr.bf16.mxu1 %v6858_v39  ;;  %v16498_v39 = vpop.permute.xlu1 %7162  ;;  %v11855_v51 = vld [vmem:[%s17662_s3 + $0x230] sm:$0xff] }
 0x61a   : > { %v6085_v37 = vpop.f32.mrb[106].mxu0  ;;  %12096 = vmatpush3.bf16.msra.mxu1 %v16284_v33  ;;  %17835 = vst [vmem:[#allocation24_spill] sm:$0xff] %v16498_v39  ;;  %v11872_v33 = vld [vmem:[%s17662_s3 + $0x2b8] sm:$0xff]  ;;  %v16506_v57 = vpop.permute.xlu0 %7167  ;;  %v11859_v39 = vld [vmem:[%s17662_s3 + $0x250] sm:$0xff] }
 0x61b   : > { %v12983_v61 = vadd.f32 %v6085_v37, %v17834_v55  ;;  %v6087_v63 = vpop.f32.mrb[107].mxu0  ;;  %7618 = vmatmul.mubr.bf16.gmra.mrb[40].mxu1 %v14445_v21  ;;  %v6693_v56 = vmax.f32 %v12982_v7, 0.0  ;;  %9663 = vperm.xlu0 %13627, %v11855_v51   ;;  %v14451_v37 = vld [vmem:[#allocation7 + $0x160] ss:$16 sps:$4 sm:$0xff]   ;;  %v14459_v55 = vld [vmem:[#allocation7 + $0x184] ss:$16 sps:$4 sm:$0xff]  }
 0x61c   : > { %7625 = vmatprep.mubr.bf16.mxu1 %v14453_v4  ;;  %9748 = vperm.xlu1 %13628, %v11872_v33   ;;  %17836 = vst [vmem:[#allocation144_spill] sm:$0xff] %v16506_v57  ;;  %v17837_v4 = vld [vmem:[#allocation25_spill] sm:$0xff]  ;;  %v17839_v51 = vld [vmem:[#allocation26_spill] sm:$0xff] }
 0x61d   : > { %v6694_v38 = vmax.f32 %v12983_v61, 0.0  ;;  %6297 = vmatmul.mubr.bf16.gmra.mrb[64].mxu0 %v14442_v49  ;;  %v14448_v61 = vld [vmem:[#allocation5 + $0xa30] ss:$24 sps:$4 sm:$0xff]   ;;  %v16509_v63 = vpop.permute.xlu1 %7082 }
 0x61e   : > { %6304 = vmatprep.mubr.bf16.mxu0 %v14450_v29  ;;  %17838 = vst [vmem:[#allocation25_spill] sm:$0xff] %v16509_v63  ;;  %v11856_v29 = vld [vmem:[%s17662_s3 + $0x238] sm:$0xff]  ;;  %v11874_v57 = vld [vmem:[%s17662_s3 + $0x2c8] sm:$0xff] }
 0x61f   : > { %v6859_v28 = vpack.c.bf16 %v6694_v38, %v6693_v56  ;;  %v14456_v38 = vld [vmem:[#allocation5 + $0xa64] ss:$24 sps:$4 sm:$0xff]   ;;  %9753 = vperm.xlu0 %13627, %v11873_v43   ;;  %v14562_v63 = vld [vmem:[#allocation5 + $0xdc0] ss:$24 sps:$4 sm:$0xff]  }
 0x620   : > { %v6090_v21 = vpop.f32.mrb[108].mxu0  ;;  %9668 = vperm.xlu1 %13628, %v11856_v29  }
 0x621   : > { %v12984_v7 = vadd.f32 %v6090_v21, %v17837_v4  ;;  %v6092_v49 = vpop.f32.mrb[109].mxu0  ;;  %12097 = vmatprep.subr.bf16.mxu1 %v6859_v28 }
 0x622   : > { %v6093_v56 = vpop.f32.mrb[110].mxu0  ;;  %12098 = vmatpush3.bf16.msra.mxu1 %v16308_v19  ;;  %v11857_v49 = vld [vmem:[%s17662_s3 + $0x240] sm:$0xff]  ;;  %v16525_v19 = vpop.permute.xlu0 %7087 }
 0x623   : > { %v12985_v33 = vadd.f32 %v6093_v56, %v17839_v51  ;;  %v6095_v21 = vpop.f32.mrb[111].mxu0  ;;  %7626 = vmatmul.mubr.bf16.gmra.mrb[44].mxu1 %v14451_v37  ;;  %v6695_v28 = vmax.f32 %v12984_v7, 0.0  ;;  %17840 = vst [vmem:[#allocation26_spill] sm:$0xff] %v16525_v19  ;;  %9673 = vperm.xlu0 %13627, %v11857_v49   ;;  %v14457_v56 = vld [vmem:[#allocation7 + $0x180] ss:$16 sps:$4 sm:$0xff]   ;;  %v16527_v37 = vpop.permute.xlu1 %7172 }
 0x624   : > { %7633 = vmatprep.mubr.bf16.mxu1 %v14459_v55  ;;  %17841 = vst [vmem:[#allocation145_spill] sm:$0xff] %v16527_v37  ;;  %9758 = vperm.xlu1 %13628, %v11874_v57   ;;  %v14465_v7 = vld [vmem:[#allocation7 + $0x1a4] ss:$16 sps:$4 sm:$0xff]   ;;  %v17909_v19 = vld [vmem:[#allocation61_spill] sm:$0xff] }
 0x625   : > { %v6696_v4 = vmax.f32 %v12985_v33, 0.0  ;;  %6305 = vmatmul.mubr.bf16.gmra.mrb[68].mxu0 %v14448_v61  ;;  %v17842_v61 = vld [vmem:[#allocation27_spill] sm:$0xff]  ;;  %v11875_v21 = vld [vmem:[%s17662_s3 + $0x2d0] sm:$0xff]  ;;  %v17843_v57 = vld [vmem:[#allocation28_spill] sm:$0xff] }
 0x626   : > { %6312 = vmatprep.mubr.bf16.mxu0 %v14456_v38  ;;  %v14454_v33 = vld [vmem:[#allocation5 + $0xa60] ss:$24 sps:$4 sm:$0xff]   ;;  %v11858_v38 = vld [vmem:[%s17662_s3 + $0x248] sm:$0xff] }
 0x627   : > { %v6860_v43 = vpack.c.bf16 %v6696_v4, %v6695_v28  ;;  %v14462_v4 = vld [vmem:[#allocation5 + $0xa94] ss:$24 sps:$4 sm:$0xff]   ;;  %9763 = vperm.xlu0 %13627, %v11875_v21  }
 0x628   : > { %v6098_v55 = vpop.f32.mrb[112].mxu0  ;;  %9678 = vperm.xlu1 %13628, %v11858_v38   ;;  %v14471_v21 = vld [vmem:[#allocation7 + $0x1c4] ss:$16 sps:$4 sm:$0xff]  }
 0x629   : > { %v12986_v29 = vadd.f32 %v6098_v55, %v17842_v61  ;;  %v6100_v51 = vpop.f32.mrb[113].mxu0  ;;  %12099 = vmatprep.subr.bf16.mxu1 %v6860_v43  ;;  %v16538_v43 = vpop.permute.xlu0 %7177 }
 0x62a   : > { %v6101_v28 = vpop.f32.mrb[114].mxu0  ;;  %12100 = vmatpush3.bf16.msra.mxu1 %v16334_v45  ;;  %17844 = vst [vmem:[#allocation27_spill] sm:$0xff] %v16538_v43  ;;  %v16540_v51 = vpop.permute.xlu1 %7092  ;;  %v11876_v45 = vld [vmem:[%s17662_s3 + $0x2d8] sm:$0xff]  ;;  %v11861_v43 = vld [vmem:[%s17662_s3 + $0x260] sm:$0xff] }
 0x62b   : > { %v12987_v49 = vadd.f32 %v6101_v28, %v17843_v57  ;;  %v6103_v37 = vpop.f32.mrb[115].mxu0  ;;  %7634 = vmatmul.mubr.bf16.gmra.mrb[48].mxu1 %v14457_v56  ;;  %v6697_v55 = vmax.f32 %v12986_v29, 0.0  ;;  %17845 = vst [vmem:[#allocation28_spill] sm:$0xff] %v16540_v51  ;;  %9683 = vperm.xlu0 %13627, %v11859_v39   ;;  %v17846_v29 = vld [vmem:[#allocation29_spill] sm:$0xff]  ;;  %v11877_v57 = vld [vmem:[%s17662_s3 + $0x2e0] sm:$0xff] }
 0x62c   : > { %7641 = vmatprep.mubr.bf16.mxu1 %v14465_v7  ;;  %v14463_v37 = vld [vmem:[#allocation7 + $0x1a0] ss:$16 sps:$4 sm:$0xff]   ;;  %9768 = vperm.xlu1 %13628, %v11876_v45   ;;  %v14468_v39 = vld [vmem:[#allocation5 + $0xac4] ss:$24 sps:$4 sm:$0xff]  }
 0x62d   : > { %v6698_v61 = vmax.f32 %v12987_v49, 0.0  ;;  %6313 = vmatmul.mubr.bf16.gmra.mrb[72].mxu0 %v14454_v33  ;;  %v14460_v28 = vld [vmem:[#allocation5 + $0xa90] ss:$24 sps:$4 sm:$0xff]   ;;  %v11860_v49 = vld [vmem:[%s17662_s3 + $0x258] sm:$0xff] }
 0x62e   : > { %6320 = vmatprep.mubr.bf16.mxu0 %v14462_v4  ;;  %v14550_v51 = vld [vmem:[#allocation5 + $0xd60] ss:$24 sps:$4 sm:$0xff]  }
 0x62f   : > { %v6861_v56 = vpack.c.bf16 %v6698_v61, %v6697_v55  ;;  %v16556_v55 = vpop.permute.xlu0 %7097  ;;  %9773 = vperm.xlu0 %13627, %v11877_v57   ;;  %v17848_v61 = vld [vmem:[#allocation30_spill] sm:$0xff] }
 0x630   : > { %v6106_v7 = vpop.f32.mrb[116].mxu0  ;;  %17847 = vst [vmem:[#allocation29_spill] sm:$0xff] %v16556_v55  ;;  %9688 = vperm.xlu1 %13628, %v11860_v49   ;;  %v17886_v55 = vld [vmem:[#allocation46_spill] sm:$0xff] }
 0x631   : > { %v12988_v38 = vadd.f32 %v6106_v7, %v17846_v29  ;;  %v6108_v33 = vpop.f32.mrb[117].mxu0  ;;  %12101 = vmatprep.subr.bf16.mxu1 %v6861_v56  ;;  %v16559_v56 = vpop.permute.xlu1 %7182 }
 0x632   : > { %v6109_v4 = vpop.f32.mrb[118].mxu0  ;;  %12102 = vmatpush3.bf16.msra.mxu1 %v16358_v11  ;;  %17849 = vst [vmem:[#allocation30_spill] sm:$0xff] %v16559_v56  ;;  %v11878_v11 = vld [vmem:[%s17662_s3 + $0x2e8] sm:$0xff]  ;;  %v11879_v56 = vld [vmem:[%s17662_s3 + $0x2f0] sm:$0xff] }
 0x633   : > { %v12989_v45 = vadd.f32 %v6109_v4, %v17848_v61  ;;  %v6111_v7 = vpop.f32.mrb[119].mxu0  ;;  %7642 = vmatmul.mubr.bf16.gmra.mrb[52].mxu1 %v14463_v37  ;;  %v6699_v29 = vmax.f32 %v12988_v38, 0.0  ;;  %9693 = vperm.xlu0 %13627, %v11861_v43   ;;  %v14469_v4 = vld [vmem:[#allocation7 + $0x1c0] ss:$16 sps:$4 sm:$0xff]   ;;  %v14477_v61 = vld [vmem:[#allocation7 + $0x1e4] ss:$16 sps:$4 sm:$0xff]   ;;  %v16567_v49 = vpop.permute.xlu0 %8369 }
 0x634   : > { %7649 = vmatprep.mubr.bf16.mxu1 %v14471_v21  ;;  %9778 = vperm.xlu1 %13628, %v11878_v11   ;;  %17850 = vst [vmem:[#allocation146_spill] sm:$0xff] %v16567_v49  ;;  %v17851_v21 = vld [vmem:[#allocation31_spill] sm:$0xff]  ;;  %v11862_v43 = vld [vmem:[%s17662_s3 + $0x268] sm:$0xff] }
 0x635   : > { %v6700_v33 = vmax.f32 %v12989_v45, 0.0  ;;  %6321 = vmatmul.mubr.bf16.gmra.mrb[76].mxu0 %v14460_v28  ;;  %v14466_v45 = vld [vmem:[#allocation5 + $0xac0] ss:$24 sps:$4 sm:$0xff]   ;;  %v16570_v7 = vpop.permute.xlu1 %7102 }
 0x636   : > { %6328 = vmatprep.mubr.bf16.mxu0 %v14468_v39  ;;  %17852 = vst [vmem:[#allocation31_spill] sm:$0xff] %v16570_v7  ;;  %v11880_v49 = vld [vmem:[%s17662_s3 + $0x2f8] sm:$0xff] }
 0x637   : > { %v6862_v57 = vpack.c.bf16 %v6700_v33, %v6699_v29  ;;  %v14474_v29 = vld [vmem:[#allocation5 + $0xaf4] ss:$24 sps:$4 sm:$0xff]   ;;  %9783 = vperm.xlu0 %13627, %v11879_v56   ;;  %v17853_v33 = vld [vmem:[#allocation32_spill] sm:$0xff] }
 0x638   : > { %v6114_v37 = vpop.f32.mrb[120].mxu0  ;;  %9698 = vperm.xlu1 %13628, %v11862_v43   ;;  %v14505_v7 = vld [vmem:[#allocation7 + $0x88] ss:$16 sps:$4 sm:$0xff]  }
 0x639   : > { %v12990_v38 = vadd.f32 %v6114_v37, %v17851_v21  ;;  %v6116_v28 = vpop.f32.mrb[121].mxu0  ;;  %12103 = vmatprep.subr.bf16.mxu1 %v6862_v57 }
 0x63a   : > { %v6117_v39 = vpop.f32.mrb[122].mxu0  ;;  %12104 = vmatpush3.bf16.msra.mxu1 %v16384_v13  ;;  %v11863_v28 = vld [vmem:[%s17662_s3 + $0x270] sm:$0xff]  ;;  %v16586_v13 = vpop.permute.xlu0 %8289 }
 0x63b   : > { %v12991_v11 = vadd.f32 %v6117_v39, %v17853_v33  ;;  %v6119_v37 = vpop.f32.mrb[123].mxu0  ;;  %7650 = vmatmul.mubr.bf16.gmra.mrb[56].mxu1 %v14469_v4  ;;  %v6701_v57 = vmax.f32 %v12990_v38, 0.0  ;;  %17854 = vst [vmem:[#allocation32_spill] sm:$0xff] %v16586_v13  ;;  %9703 = vperm.xlu0 %13627, %v11863_v28   ;;  %v14475_v39 = vld [vmem:[#allocation7 + $0x1e0] ss:$16 sps:$4 sm:$0xff]   ;;  %v16588_v4 = vpop.permute.xlu1 %8374 }
 0x63c   : > { %7657 = vmatprep.mubr.bf16.mxu1 %v14477_v61  ;;  %17855 = vst [vmem:[#allocation147_spill] sm:$0xff] %v16588_v4  ;;  %9788 = vperm.xlu1 %13628, %v11880_v49   ;;  %v14483_v38 = vld [vmem:[#allocation7 + $0xc] ss:$16 sps:$4 sm:$0xff]   ;;  %v11945_v37 = vld [vmem:[%s17664_s5 + $0x100] sm:$0xff]  ;;  %v17857_v49 = vld [vmem:[#allocation34_spill] sm:$0xff] }
 0x63d   : > { %v6702_v21 = vmax.f32 %v12991_v11, 0.0  ;;  %6329 = vmatmul.mubr.bf16.gmra.mrb[80].mxu0 %v14466_v45  ;;  %v17856_v45 = vld [vmem:[#allocation33_spill] sm:$0xff] }
 0x63e   : > { %6336 = vmatprep.mubr.bf16.mxu0 %v14474_v29  ;;  %v14472_v11 = vld [vmem:[#allocation5 + $0xaf0] ss:$24 sps:$4 sm:$0xff]   ;;  %v11864_v29 = vld [vmem:[%s17662_s3 + $0x278] sm:$0xff] }
 0x63f   : > { %v6863_v56 = vpack.c.bf16 %v6702_v21, %v6701_v57  ;;  %v14480_v21 = vld [vmem:[#allocation5 + $0xb24] ss:$24 sps:$4 sm:$0xff]   ;;  %10517 = vperm.xlu0 %13627, %v11945_v37   ;;  %v11947_v13 = vld [vmem:[%s17664_s5 + $0x110] sm:$0xff] }
 0x640   : > { %v6122_v61 = vpop.f32.mrb[124].mxu0  ;;  %9708 = vperm.xlu1 %13628, %v11864_v29   ;;  %v17860_v37 = vld [vmem:[#allocation35_spill] sm:$0xff] }
 0x641   : > { %v12992_v43 = vadd.f32 %v6122_v61, %v17856_v45  ;;  %v6124_v33 = vpop.f32.mrb[125].mxu0  ;;  %12105 = vmatprep.subr.bf16.mxu1 %v6863_v56  ;;  %v16599_v56 = vpop.permute.xlu0 %8379 }
 0x642   : > { %v6125_v57 = vpop.f32.mrb[126].mxu0  ;;  %12106 = vmatpush3.bf16.msra.mxu1 %v16410_v36  ;;  %17858 = vst [vmem:[#allocation33_spill] sm:$0xff] %v16599_v56  ;;  %v16601_v33 = vpop.permute.xlu1 %8294  ;;  %v11946_v36 = vld [vmem:[%s17664_s5 + $0x108] sm:$0xff]  ;;  %v11951_v56 = vld [vmem:[%s17664_s5 + $0x130] sm:$0xff] }
 0x643   : > { %v12993_v28 = vadd.f32 %v6125_v57, %v17857_v49  ;;  %v6127_v4 = vpop.f32.mrb[127].mxu0  ;;  %7658 = vmatmul.mubr.bf16.gmra.mrb[60].mxu1 %v14475_v39  ;;  %v6703_v61 = vmax.f32 %v12992_v43, 0.0  ;;  %17859 = vst [vmem:[#allocation34_spill] sm:$0xff] %v16601_v33  ;;  %10527 = vperm.xlu0 %13627, %v11947_v13   ;;  %v11949_v57 = vld [vmem:[%s17664_s5 + $0x120] sm:$0xff]  ;;  %v11948_v49 = vld [vmem:[%s17664_s5 + $0x118] sm:$0xff]  ;;  %v11959_v33 = vld [vmem:[%s17664_s5 + $0x170] sm:$0xff] }
 0x644   : > { %7698 = vmatprep.mubr.bf16.mxu1 %v14483_v38  ;;  %10522 = vperm.xlu1 %13628, %v11946_v36   ;;  %v14478_v38 = vld [vmem:[#allocation5 + $0xb20] ss:$24 sps:$4 sm:$0xff]   ;;  %v14486_v13 = vld [vmem:[#allocation5 + $0xb54] ss:$24 sps:$4 sm:$0xff]  }
 0x645   : > { %v6704_v45 = vmax.f32 %v12993_v28, 0.0  ;;  %6337 = vmatmul.mubr.bf16.gmra.mrb[84].mxu0 %v14472_v11  ;;  %v14481_v11 = vld [vmem:[#allocation7 + $0x8] ss:$16 sps:$4 sm:$0xff]  }
 0x646   : > { %6344 = vmatprep.mubr.bf16.mxu0 %v14480_v21  ;;  %v14489_v21 = vld [vmem:[#allocation7 + $0x2c] ss:$16 sps:$4 sm:$0xff]  }
 0x647   : > { %v6864_v39 = vpack.c.bf16 %v6704_v45, %v6703_v61  ;;  %v16617_v61 = vpop.permute.xlu0 %8299  ;;  %10537 = vperm.xlu0 %13627, %v11949_v57   ;;  %v17862_v45 = vld [vmem:[#allocation36_spill] sm:$0xff] }
 0x648   : > { %v6130_v4 = vpop.f32.mrb[128].mxu0  ;;  %17861 = vst [vmem:[#allocation35_spill] sm:$0xff] %v16617_v61  ;;  %10532 = vperm.xlu1 %13628, %v11948_v49   ;;  %v14484_v49 = vld [vmem:[#allocation5 + $0xb50] ss:$24 sps:$4 sm:$0xff]  }
 0x649   : > { %v12994_v43 = vadd.f32 %v6130_v4, %v17860_v37  ;;  %v6132_v29 = vpop.f32.mrb[129].mxu0  ;;  %12107 = vmatprep.subr.bf16.mxu1 %v6864_v39  ;;  %v16620_v4 = vpop.permute.xlu1 %8384 }
 0x64a   : > { %v6133_v28 = vpop.f32.mrb[130].mxu0  ;;  %12108 = vmatpush3.bf16.msra.mxu1 %v16434_v1  ;;  %17863 = vst [vmem:[#allocation36_spill] sm:$0xff] %v16620_v4  ;;  %v11950_v1 = vld [vmem:[%s17664_s5 + $0x128] sm:$0xff]  ;;  %v11953_v4 = vld [vmem:[%s17664_s5 + $0x140] sm:$0xff] }
 0x64b   : > { %v12995_v36 = vadd.f32 %v6133_v28, %v17862_v45  ;;  %v6135_v39 = vpop.f32.mrb[131].mxu0  ;;  %v6705_v37 = vmax.f32 %v12994_v43, 0.0  ;;  %10547 = vperm.xlu0 %13627, %v11951_v56   ;;  %v16630_v43 = vpop.permute.xlu0 %8389 }
 0x64c   : > { %10542 = vperm.xlu1 %13628, %v11950_v1   ;;  %17865 = vst [vmem:[#allocation149_spill] sm:$0xff] %v16630_v43 }
 0x64d   : > { %v6706_v29 = vmax.f32 %v12995_v36, 0.0  ;;  %6345 = vmatmul.mubr.bf16.gmra.mrb[88].mxu0 %v14478_v38  ;;  %7699 = vmatmul.mubr.bf16.vlgmr.msra.gmra.mrb[64].mxu1 %v14481_v11  ;;  %v17866_v38 = vld [vmem:[#allocation37_spill] sm:$0xff]  ;;  %v14487_v36 = vld [vmem:[#allocation7 + $0x28] ss:$16 sps:$4 sm:$0xff]   ;;  %v16633_v39 = vpop.permute.xlu1 %8304 }
 0x64e   : > { %6352 = vmatprep.mubr.bf16.mxu0 %v14486_v13  ;;  %7706 = vmatprep.mubr.bf16.mxu1 %v14489_v21  ;;  %17867 = vst [vmem:[#allocation37_spill] sm:$0xff] %v16633_v39  ;;  %v11952_v13 = vld [vmem:[%s17664_s5 + $0x138] sm:$0xff]  ;;  %v11954_v39 = vld [vmem:[%s17664_s5 + $0x148] sm:$0xff] }
 0x64f   : > { %v16628_v57 = vpack.c.bf16 %v6706_v29, %v6705_v37  ;;  %v14492_v21 = vld [vmem:[#allocation5 + $0xb84] ss:$24 sps:$4 sm:$0xff]   ;;  %v17868_v29 = vld [vmem:[#allocation38_spill] sm:$0xff]  ;;  %10557 = vperm.xlu0 %13627, %v11953_v4   ;;  %v16648_v61 = vpop.permute.xlu0 %8309 }
 0x650   : > { %v6138_v28 = vpop.f32.mrb[132].mxu0  ;;  %v14495_v37 = vld [vmem:[#allocation7 + $0x4c] ss:$16 sps:$4 sm:$0xff]   ;;  %10552 = vperm.xlu1 %13628, %v11952_v13   ;;  %17869 = vst [vmem:[#allocation38_spill] sm:$0xff] %v16648_v61 }
 0x651   : > { %17864 = vst [vmem:[#allocation148_spill] sm:$0xff] %v16628_v57  ;;  %v12996_v11 = vadd.f32 %v6138_v28, %v17866_v38  ;;  %v6140_v45 = vpop.f32.mrb[133].mxu0  ;;  %v16652_v4 = vpop.permute.xlu1 %8394  ;;  %v17882_v57 = vld [vmem:[#allocation43_spill] sm:$0xff] }
 0x652   : > { %v6141_v56 = vpop.f32.mrb[134].mxu0  ;;  %v11955_v45 = vld [vmem:[%s17664_s5 + $0x150] sm:$0xff]  ;;  %17871 = vst [vmem:[#allocation151_spill] sm:$0xff] %v16652_v4  ;;  %v17873_v4 = vld [vmem:[#allocation40_spill] sm:$0xff] }
 0x653   : > { %v12997_v1 = vadd.f32 %v6141_v56, %v17868_v29  ;;  %v6143_v43 = vpop.f32.mrb[135].mxu0  ;;  %v6707_v28 = vmax.f32 %v12996_v11, 0.0  ;;  %10567 = vperm.xlu0 %13627, %v11955_v45   ;;  %v17872_v11 = vld [vmem:[#allocation39_spill] sm:$0xff]  ;;  %v14493_v29 = vld [vmem:[#allocation7 + $0x48] ss:$16 sps:$4 sm:$0xff]   ;;  %v16662_v61 = vpop.permute.xlu0 %8399 }
 0x654   : > { %10562 = vperm.xlu1 %13628, %v11954_v39   ;;  %v14490_v43 = vld [vmem:[#allocation5 + $0xb80] ss:$24 sps:$4 sm:$0xff]   ;;  %17874 = vst [vmem:[#allocation39_spill] sm:$0xff] %v16662_v61 }
 0x655   : > { %v6708_v38 = vmax.f32 %v12997_v1, 0.0  ;;  %6353 = vmatmul.mubr.bf16.gmra.mrb[92].mxu0 %v14484_v49  ;;  %7707 = vmatmul.mubr.bf16.gmra.mrb[68].mxu1 %v14487_v36  ;;  %v11957_v1 = vld [vmem:[%s17664_s5 + $0x160] sm:$0xff] }
 0x656   : > { %6360 = vmatprep.mubr.bf16.mxu0 %v14492_v21  ;;  %7714 = vmatprep.mubr.bf16.mxu1 %v14495_v37  ;;  %v11956_v21 = vld [vmem:[%s17664_s5 + $0x158] sm:$0xff] }
 0x657   : > { %v16650_v56 = vpack.c.bf16 %v6708_v38, %v6707_v28  ;;  %v14498_v28 = vld [vmem:[#allocation5 + $0xbb4] ss:$24 sps:$4 sm:$0xff]   ;;  %10577 = vperm.xlu0 %13627, %v11957_v1   ;;  %v14496_v1 = vld [vmem:[#allocation5 + $0xbb0] ss:$24 sps:$4 sm:$0xff]  }
 0x658   : > { %v6146_v49 = vpop.f32.mrb[136].mxu0  ;;  %v14501_v38 = vld [vmem:[#allocation7 + $0x6c] ss:$16 sps:$4 sm:$0xff]   ;;  %10572 = vperm.xlu1 %13628, %v11956_v21  }
 0x659   : > { %17870 = vst [vmem:[#allocation150_spill] sm:$0xff] %v16650_v56  ;;  %v12998_v36 = vadd.f32 %v6146_v49, %v17872_v11  ;;  %v6148_v13 = vpop.f32.mrb[137].mxu0  ;;  %v11958_v56 = vld [vmem:[%s17664_s5 + $0x168] sm:$0xff] }
 0x65a   : > { %v6149_v37 = vpop.f32.mrb[138].mxu0  ;;  %v16664_v13 = vpop.permute.xlu1 %8314 }
 0x65b   : > { %v12999_v45 = vadd.f32 %v6149_v37, %v17873_v4  ;;  %v6151_v39 = vpop.f32.mrb[139].mxu0  ;;  %v6709_v49 = vmax.f32 %v12998_v36, 0.0  ;;  %17875 = vst [vmem:[#allocation40_spill] sm:$0xff] %v16664_v13  ;;  %10587 = vperm.xlu0 %13627, %v11959_v33   ;;  %v14499_v37 = vld [vmem:[#allocation7 + $0x68] ss:$16 sps:$4 sm:$0xff]  }
 0x65c   : > { %10582 = vperm.xlu1 %13628, %v11958_v56   ;;  %v11960_v39 = vld [vmem:[%s17664_s5 + $0x178] sm:$0xff] }
 0x65d   : > { %v6710_v11 = vmax.f32 %v12999_v45, 0.0  ;;  %6361 = vmatmul.mubr.bf16.gmra.mrb[96].mxu0 %v14490_v43  ;;  %7715 = vmatmul.mubr.bf16.gmra.mrb[72].mxu1 %v14493_v29  ;;  %v17877_v43 = vld [vmem:[#allocation41_spill] sm:$0xff]  ;;  %v10838_v45 = vld [vmem:[%s17666_s7] sm:$0xff]  ;;  %v17879_v33 = vld [vmem:[#allocation42_spill] sm:$0xff] }
 0x65e   : > { %6368 = vmatprep.mubr.bf16.mxu0 %v14498_v28  ;;  %7722 = vmatprep.mubr.bf16.mxu1 %v14501_v38  ;;  %v14504_v38 = vld [vmem:[#allocation5 + $0xbe4] ss:$24 sps:$4 sm:$0xff]   ;;  %v16684_v13 = vpop.permute.xlu1 %8404 }
 0x65f   : > { %v16672_v4 = vpack.c.bf16 %v6710_v11, %v6709_v49  ;;  %v14507_v49 = vld [vmem:[#allocation7 + $0x8c] ss:$16 sps:$4 sm:$0xff]   ;;  %v16681_v11 = vpop.permute.xlu0 %8319  ;;  %17880 = vst [vmem:[#allocation42_spill] sm:$0xff] %v16684_v13  ;;  %10841 = vperm.xlu0 %13627, %v10838_v45   ;;  %v17883_v13 = vld [vmem:[#allocation44_spill] sm:$0xff] }
 0x660   : > { %v6154_v36 = vpop.f32.mrb[140].mxu0  ;;  %17878 = vst [vmem:[#allocation41_spill] sm:$0xff] %v16681_v11  ;;  %10592 = vperm.xlu1 %13628, %v11960_v39   ;;  %v14502_v11 = vld [vmem:[#allocation5 + $0xbe0] ss:$24 sps:$4 sm:$0xff]  }
 0x661   : > { %17876 = vst [vmem:[#allocation152_spill] sm:$0xff] %v16672_v4  ;;  %v13000_v29 = vadd.f32 %v6154_v36, %v17877_v43  ;;  %v6156_v21 = vpop.f32.mrb[141].mxu0 }
 0x662   : > { %v6157_v28 = vpop.f32.mrb[142].mxu0 }
 0x663   : > { %v13001_v56 = vadd.f32 %v6157_v28, %v17879_v33  ;;  %v6159_v61 = vpop.f32.mrb[143].mxu0  ;;  %v6711_v36 = vmax.f32 %v13000_v29, 0.0  ;;  %v14513_v33 = vld [vmem:[#allocation7 + $0xac] ss:$16 sps:$4 sm:$0xff]  }
 0x664   : > { %v14510_v61 = vld [vmem:[#allocation5 + $0xc14] ss:$24 sps:$4 sm:$0xff]  }
 0x665   : > { %v6712_v43 = vmax.f32 %v13001_v56, 0.0  ;;  %6369 = vmatmul.mubr.bf16.gmra.mrb[100].mxu0 %v14496_v1  ;;  %7723 = vmatmul.mubr.bf16.gmra.mrb[76].mxu1 %v14499_v37 }
 0x666   : > { %6376 = vmatprep.mubr.bf16.mxu0 %v14504_v38  ;;  %7730 = vmatprep.mubr.bf16.mxu1 %v14507_v49  ;;  %v17885_v38 = vld [vmem:[#allocation45_spill] sm:$0xff]  ;;  %v14511_v49 = vld [vmem:[#allocation7 + $0xa8] ss:$16 sps:$4 sm:$0xff]  }
 0x667   : > { %v16686_v21 = vpack.c.bf16 %v6712_v43, %v6711_v36  ;;  %v14516_v43 = vld [vmem:[#allocation5 + $0xc44] ss:$24 sps:$4 sm:$0xff]  }
 0x668   : > { %v6162_v4 = vpop.f32.mrb[144].mxu0 }
 0x669   : > { %17881 = vst [vmem:[#allocation153_spill] sm:$0xff] %v16686_v21  ;;  %v13002_v50 = vadd.f32 %v6162_v4, %v17882_v57  ;;  %v6164_v40 = vpop.f32.mrb[145].mxu0  ;;  %v14508_v4 = vld [vmem:[#allocation5 + $0xc10] ss:$24 sps:$4 sm:$0xff]   ;;  %v14519_v21 = vld [vmem:[#allocation7 + $0xcc] ss:$16 sps:$4 sm:$0xff]  }
 0x66a   : > { %v6165_v28 = vpop.f32.mrb[146].mxu0 }
 0x66b   : > { %v13003_v45 = vadd.f32 %v6165_v28, %v17883_v13  ;;  %v6167_v39 = vpop.f32.mrb[147].mxu0  ;;  %v6713_v29 = vmax.f32 %v13002_v50, 0.0 }
 0x66d   : > { %v6714_v56 = vmax.f32 %v13003_v45, 0.0  ;;  %6377 = vmatmul.mubr.bf16.gmra.mrb[104].mxu0 %v14502_v11  ;;  %7731 = vmatmul.mubr.bf16.gmra.mrb[80].mxu1 %v14505_v7 }
 0x66e   : > { %6384 = vmatprep.mubr.bf16.mxu0 %v14510_v61  ;;  %7738 = vmatprep.mubr.bf16.mxu1 %v14513_v33  ;;  %v17888_v61 = vld [vmem:[#allocation47_spill] sm:$0xff] }
 0x66f   : > { %v16690_v1 = vpack.c.bf16 %v6714_v56, %v6713_v29  ;;  %v14514_v29 = vld [vmem:[#allocation5 + $0xc40] ss:$24 sps:$4 sm:$0xff]  }
 0x670   : > { %v6170_v37 = vpop.f32.mrb[0].mxu0  ;;  %v14517_v56 = vld [vmem:[#allocation7 + $0xc8] ss:$16 sps:$4 sm:$0xff]  }
 0x671   : > { %17884 = vst [vmem:[#allocation43_spill] sm:$0xff] %v16690_v1  ;;  %v6171_v57 = vadd.f32 %v6170_v37, %v17885_v38  ;;  %v6172_v40 = vpop.f32.mrb[1].mxu0  ;;  %v14522_v38 = vld [vmem:[#allocation5 + $0xc74] ss:$24 sps:$4 sm:$0xff]   ;;  %v17889_v1 = vld [vmem:[#allocation48_spill] sm:$0xff] }
 0x672   : > { %v6173_v36 = vpop.f32.mrb[2].mxu0  ;;  %v14525_v40 = vld [vmem:[#allocation7 + $0xec] ss:$16 sps:$4 sm:$0xff]  }
 0x673   : > { %v6174_v13 = vadd.f32 %v6173_v36, %v17886_v55  ;;  %v6175_v28 = vpop.f32.mrb[3].mxu0  ;;  %v6715_v50 = vmax.f32 %v6171_v57, 0.0 }
 0x675   : > { %v6716_v45 = vmax.f32 %v6174_v13, 0.0  ;;  %6385 = vmatmul.mubr.bf16.gmra.mrb[108].mxu0 %v14508_v4  ;;  %7739 = vmatmul.mubr.bf16.gmra.mrb[84].mxu1 %v14511_v49  ;;  %v17891_v49 = vld [vmem:[#allocation49_spill] sm:$0xff] }
 0x676   : > { %6392 = vmatprep.mubr.bf16.mxu0 %v14516_v43  ;;  %7746 = vmatprep.mubr.bf16.mxu1 %v14519_v21 }
 0x677   : > { %v16694_v7 = vpack.c.bf16 %v6716_v45, %v6715_v50  ;;  %v14520_v50 = vld [vmem:[#allocation5 + $0xc70] ss:$24 sps:$4 sm:$0xff]  }
 0x678   : > { %v6178_v11 = vpop.f32.mrb[4].mxu0  ;;  %v14523_v45 = vld [vmem:[#allocation7 + $0xe8] ss:$16 sps:$4 sm:$0xff]  }
 0x679   : > { %17887 = vst [vmem:[#allocation44_spill] sm:$0xff] %v16694_v7  ;;  %v6179_v33 = vadd.f32 %v6178_v11, %v17888_v61  ;;  %v6180_v39 = vpop.f32.mrb[5].mxu0  ;;  %v14528_v61 = vld [vmem:[#allocation5 + $0xca4] ss:$24 sps:$4 sm:$0xff]   ;;  %v17892_v7 = vld [vmem:[#allocation50_spill] sm:$0xff] }
 0x67a   : > { %v6181_v37 = vpop.f32.mrb[6].mxu0  ;;  %v14531_v39 = vld [vmem:[#allocation7 + $0x10c] ss:$16 sps:$4 sm:$0xff]  }
 0x67b   : > { %v6182_v55 = vadd.f32 %v6181_v37, %v17889_v1  ;;  %v6183_v36 = vpop.f32.mrb[7].mxu0  ;;  %v6717_v57 = vmax.f32 %v6179_v33, 0.0 }
 0x67d   : > { %v6718_v13 = vmax.f32 %v6182_v55, 0.0  ;;  %6393 = vmatmul.mubr.bf16.gmra.mrb[112].mxu0 %v14514_v29  ;;  %7747 = vmatmul.mubr.bf16.gmra.mrb[88].mxu1 %v14517_v56 }
 0x67e   : > { %6400 = vmatprep.mubr.bf16.mxu0 %v14522_v38  ;;  %7754 = vmatprep.mubr.bf16.mxu1 %v14525_v40  ;;  %v17894_v38 = vld [vmem:[#allocation51_spill] sm:$0xff] }
 0x67f   : > { %v16698_v21 = vpack.c.bf16 %v6718_v13, %v6717_v57  ;;  %v14526_v57 = vld [vmem:[#allocation5 + $0xca0] ss:$24 sps:$4 sm:$0xff]  }
 0x680   : > { %v6186_v4 = vpop.f32.mrb[8].mxu0  ;;  %v14529_v13 = vld [vmem:[#allocation7 + $0x108] ss:$16 sps:$4 sm:$0xff]  }
 0x681   : > { %17890 = vst [vmem:[#allocation45_spill] sm:$0xff] %v16698_v21  ;;  %v6187_v43 = vadd.f32 %v6186_v4, %v17891_v49  ;;  %v6188_v28 = vpop.f32.mrb[9].mxu0  ;;  %v14534_v49 = vld [vmem:[#allocation5 + $0xcd4] ss:$24 sps:$4 sm:$0xff]   ;;  %v17895_v21 = vld [vmem:[#allocation52_spill] sm:$0xff] }
 0x682   : > { %v6189_v11 = vpop.f32.mrb[10].mxu0  ;;  %v14537_v28 = vld [vmem:[#allocation7 + $0x12c] ss:$16 sps:$4 sm:$0xff]  }
 0x683   : > { %v6190_v1 = vadd.f32 %v6189_v11, %v17892_v7  ;;  %v6191_v37 = vpop.f32.mrb[11].mxu0  ;;  %v6719_v33 = vmax.f32 %v6187_v43, 0.0 }
 0x685   : > { %v6720_v55 = vmax.f32 %v6190_v1, 0.0  ;;  %6401 = vmatmul.mubr.bf16.gmra.mrb[116].mxu0 %v14520_v50  ;;  %7755 = vmatmul.mubr.bf16.gmra.mrb[92].mxu1 %v14523_v45 }
 0x686   : > { %6408 = vmatprep.mubr.bf16.mxu0 %v14528_v61  ;;  %7762 = vmatprep.mubr.bf16.mxu1 %v14531_v39  ;;  %v17897_v61 = vld [vmem:[#allocation53_spill] sm:$0xff] }
 0x687   : > { %v16702_v29 = vpack.c.bf16 %v6720_v55, %v6719_v33  ;;  %v14532_v33 = vld [vmem:[#allocation5 + $0xcd0] ss:$24 sps:$4 sm:$0xff]  }
 0x688   : > { %v6194_v56 = vpop.f32.mrb[12].mxu0  ;;  %v14535_v55 = vld [vmem:[#allocation7 + $0x128] ss:$16 sps:$4 sm:$0xff]  }
 0x689   : > { %17893 = vst [vmem:[#allocation46_spill] sm:$0xff] %v16702_v29  ;;  %v6195_v40 = vadd.f32 %v6194_v56, %v17894_v38  ;;  %v6196_v36 = vpop.f32.mrb[13].mxu0  ;;  %v14540_v38 = vld [vmem:[#allocation5 + $0xd04] ss:$24 sps:$4 sm:$0xff]   ;;  %v17898_v29 = vld [vmem:[#allocation54_spill] sm:$0xff] }
 0x68a   : > { %v6197_v4 = vpop.f32.mrb[14].mxu0  ;;  %v14543_v36 = vld [vmem:[#allocation7 + $0x14c] ss:$16 sps:$4 sm:$0xff]  }
 0x68b   : > { %v6198_v7 = vadd.f32 %v6197_v4, %v17895_v21  ;;  %v6199_v11 = vpop.f32.mrb[15].mxu0  ;;  %v6721_v43 = vmax.f32 %v6195_v40, 0.0 }
 0x68d   : > { %v6722_v1 = vmax.f32 %v6198_v7, 0.0  ;;  %6409 = vmatmul.mubr.bf16.gmra.mrb[120].mxu0 %v14526_v57  ;;  %7763 = vmatmul.mubr.bf16.gmra.mrb[96].mxu1 %v14529_v13 }
 0x68e   : > { %6416 = vmatprep.mubr.bf16.mxu0 %v14534_v49  ;;  %7770 = vmatprep.mubr.bf16.mxu1 %v14537_v28  ;;  %v17900_v49 = vld [vmem:[#allocation55_spill] sm:$0xff] }
 0x68f   : > { %v16706_v50 = vpack.c.bf16 %v6722_v1, %v6721_v43  ;;  %v14538_v43 = vld [vmem:[#allocation5 + $0xd00] ss:$24 sps:$4 sm:$0xff]  }
 0x690   : > { %v6202_v45 = vpop.f32.mrb[16].mxu0  ;;  %v14541_v1 = vld [vmem:[#allocation7 + $0x148] ss:$16 sps:$4 sm:$0xff]  }
 0x691   : > { %17896 = vst [vmem:[#allocation47_spill] sm:$0xff] %v16706_v50  ;;  %v6203_v39 = vadd.f32 %v6202_v45, %v17897_v61  ;;  %v6204_v37 = vpop.f32.mrb[17].mxu0  ;;  %v14546_v61 = vld [vmem:[#allocation5 + $0xd34] ss:$24 sps:$4 sm:$0xff]   ;;  %v17901_v50 = vld [vmem:[#allocation56_spill] sm:$0xff] }
 0x692   : > { %v6205_v56 = vpop.f32.mrb[18].mxu0  ;;  %v14549_v37 = vld [vmem:[#allocation7 + $0x16c] ss:$16 sps:$4 sm:$0xff]  }
 0x693   : > { %v6206_v21 = vadd.f32 %v6205_v56, %v17898_v29  ;;  %v6207_v4 = vpop.f32.mrb[19].mxu0  ;;  %v6723_v40 = vmax.f32 %v6203_v39, 0.0 }
 0x695   : > { %v6724_v7 = vmax.f32 %v6206_v21, 0.0  ;;  %6417 = vmatmul.mubr.bf16.gmra.mrb[124].mxu0 %v14532_v33  ;;  %7771 = vmatmul.mubr.bf16.gmra.mrb[100].mxu1 %v14535_v55 }
 0x696   : > { %6424 = vmatprep.mubr.bf16.mxu0 %v14540_v38  ;;  %7778 = vmatprep.mubr.bf16.mxu1 %v14543_v36 }
 0x697   : > { %v16710_v57 = vpack.c.bf16 %v6724_v7, %v6723_v40  ;;  %v17903_v7 = vld [vmem:[#allocation57_spill] sm:$0xff] }
 0x698   : > { %v6210_v13 = vpop.f32.mrb[20].mxu0 }
 0x699   : > { %17899 = vst [vmem:[#allocation48_spill] sm:$0xff] %v16710_v57  ;;  %v6211_v28 = vadd.f32 %v6210_v13, %v17900_v49  ;;  %v6212_v11 = vpop.f32.mrb[21].mxu0  ;;  %v17906_v57 = vld [vmem:[#allocation59_spill] sm:$0xff] }
 0x69a   : > { %v6213_v45 = vpop.f32.mrb[22].mxu0  ;;  %v14544_v11 = vld [vmem:[#allocation5 + $0xd30] ss:$24 sps:$4 sm:$0xff]  }
 0x69b   : > { %v6214_v29 = vadd.f32 %v6213_v45, %v17901_v50  ;;  %v6215_v56 = vpop.f32.mrb[23].mxu0  ;;  %v6725_v39 = vmax.f32 %v6211_v28, 0.0  ;;  %v14547_v50 = vld [vmem:[#allocation7 + $0x168] ss:$16 sps:$4 sm:$0xff]  }
 0x69d   : > { %v6726_v21 = vmax.f32 %v6214_v29, 0.0  ;;  %6425 = vmatmul.mubr.bf16.gmra.mrb[168].mxu0 %v14538_v43  ;;  %7779 = vmatmul.mubr.bf16.gmra.mrb[104].mxu1 %v14541_v1  ;;  %v14552_v29 = vld [vmem:[#allocation5 + $0xd64] ss:$24 sps:$4 sm:$0xff]  }
 0x69e   : > { %6432 = vmatprep.mubr.bf16.mxu0 %v14546_v61  ;;  %7786 = vmatprep.mubr.bf16.mxu1 %v14549_v37  ;;  %v11997_v33 = vpop.f32.mrb[0].mxu1  ;;  %v14555_v43 = vld [vmem:[#allocation7 + $0x18c] ss:$16 sps:$4 sm:$0xff]   ;;  %v17904_v61 = vld [vmem:[#allocation58_spill] sm:$0xff] }
 0x69f   : > { %v16714_v55 = vpack.c.bf16 %v6726_v21, %v6725_v39  ;;  %v11998_v38 = vpop.f32.mrb[1].mxu1 }
 0x6a0   : > { %v6218_v36 = vpop.f32.mrb[24].mxu0  ;;  %v16716_v4 = vadd.f32 %v11998_v38, %v11997_v33  ;;  %v12000_v40 = vpop.f32.mrb[2].mxu1 }
 0x6a1   : > { %17902 = vst [vmem:[#allocation49_spill] sm:$0xff] %v16714_v55  ;;  %v6219_v13 = vadd.f32 %v6218_v36, %v17903_v7  ;;  %v6220_v49 = vpop.f32.mrb[25].mxu0  ;;  %v12001_v45 = vpop.f32.mrb[3].mxu1 }
 0x6a2   : > { %v6221_v28 = vpop.f32.mrb[26].mxu0  ;;  %v16719_v1 = vadd.f32 %v12001_v45, %v12000_v40 }
 0x6a3   : > { %v6222_v37 = vadd.f32 %v6221_v28, %v17904_v61  ;;  %v6223_v56 = vpop.f32.mrb[27].mxu0  ;;  %v6727_v39 = vmax.f32 %v6219_v13, 0.0  ;;  %v14553_v28 = vld [vmem:[#allocation7 + $0x188] ss:$16 sps:$4 sm:$0xff]  }
 0x6a5   : > { %v6728_v21 = vmax.f32 %v6222_v37, 0.0  ;;  %6433 = vmatmul.mubr.bf16.gmra.mrb[172].mxu0 %v14544_v11  ;;  %7787 = vmatmul.mubr.bf16.gmra.mrb[108].mxu1 %v14547_v50  ;;  %v14558_v37 = vld [vmem:[#allocation5 + $0xd94] ss:$24 sps:$4 sm:$0xff]  }
 0x6a6   : > { %6440 = vmatprep.mubr.bf16.mxu0 %v14552_v29  ;;  %7794 = vmatprep.mubr.bf16.mxu1 %v14555_v43  ;;  %v12003_v33 = vpop.f32.mrb[4].mxu1  ;;  %v14561_v11 = vld [vmem:[#allocation7 + $0x1ac] ss:$16 sps:$4 sm:$0xff]   ;;  %v17907_v29 = vld [vmem:[#allocation60_spill] sm:$0xff] }
 0x6a7   : > { %v16722_v38 = vpack.c.bf16 %v6728_v21, %v6727_v39  ;;  %v12004_v36 = vpop.f32.mrb[5].mxu1 }
 0x6a8   : > { %v6226_v7 = vpop.f32.mrb[28].mxu0  ;;  %v16724_v49 = vadd.f32 %v12004_v36, %v12003_v33  ;;  %v12006_v55 = vpop.f32.mrb[6].mxu1 }
 0x6a9   : > { %17905 = vst [vmem:[#allocation50_spill] sm:$0xff] %v16722_v38  ;;  %v6227_v40 = vadd.f32 %v6226_v7, %v17906_v57  ;;  %v6228_v45 = vpop.f32.mrb[29].mxu0  ;;  %v12007_v61 = vpop.f32.mrb[7].mxu1 }
 0x6aa   : > { %v6229_v13 = vpop.f32.mrb[30].mxu0  ;;  %v16727_v50 = vadd.f32 %v12007_v61, %v12006_v55 }
 0x6ab   : > { %v6230_v43 = vadd.f32 %v6229_v13, %v17907_v29  ;;  %v6231_v56 = vpop.f32.mrb[31].mxu0  ;;  %v6729_v39 = vmax.f32 %v6227_v40, 0.0  ;;  %v14559_v13 = vld [vmem:[#allocation7 + $0x1a8] ss:$16 sps:$4 sm:$0xff]  }
 0x6ad   : > { %v6730_v21 = vmax.f32 %v6230_v43, 0.0  ;;  %6441 = vmatmul.mubr.bf16.gmra.mrb[176].mxu0 %v14550_v51  ;;  %7795 = vmatmul.mubr.bf16.gmra.mrb[112].mxu1 %v14553_v28  ;;  %v14564_v43 = vld [vmem:[#allocation5 + $0xdc4] ss:$24 sps:$4 sm:$0xff]  }
 0x6ae   : > { %6448 = vmatprep.mubr.bf16.mxu0 %v14558_v37  ;;  %7802 = vmatprep.mubr.bf16.mxu1 %v14561_v11  ;;  %v12009_v33 = vpop.f32.mrb[8].mxu1  ;;  %v14567_v51 = vld [vmem:[#allocation7 + $0x1cc] ss:$16 sps:$4 sm:$0xff]   ;;  %v17910_v37 = vld [vmem:[#allocation62_spill] sm:$0xff] }
 0x6af   : > { %v16730_v57 = vpack.c.bf16 %v6730_v21, %v6729_v39  ;;  %v12010_v36 = vpop.f32.mrb[9].mxu1 }
 0x6b0   : > { %v6234_v7 = vpop.f32.mrb[32].mxu0  ;;  %v16732_v45 = vadd.f32 %v12010_v36, %v12009_v33  ;;  %v12012_v38 = vpop.f32.mrb[10].mxu1 }
 0x6b1   : > { %17908 = vst [vmem:[#allocation51_spill] sm:$0xff] %v16730_v57  ;;  %v6235_v55 = vadd.f32 %v6234_v7, %v17909_v19  ;;  %v6236_v61 = vpop.f32.mrb[33].mxu0  ;;  %v12013_v29 = vpop.f32.mrb[11].mxu1 }
 0x6b2   : > { %v6237_v40 = vpop.f32.mrb[34].mxu0  ;;  %v16735_v28 = vadd.f32 %v12013_v29, %v12012_v38 }
 0x6b3   : > { %v6238_v11 = vadd.f32 %v6237_v40, %v17910_v37  ;;  %v6239_v56 = vpop.f32.mrb[35].mxu0  ;;  %v6731_v39 = vmax.f32 %v6235_v55, 0.0  ;;  %v14565_v40 = vld [vmem:[#allocation7 + $0x1c8] ss:$16 sps:$4 sm:$0xff]  }
 0x6b5   : > { %v6732_v21 = vmax.f32 %v6238_v11, 0.0  ;;  %6449 = vmatmul.mubr.bf16.gmra.mrb[180].mxu0 %v14556_v20  ;;  %7803 = vmatmul.mubr.bf16.gmra.mrb[116].mxu1 %v14559_v13  ;;  %v14570_v11 = vld [vmem:[#allocation5 + $0xdf4] ss:$24 sps:$4 sm:$0xff]  }
 0x6b6   : > { %6456 = vmatprep.mubr.bf16.mxu0 %v14564_v43  ;;  %7810 = vmatprep.mubr.bf16.mxu1 %v14567_v51  ;;  %v12015_v33 = vpop.f32.mrb[12].mxu1  ;;  %v14573_v20 = vld [vmem:[#allocation7 + $0x1ec] ss:$16 sps:$4 sm:$0xff]  }
 0x6b7   : > { %v16738_v19 = vpack.c.bf16 %v6732_v21, %v6731_v39  ;;  %v12016_v36 = vpop.f32.mrb[13].mxu1 }
 0x6b8   : > { %v6242_v7 = vpop.f32.mrb[36].mxu0  ;;  %v16740_v61 = vadd.f32 %v12016_v36, %v12015_v33  ;;  %v12018_v57 = vpop.f32.mrb[14].mxu1 }
 0x6b9   : > { %17911 = vst [vmem:[#allocation52_spill] sm:$0xff] %v16738_v19  ;;  %v6243_v38 = vadd.f32 %v6242_v7, %v15771_v53  ;;  %v6244_v29 = vpop.f32.mrb[37].mxu0  ;;  %v12019_v37 = vpop.f32.mrb[15].mxu1  ;;  %v14568_v19 = vld [vmem:[#allocation5 + $0xdf0] ss:$24 sps:$4 sm:$0xff]  }
 0x6ba   : > { %v6245_v55 = vpop.f32.mrb[38].mxu0  ;;  %v16743_v13 = vadd.f32 %v12019_v37, %v12018_v57 }
 0x6bb   : > { %v6246_v43 = vadd.f32 %v6245_v55, %v15774_v41  ;;  %v6247_v51 = vpop.f32.mrb[39].mxu0  ;;  %v6733_v56 = vmax.f32 %v6243_v38, 0.0  ;;  %v14571_v41 = vld [vmem:[#allocation7 + $0x1e8] ss:$16 sps:$4 sm:$0xff]  }
 0x6bd   : > { %v6734_v39 = vmax.f32 %v6246_v43, 0.0  ;;  %6457 = vmatmul.mubr.bf16.gmra.mrb[184].mxu0 %v14562_v63  ;;  %7811 = vmatmul.mubr.bf16.gmra.mrb[120].mxu1 %v14565_v40  ;;  %v14576_v43 = vld [vmem:[#allocation5 + $0xe24] ss:$24 sps:$4 sm:$0xff]  }
 0x6be   : > { %6464 = vmatprep.mubr.bf16.mxu0 %v14570_v11  ;;  %7818 = vmatprep.mubr.bf16.mxu1 %v14573_v20  ;;  %v12021_v21 = vpop.f32.mrb[16].mxu1  ;;  %v17913_v40 = vld [vmem:[#allocation63_spill] sm:$0xff] }
 0x6bf   : > { %v16746_v53 = vpack.c.bf16 %v6734_v39, %v6733_v56  ;;  %v12022_v33 = vpop.f32.mrb[17].mxu1 }
 0x6c0   : > { %v6250_v36 = vpop.f32.mrb[40].mxu0  ;;  %v16748_v7 = vadd.f32 %v12022_v33, %v12021_v21  ;;  %v12024_v29 = vpop.f32.mrb[18].mxu1 }
 0x6c1   : > { %17912 = vst [vmem:[#allocation53_spill] sm:$0xff] %v16746_v53  ;;  %v6251_v57 = vadd.f32 %v6250_v36, %v15782_v35  ;;  %v6252_v37 = vpop.f32.mrb[41].mxu0  ;;  %v12025_v55 = vpop.f32.mrb[19].mxu1  ;;  %v17916_v53 = vld [vmem:[#allocation64_spill] sm:$0xff] }
 0x6c2   : > { %v6253_v38 = vpop.f32.mrb[42].mxu0  ;;  %v16751_v63 = vadd.f32 %v12025_v55, %v12024_v29  ;;  %v14574_v55 = vld [vmem:[#allocation5 + $0xe20] ss:$24 sps:$4 sm:$0xff]  }
 0x6c3   : > { %v6254_v11 = vadd.f32 %v6253_v38, %v17913_v40  ;;  %v6255_v20 = vpop.f32.mrb[43].mxu0  ;;  %v6735_v51 = vmax.f32 %v6251_v57, 0.0  ;;  %v14579_v40 = vld [vmem:[#allocation5 + $0xe54] ss:$24 sps:$4 sm:$0xff]  }
 0x6c5   : > { %v6736_v56 = vmax.f32 %v6254_v11, 0.0  ;;  %6465 = vmatmul.mubr.bf16.gmra.mrb[188].mxu0 %v14568_v19  ;;  %7819 = vmatmul.mubr.bf16.gmra.mrb[124].mxu1 %v14571_v41  ;;  %v17918_v19 = vld [vmem:[#allocation65_spill] sm:$0xff] }
 0x6c6   : > { %6472 = vmatprep.mubr.bf16.mxu0 %v14576_v43  ;;  %v12027_v39 = vpop.f32.mrb[20].mxu1 }
 0x6c7   : > { %v16754_v21 = vpack.c.bf16 %v6736_v56, %v6735_v51  ;;  %v12028_v35 = vpop.f32.mrb[21].mxu1 }
 0x6c8   : > { %v6258_v33 = vpop.f32.mrb[44].mxu0  ;;  %v16756_v36 = vadd.f32 %v12028_v35, %v12027_v39  ;;  %v12030_v37 = vpop.f32.mrb[22].mxu1 }
 0x6c9   : > { %17914 = vst [vmem:[#allocation54_spill] sm:$0xff] %v16754_v21  ;;  %v6259_v62 = vadd.f32 %v6258_v33, %v17916_v53  ;;  %v6260_v29 = vpop.f32.mrb[45].mxu0  ;;  %v12031_v59 = vpop.f32.mrb[23].mxu1 }
 0x6ca   : > { %17915 = vst [vmem:[#allocation55_spill] sm:$0xff] %v16756_v36  ;;  %v6261_v38 = vpop.f32.mrb[46].mxu0  ;;  %v16759_v57 = vadd.f32 %v12031_v59, %v12030_v37  ;;  %v17921_v29 = vld [vmem:[#allocation66_spill] sm:$0xff]  ;;  %v14577_v59 = vld [vmem:[#allocation5 + $0xe50] ss:$24 sps:$4 sm:$0xff]  }
 0x6cb   : > { %v6262_v41 = vadd.f32 %v6261_v38, %v17918_v19  ;;  %v6263_v43 = vpop.f32.mrb[47].mxu0  ;;  %v6737_v11 = vmax.f32 %v6259_v62, 0.0  ;;  %v14582_v38 = vld [vmem:[#allocation5 + $0xe84] ss:$24 sps:$4 sm:$0xff]  }
 0x6cc   : > { %17917 = vst [vmem:[#allocation56_spill] sm:$0xff] %v16759_v57  ;;  %v17923_v62 = vld [vmem:[#allocation67_spill] sm:$0xff] }
 0x6cd   : > { %v6738_v20 = vmax.f32 %v6262_v41, 0.0  ;;  %6473 = vmatmul.mubr.bf16.gmra.mrb[192].mxu0 %v14574_v55 }
 0x6ce   : > { %6480 = vmatprep.mubr.bf16.mxu0 %v14579_v40  ;;  %v12033_v51 = vpop.f32.mrb[24].mxu1 }
 0x6cf   : > { %v16762_v56 = vpack.c.bf16 %v6738_v20, %v6737_v11  ;;  %v12034_v39 = vpop.f32.mrb[25].mxu1 }
 0x6d0   : > { %v6266_v35 = vpop.f32.mrb[48].mxu0  ;;  %v16764_v53 = vadd.f32 %v12034_v39, %v12033_v51  ;;  %v12036_v33 = vpop.f32.mrb[26].mxu1 }
 0x6d1   : > { %17919 = vst [vmem:[#allocation57_spill] sm:$0xff] %v16762_v56  ;;  %v6267_v21 = vadd.f32 %v6266_v35, %v17921_v29  ;;  %v6268_v36 = vpop.f32.mrb[49].mxu0  ;;  %v12037_v37 = vpop.f32.mrb[27].mxu1  ;;  %v17926_v29 = vld [vmem:[#allocation68_spill] sm:$0xff] }
 0x6d2   : > { %17920 = vst [vmem:[#allocation58_spill] sm:$0xff] %v16764_v53  ;;  %v6269_v57 = vpop.f32.mrb[50].mxu0  ;;  %v16767_v19 = vadd.f32 %v12037_v37, %v12036_v33  ;;  %v14580_v33 = vld [vmem:[#allocation5 + $0xe80] ss:$24 sps:$4 sm:$0xff]  }
 0x6d3   : > { %v6270_v55 = vadd.f32 %v6269_v57, %v17923_v62  ;;  %v6271_v40 = vpop.f32.mrb[51].mxu0  ;;  %v6739_v41 = vmax.f32 %v6267_v21, 0.0  ;;  %v14585_v57 = vld [vmem:[#allocation5 + $0xeb4] ss:$24 sps:$4 sm:$0xff]  }
 0x6d4   : > { %17922 = vst [vmem:[#allocation59_spill] sm:$0xff] %v16767_v19  ;;  %v17928_v21 = vld [vmem:[#allocation69_spill] sm:$0xff] }
 0x6d5   : > { %v6740_v43 = vmax.f32 %v6270_v55, 0.0  ;;  %6481 = vmatmul.mubr.bf16.gmra.mrb[196].mxu0 %v14577_v59 }
 0x6d6   : > { %6488 = vmatprep.mubr.bf16.mxu0 %v14582_v38  ;;  %v12039_v11 = vpop.f32.mrb[28].mxu1 }
 0x6d7   : > { %v16770_v20 = vpack.c.bf16 %v6740_v43, %v6739_v41  ;;  %v12040_v51 = vpop.f32.mrb[29].mxu1 }
 0x6d8   : > { %v6274_v39 = vpop.f32.mrb[52].mxu0  ;;  %v16772_v35 = vadd.f32 %v12040_v51, %v12039_v11  ;;  %v12042_v36 = vpop.f32.mrb[30].mxu1 }
 0x6d9   : > { %17924 = vst [vmem:[#allocation60_spill] sm:$0xff] %v16770_v20  ;;  %v6275_v56 = vadd.f32 %v6274_v39, %v17926_v29  ;;  %v6276_v53 = vpop.f32.mrb[53].mxu0  ;;  %v12043_v37 = vpop.f32.mrb[31].mxu1  ;;  %v17931_v29 = vld [vmem:[#allocation70_spill] sm:$0xff] }
 0x6da   : > { %17925 = vst [vmem:[#allocation61_spill] sm:$0xff] %v16772_v35  ;;  %v6277_v19 = vpop.f32.mrb[54].mxu0  ;;  %v16775_v62 = vadd.f32 %v12043_v37, %v12042_v36  ;;  %v14583_v36 = vld [vmem:[#allocation5 + $0xeb0] ss:$24 sps:$4 sm:$0xff]  }
 0x6db   : > { %v6278_v59 = vadd.f32 %v6277_v19, %v17928_v21  ;;  %v6279_v38 = vpop.f32.mrb[55].mxu0  ;;  %v6741_v55 = vmax.f32 %v6275_v56, 0.0  ;;  %v14588_v19 = vld [vmem:[#allocation5 + $0xee4] ss:$24 sps:$4 sm:$0xff]  }
 0x6dc   : > { %17927 = vst [vmem:[#allocation62_spill] sm:$0xff] %v16775_v62  ;;  %v17933_v56 = vld [vmem:[#allocation71_spill] sm:$0xff] }
 0x6dd   : > { %v6742_v40 = vmax.f32 %v6278_v59, 0.0  ;;  %6489 = vmatmul.mubr.bf16.gmra.mrb[200].mxu0 %v14580_v33 }
 0x6de   : > { %6496 = vmatprep.mubr.bf16.mxu0 %v14585_v57  ;;  %v12045_v41 = vpop.f32.mrb[32].mxu1 }
 0x6df   : > { %v16778_v43 = vpack.c.bf16 %v6742_v40, %v6741_v55  ;;  %v12046_v11 = vpop.f32.mrb[33].mxu1 }
 0x6e0   : > { %v6282_v51 = vpop.f32.mrb[56].mxu0  ;;  %v16780_v39 = vadd.f32 %v12046_v11, %v12045_v41  ;;  %v12048_v53 = vpop.f32.mrb[34].mxu1 }
 0x6e1   : > { %17929 = vst [vmem:[#allocation63_spill] sm:$0xff] %v16778_v43  ;;  %v6283_v20 = vadd.f32 %v6282_v51, %v17931_v29  ;;  %v6284_v35 = vpop.f32.mrb[57].mxu0  ;;  %v12049_v37 = vpop.f32.mrb[35].mxu1  ;;  %v17935_v29 = vld [vmem:[#allocation72_spill] sm:$0xff] }
 0x6e2   : > { %17930 = vst [vmem:[#allocation64_spill] sm:$0xff] %v16780_v39  ;;  %v6285_v62 = vpop.f32.mrb[58].mxu0  ;;  %v16783_v21 = vadd.f32 %v12049_v37, %v12048_v53  ;;  %v14586_v53 = vld [vmem:[#allocation5 + $0xee0] ss:$24 sps:$4 sm:$0xff]  }
 0x6e3   : > { %v6286_v33 = vadd.f32 %v6285_v62, %v17933_v56  ;;  %v6287_v57 = vpop.f32.mrb[59].mxu0  ;;  %v6743_v59 = vmax.f32 %v6283_v20, 0.0  ;;  %v14591_v62 = vld [vmem:[#allocation5 + $0xf14] ss:$24 sps:$4 sm:$0xff]  }
 0x6e4   : > { %17932 = vst [vmem:[#allocation65_spill] sm:$0xff] %v16783_v21  ;;  %v17937_v20 = vld [vmem:[#allocation73_spill] sm:$0xff] }
 0x6e5   : > { %v6744_v38 = vmax.f32 %v6286_v33, 0.0  ;;  %6497 = vmatmul.mubr.bf16.gmra.mrb[204].mxu0 %v14583_v36 }
 0x6e6   : > { %6504 = vmatprep.mubr.bf16.mxu0 %v14588_v19  ;;  %v12051_v55 = vpop.f32.mrb[36].mxu1 }
 0x6e7   : > { %v16786_v40 = vpack.c.bf16 %v6744_v38, %v6743_v59  ;;  %v12052_v41 = vpop.f32.mrb[37].mxu1 }
 0x6e8   : > { %v6290_v11 = vpop.f32.mrb[60].mxu0  ;;  %v16788_v51 = vadd.f32 %v12052_v41, %v12051_v55  ;;  %v12054_v35 = vpop.f32.mrb[38].mxu1 }
 0x6e9   : > { %17934 = vst [vmem:[#allocation66_spill] sm:$0xff] %v16786_v40  ;;  %v6291_v43 = vadd.f32 %v6290_v11, %v17935_v29  ;;  %v6292_v39 = vpop.f32.mrb[61].mxu0  ;;  %v12055_v37 = vpop.f32.mrb[39].mxu1 }
 0x6ea   : > { %v6293_v21 = vpop.f32.mrb[62].mxu0  ;;  %v16791_v56 = vadd.f32 %v12055_v37, %v12054_v35  ;;  %v14589_v35 = vld [vmem:[#allocation5 + $0xf10] ss:$24 sps:$4 sm:$0xff]  }
 0x6eb   : > { %v6294_v36 = vadd.f32 %v6293_v21, %v17937_v20  ;;  %v6295_v19 = vpop.f32.mrb[63].mxu0  ;;  %v6745_v33 = vmax.f32 %v6291_v43, 0.0  ;;  %v14594_v21 = vld [vmem:[#allocation5 + $0xf44] ss:$24 sps:$4 sm:$0xff]  }
 0x6ec   : > { %17936 = vst [vmem:[#allocation67_spill] sm:$0xff] %v16791_v56 }
 0x6ed   : > { %v6746_v57 = vmax.f32 %v6294_v36, 0.0  ;;  %6505 = vmatmul.mubr.bf16.gmra.mrb[208].mxu0 %v14586_v53 }
 0x6ee   : > { %6512 = vmatprep.mubr.bf16.mxu0 %v14591_v62  ;;  %v12057_v59 = vpop.f32.mrb[40].mxu1 }
 0x6ef   : > { %v16794_v38 = vpack.c.bf16 %v6746_v57, %v6745_v33  ;;  %v12058_v55 = vpop.f32.mrb[41].mxu1 }
 0x6f0   : > { %v6298_v41 = vpop.f32.mrb[64].mxu0  ;;  %v16796_v11 = vadd.f32 %v12058_v55, %v12057_v59  ;;  %v12060_v39 = vpop.f32.mrb[42].mxu1 }
 0x6f1   : > { %17938 = vst [vmem:[#allocation68_spill] sm:$0xff] %v16794_v38  ;;  %v6299_v29 = vadd.f32 %v6298_v41, %v15862_v17  ;;  %v6300_v40 = vpop.f32.mrb[65].mxu0  ;;  %v12061_v37 = vpop.f32.mrb[43].mxu1 }
 0x6f2   : > { %v6301_v56 = vpop.f32.mrb[66].mxu0  ;;  %v16799_v20 = vadd.f32 %v12061_v37, %v12060_v39  ;;  %v14592_v39 = vld [vmem:[#allocation5 + $0xf40] ss:$24 sps:$4 sm:$0xff]  }
 0x6f3   : > { %v6302_v43 = vadd.f32 %v6301_v56, %v15865_v52  ;;  %v6303_v53 = vpop.f32.mrb[67].mxu0  ;;  %v6747_v62 = vmax.f32 %v6299_v29, 0.0  ;;  %v14597_v52 = vld [vmem:[#allocation5 + $0xf74] ss:$24 sps:$4 sm:$0xff]  }
 0x6f5   : > { %v6748_v36 = vmax.f32 %v6302_v43, 0.0  ;;  %6513 = vmatmul.mubr.bf16.gmra.mrb[212].mxu0 %v14589_v35 }
 0x6f6   : > { %6520 = vmatprep.mubr.bf16.mxu0 %v14594_v21  ;;  %v12063_v19 = vpop.f32.mrb[44].mxu1 }
 0x6f7   : > { %v16802_v33 = vpack.c.bf16 %v6748_v36, %v6747_v62  ;;  %v12064_v57 = vpop.f32.mrb[45].mxu1 }
 0x6f8   : > { %v6306_v59 = vpop.f32.mrb[68].mxu0  ;;  %v16804_v17 = vadd.f32 %v12064_v57, %v12063_v19  ;;  %v12066_v40 = vpop.f32.mrb[46].mxu1 }
 0x6f9   : > { %17939 = vst [vmem:[#allocation69_spill] sm:$0xff] %v16802_v33  ;;  %v6307_v55 = vadd.f32 %v6306_v59, %v15868_v31  ;;  %v6308_v41 = vpop.f32.mrb[69].mxu0  ;;  %v12067_v37 = vpop.f32.mrb[47].mxu1 }
 0x6fa   : > { %v6309_v38 = vpop.f32.mrb[70].mxu0  ;;  %v16807_v56 = vadd.f32 %v12067_v37, %v12066_v40  ;;  %v14595_v40 = vld [vmem:[#allocation5 + $0xf70] ss:$24 sps:$4 sm:$0xff]  }
 0x6fb   : > { %v6310_v29 = vadd.f32 %v6309_v38, %v15871_v5  ;;  %v6311_v35 = vpop.f32.mrb[71].mxu0  ;;  %v6749_v21 = vmax.f32 %v6307_v55, 0.0  ;;  %v14600_v5 = vld [vmem:[#allocation5 + $0xfa4] ss:$24 sps:$4 sm:$0xff]  }
 0x6fd   : > { %v6750_v43 = vmax.f32 %v6310_v29, 0.0  ;;  %6521 = vmatmul.mubr.bf16.gmra.mrb[216].mxu0 %v14592_v39 }
 0x6fe   : > { %6528 = vmatprep.mubr.bf16.mxu0 %v14597_v52  ;;  %v12069_v53 = vpop.f32.mrb[48].mxu1 }
 0x6ff   : > { %v16810_v62 = vpack.c.bf16 %v6750_v43, %v6749_v21  ;;  %v12070_v36 = vpop.f32.mrb[49].mxu1 }
 0x700   : > { %v6314_v19 = vpop.f32.mrb[72].mxu0  ;;  %v16812_v31 = vadd.f32 %v12070_v36, %v12069_v53  ;;  %v12072_v57 = vpop.f32.mrb[50].mxu1 }
 0x701   : > { %17940 = vst [vmem:[#allocation70_spill] sm:$0xff] %v16810_v62  ;;  %v6315_v59 = vadd.f32 %v6314_v19, %v15874_v60  ;;  %v6316_v41 = vpop.f32.mrb[73].mxu0  ;;  %v12073_v37 = vpop.f32.mrb[51].mxu1 }
 0x702   : > { %v6317_v33 = vpop.f32.mrb[74].mxu0  ;;  %v16815_v38 = vadd.f32 %v12073_v37, %v12072_v57  ;;  %v14598_v57 = vld [vmem:[#allocation5 + $0xfa0] ss:$24 sps:$4 sm:$0xff]  }
 0x703   : > { %v6318_v55 = vadd.f32 %v6317_v33, %v15877_v44  ;;  %v6319_v39 = vpop.f32.mrb[75].mxu0  ;;  %v6751_v52 = vmax.f32 %v6315_v59, 0.0  ;;  %v14603_v44 = vld [vmem:[#allocation5 + $0xfd4] ss:$24 sps:$4 sm:$0xff]  }
 0x705   : > { %v6752_v29 = vmax.f32 %v6318_v55, 0.0  ;;  %6529 = vmatmul.mubr.bf16.gmra.mrb[220].mxu0 %v14595_v40 }
 0x706   : > { %6536 = vmatprep.mubr.bf16.mxu0 %v14600_v5  ;;  %v12075_v35 = vpop.f32.mrb[52].mxu1 }
 0x707   : > { %v16818_v21 = vpack.c.bf16 %v6752_v29, %v6751_v52  ;;  %v12076_v43 = vpop.f32.mrb[53].mxu1 }
 0x708   : > { %v6322_v53 = vpop.f32.mrb[76].mxu0  ;;  %v16820_v60 = vadd.f32 %v12076_v43, %v12075_v35  ;;  %v12078_v36 = vpop.f32.mrb[54].mxu1 }
 0x709   : > { %17941 = vst [vmem:[#allocation71_spill] sm:$0xff] %v16818_v21  ;;  %v6323_v19 = vadd.f32 %v6322_v53, %v15880_v8  ;;  %v6324_v41 = vpop.f32.mrb[77].mxu0  ;;  %v12079_v37 = vpop.f32.mrb[55].mxu1 }
 0x70a   : > { %v6325_v62 = vpop.f32.mrb[78].mxu0  ;;  %v16823_v33 = vadd.f32 %v12079_v37, %v12078_v36  ;;  %v14601_v36 = vld [vmem:[#allocation5 + $0xfd0] ss:$24 sps:$4 sm:$0xff]  }
 0x70b   : > { %v6326_v59 = vadd.f32 %v6325_v62, %v15883_v27  ;;  %v6327_v40 = vpop.f32.mrb[79].mxu0  ;;  %v6753_v5 = vmax.f32 %v6323_v19, 0.0  ;;  %v14606_v27 = vld [vmem:[#allocation5 + $0x1004] ss:$24 sps:$4 sm:$0xff]  }
 0x70d   : > { %v6754_v55 = vmax.f32 %v6326_v59, 0.0  ;;  %6537 = vmatmul.mubr.bf16.gmra.mrb[224].mxu0 %v14598_v57 }
 0x70e   : > { %6544 = vmatprep.mubr.bf16.mxu0 %v14603_v44  ;;  %v12081_v39 = vpop.f32.mrb[56].mxu1 }
 0x70f   : > { %v16826_v52 = vpack.c.bf16 %v6754_v55, %v6753_v5  ;;  %v12082_v29 = vpop.f32.mrb[57].mxu1 }
 0x710   : > { %v6330_v35 = vpop.f32.mrb[80].mxu0  ;;  %v16828_v8 = vadd.f32 %v12082_v29, %v12081_v39  ;;  %v12084_v43 = vpop.f32.mrb[58].mxu1 }
 0x711   : > { %17942 = vst [vmem:[#allocation72_spill] sm:$0xff] %v16826_v52  ;;  %v6331_v53 = vadd.f32 %v6330_v35, %v15886_v24  ;;  %v6332_v41 = vpop.f32.mrb[81].mxu0  ;;  %v12085_v37 = vpop.f32.mrb[59].mxu1 }
 0x712   : > { %v6333_v21 = vpop.f32.mrb[82].mxu0  ;;  %v16831_v62 = vadd.f32 %v12085_v37, %v12084_v43  ;;  %v14604_v43 = vld [vmem:[#allocation5 + $0x1000] ss:$24 sps:$4 sm:$0xff]  }
 0x713   : > { %v6334_v19 = vadd.f32 %v6333_v21, %v15889_v23  ;;  %v6335_v57 = vpop.f32.mrb[83].mxu0  ;;  %v6755_v44 = vmax.f32 %v6331_v53, 0.0  ;;  %v14609_v23 = vld [vmem:[#allocation5 + $0x1034] ss:$24 sps:$4 sm:$0xff]  }
 0x715   : > { %v6756_v59 = vmax.f32 %v6334_v19, 0.0  ;;  %6545 = vmatmul.mubr.bf16.gmra.mrb[228].mxu0 %v14601_v36 }
 0x716   : > { %6552 = vmatprep.mubr.bf16.mxu0 %v14606_v27  ;;  %v12087_v40 = vpop.f32.mrb[60].mxu1 }
 0x717   : > { %v16834_v5 = vpack.c.bf16 %v6756_v59, %v6755_v44  ;;  %v12088_v55 = vpop.f32.mrb[61].mxu1 }
 0x718   : > { %v6338_v39 = vpop.f32.mrb[84].mxu0  ;;  %v16836_v24 = vadd.f32 %v12088_v55, %v12087_v40  ;;  %v12090_v29 = vpop.f32.mrb[62].mxu1  ;;  %v14607_v55 = vld [vmem:[#allocation5 + $0x1030] ss:$24 sps:$4 sm:$0xff]  }
 0x719   : > { %17943 = vst [vmem:[#allocation73_spill] sm:$0xff] %v16834_v5  ;;  %v6339_v35 = vadd.f32 %v6338_v39, %v15892_v12  ;;  %v6340_v41 = vpop.f32.mrb[85].mxu0  ;;  %v12091_v37 = vpop.f32.mrb[63].mxu1  ;;  %v14612_v5 = vld [vmem:[#allocation5 + $0x1064] ss:$24 sps:$4 sm:$0xff]  }
 0x71a   : > { %v6341_v52 = vpop.f32.mrb[86].mxu0  ;;  %v16839_v21 = vadd.f32 %v12091_v37, %v12090_v29 }
 0x71b   : > { %v6342_v53 = vadd.f32 %v6341_v52, %v15895_v15  ;;  %v6343_v36 = vpop.f32.mrb[87].mxu0  ;;  %v6757_v27 = vmax.f32 %v6339_v35, 0.0  ;;  %v7540_v15 = vadd.f32 %v16716_v4, %v16312_v47 }
 0x71c   : > { %v7543_v36 = vadd.f32 %v16719_v1, %v16326_v26  ;;  %v14615_v26 = vld [vmem:[#allocation5 + $0x1094] ss:$24 sps:$4 sm:$0xff]  }
 0x71d   : > { %v6758_v19 = vmax.f32 %v6342_v53, 0.0  ;;  %6553 = vmatmul.mubr.bf16.gmra.mrb[232].mxu0 %v14604_v43 }
 0x71e   : > { %6560 = vmatprep.mubr.bf16.mxu0 %v14609_v23 }
 0x71f   : > { %v16842_v57 = vpack.c.bf16 %v6758_v19, %v6757_v27  ;;  %v14639_v19 = vld [vmem:[#allocation8 + $0x4] ss:$8 sps:$4 sm:$0xff]  }
 0x720   : > { %v6346_v44 = vpop.f32.mrb[88].mxu0  ;;  %v12109_v59 = vpop.f32.mrb[64].mxu1  ;;  %8099 = vmatprep.mubr.bf16.mxu1 %v14639_v19 }
 0x721   : > { %v6347_v12 = vadd.f32 %v6346_v44, %v15898_v16  ;;  %v6348_v40 = vpop.f32.mrb[89].mxu0  ;;  %v12110_v39 = vpop.f32.mrb[65].mxu1 }
 0x722   : > { %v6349_v41 = vpop.f32.mrb[90].mxu0  ;;  %v12111_v29 = vadd.f32 %v12110_v39, %v12109_v59  ;;  %v12112_v37 = vpop.f32.mrb[66].mxu1 }
 0x723   : > { %v6350_v52 = vadd.f32 %v6349_v41, %v15901_v0  ;;  %v6351_v35 = vpop.f32.mrb[91].mxu0  ;;  %v12113_v43 = vpop.f32.mrb[67].mxu1  ;;  %v6759_v16 = vmax.f32 %v6347_v12, 0.0 }
 0x724   : > { %v12114_v23 = vadd.f32 %v12113_v43, %v12112_v37  ;;  %v7701_v53 = vadd.f32 %v12111_v29, %v7540_v15  ;;  %v14610_v29 = vld [vmem:[#allocation5 + $0x1060] ss:$24 sps:$4 sm:$0xff]  }
 0x725   : > { %v6760_v27 = vmax.f32 %v6350_v52, 0.0  ;;  %6561 = vmatmul.mubr.bf16.gmra.mrb[236].mxu0 %v14607_v55 }
 0x726   : > { %6568 = vmatprep.mubr.bf16.mxu0 %v14612_v5  ;;  %v7704_v44 = vadd.f32 %v12114_v23, %v7543_v36  ;;  %v7827_v47 = vmax.f32 %v7701_v53, 0.0  ;;  %v7548_v5 = vadd.f32 %v16724_v49, %v16339_v2 }
 0x727   : > { %v16850_v59 = vpack.c.bf16 %v6760_v27, %v6759_v16 }
 0x728   : > { %v6354_v40 = vpop.f32.mrb[92].mxu0  ;;  %v12115_v4 = vpop.f32.mrb[68].mxu1  ;;  %v7828_v0 = vmax.f32 %v7704_v44, 0.0 }
 0x729   : > { %v6355_v39 = vadd.f32 %v6354_v40, %v15904_v6  ;;  %v6356_v41 = vpop.f32.mrb[93].mxu0  ;;  %v12116_v37 = vpop.f32.mrb[69].mxu1  ;;  %v7551_v6 = vadd.f32 %v16727_v50, %v16365_v9 }
 0x72a   : > { %v6357_v15 = vpop.f32.mrb[94].mxu0  ;;  %v12117_v1 = vadd.f32 %v12116_v37, %v12115_v4  ;;  %v12118_v12 = vpop.f32.mrb[70].mxu1  ;;  %v16853_v55 = vpack.c.bf16 %v7828_v0, %v7827_v47  ;;  %v14613_v4 = vld [vmem:[#allocation5 + $0x1090] ss:$24 sps:$4 sm:$0xff]   ;;  %v14618_v37 = vld [vmem:[#allocation5 + $0x10c4] ss:$24 sps:$4 sm:$0xff]  }
 0x72b   : > { %v6358_v52 = vadd.f32 %v6357_v15, %v15907_v25  ;;  %v6359_v35 = vpop.f32.mrb[95].mxu0  ;;  %v12119_v43 = vpop.f32.mrb[71].mxu1  ;;  %v6761_v36 = vmax.f32 %v6355_v39, 0.0  ;;  %v7556_v39 = vadd.f32 %v16732_v45, %v16376_v46 }
 0x72c   : > { %v12120_v23 = vadd.f32 %v12119_v43, %v12118_v12  ;;  %v7709_v53 = vadd.f32 %v12117_v1, %v7548_v5 }
 0x72d   : > { %v6762_v16 = vmax.f32 %v6358_v52, 0.0  ;;  %6569 = vmatmul.mubr.bf16.gmra.mrb[240].mxu0 %v14610_v29 }
 0x72e   : > { %6576 = vmatprep.mubr.bf16.mxu0 %v14615_v26  ;;  %v7712_v27 = vadd.f32 %v12120_v23, %v7551_v6  ;;  %v7829_v47 = vmax.f32 %v7709_v53, 0.0 }
 0x72f   : > { %v16860_v19 = vpack.c.bf16 %v6762_v16, %v6761_v36  ;;  %v14616_v16 = vld [vmem:[#allocation5 + $0x10c0] ss:$24 sps:$4 sm:$0xff]  }
 0x730   : > { %v6362_v44 = vpop.f32.mrb[96].mxu0  ;;  %v12121_v40 = vpop.f32.mrb[72].mxu1  ;;  %v7830_v2 = vmax.f32 %v7712_v27, 0.0 }
 0x731   : > { %v6363_v25 = vadd.f32 %v6362_v44, %v15910_v10  ;;  %v6364_v49 = vpop.f32.mrb[97].mxu0  ;;  %v12122_v0 = vpop.f32.mrb[73].mxu1  ;;  %v7559_v10 = vadd.f32 %v16735_v28, %v16402_v3 }
 0x732   : > { %v6365_v41 = vpop.f32.mrb[98].mxu0  ;;  %v12123_v15 = vadd.f32 %v12122_v0, %v12121_v40  ;;  %v12124_v9 = vpop.f32.mrb[74].mxu1  ;;  %v16863_v50 = vpack.c.bf16 %v7830_v2, %v7829_v47  ;;  %v14621_v40 = vld [vmem:[#allocation5 + $0x10f4] ss:$24 sps:$4 sm:$0xff]   ;;  %v7564_v2 = vadd.f32 %v16740_v61, %v16415_v34 }
 0x733   : > { %v6366_v29 = vadd.f32 %v6365_v41, %v15913_v48  ;;  %v6367_v26 = vpop.f32.mrb[99].mxu0  ;;  %v12125_v1 = vpop.f32.mrb[75].mxu1  ;;  %v6763_v52 = vmax.f32 %v6363_v25, 0.0 }
 0x734   : > { %v12126_v12 = vadd.f32 %v12125_v1, %v12124_v9  ;;  %v7717_v5 = vadd.f32 %v12123_v15, %v7556_v39 }
 0x735   : > { %v6764_v35 = vmax.f32 %v6366_v29, 0.0  ;;  %6577 = vmatmul.mubr.bf16.gmra.mrb[244].mxu0 %v14613_v4 }
 0x736   : > { %6584 = vmatprep.mubr.bf16.mxu0 %v14618_v37  ;;  %v7720_v43 = vadd.f32 %v12126_v12, %v7559_v10  ;;  %v7831_v36 = vmax.f32 %v7717_v5, 0.0  ;;  %v14619_v12 = vld [vmem:[#allocation5 + $0x10f0] ss:$24 sps:$4 sm:$0xff]  }
 0x737   : > { %v16870_v23 = vpack.c.bf16 %v6764_v35, %v6763_v52  ;;  %v14624_v52 = vld [vmem:[#allocation5 + $0x1124] ss:$24 sps:$4 sm:$0xff]  }
 0x738   : > { %v6370_v53 = vpop.f32.mrb[100].mxu0  ;;  %v12127_v6 = vpop.f32.mrb[76].mxu1  ;;  %v7832_v46 = vmax.f32 %v7720_v43, 0.0  ;;  %v7572_v43 = vadd.f32 %v16748_v7, %v16458_v54 }
 0x739   : > { %v6371_v48 = vadd.f32 %v6370_v53, %v15916_v30  ;;  %v6372_v45 = vpop.f32.mrb[101].mxu0  ;;  %v12128_v27 = vpop.f32.mrb[77].mxu1  ;;  %v7567_v30 = vadd.f32 %v16743_v13, %v16441_v14 }
 0x73a   : > { %v6373_v44 = vpop.f32.mrb[102].mxu0  ;;  %v12129_v47 = vadd.f32 %v12128_v27, %v12127_v6  ;;  %v12130_v3 = vpop.f32.mrb[78].mxu1  ;;  %v16873_v28 = vpack.c.bf16 %v7832_v46, %v7831_v36 }
 0x73b   : > { %v6374_v25 = vadd.f32 %v6373_v44, %v15919_v18  ;;  %v6375_v49 = vpop.f32.mrb[103].mxu0  ;;  %v12131_v4 = vpop.f32.mrb[79].mxu1  ;;  %v6765_v37 = vmax.f32 %v6371_v48, 0.0 }
 0x73c   : > { %v12132_v0 = vadd.f32 %v12131_v4, %v12130_v3  ;;  %v7725_v41 = vadd.f32 %v12129_v47, %v7564_v2  ;;  %v14622_v2 = vld [vmem:[#allocation5 + $0x1120] ss:$24 sps:$4 sm:$0xff]   ;;  %v14627_v4 = vld [vmem:[#allocation5 + $0x1154] ss:$24 sps:$4 sm:$0xff]  }
 0x73d   : > { %v6766_v15 = vmax.f32 %v6374_v25, 0.0  ;;  %6585 = vmatmul.mubr.bf16.gmra.mrb[248].mxu0 %v14616_v16 }
 0x73e   : > { %6592 = vmatprep.mubr.bf16.mxu0 %v14621_v40  ;;  %v7728_v9 = vadd.f32 %v12132_v0, %v7567_v30  ;;  %v7833_v1 = vmax.f32 %v7725_v41, 0.0  ;;  %v17944_v41 = vld [vmem:[#allocation23_spill] sm:$0xff] }
 0x73f   : > { %v16880_v39 = vpack.c.bf16 %v6766_v15, %v6765_v37  ;;  %v17945_v30 = vld [vmem:[#allocation55_spill] sm:$0xff]  ;;  %v17946_v15 = vld [vmem:[#allocation74_spill] sm:$0xff] }
 0x740   : > { %v6378_v29 = vpop.f32.mrb[104].mxu0  ;;  %v12133_v26 = vpop.f32.mrb[80].mxu1  ;;  %v7834_v34 = vmax.f32 %v7728_v9, 0.0  ;;  %v7580_v37 = vadd.f32 %v17945_v30, %v17944_v41  ;;  %v17955_v41 = vld [vmem:[#allocation59_spill] sm:$0xff] }
 0x741   : > { %v6379_v18 = vadd.f32 %v6378_v29, %v15922_v32  ;;  %v6380_v61 = vpop.f32.mrb[105].mxu0  ;;  %v12134_v5 = vpop.f32.mrb[81].mxu1  ;;  %v7575_v32 = vadd.f32 %v16751_v63, %v16477_v58 }
 0x742   : > { %v6381_v10 = vpop.f32.mrb[106].mxu0  ;;  %v12135_v35 = vadd.f32 %v12134_v5, %v12133_v26  ;;  %v12136_v14 = vpop.f32.mrb[82].mxu1  ;;  %v16883_v13 = vpack.c.bf16 %v7834_v34, %v7833_v1 }
 0x743   : > { %v6382_v53 = vadd.f32 %v6381_v10, %v15925_v22  ;;  %v6383_v6 = vpop.f32.mrb[107].mxu0  ;;  %v12137_v36 = vpop.f32.mrb[83].mxu1  ;;  %v6767_v45 = vmax.f32 %v6379_v18, 0.0  ;;  %v17947_v18 = vld [vmem:[#allocation25_spill] sm:$0xff] }
 0x744   : > { %v12138_v46 = vadd.f32 %v12137_v36, %v12136_v14  ;;  %v7733_v48 = vadd.f32 %v12135_v35, %v7572_v43  ;;  %v17950_v6 = vld [vmem:[#allocation75_spill] sm:$0xff] }
 0x745   : > { %v6768_v16 = vmax.f32 %v6382_v53, 0.0  ;;  %6593 = vmatmul.mubr.bf16.gmra.mrb[252].mxu0 %v14619_v12 }
 0x746   : > { %6600 = vmatprep.mubr.bf16.mxu0 %v14624_v52  ;;  %v7736_v27 = vadd.f32 %v12138_v46, %v7575_v32  ;;  %v7835_v3 = vmax.f32 %v7733_v48, 0.0  ;;  %v14625_v48 = vld [vmem:[#allocation5 + $0x1150] ss:$24 sps:$4 sm:$0xff]  }
 0x747   : > { %v16890_v44 = vpack.c.bf16 %v6768_v16, %v6767_v45  ;;  %v14630_v16 = vld [vmem:[#allocation5 + $0x1184] ss:$24 sps:$4 sm:$0xff]  }
 0x748   : > { %v6386_v40 = vpop.f32.mrb[108].mxu0  ;;  %v12139_v47 = vpop.f32.mrb[84].mxu1  ;;  %v7836_v54 = vmax.f32 %v7736_v27, 0.0 }
 0x749   : > { %v6387_v22 = vadd.f32 %v6386_v40, %v15928_v42  ;;  %v6388_v7 = vpop.f32.mrb[109].mxu0  ;;  %v12140_v25 = vpop.f32.mrb[85].mxu1  ;;  %v17948_v42 = vld [vmem:[#allocation56_spill] sm:$0xff] }
 0x74a   : > { %v6389_v49 = vpop.f32.mrb[110].mxu0  ;;  %v12141_v0 = vadd.f32 %v12140_v25, %v12139_v47  ;;  %v12142_v58 = vpop.f32.mrb[86].mxu1  ;;  %v16893_v63 = vpack.c.bf16 %v7836_v54, %v7835_v3  ;;  %v7583_v61 = vadd.f32 %v17948_v42, %v17947_v18  ;;  %v17951_v3 = vld [vmem:[#allocation26_spill] sm:$0xff]  ;;  %v17953_v7 = vld [vmem:[#allocation76_spill] sm:$0xff]  ;;  %v17957_v42 = vld [vmem:[#allocation77_spill] sm:$0xff] }
 0x74b   : > { %v6390_v9 = vadd.f32 %v6389_v49, %v17946_v15  ;;  %v6391_v29 = vpop.f32.mrb[111].mxu0  ;;  %v12143_v26 = vpop.f32.mrb[87].mxu1  ;;  %v6769_v12 = vmax.f32 %v6387_v22, 0.0  ;;  %v17952_v54 = vld [vmem:[#allocation58_spill] sm:$0xff] }
 0x74c   : > { %v12144_v1 = vadd.f32 %v12143_v26, %v12142_v58  ;;  %v7741_v34 = vadd.f32 %v12141_v0, %v7580_v37  ;;  %v7588_v22 = vadd.f32 %v17952_v54, %v17951_v3  ;;  %v17954_v58 = vld [vmem:[#allocation28_spill] sm:$0xff]  ;;  %v17961_v54 = vld [vmem:[#allocation31_spill] sm:$0xff] }
 0x74d   : > { %v6770_v5 = vmax.f32 %v6390_v9, 0.0  ;;  %6601 = vmatmul.mubr.bf16.gmra.mrb[148].mxu0 %v14622_v2  ;;  %v7591_v30 = vadd.f32 %v17955_v41, %v17954_v58 }
 0x74e   : > { %6608 = vmatprep.mubr.bf16.mxu0 %v14627_v4  ;;  %v7744_v10 = vadd.f32 %v12144_v1, %v7583_v61  ;;  %v7837_v43 = vmax.f32 %v7741_v34, 0.0 }
 0x74f   : > { %v16900_v52 = vpack.c.bf16 %v6770_v5, %v6769_v12  ;;  %v14628_v5 = vld [vmem:[#allocation5 + $0x1180] ss:$24 sps:$4 sm:$0xff]  }
 0x750   : > { %v6394_v35 = vpop.f32.mrb[112].mxu0  ;;  %v12145_v14 = vpop.f32.mrb[88].mxu1  ;;  %v7838_v53 = vmax.f32 %v7744_v10, 0.0 }
 0x751   : > { %17949 = vst [vmem:[#allocation23_spill] sm:$0xff] %v16900_v52  ;;  %v6395_v36 = vadd.f32 %v6394_v35, %v17950_v6  ;;  %v6396_v46 = vpop.f32.mrb[113].mxu0  ;;  %v12146_v32 = vpop.f32.mrb[89].mxu1 }
 0x752   : > { %v6397_v45 = vpop.f32.mrb[114].mxu0  ;;  %v12147_v27 = vadd.f32 %v12146_v32, %v12145_v14  ;;  %v12148_v40 = vpop.f32.mrb[90].mxu1  ;;  %v16903_v47 = vpack.c.bf16 %v7838_v53, %v7837_v43  ;;  %v14633_v14 = vld [vmem:[#allocation5 + $0x11b4] ss:$24 sps:$4 sm:$0xff]  }
 0x753   : > { %v6398_v2 = vadd.f32 %v6397_v45, %v17953_v7  ;;  %v6399_v25 = vpop.f32.mrb[115].mxu0  ;;  %v12149_v49 = vpop.f32.mrb[91].mxu1  ;;  %v6771_v37 = vmax.f32 %v6395_v36, 0.0  ;;  %v17958_v36 = vld [vmem:[#allocation29_spill] sm:$0xff]  ;;  %v17960_v32 = vld [vmem:[#allocation78_spill] sm:$0xff] }
 0x754   : > { %v12150_v4 = vadd.f32 %v12149_v49, %v12148_v40  ;;  %v7749_v0 = vadd.f32 %v12147_v27, %v7588_v22  ;;  %v17959_v46 = vld [vmem:[#allocation61_spill] sm:$0xff]  ;;  %v17962_v22 = vld [vmem:[#allocation62_spill] sm:$0xff] }
 0x755   : > { %v6772_v15 = vmax.f32 %v6398_v2, 0.0  ;;  %6609 = vmatmul.mubr.bf16.gmra.mrb[152].mxu0 %v14625_v48  ;;  %v7596_v48 = vadd.f32 %v17959_v46, %v17958_v36  ;;  %v7599_v7 = vadd.f32 %v17962_v22, %v17961_v54  ;;  %v17968_v46 = vld [vmem:[#allocation123_spill] sm:$0xff] }
 0x756   : > { %6616 = vmatprep.mubr.bf16.mxu0 %v14630_v16  ;;  %v7752_v9 = vadd.f32 %v12150_v4, %v7591_v30  ;;  %v7839_v34 = vmax.f32 %v7749_v0, 0.0 }
 0x757   : > { %v16910_v29 = vpack.c.bf16 %v6772_v15, %v6771_v37  ;;  %v17964_v37 = vld [vmem:[#allocation79_spill] sm:$0xff] }
 0x758   : > { %v6402_v26 = vpop.f32.mrb[116].mxu0  ;;  %v12151_v1 = vpop.f32.mrb[92].mxu1  ;;  %v7840_v18 = vmax.f32 %v7752_v9, 0.0 }
 0x759   : > { %17956 = vst [vmem:[#allocation55_spill] sm:$0xff] %v16910_v29  ;;  %v6403_v61 = vadd.f32 %v6402_v26, %v17957_v42  ;;  %v6404_v12 = vpop.f32.mrb[117].mxu0  ;;  %v12152_v10 = vpop.f32.mrb[93].mxu1  ;;  %v14631_v26 = vld [vmem:[#allocation5 + $0x11b0] ss:$24 sps:$4 sm:$0xff]  }
 0x75a   : > { %v6405_v35 = vpop.f32.mrb[118].mxu0  ;;  %v12153_v43 = vadd.f32 %v12152_v10, %v12151_v1  ;;  %v12154_v53 = vpop.f32.mrb[94].mxu1  ;;  %v16913_v6 = vpack.c.bf16 %v7840_v18, %v7839_v34  ;;  %v17965_v34 = vld [vmem:[#allocation121_spill] sm:$0xff]  ;;  %v17966_v18 = vld [vmem:[#allocation64_spill] sm:$0xff] }
 0x75b   : > { %v6406_v45 = vadd.f32 %v6405_v35, %v17960_v32  ;;  %v6407_v16 = vpop.f32.mrb[119].mxu0  ;;  %v12155_v27 = vpop.f32.mrb[95].mxu1  ;;  %v6773_v2 = vmax.f32 %v6403_v61, 0.0  ;;  %v7604_v42 = vadd.f32 %v17966_v18, %v17965_v34  ;;  %v14636_v61 = vld [vmem:[#allocation5 + $0x11e4] ss:$24 sps:$4 sm:$0xff]   ;;  %v17973_v18 = vld [vmem:[#allocation82_spill] sm:$0xff] }
 0x75c   : > { %v12156_v40 = vadd.f32 %v12155_v27, %v12154_v53  ;;  %v7757_v3 = vadd.f32 %v12153_v43, %v7596_v48  ;;  %v17969_v48 = vld [vmem:[#allocation65_spill] sm:$0xff] }
 0x75d   : > { %v6774_v25 = vmax.f32 %v6406_v45, 0.0  ;;  %6617 = vmatmul.mubr.bf16.gmra.mrb[156].mxu0 %v14628_v5  ;;  %v7607_v32 = vadd.f32 %v17969_v48, %v17968_v46 }
 0x75e   : > { %6624 = vmatprep.mubr.bf16.mxu0 %v14633_v14  ;;  %v7760_v49 = vadd.f32 %v12156_v40, %v7599_v7  ;;  %v7841_v41 = vmax.f32 %v7757_v3, 0.0  ;;  %v17967_v14 = vld [vmem:[#allocation80_spill] sm:$0xff] }
 0x75f   : > { %v16920_v4 = vpack.c.bf16 %v6774_v25, %v6773_v2 }
 0x760   : > { %v6410_v0 = vpop.f32.mrb[120].mxu0  ;;  %v12157_v58 = vpop.f32.mrb[96].mxu1  ;;  %v7842_v30 = vmax.f32 %v7760_v49, 0.0  ;;  %v17971_v49 = vld [vmem:[#allocation81_spill] sm:$0xff] }
 0x761   : > { %17963 = vst [vmem:[#allocation74_spill] sm:$0xff] %v16920_v4  ;;  %v6411_v15 = vadd.f32 %v6410_v0, %v17964_v37  ;;  %v6412_v9 = vpop.f32.mrb[121].mxu0  ;;  %v12158_v1 = vpop.f32.mrb[97].mxu1  ;;  %v17972_v37 = vld [vmem:[#allocation125_spill] sm:$0xff] }
 0x762   : > { %v6413_v12 = vpop.f32.mrb[122].mxu0  ;;  %v12159_v10 = vadd.f32 %v12158_v1, %v12157_v58  ;;  %v12160_v5 = vpop.f32.mrb[98].mxu1  ;;  %v16925_v35 = vpack.c.bf16 %v7842_v30, %v7841_v41  ;;  %v14634_v41 = vld [vmem:[#allocation5 + $0x11e0] ss:$24 sps:$4 sm:$0xff]   ;;  %v7612_v9 = vadd.f32 %v16788_v51, %v17972_v37 }
 0x763   : > { %v6414_v43 = vadd.f32 %v6413_v12, %v17967_v14  ;;  %v6415_v53 = vpop.f32.mrb[123].mxu0  ;;  %v12161_v36 = vpop.f32.mrb[99].mxu1  ;;  %v6775_v27 = vmax.f32 %v6411_v15, 0.0 }
 0x764   : > { %v7765_v45 = vadd.f32 %v12159_v10, %v7604_v42  ;;  %v12162_v16 = vadd.f32 %v12161_v36, %v12160_v5  ;;  %v17974_v10 = vld [vmem:[#allocation128_spill] sm:$0xff]  ;;  %v17975_v5 = vld [vmem:[#allocation67_spill] sm:$0xff] }
 0x765   : > { %v6776_v40 = vmax.f32 %v6414_v43, 0.0  ;;  %6625 = vmatmul.mubr.bf16.gmra.mrb[160].mxu0 %v14631_v26  ;;  %v7615_v14 = vadd.f32 %v17975_v5, %v17974_v10 }
 0x766   : > { %6632 = vmatprep.mubr.bf16.mxu0 %v14636_v61  ;;  %v7768_v3 = vadd.f32 %v12162_v16, %v7607_v32  ;;  %v7843_v2 = vmax.f32 %v7765_v45, 0.0 }
 0x767   : > { %v16930_v54 = vpack.c.bf16 %v6776_v40, %v6775_v27  ;;  %v17977_v40 = vld [vmem:[#allocation83_spill] sm:$0xff] }
 0x768   : > { %v6418_v22 = vpop.f32.mrb[124].mxu0  ;;  %v12163_v7 = vpop.f32.mrb[100].mxu1  ;;  %v7844_v25 = vmax.f32 %v7768_v3, 0.0 }
 0x769   : > { %17970 = vst [vmem:[#allocation25_spill] sm:$0xff] %v16930_v54  ;;  %v6419_v0 = vadd.f32 %v6418_v22, %v17971_v49  ;;  %v6420_v58 = vpop.f32.mrb[125].mxu0  ;;  %v12164_v30 = vpop.f32.mrb[101].mxu1 }
 0x76a   : > { %v6421_v1 = vpop.f32.mrb[126].mxu0  ;;  %v12165_v15 = vadd.f32 %v12164_v30, %v12163_v7  ;;  %v12166_v34 = vpop.f32.mrb[102].mxu1  ;;  %v7867_v26 = vpack.c.bf16 %v7844_v25, %v7843_v2  ;;  %v17978_v2 = vld [vmem:[#allocation131_spill] sm:$0xff]  ;;  %v17979_v30 = vld [vmem:[#allocation84_spill] sm:$0xff] }
 0x76b   : > { %v6422_v42 = vadd.f32 %v6421_v1, %v17973_v18  ;;  %v6423_v12 = vpop.f32.mrb[127].mxu0  ;;  %v12167_v61 = vpop.f32.mrb[103].mxu1  ;;  %v6777_v36 = vmax.f32 %v6419_v0, 0.0  ;;  %v7620_v25 = vadd.f32 %v16796_v11, %v17978_v2  ;;  %v17980_v1 = vld [vmem:[#allocation134_spill] sm:$0xff] }
 0x76c   : > { %v7773_v43 = vadd.f32 %v12165_v15, %v7612_v9  ;;  %v12168_v53 = vadd.f32 %v12167_v61, %v12166_v34  ;;  %12205 = vmatprep.subr.bf16.mxu1 %v7867_v26  ;;  %v7623_v15 = vadd.f32 %v16799_v20, %v17980_v1  ;;  %v17987_v1 = vld [vmem:[#allocation87_spill] sm:$0xff] }
 0x76d   : > { %v6778_v46 = vmax.f32 %v6422_v42, 0.0  ;;  %6633 = vmatmul.mubr.bf16.gmra.mrb[164].mxu0 %v14634_v41  ;;  %12206 = vmatpush3.bf16.msra.mxu1 %v16853_v55 }
 0x76e   : > { %v7776_v51 = vadd.f32 %v12168_v53, %v7615_v14  ;;  %v7845_v16 = vmax.f32 %v7773_v43, 0.0  ;;  %v17982_v43 = vld [vmem:[#allocation85_spill] sm:$0xff] }
 0x76f   : > { %v16939_v48 = vpack.c.bf16 %v6778_v46, %v6777_v36 }
 0x770   : > { %v6426_v32 = vpop.f32.mrb[168].mxu0  ;;  %v12169_v45 = vpop.f32.mrb[104].mxu1  ;;  %v7846_v27 = vmax.f32 %v7776_v51, 0.0  ;;  %v17983_v51 = vld [vmem:[#allocation135_spill] sm:$0xff] }
 0x771   : > { %17976 = vst [vmem:[#allocation56_spill] sm:$0xff] %v16939_v48  ;;  %v13132_v3 = vadd.f32 %v6426_v32, %v17977_v40  ;;  %v6428_v22 = vpop.f32.mrb[169].mxu0  ;;  %v12170_v7 = vpop.f32.mrb[105].mxu1  ;;  %v7628_v20 = vadd.f32 %v16804_v17, %v17983_v51  ;;  %v17984_v40 = vld [vmem:[#allocation86_spill] sm:$0xff] }
 0x772   : > { %v6429_v49 = vpop.f32.mrb[170].mxu0  ;;  %v12171_v0 = vadd.f32 %v12170_v7, %v12169_v45  ;;  %v12172_v58 = vpop.f32.mrb[106].mxu1  ;;  %v7868_v41 = vpack.c.bf16 %v7846_v27, %v7845_v16  ;;  %v17985_v7 = vld [vmem:[#allocation138_spill] sm:$0xff] }
 0x773   : > { %v13133_v55 = vadd.f32 %v6429_v49, %v17979_v30  ;;  %v6431_v37 = vpop.f32.mrb[171].mxu0  ;;  %v12173_v9 = vpop.f32.mrb[107].mxu1  ;;  %v6779_v18 = vmax.f32 %v13132_v3, 0.0  ;;  %v7631_v2 = vadd.f32 %v16807_v56, %v17985_v7 }
 0x774   : > { %v7781_v34 = vadd.f32 %v12171_v0, %v7620_v25  ;;  %v12174_v26 = vadd.f32 %v12173_v9, %v12172_v58  ;;  %12207 = vmatprep.subr.bf16.mxu1 %v7868_v41 }
 0x775   : > { %v6780_v42 = vmax.f32 %v13133_v55, 0.0  ;;  %12208 = vmatpush3.bf16.msra.mxu1 %v16863_v50 }
 0x776   : > { %v7784_v12 = vadd.f32 %v12174_v26, %v7623_v15  ;;  %v7847_v5 = vmax.f32 %v7781_v34, 0.0 }
 0x777   : > { %v16948_v11 = vpack.c.bf16 %v6780_v42, %v6779_v18  ;;  %v17988_v18 = vld [vmem:[#allocation141_spill] sm:$0xff] }
 0x778   : > { %v6434_v61 = vpop.f32.mrb[172].mxu0  ;;  %v12175_v10 = vpop.f32.mrb[108].mxu1  ;;  %v7848_v14 = vmax.f32 %v7784_v12, 0.0  ;;  %v7636_v56 = vadd.f32 %v16812_v31, %v17988_v18 }
 0x779   : > { %17981 = vst [vmem:[#allocation75_spill] sm:$0xff] %v16948_v11  ;;  %v13134_v53 = vadd.f32 %v6434_v61, %v17982_v43  ;;  %v6436_v36 = vpop.f32.mrb[173].mxu0  ;;  %v12176_v46 = vpop.f32.mrb[109].mxu1 }
 0x77a   : > { %v6437_v32 = vpop.f32.mrb[174].mxu0  ;;  %v12177_v45 = vadd.f32 %v12176_v46, %v12175_v10  ;;  %v12178_v16 = vpop.f32.mrb[110].mxu1  ;;  %v7869_v27 = vpack.c.bf16 %v7848_v14, %v7847_v5  ;;  %v17989_v5 = vld [vmem:[#allocation88_spill] sm:$0xff] }
 0x77b   : > { %v13135_v50 = vadd.f32 %v6437_v32, %v17984_v40  ;;  %v6439_v3 = vpop.f32.mrb[175].mxu0  ;;  %v12179_v22 = vpop.f32.mrb[111].mxu1  ;;  %v6781_v0 = vmax.f32 %v13134_v53, 0.0  ;;  %v17990_v53 = vld [vmem:[#allocation142_spill] sm:$0xff] }
 0x77c   : > { %v7789_v25 = vadd.f32 %v12177_v45, %v7628_v20  ;;  %v12180_v49 = vadd.f32 %v12179_v22, %v12178_v16  ;;  %12209 = vmatprep.subr.bf16.mxu1 %v7869_v27  ;;  %v7639_v36 = vadd.f32 %v16815_v38, %v17990_v53  ;;  %v17992_v3 = vld [vmem:[#allocation89_spill] sm:$0xff]  ;;  %v17998_v53 = vld [vmem:[#allocation144_spill] sm:$0xff] }
 0x77d   : > { %v6782_v58 = vmax.f32 %v13135_v50, 0.0  ;;  %12210 = vmatpush3.bf16.msra.mxu1 %v16873_v28 }
 0x77e   : > { %v7792_v41 = vadd.f32 %v12180_v49, %v7631_v2  ;;  %v7849_v37 = vmax.f32 %v7789_v25, 0.0  ;;  %v17993_v25 = vld [vmem:[#allocation21_spill] sm:$0xff] }
 0x77f   : > { %v16957_v17 = vpack.c.bf16 %v6782_v58, %v6781_v0  ;;  %v7644_v38 = vadd.f32 %v16820_v60, %v17993_v25 }
 0x780   : > { %v6442_v30 = vpop.f32.mrb[176].mxu0  ;;  %v12181_v55 = vpop.f32.mrb[112].mxu1  ;;  %v7850_v9 = vmax.f32 %v7792_v41, 0.0 }
 0x781   : > { %17986 = vst [vmem:[#allocation26_spill] sm:$0xff] %v16957_v17  ;;  %v13136_v15 = vadd.f32 %v6442_v30, %v17987_v1  ;;  %v6444_v34 = vpop.f32.mrb[177].mxu0  ;;  %v12182_v26 = vpop.f32.mrb[113].mxu1  ;;  %v17994_v30 = vld [vmem:[#allocation90_spill] sm:$0xff]  ;;  %v14726_v17 = vld [vmem:[#allocation7 + $0x2ac] ss:$16 sps:$4 sm:$0xff]  }
 0x782   : > { %v6445_v42 = vpop.f32.mrb[178].mxu0  ;;  %v12183_v12 = vadd.f32 %v12182_v26, %v12181_v55  ;;  %v12184_v61 = vpop.f32.mrb[114].mxu1  ;;  %v7870_v10 = vpack.c.bf16 %v7850_v9, %v7849_v37  ;;  %v17995_v9 = vld [vmem:[#allocation24_spill] sm:$0xff] }
 0x783   : > { %v13137_v28 = vadd.f32 %v6445_v42, %v17989_v5  ;;  %v6447_v14 = vpop.f32.mrb[179].mxu0  ;;  %v12185_v43 = vpop.f32.mrb[115].mxu1  ;;  %v6783_v20 = vmax.f32 %v13136_v15, 0.0  ;;  %v7647_v1 = vadd.f32 %v16823_v33, %v17995_v9  ;;  %v17997_v5 = vld [vmem:[#allocation91_spill] sm:$0xff]  ;;  %v7652_v33 = vadd.f32 %v16828_v8, %v17998_v53 }
 0x784   : > { %v7797_v46 = vadd.f32 %v12183_v12, %v7636_v56  ;;  %v12186_v51 = vadd.f32 %v12185_v43, %v12184_v61  ;;  %12211 = vmatprep.subr.bf16.mxu1 %v7870_v10 }
 0x785   : > { %v6784_v32 = vmax.f32 %v13137_v28, 0.0  ;;  %12212 = vmatpush3.bf16.msra.mxu1 %v16883_v13 }
 0x786   : > { %v7800_v45 = vadd.f32 %v12186_v51, %v7639_v36  ;;  %v7851_v40 = vmax.f32 %v7797_v46, 0.0 }
 0x787   : > { %v16966_v31 = vpack.c.bf16 %v6784_v32, %v6783_v20  ;;  %v17999_v32 = vld [vmem:[#allocation92_spill] sm:$0xff] }
 0x788   : > { %v6450_v16 = vpop.f32.mrb[180].mxu0  ;;  %v12187_v27 = vpop.f32.mrb[116].mxu1  ;;  %v7852_v50 = vmax.f32 %v7800_v45, 0.0 }
 0x789   : > { %17991 = vst [vmem:[#allocation58_spill] sm:$0xff] %v16966_v31  ;;  %v13138_v22 = vadd.f32 %v6450_v16, %v17992_v3  ;;  %v6452_v7 = vpop.f32.mrb[181].mxu0  ;;  %v12188_v2 = vpop.f32.mrb[117].mxu1 }
 0x78a   : > { %v6453_v49 = vpop.f32.mrb[182].mxu0  ;;  %v12189_v0 = vadd.f32 %v12188_v2, %v12187_v27  ;;  %v12190_v58 = vpop.f32.mrb[118].mxu1  ;;  %v7871_v41 = vpack.c.bf16 %v7852_v50, %v7851_v40  ;;  %v18000_v27 = vld [vmem:[#allocation145_spill] sm:$0xff] }
 0x78b   : > { %v13139_v13 = vadd.f32 %v6453_v49, %v17994_v30  ;;  %v6455_v55 = vpop.f32.mrb[183].mxu0  ;;  %v12191_v37 = vpop.f32.mrb[119].mxu1  ;;  %v6785_v26 = vmax.f32 %v13138_v22, 0.0  ;;  %v7655_v40 = vadd.f32 %v16831_v62, %v18000_v27 }
 0x78c   : > { %v7805_v15 = vadd.f32 %v12189_v0, %v7644_v38  ;;  %v12192_v34 = vadd.f32 %v12191_v37, %v12190_v58  ;;  %12213 = vmatprep.subr.bf16.mxu1 %v7871_v41  ;;  %v18002_v58 = vld [vmem:[#allocation93_spill] sm:$0xff]  ;;  %v18003_v55 = vld [vmem:[#allocation27_spill] sm:$0xff] }
 0x78d   : > { %v6786_v18 = vmax.f32 %v13139_v13, 0.0  ;;  %12214 = vmatpush3.bf16.msra.mxu1 %v16893_v63  ;;  %v7660_v62 = vadd.f32 %v16836_v24, %v18003_v55  ;;  %v18015_v55 = vld [vmem:[#allocation150_spill] sm:$0xff] }
 0x78e   : > { %v7808_v56 = vadd.f32 %v12192_v34, %v7647_v1  ;;  %v7853_v61 = vmax.f32 %v7805_v15, 0.0  ;;  %v18004_v34 = vld [vmem:[#allocation94_spill] sm:$0xff] }
 0x78f   : > { %v16975_v60 = vpack.c.bf16 %v6786_v18, %v6785_v26 }
 0x790   : > { %v6458_v42 = vpop.f32.mrb[184].mxu0  ;;  %v12193_v12 = vpop.f32.mrb[120].mxu1  ;;  %v7854_v10 = vmax.f32 %v7808_v56, 0.0  ;;  %v18005_v56 = vld [vmem:[#allocation30_spill] sm:$0xff] }
 0x791   : > { %17996 = vst [vmem:[#allocation76_spill] sm:$0xff] %v16975_v60  ;;  %v13140_v28 = vadd.f32 %v6458_v42, %v17997_v5  ;;  %v6460_v14 = vpop.f32.mrb[185].mxu0  ;;  %v12194_v43 = vpop.f32.mrb[121].mxu1  ;;  %v7663_v42 = vadd.f32 %v16839_v21, %v18005_v56  ;;  %v18020_v56 = vld [vmem:[#allocation50_spill] sm:$0xff] }
 0x792   : > { %v6461_v36 = vpop.f32.mrb[186].mxu0  ;;  %v12195_v46 = vadd.f32 %v12194_v43, %v12193_v12  ;;  %v12196_v51 = vpop.f32.mrb[122].mxu1  ;;  %v7872_v20 = vpack.c.bf16 %v7854_v10, %v7853_v61 }
 0x793   : > { %v13141_v63 = vadd.f32 %v6461_v36, %v17999_v32  ;;  %v6463_v45 = vpop.f32.mrb[187].mxu0  ;;  %v12197_v16 = vpop.f32.mrb[123].mxu1  ;;  %v6787_v22 = vmax.f32 %v13140_v28, 0.0  ;;  %v18008_v32 = vld [vmem:[#allocation96_spill] sm:$0xff] }
 0x794   : > { %v7813_v50 = vadd.f32 %v12195_v46, %v7652_v33  ;;  %v12198_v3 = vadd.f32 %v12197_v16, %v12196_v51  ;;  %12215 = vmatprep.subr.bf16.mxu1 %v7872_v20  ;;  %v18007_v33 = vld [vmem:[#allocation95_spill] sm:$0xff] }
 0x795   : > { %v6788_v7 = vmax.f32 %v13141_v63, 0.0  ;;  %12216 = vmatpush3.bf16.msra.mxu1 %v16903_v47  ;;  %v14637_v45 = vld [vmem:[#allocation8] ss:$8 sps:$4 sm:$0xff]  }
 0x796   : > { %v7816_v2 = vadd.f32 %v12198_v3, %v7655_v40  ;;  %v7855_v49 = vmax.f32 %v7813_v50, 0.0  ;;  %v18009_v40 = vld [vmem:[#allocation47_spill] sm:$0xff] }
 0x797   : > { %v16984_v8 = vpack.c.bf16 %v6788_v7, %v6787_v22  ;;  %v18011_v22 = vld [vmem:[#allocation97_spill] sm:$0xff] }
 0x798   : > { %v6466_v25 = vpop.f32.mrb[188].mxu0  ;;  %v12199_v38 = vpop.f32.mrb[124].mxu1  ;;  %v7856_v0 = vmax.f32 %v7816_v2, 0.0 }
 0x799   : > { %18001 = vst [vmem:[#allocation28_spill] sm:$0xff] %v16984_v8  ;;  %v13142_v41 = vadd.f32 %v6466_v25, %v18002_v58  ;;  %v6468_v30 = vpop.f32.mrb[189].mxu0  ;;  %v12200_v13 = vpop.f32.mrb[125].mxu1  ;;  %v18012_v25 = vld [vmem:[#allocation148_spill] sm:$0xff] }
 0x79a   : > { %v12201_v37 = vadd.f32 %v12200_v13, %v12199_v38  ;;  %v6469_v9 = vpop.f32.mrb[190].mxu0  ;;  %v12202_v1 = vpop.f32.mrb[126].mxu1  ;;  %v7873_v15 = vpack.c.bf16 %v7856_v0, %v7855_v49  ;;  %v18013_v49 = vld [vmem:[#allocation48_spill] sm:$0xff]  ;;  %v18014_v0 = vld [vmem:[#allocation98_spill] sm:$0xff] }
 0x79b   : > { %v13143_v47 = vadd.f32 %v6469_v9, %v18004_v34  ;;  %v6471_v26 = vpop.f32.mrb[191].mxu0  ;;  %v12203_v18 = vpop.f32.mrb[127].mxu1  ;;  %v6789_v10 = vmax.f32 %v13142_v41, 0.0 }
 0x79c   : > { %v7821_v12 = vadd.f32 %v12201_v37, %v7660_v62  ;;  %v12204_v61 = vadd.f32 %v12203_v18, %v12202_v1  ;;  %12217 = vmatprep.subr.bf16.mxu1 %v7873_v15  ;;  %v14645_v62 = vld [vmem:[#allocation8 + $0x24] ss:$8 sps:$4 sm:$0xff]   ;;  %v18018_v15 = vld [vmem:[#allocation99_spill] sm:$0xff] }
 0x79d   : > { %v6790_v5 = vmax.f32 %v13143_v47, 0.0  ;;  %12218 = vmatpush3.bf16.msra.mxu1 %v16913_v6  ;;  %v14642_v6 = vld [vmem:[#allocation8 + $0x14] ss:$8 sps:$4 sm:$0xff]   ;;  %v18016_v37 = vld [vmem:[#allocation49_spill] sm:$0xff]  ;;  %v18019_v26 = vld [vmem:[#allocation152_spill] sm:$0xff] }
 0x79e   : > { %v7824_v28 = vadd.f32 %v12204_v61, %v7663_v42  ;;  %v7857_v43 = vmax.f32 %v7821_v12, 0.0  ;;  %v18021_v42 = vld [vmem:[#allocation100_spill] sm:$0xff] }
 0x79f   : > { %v16993_v24 = vpack.c.bf16 %v6790_v5, %v6789_v10  ;;  %v14643_v10 = vld [vmem:[#allocation8 + $0x20] ss:$8 sps:$4 sm:$0xff]  }
 0x7a0   : > { %v6474_v14 = vpop.f32.mrb[192].mxu0  ;;  %v7858_v53 = vmax.f32 %v7824_v28, 0.0 }
 0x7a1   : > { %18006 = vst [vmem:[#allocation59_spill] sm:$0xff] %v16993_v24  ;;  %v13144_v36 = vadd.f32 %v6474_v14, %v18007_v33  ;;  %v6476_v46 = vpop.f32.mrb[193].mxu0  ;;  %v18022_v14 = vld [vmem:[#allocation153_spill] sm:$0xff] }
 0x7a2   : > { %v6477_v51 = vpop.f32.mrb[194].mxu0  ;;  %v7874_v20 = vpack.c.bf16 %v7858_v53, %v7857_v43  ;;  %v14648_v43 = vld [vmem:[#allocation8 + $0x34] ss:$8 sps:$4 sm:$0xff]   ;;  %v18025_v46 = vld [vmem:[#allocation101_spill] sm:$0xff] }
 0x7a3   : > { %v13145_v21 = vadd.f32 %v6477_v51, %v18008_v32  ;;  %v6479_v63 = vpop.f32.mrb[195].mxu0  ;;  %v6791_v16 = vmax.f32 %v13144_v36, 0.0  ;;  %v18023_v53 = vld [vmem:[#allocation51_spill] sm:$0xff] }
 0x7a4   : > { %12219 = vmatprep.subr.bf16.mxu1 %v7874_v20  ;;  %v18026_v32 = vld [vmem:[#allocation43_spill] sm:$0xff]  ;;  %v18027_v63 = vld [vmem:[#allocation52_spill] sm:$0xff] }
 0x7a5   : > { %v6792_v27 = vmax.f32 %v13145_v21, 0.0  ;;  %12220 = vmatpush3.bf16.msra.mxu1 %v16925_v35  ;;  %v14640_v35 = vld [vmem:[#allocation8 + $0x10] ss:$8 sps:$4 sm:$0xff]  }
 0x7a6   : > { %12269 = vmatprep.subr.bf16.mxu1 %v18009_v40 }
 0x7a7   : > { %v16999_v50 = vpack.c.bf16 %v6792_v27, %v6791_v16 }
 0x7a8   : > { %v6482_v3 = vpop.f32.mrb[196].mxu0  ;;  %8100 = vmatmul.mubr.bf16.vlgmr.msra.gmra.mrb[128].mxu1 %v14637_v45  ;;  %v18028_v45 = vld [vmem:[#allocation102_spill] sm:$0xff] }
 0x7a9   : > { %18010 = vst [vmem:[#allocation77_spill] sm:$0xff] %v16999_v50  ;;  %v13146_v7 = vadd.f32 %v6482_v3, %v18011_v22  ;;  %v6484_v2 = vpop.f32.mrb[197].mxu0  ;;  %12270 = vmatpush3.bf16.msra.mxu1 %v18012_v25  ;;  %8107 = vmatprep.mubr.bf16.mxu1 %v14642_v6  ;;  %v14646_v6 = vld [vmem:[#allocation8 + $0x30] ss:$8 sps:$4 sm:$0xff]   ;;  %v18029_v22 = vld [vmem:[#allocation44_spill] sm:$0xff] }
 0x7aa   : > { %v6485_v38 = vpop.f32.mrb[198].mxu0  ;;  %12271 = vmatprep.subr.bf16.mxu1 %v18013_v49  ;;  %v18030_v2 = vld [vmem:[#allocation53_spill] sm:$0xff]  ;;  %v18032_v49 = vld [vmem:[#allocation103_spill] sm:$0xff] }
 0x7ab   : > { %v13147_v58 = vadd.f32 %v6485_v38, %v18014_v0  ;;  %v6487_v41 = vpop.f32.mrb[199].mxu0  ;;  %v6793_v30 = vmax.f32 %v13146_v7, 0.0  ;;  %v14651_v7 = vld [vmem:[#allocation8 + $0x44] ss:$8 sps:$4 sm:$0xff]  }
 0x7ac   : > { %v18033_v41 = vld [vmem:[#allocation45_spill] sm:$0xff] }
 0x7ad   : > { %v6794_v13 = vmax.f32 %v13147_v58, 0.0  ;;  %12272 = vmatpush3.bf16.msra.mxu1 %v18015_v55 }
 0x7ae   : > { %12273 = vmatprep.subr.bf16.mxu1 %v18016_v37  ;;  %v14649_v37 = vld [vmem:[#allocation8 + $0x40] ss:$8 sps:$4 sm:$0xff]  }
 0x7af   : > { %v17007_v9 = vpack.c.bf16 %v6794_v13, %v6793_v30  ;;  %v18034_v30 = vld [vmem:[#allocation54_spill] sm:$0xff]  ;;  %v18035_v13 = vld [vmem:[#allocation104_spill] sm:$0xff] }
 0x7b0   : > { %v6490_v1 = vpop.f32.mrb[200].mxu0  ;;  %8108 = vmatmul.mubr.bf16.gmra.mrb[132].mxu1 %v14640_v35 }
 0x7b1   : > { %18017 = vst [vmem:[#allocation29_spill] sm:$0xff] %v17007_v9  ;;  %v13148_v34 = vadd.f32 %v6490_v1, %v18018_v15  ;;  %v6492_v47 = vpop.f32.mrb[201].mxu0  ;;  %12274 = vmatpush3.bf16.msra.mxu1 %v18019_v26  ;;  %8115 = vmatprep.mubr.bf16.mxu1 %v14645_v62  ;;  %v18037_v26 = vld [vmem:[#allocation72_spill] sm:$0xff] }
 0x7b2   : > { %v6493_v18 = vpop.f32.mrb[202].mxu0  ;;  %12275 = vmatprep.subr.bf16.mxu1 %v18020_v56  ;;  %v14654_v47 = vld [vmem:[#allocation8 + $0x54] ss:$8 sps:$4 sm:$0xff]  }
 0x7b3   : > { %v13149_v12 = vadd.f32 %v6493_v18, %v18021_v42  ;;  %v6495_v61 = vpop.f32.mrb[203].mxu0  ;;  %v6795_v5 = vmax.f32 %v13148_v34, 0.0  ;;  %v18036_v34 = vld [vmem:[#allocation46_spill] sm:$0xff]  ;;  %v18039_v42 = vld [vmem:[#allocation105_spill] sm:$0xff] }
 0x7b5   : > { %v6796_v28 = vmax.f32 %v13149_v12, 0.0  ;;  %12276 = vmatpush3.bf16.msra.mxu1 %v18022_v14 }
 0x7b6   : > { %12277 = vmatprep.subr.bf16.mxu1 %v18023_v53 }
 0x7b7   : > { %v17015_v33 = vpack.c.bf16 %v6796_v28, %v6795_v5  ;;  %v18040_v5 = vld [vmem:[#allocation106_spill] sm:$0xff] }
 0x7b8   : > { %v6498_v36 = vpop.f32.mrb[204].mxu0  ;;  %8116 = vmatmul.mubr.bf16.gmra.mrb[136].mxu1 %v14643_v10 }
 0x7b9   : > { %18024 = vst [vmem:[#allocation61_spill] sm:$0xff] %v17015_v33  ;;  %v13150_v51 = vadd.f32 %v6498_v36, %v18025_v46  ;;  %v6500_v20 = vpop.f32.mrb[205].mxu0  ;;  %12278 = vmatpush3.bf16.msra.mxu1 %v18026_v32  ;;  %8123 = vmatprep.mubr.bf16.mxu1 %v14648_v43  ;;  %v14652_v43 = vld [vmem:[#allocation8 + $0x50] ss:$8 sps:$4 sm:$0xff]   ;;  %v14657_v46 = vld [vmem:[#allocation8 + $0x64] ss:$8 sps:$4 sm:$0xff]  }
 0x7ba   : > { %v6501_v21 = vpop.f32.mrb[206].mxu0  ;;  %12279 = vmatprep.subr.bf16.mxu1 %v18027_v63  ;;  %v18042_v32 = vld [vmem:[#allocation107_spill] sm:$0xff] }
 0x7bb   : > { %v13151_v16 = vadd.f32 %v6501_v21, %v18028_v45  ;;  %v6503_v27 = vpop.f32.mrb[207].mxu0  ;;  %v6797_v40 = vmax.f32 %v13150_v51, 0.0 }
 0x7bd   : > { %v6798_v3 = vmax.f32 %v13151_v16, 0.0  ;;  %12280 = vmatpush3.bf16.msra.mxu1 %v18029_v22  ;;  %v18043_v16 = vld [vmem:[#allocation108_spill] sm:$0xff] }
 0x7be   : > { %12281 = vmatprep.subr.bf16.mxu1 %v18030_v2 }
 0x7bf   : > { %v17023_v25 = vpack.c.bf16 %v6798_v3, %v6797_v40  ;;  %v14655_v40 = vld [vmem:[#allocation8 + $0x60] ss:$8 sps:$4 sm:$0xff]  }
 0x7c0   : > { %v6506_v38 = vpop.f32.mrb[208].mxu0  ;;  %8124 = vmatmul.mubr.bf16.gmra.mrb[140].mxu1 %v14646_v6 }
 0x7c1   : > { %18031 = vst [vmem:[#allocation78_spill] sm:$0xff] %v17023_v25  ;;  %v13152_v0 = vadd.f32 %v6506_v38, %v18032_v49  ;;  %v6508_v58 = vpop.f32.mrb[209].mxu0  ;;  %12282 = vmatpush3.bf16.msra.mxu1 %v18033_v41  ;;  %8131 = vmatprep.mubr.bf16.mxu1 %v14651_v7  ;;  %v14660_v7 = vld [vmem:[#allocation8 + $0x74] ss:$8 sps:$4 sm:$0xff]   ;;  %v18045_v49 = vld [vmem:[#allocation109_spill] sm:$0xff] }
 0x7c2   : > { %v6509_v35 = vpop.f32.mrb[210].mxu0  ;;  %12283 = vmatprep.subr.bf16.mxu1 %v18034_v30 }
 0x7c3   : > { %v13153_v55 = vadd.f32 %v6509_v35, %v18035_v13  ;;  %v6511_v62 = vpop.f32.mrb[211].mxu0  ;;  %v6799_v1 = vmax.f32 %v13152_v0, 0.0  ;;  %v18046_v35 = vld [vmem:[#allocation110_spill] sm:$0xff] }
 0x7c5   : > { %v6800_v15 = vmax.f32 %v13153_v55, 0.0  ;;  %12284 = vmatpush3.bf16.msra.mxu1 %v18036_v34  ;;  %v14658_v55 = vld [vmem:[#allocation8 + $0x70] ss:$8 sps:$4 sm:$0xff]  }
 0x7c6   : > { %12381 = vmatprep.subr.bf16.mxu1 %v18037_v26 }
 0x7c7   : > { %v17031_v18 = vpack.c.bf16 %v6800_v15, %v6799_v1  ;;  %v14663_v1 = vld [vmem:[#allocation7 + $0x204] ss:$16 sps:$4 sm:$0xff]  }
 0x7c8   : > { %v6514_v56 = vpop.f32.mrb[212].mxu0  ;;  %8132 = vmatmul.mubr.bf16.gmra.mrb[144].mxu1 %v14649_v37 }
 0x7c9   : > { %18038 = vst [vmem:[#allocation31_spill] sm:$0xff] %v17031_v18  ;;  %v13154_v12 = vadd.f32 %v6514_v56, %v18039_v42  ;;  %v6516_v61 = vpop.f32.mrb[213].mxu0  ;;  %8139 = vmatprep.mubr.bf16.mxu1 %v14654_v47  ;;  %v18048_v47 = vld [vmem:[#allocation111_spill] sm:$0xff] }
 0x7ca   : > { %v6517_v10 = vpop.f32.mrb[214].mxu0 }
 0x7cb   : > { %v13155_v28 = vadd.f32 %v6517_v10, %v18040_v5  ;;  %v6519_v14 = vpop.f32.mrb[215].mxu0  ;;  %v6801_v53 = vmax.f32 %v13154_v12, 0.0  ;;  %v18049_v12 = vld [vmem:[#allocation112_spill] sm:$0xff]  ;;  %v14661_v5 = vld [vmem:[#allocation7 + $0x200] ss:$16 sps:$4 sm:$0xff]  }
 0x7cd   : > { %v6802_v36 = vmax.f32 %v13155_v28, 0.0 }
 0x7cf   : > { %v17035_v51 = vpack.c.bf16 %v6802_v36, %v6801_v53 }
 0x7d0   : > { %v6522_v20 = vpop.f32.mrb[216].mxu0  ;;  %8140 = vmatmul.mubr.bf16.gmra.mrb[208].mxu1 %v14652_v43  ;;  %v14666_v43 = vld [vmem:[#allocation7 + $0x224] ss:$16 sps:$4 sm:$0xff]  }
 0x7d1   : > { %18041 = vst [vmem:[#allocation62_spill] sm:$0xff] %v17035_v51  ;;  %v13156_v21 = vadd.f32 %v6522_v20, %v18042_v32  ;;  %v6524_v63 = vpop.f32.mrb[217].mxu0  ;;  %8147 = vmatprep.mubr.bf16.mxu1 %v14657_v46  ;;  %v18051_v46 = vld [vmem:[#allocation113_spill] sm:$0xff] }
 0x7d2   : > { %v6525_v45 = vpop.f32.mrb[218].mxu0  ;;  %v18052_v32 = vld [vmem:[#allocation57_spill] sm:$0xff] }
 0x7d3   : > { %v13157_v27 = vadd.f32 %v6525_v45, %v18043_v16  ;;  %v6527_v6 = vpop.f32.mrb[219].mxu0  ;;  %v6803_v3 = vmax.f32 %v13156_v21, 0.0  ;;  %v18053_v63 = vld [vmem:[#allocation73_spill] sm:$0xff]  ;;  %v18054_v16 = vld [vmem:[#allocation114_spill] sm:$0xff] }
 0x7d5   : > { %v6804_v22 = vmax.f32 %v13157_v27, 0.0 }
 0x7d7   : > { %v17039_v2 = vpack.c.bf16 %v6804_v22, %v6803_v3 }
 0x7d8   : > { %v6530_v38 = vpop.f32.mrb[220].mxu0  ;;  %8148 = vmatmul.mubr.bf16.gmra.mrb[212].mxu1 %v14655_v40  ;;  %v14664_v40 = vld [vmem:[#allocation7 + $0x220] ss:$16 sps:$4 sm:$0xff]  }
 0x7d9   : > { %18044 = vst [vmem:[#allocation79_spill] sm:$0xff] %v17039_v2  ;;  %v13158_v0 = vadd.f32 %v6530_v38, %v18045_v49  ;;  %v6532_v58 = vpop.f32.mrb[221].mxu0  ;;  %8155 = vmatprep.mubr.bf16.mxu1 %v14660_v7  ;;  %v18055_v7 = vld [vmem:[#allocation60_spill] sm:$0xff] }
 0x7da   : > { %v6533_v41 = vpop.f32.mrb[222].mxu0  ;;  %v14669_v38 = vld [vmem:[#allocation7 + $0x244] ss:$16 sps:$4 sm:$0xff]   ;;  %v18057_v58 = vld [vmem:[#allocation115_spill] sm:$0xff] }
 0x7db   : > { %v13159_v30 = vadd.f32 %v6533_v41, %v18046_v35  ;;  %v6535_v13 = vpop.f32.mrb[223].mxu0  ;;  %v6805_v62 = vmax.f32 %v13158_v0, 0.0  ;;  %v18058_v35 = vld [vmem:[#allocation63_spill] sm:$0xff] }
 0x7dd   : > { %v6806_v37 = vmax.f32 %v13159_v30, 0.0 }
 0x7df   : > { %v17043_v15 = vpack.c.bf16 %v6806_v37, %v6805_v62 }
 0x7e0   : > { %v6538_v34 = vpop.f32.mrb[224].mxu0  ;;  %8156 = vmatmul.mubr.bf16.gmra.mrb[216].mxu1 %v14658_v55  ;;  %v18059_v55 = vld [vmem:[#allocation116_spill] sm:$0xff] }
 0x7e1   : > { %18047 = vst [vmem:[#allocation121_spill] sm:$0xff] %v17043_v15  ;;  %v13160_v26 = vadd.f32 %v6538_v34, %v18048_v47  ;;  %v6540_v56 = vpop.f32.mrb[225].mxu0  ;;  %8799 = vmatprep.mubr.bf16.mxu1 %v14663_v1  ;;  %v14667_v1 = vld [vmem:[#allocation7 + $0x240] ss:$16 sps:$4 sm:$0xff]  }
 0x7e2   : > { %v6541_v42 = vpop.f32.mrb[226].mxu0 }
 0x7e3   : > { %v13161_v61 = vadd.f32 %v6541_v42, %v18049_v12  ;;  %v6543_v10 = vpop.f32.mrb[227].mxu0  ;;  %v6807_v28 = vmax.f32 %v13160_v26, 0.0  ;;  %v14672_v26 = vld [vmem:[#allocation7 + $0x264] ss:$16 sps:$4 sm:$0xff]   ;;  %v18062_v12 = vld [vmem:[#allocation117_spill] sm:$0xff] }
 0x7e4   : > { %v18063_v10 = vld [vmem:[#allocation68_spill] sm:$0xff] }
 0x7e5   : > { %v6808_v14 = vmax.f32 %v13161_v61, 0.0 }
 0x7e7   : > { %v17047_v53 = vpack.c.bf16 %v6808_v14, %v6807_v28  ;;  %v18064_v28 = vld [vmem:[#allocation118_spill] sm:$0xff] }
 0x7e8   : > { %v6546_v36 = vpop.f32.mrb[228].mxu0  ;;  %8800 = vmatmul.mubr.bf16.vlgmr.msra.gmra.mrb[220].mxu1 %v14661_v5 }
 0x7e9   : > { %18050 = vst [vmem:[#allocation64_spill] sm:$0xff] %v17047_v53  ;;  %v13162_v20 = vadd.f32 %v6546_v36, %v18051_v46  ;;  %12382 = vmatpush3.bf16.msra.mxu1 %v18052_v32  ;;  %v6548_v21 = vpop.f32.mrb[229].mxu0  ;;  %8807 = vmatprep.mubr.bf16.mxu1 %v14666_v43  ;;  %v14670_v36 = vld [vmem:[#allocation7 + $0x260] ss:$16 sps:$4 sm:$0xff]   ;;  %v14675_v32 = vld [vmem:[#allocation7 + $0x284] ss:$16 sps:$4 sm:$0xff]  }
 0x7ea   : > { %12383 = vmatprep.subr.bf16.mxu1 %v18053_v63  ;;  %v6549_v45 = vpop.f32.mrb[230].mxu0  ;;  %v14723_v53 = vld [vmem:[#allocation7 + $0x28c] ss:$16 sps:$4 sm:$0xff]  }
 0x7eb   : > { %v13163_v27 = vadd.f32 %v6549_v45, %v18054_v16  ;;  %v6551_v6 = vpop.f32.mrb[231].mxu0  ;;  %v6809_v3 = vmax.f32 %v13162_v20, 0.0  ;;  %v18067_v45 = vld [vmem:[#allocation119_spill] sm:$0xff] }
 0x7ed   : > { %v6810_v22 = vmax.f32 %v13163_v27, 0.0  ;;  %12384 = vmatpush3.bf16.msra.mxu1 %v18055_v7  ;;  %v18068_v27 = vld [vmem:[#allocation70_spill] sm:$0xff]  ;;  %v14673_v7 = vld [vmem:[#allocation7 + $0x280] ss:$16 sps:$4 sm:$0xff]  }
 0x7ee   : > { %12385 = vmatprep.subr.bf16.mxu1 %v16842_v57  ;;  %v18060_v57 = vld [vmem:[#allocation66_spill] sm:$0xff] }
 0x7ef   : > { %v17055_v49 = vpack.c.bf16 %v6810_v22, %v6809_v3 }
 0x7f0   : > { %v6554_v0 = vpop.f32.mrb[232].mxu0  ;;  %8808 = vmatmul.mubr.bf16.gmra.mrb[224].mxu1 %v14664_v40  ;;  %v18069_v40 = vld [vmem:[#allocation120_spill] sm:$0xff] }
 0x7f1   : > { %18056 = vst [vmem:[#allocation80_spill] sm:$0xff] %v17055_v49  ;;  %v13164_v41 = vadd.f32 %v6554_v0, %v18057_v58  ;;  %12386 = vmatpush3.bf16.msra.mxu1 %v18058_v35  ;;  %v6556_v30 = vpop.f32.mrb[233].mxu0  ;;  %8815 = vmatprep.mubr.bf16.mxu1 %v14669_v38  ;;  %v14678_v58 = vld [vmem:[#allocation7 + $0x2a4] ss:$16 sps:$4 sm:$0xff]   ;;  %v14718_v49 = vld [vmem:[#allocation7 + $0x268] ss:$16 sps:$4 sm:$0xff]  }
 0x7f2   : > { %12387 = vmatprep.subr.bf16.mxu1 %v16850_v59  ;;  %v6557_v13 = vpop.f32.mrb[234].mxu0  ;;  %v18072_v30 = vld [vmem:[#allocation122_spill] sm:$0xff] }
 0x7f3   : > { %v13165_v62 = vadd.f32 %v6557_v13, %v18059_v55  ;;  %v6559_v37 = vpop.f32.mrb[235].mxu0  ;;  %v6811_v34 = vmax.f32 %v13164_v41, 0.0 }
 0x7f5   : > { %v6812_v47 = vmax.f32 %v13165_v62, 0.0  ;;  %12388 = vmatpush3.bf16.msra.mxu1 %v18060_v57 }
 0x7f6   : > { %12389 = vmatprep.subr.bf16.mxu1 %v16860_v19  ;;  %v18065_v19 = vld [vmem:[#allocation69_spill] sm:$0xff] }
 0x7f7   : > { %v17063_v56 = vpack.c.bf16 %v6812_v47, %v6811_v34  ;;  %v14676_v34 = vld [vmem:[#allocation7 + $0x2a0] ss:$16 sps:$4 sm:$0xff]  }
 0x7f8   : > { %v6562_v42 = vpop.f32.mrb[236].mxu0  ;;  %8816 = vmatmul.mubr.bf16.gmra.mrb[228].mxu1 %v14667_v1 }
 0x7f9   : > { %18061 = vst [vmem:[#allocation123_spill] sm:$0xff] %v17063_v56  ;;  %v13166_v61 = vadd.f32 %v6562_v42, %v18062_v12  ;;  %12390 = vmatpush3.bf16.msra.mxu1 %v18063_v10  ;;  %v6564_v59 = vpop.f32.mrb[237].mxu0  ;;  %8823 = vmatprep.mubr.bf16.mxu1 %v14672_v26  ;;  %v14681_v26 = vld [vmem:[#allocation7 + $0x2c4] ss:$16 sps:$4 sm:$0xff]   ;;  %v14720_v56 = vld [vmem:[#allocation7 + $0x26c] ss:$16 sps:$4 sm:$0xff]  }
 0x7fa   : > { %12391 = vmatprep.subr.bf16.mxu1 %v16870_v23  ;;  %v6565_v5 = vpop.f32.mrb[238].mxu0 }
 0x7fb   : > { %v13167_v14 = vadd.f32 %v6565_v5, %v18064_v28  ;;  %v6567_v43 = vpop.f32.mrb[239].mxu0  ;;  %v6813_v46 = vmax.f32 %v13166_v61, 0.0  ;;  %v18075_v61 = vld [vmem:[#allocation126_spill] sm:$0xff]  ;;  %v18076_v28 = vld [vmem:[#allocation127_spill] sm:$0xff] }
 0x7fd   : > { %v6814_v20 = vmax.f32 %v13167_v14, 0.0  ;;  %12392 = vmatpush3.bf16.msra.mxu1 %v18065_v19  ;;  %v14684_v19 = vld [vmem:[#allocation7 + $0x2e4] ss:$16 sps:$4 sm:$0xff]  }
 0x7fe   : > { %12393 = vmatprep.subr.bf16.mxu1 %v16880_v39  ;;  %v18070_v39 = vld [vmem:[#allocation71_spill] sm:$0xff] }
 0x7ff   : > { %v17071_v21 = vpack.c.bf16 %v6814_v20, %v6813_v46 }
 0x800   : > { %v6570_v63 = vpop.f32.mrb[240].mxu0  ;;  %8824 = vmatmul.mubr.bf16.gmra.mrb[232].mxu1 %v14670_v36  ;;  %v14679_v36 = vld [vmem:[#allocation7 + $0x2c0] ss:$16 sps:$4 sm:$0xff]  }
 0x801   : > { %18066 = vst [vmem:[#allocation65_spill] sm:$0xff] %v17071_v21  ;;  %v13168_v16 = vadd.f32 %v6570_v63, %v18067_v45  ;;  %12394 = vmatpush3.bf16.msra.mxu1 %v18068_v27  ;;  %v6572_v23 = vpop.f32.mrb[241].mxu0  ;;  %8831 = vmatprep.mubr.bf16.mxu1 %v14675_v32  ;;  %v18078_v45 = vld [vmem:[#allocation129_spill] sm:$0xff] }
 0x802   : > { %12395 = vmatprep.subr.bf16.mxu1 %v16890_v44  ;;  %v6573_v6 = vpop.f32.mrb[242].mxu0  ;;  %v18073_v44 = vld [vmem:[#allocation124_spill] sm:$0xff] }
 0x803   : > { %v13169_v3 = vadd.f32 %v6573_v6, %v18069_v40  ;;  %v6575_v22 = vpop.f32.mrb[243].mxu0  ;;  %v6815_v38 = vmax.f32 %v13168_v16, 0.0  ;;  %v17089_v6 = vpop.permute.xlu1 %8324  ;;  %v18079_v40 = vld [vmem:[#allocation130_spill] sm:$0xff] }
 0x805   : > { %v6816_v0 = vmax.f32 %v13169_v3, 0.0  ;;  %12396 = vmatpush3.bf16.msra.mxu1 %v18070_v39  ;;  %v14687_v39 = vld [vmem:[#allocation7 + $0x304] ss:$16 sps:$4 sm:$0xff]  }
 0x807   : > { %v17078_v41 = vpack.c.bf16 %v6816_v0, %v6815_v38 }
 0x808   : > { %v6578_v35 = vpop.f32.mrb[244].mxu0  ;;  %8832 = vmatmul.mubr.bf16.gmra.mrb[236].mxu1 %v14673_v7  ;;  %v14682_v7 = vld [vmem:[#allocation7 + $0x2e0] ss:$16 sps:$4 sm:$0xff]  }
 0x809   : > { %18071 = vst [vmem:[#allocation81_spill] sm:$0xff] %v17078_v41  ;;  %v13170_v13 = vadd.f32 %v6578_v35, %v18072_v30  ;;  %v6580_v55 = vpop.f32.mrb[245].mxu0  ;;  %8839 = vmatprep.mubr.bf16.mxu1 %v14678_v58  ;;  %v17092_v58 = vpop.permute.xlu0 %8409 }
 0x80a   : > { %v6581_v62 = vpop.f32.mrb[246].mxu0  ;;  %v18081_v55 = vld [vmem:[#allocation132_spill] sm:$0xff] }
 0x80b   : > { %v13171_v37 = vadd.f32 %v6581_v62, %v18073_v44  ;;  %v6583_v1 = vpop.f32.mrb[247].mxu0  ;;  %v6817_v47 = vmax.f32 %v13170_v13, 0.0  ;;  %v17096_v13 = vpop.permute.xlu1 %8414 }
 0x80c   : > { %v18082_v1 = vld [vmem:[#allocation133_spill] sm:$0xff] }
 0x80d   : > { %v6818_v57 = vmax.f32 %v13171_v37, 0.0 }
 0x80f   : > { %v17082_v42 = vpack.c.bf16 %v6818_v57, %v6817_v47  ;;  %v14685_v57 = vld [vmem:[#allocation7 + $0x300] ss:$16 sps:$4 sm:$0xff]  }
 0x810   : > { %v6586_v12 = vpop.f32.mrb[248].mxu0  ;;  %8840 = vmatmul.mubr.bf16.gmra.mrb[240].mxu1 %v14676_v34 }
 0x811   : > { %18074 = vst [vmem:[#allocation125_spill] sm:$0xff] %v17082_v42  ;;  %v13172_v10 = vadd.f32 %v6586_v12, %v18075_v61  ;;  %v6588_v59 = vpop.f32.mrb[249].mxu0  ;;  %8847 = vmatprep.mubr.bf16.mxu1 %v14681_v26  ;;  %v17100_v26 = vpop.permute.xlu0 %8329 }
 0x812   : > { %v6589_v5 = vpop.f32.mrb[250].mxu0  ;;  %v17102_v59 = vpop.permute.xlu1 %8334 }
 0x813   : > { %v13173_v14 = vadd.f32 %v6589_v5, %v18076_v28  ;;  %v6591_v43 = vpop.f32.mrb[251].mxu0  ;;  %v6819_v46 = vmax.f32 %v13172_v10, 0.0  ;;  %v14690_v10 = vld [vmem:[#allocation7 + $0x324] ss:$16 sps:$4 sm:$0xff]  }
 0x815   : > { %v6820_v20 = vmax.f32 %v13173_v14, 0.0  ;;  %v18084_v14 = vld [vmem:[#allocation136_spill] sm:$0xff] }
 0x817   : > { %v17086_v32 = vpack.c.bf16 %v6820_v20, %v6819_v46  ;;  %v17107_v20 = vpop.permute.xlu0 %8419 }
 0x818   : > { %v6594_v63 = vpop.f32.mrb[252].mxu0  ;;  %8848 = vmatmul.mubr.bf16.gmra.mrb[244].mxu1 %v14679_v36 }
 0x819   : > { %18077 = vst [vmem:[#allocation82_spill] sm:$0xff] %v17086_v32  ;;  %v13174_v16 = vadd.f32 %v6594_v63, %v18078_v45  ;;  %v6596_v27 = vpop.f32.mrb[253].mxu0  ;;  %8855 = vmatprep.mubr.bf16.mxu1 %v14684_v19  ;;  %v18085_v19 = vld [vmem:[#allocation137_spill] sm:$0xff] }
 0x81a   : > { %v6597_v23 = vpop.f32.mrb[254].mxu0  ;;  %v17110_v27 = vpop.permute.xlu1 %8424 }
 0x81b   : > { %v13175_v3 = vadd.f32 %v6597_v23, %v18079_v40  ;;  %v6599_v22 = vpop.f32.mrb[255].mxu0  ;;  %v6821_v38 = vmax.f32 %v13174_v16, 0.0  ;;  %v14688_v16 = vld [vmem:[#allocation7 + $0x320] ss:$16 sps:$4 sm:$0xff]  }
 0x81d   : > { %v6822_v0 = vmax.f32 %v13175_v3, 0.0  ;;  %v14693_v3 = vld [vmem:[#allocation7 + $0x344] ss:$16 sps:$4 sm:$0xff]  }
 0x81f   : > { %v17094_v35 = vpack.c.bf16 %v6822_v0, %v6821_v38  ;;  %v17114_v38 = vpop.permute.xlu0 %8339  ;;  %v18087_v0 = vld [vmem:[#allocation139_spill] sm:$0xff] }
 0x820   : > { %v6602_v30 = vpop.f32.mrb[148].mxu0  ;;  %8856 = vmatmul.mubr.bf16.gmra.mrb[248].mxu1 %v14682_v7 }
 0x821   : > { %18080 = vst [vmem:[#allocation128_spill] sm:$0xff] %v17094_v35  ;;  %v13176_v62 = vadd.f32 %v6602_v30, %v18081_v55  ;;  %v6604_v44 = vpop.f32.mrb[149].mxu0  ;;  %8863 = vmatprep.mubr.bf16.mxu1 %v14687_v39 }
 0x822   : > { %v6605_v37 = vpop.f32.mrb[150].mxu0  ;;  %v18088_v44 = vld [vmem:[#allocation140_spill] sm:$0xff] }
 0x823   : > { %v13177_v34 = vadd.f32 %v6605_v37, %v18082_v1  ;;  %v6607_v47 = vpop.f32.mrb[151].mxu0  ;;  %v6823_v12 = vmax.f32 %v13176_v62, 0.0  ;;  %v17117_v62 = vpop.permute.xlu1 %8344 }
 0x825   : > { %v6824_v61 = vmax.f32 %v13177_v34, 0.0  ;;  %v14691_v34 = vld [vmem:[#allocation7 + $0x340] ss:$16 sps:$4 sm:$0xff]  }
 0x827   : > { %v17104_v5 = vpack.c.bf16 %v6824_v61, %v6823_v12  ;;  %v14696_v12 = vld [vmem:[#allocation7 + $0x364] ss:$16 sps:$4 sm:$0xff]   ;;  %v17120_v61 = vpop.permute.xlu0 %8429 }
 0x828   : > { %v6610_v28 = vpop.f32.mrb[152].mxu0  ;;  %8864 = vmatmul.mubr.bf16.gmra.mrb[252].mxu1 %v14685_v57 }
 0x829   : > { %18083 = vst [vmem:[#allocation67_spill] sm:$0xff] %v17104_v5  ;;  %v13178_v43 = vadd.f32 %v6610_v28, %v18084_v14  ;;  %v6612_v36 = vpop.f32.mrb[153].mxu0  ;;  %8871 = vmatprep.mubr.bf16.mxu1 %v14690_v10  ;;  %v17124_v14 = vpop.permute.xlu1 %8434 }
 0x82a   : > { %v6613_v46 = vpop.f32.mrb[154].mxu0 }
 0x82b   : > { %v13179_v63 = vadd.f32 %v6613_v46, %v18085_v19  ;;  %v6615_v45 = vpop.f32.mrb[155].mxu0  ;;  %v6825_v23 = vmax.f32 %v13178_v43, 0.0  ;;  %v18090_v43 = vld [vmem:[#allocation19_spill] sm:$0xff] }
 0x82d   : > { %v6826_v40 = vmax.f32 %v13179_v63, 0.0  ;;  %v18091_v63 = vld [vmem:[#allocation20_spill] sm:$0xff] }
 0x82f   : > { %v17112_v22 = vpack.c.bf16 %v6826_v40, %v6825_v23  ;;  %v14694_v23 = vld [vmem:[#allocation7 + $0x360] ss:$16 sps:$4 sm:$0xff]   ;;  %v17128_v40 = vpop.permute.xlu0 %8349 }
 0x830   : > { %v6618_v7 = vpop.f32.mrb[156].mxu0  ;;  %8872 = vmatmul.mubr.bf16.gmra.mrb[148].mxu1 %v14688_v16 }
 0x831   : > { %18086 = vst [vmem:[#allocation83_spill] sm:$0xff] %v17112_v22  ;;  %v13180_v39 = vadd.f32 %v6618_v7, %v18087_v0  ;;  %v6620_v30 = vpop.f32.mrb[157].mxu0  ;;  %8879 = vmatprep.mubr.bf16.mxu1 %v14693_v3  ;;  %v14699_v0 = vld [vmem:[#allocation7 + $0x384] ss:$16 sps:$4 sm:$0xff]  }
 0x832   : > { %v6621_v55 = vpop.f32.mrb[158].mxu0 }
 0x833   : > { %v13181_v37 = vadd.f32 %v6621_v55, %v18088_v44  ;;  %v6623_v1 = vpop.f32.mrb[159].mxu0  ;;  %v6827_v47 = vmax.f32 %v13180_v39, 0.0  ;;  %v17130_v39 = vpop.permute.xlu1 %8354  ;;  %v18093_v44 = vld [vmem:[#allocation22_spill] sm:$0xff] }
 0x835   : > { %v6828_v57 = vmax.f32 %v13181_v37, 0.0 }
 0x837   : > { %v17122_v10 = vpack.c.bf16 %v6828_v57, %v6827_v47  ;;  %v17135_v47 = vpop.permute.xlu0 %8439  ;;  %v18095_v57 = vld [vmem:[#allocation143_spill] sm:$0xff] }
 0x838   : > { %v6626_v28 = vpop.f32.mrb[160].mxu0  ;;  %8880 = vmatmul.mubr.bf16.gmra.mrb[152].mxu1 %v14691_v34  ;;  %18094 = vst [vmem:[#allocation134_spill] sm:$0xff] %v17135_v47 }
 0x839   : > { %18089 = vst [vmem:[#allocation131_spill] sm:$0xff] %v17122_v10  ;;  %v13182_v36 = vadd.f32 %v6626_v28, %v18090_v43  ;;  %v6628_v46 = vpop.f32.mrb[161].mxu0  ;;  %8887 = vmatprep.mubr.bf16.mxu1 %v14696_v12  ;;  %v14697_v43 = vld [vmem:[#allocation7 + $0x380] ss:$16 sps:$4 sm:$0xff]  }
 0x83a   : > { %v6629_v19 = vpop.f32.mrb[162].mxu0 }
 0x83b   : > { %v13183_v45 = vadd.f32 %v6629_v19, %v18091_v63  ;;  %v6631_v16 = vpop.f32.mrb[163].mxu0  ;;  %v6829_v3 = vmax.f32 %v13182_v36, 0.0  ;;  %v17138_v36 = vpop.permute.xlu1 %8444  ;;  %v14702_v63 = vld [vmem:[#allocation7 + $0x3a4] ss:$16 sps:$4 sm:$0xff]  }
 0x83c   : > { %18096 = vst [vmem:[#allocation85_spill] sm:$0xff] %v17138_v36  ;;  %v17142_v16 = vpop.permute.xlu0 %8359  ;;  %v14759_v36 = vld [vmem:[#allocation8 + $0x84] ss:$8 sps:$4 sm:$0xff]  }
 0x83d   : > { %v6830_v7 = vmax.f32 %v13183_v45, 0.0 }
 0x83f   : > { %v17132_v30 = vpack.c.bf16 %v6830_v7, %v6829_v3  ;;  %v14700_v3 = vld [vmem:[#allocation7 + $0x3a0] ss:$16 sps:$4 sm:$0xff]   ;;  %v14705_v7 = vld [vmem:[#allocation7 + $0x3c4] ss:$16 sps:$4 sm:$0xff]  }
 0x840   : > { %v6634_v55 = vpop.f32.mrb[164].mxu0  ;;  %8888 = vmatmul.mubr.bf16.gmra.mrb[156].mxu1 %v14694_v23  ;;  %v17144_v23 = vpop.permute.xlu1 %8364 }
 0x841   : > { %18092 = vst [vmem:[#allocation84_spill] sm:$0xff] %v17132_v30  ;;  %v13184_v37 = vadd.f32 %v6634_v55, %v18093_v44  ;;  %v6636_v1 = vpop.f32.mrb[165].mxu0  ;;  %8895 = vmatprep.mubr.bf16.mxu1 %v14699_v0  ;;  %v17146_v0 = vpop.permute.xlu0 %9173  ;;  %v14703_v44 = vld [vmem:[#allocation7 + $0x3c0] ss:$16 sps:$4 sm:$0xff]  }
 0x842   : > { %v6637_v34 = vpop.f32.mrb[166].mxu0  ;;  %18098 = vst [vmem:[#allocation86_spill] sm:$0xff] %v17146_v0  ;;  %v14708_v1 = vld [vmem:[#allocation7 + $0x3e4] ss:$16 sps:$4 sm:$0xff]  }
 0x843   : > { %v13185_v12 = vadd.f32 %v6637_v34, %v18095_v57  ;;  %v6639_v28 = vpop.f32.mrb[167].mxu0  ;;  %v6831_v46 = vmax.f32 %v13184_v37, 0.0 }
 0x844   : > { %v17148_v55 = vpop.permute.xlu1 %9178 }
 0x845   : > { %v6832_v19 = vmax.f32 %v13185_v12, 0.0  ;;  %18099 = vst [vmem:[#allocation138_spill] sm:$0xff] %v17148_v55  ;;  %v17150_v37 = vpop.permute.xlu0 %9183  ;;  %v14706_v12 = vld [vmem:[#allocation7 + $0x3e0] ss:$16 sps:$4 sm:$0xff]   ;;  %v18126_v55 = vld [vmem:[#allocation34_spill] sm:$0xff] }
 0x846   : > { %18100 = vst [vmem:[#allocation87_spill] sm:$0xff] %v17150_v37 }
 0x847   : > { %v17140_v45 = vpack.c.bf16 %v6832_v19, %v6831_v46 }
 0x848   : > { %8896 = vmatmul.mubr.bf16.gmra.mrb[160].mxu1 %v14697_v43  ;;  %v17152_v34 = vpop.permute.xlu1 %9188  ;;  %v14711_v43 = vld [vmem:[#allocation7 + $0x20c] ss:$16 sps:$4 sm:$0xff]  }
 0x849   : > { %18097 = vst [vmem:[#allocation135_spill] sm:$0xff] %v17140_v45  ;;  %8903 = vmatprep.mubr.bf16.mxu1 %v14702_v63  ;;  %18101 = vst [vmem:[#allocation141_spill] sm:$0xff] %v17152_v34  ;;  %v17154_v57 = vpop.permute.xlu0 %9193  ;;  %v14709_v63 = vld [vmem:[#allocation7 + $0x208] ss:$16 sps:$4 sm:$0xff]   ;;  %v14717_v45 = vld [vmem:[#allocation7 + $0x24c] ss:$16 sps:$4 sm:$0xff]  }
 0x84a   : > { %18102 = vst [vmem:[#allocation88_spill] sm:$0xff] %v17154_v57 }
 0x84c   : > { %v17156_v28 = vpop.permute.xlu1 %9198 }
 0x84d   : > { %18103 = vst [vmem:[#allocation142_spill] sm:$0xff] %v17156_v28  ;;  %v17158_v46 = vpop.permute.xlu0 %9203 }
 0x84e   : > { %18104 = vst [vmem:[#allocation89_spill] sm:$0xff] %v17158_v46 }
 0x850   : > { %8904 = vmatmul.mubr.bf16.gmra.mrb[164].mxu1 %v14700_v3  ;;  %v17160_v19 = vpop.permute.xlu1 %9208  ;;  %v14714_v3 = vld [vmem:[#allocation7 + $0x22c] ss:$16 sps:$4 sm:$0xff]  }
 0x851   : > { %8911 = vmatprep.mubr.bf16.mxu1 %v14705_v7  ;;  %18105 = vst [vmem:[#allocation21_spill] sm:$0xff] %v17160_v19  ;;  %v17162_v7 = vpop.permute.xlu0 %9213 }
 0x852   : > { %18106 = vst [vmem:[#allocation90_spill] sm:$0xff] %v17162_v7 }
 0x854   : > { %v17164_v41 = vpop.permute.xlu1 %9218 }
 0x855   : > { %18107 = vst [vmem:[#allocation24_spill] sm:$0xff] %v17164_v41 }
 0x858   : > { %8912 = vmatmul.mubr.bf16.gmra.mrb[168].mxu1 %v14703_v44  ;;  %v14712_v44 = vld [vmem:[#allocation7 + $0x228] ss:$16 sps:$4 sm:$0xff]   ;;  %v17168_v21 = vpop.permute.xlu1 %9228 }
 0x859   : > { %8919 = vmatprep.mubr.bf16.mxu1 %v14708_v1  ;;  %v17166_v1 = vpop.permute.xlu0 %9223  ;;  %18109 = vst [vmem:[#allocation144_spill] sm:$0xff] %v17168_v21 }
 0x85a   : > { %18108 = vst [vmem:[#allocation91_spill] sm:$0xff] %v17166_v1 }
 0x85c   : > { %v17172_v30 = vpop.permute.xlu1 %9238 }
 0x85d   : > { %18111 = vst [vmem:[#allocation145_spill] sm:$0xff] %v17172_v30 }
 0x860   : > { %8920 = vmatmul.mubr.bf16.gmra.mrb[172].mxu1 %v14706_v12  ;;  %v17170_v12 = vpop.permute.xlu0 %9233 }
 0x861   : > { %8960 = vmatprep.mubr.bf16.mxu1 %v14711_v43  ;;  %18110 = vst [vmem:[#allocation92_spill] sm:$0xff] %v17170_v12  ;;  %v14715_v43 = vld [vmem:[#allocation7 + $0x248] ss:$16 sps:$4 sm:$0xff]  }
 0x864   : > { %v17174_v10 = vpop.permute.xlu0 %9243 }
 0x865   : > { %18112 = vst [vmem:[#allocation93_spill] sm:$0xff] %v17174_v10 }
 0x868   : > { %8961 = vmatmul.mubr.bf16.vlgmr.msra.gmra.mrb[176].mxu1 %v14709_v63  ;;  %v17176_v63 = vpop.permute.xlu1 %9248 }
 0x869   : > { %8968 = vmatprep.mubr.bf16.mxu1 %v14714_v3  ;;  %18113 = vst [vmem:[#allocation27_spill] sm:$0xff] %v17176_v63 }
 0x86c   : > { %v7915_v32 = vpop.permute.xlu1 %7914 }
 0x870   : > { %8969 = vmatmul.mubr.bf16.gmra.mrb[180].mxu1 %v14712_v44  ;;  %v7910_v44 = vpop.permute.xlu0 %7909 }
 0x871   : > { %8976 = vmatprep.mubr.bf16.mxu1 %v14717_v45 }
 0x878   : > { %8977 = vmatmul.mubr.bf16.gmra.mrb[184].mxu1 %v14715_v43 }
 0x879   : > { %8984 = vmatprep.mubr.bf16.mxu1 %v14720_v56  ;;  %v14721_v56 = vld [vmem:[#allocation7 + $0x288] ss:$16 sps:$4 sm:$0xff]  }
 0x87b   : > { %v12221_v3 = vpop.f32.mrb[128].mxu1 }
 0x87c   : > { %v12222_v22 = vpop.f32.mrb[129].mxu1 }
 0x87d   : > { %v12223_v5 = vadd.f32 %v12222_v22, %v12221_v3  ;;  %v12224_v15 = vpop.f32.mrb[130].mxu1  ;;  %v7920_v22 = vpop.permute.xlu0 %7919 }
 0x87e   : > { %v12225_v45 = vpop.f32.mrb[131].mxu1 }
 0x87f   : > { %v8102_v35 = vadd.f32 %v12223_v5, %v7910_v44  ;;  %v12226_v2 = vadd.f32 %v12225_v45, %v12224_v15  ;;  %v7925_v15 = vpop.permute.xlu1 %7924  ;;  %v14729_v5 = vld [vmem:[#allocation7 + $0x2cc] ss:$16 sps:$4 sm:$0xff]  }
 0x880   : > { %8985 = vmatmul.mubr.bf16.gmra.mrb[188].mxu1 %v14718_v49 }
 0x881   : > { %8992 = vmatprep.mubr.bf16.mxu1 %v14723_v53  ;;  %v8105_v51 = vadd.f32 %v12226_v2, %v7915_v32  ;;  %v8164_v43 = vmax.f32 %v8102_v35, 0.0 }
 0x883   : > { %v8165_v42 = vmax.f32 %v8105_v51, 0.0  ;;  %v12227_v31 = vpop.f32.mrb[132].mxu1  ;;  %v14724_v51 = vld [vmem:[#allocation7 + $0x2a8] ss:$16 sps:$4 sm:$0xff]  }
 0x884   : > { %v12228_v18 = vpop.f32.mrb[133].mxu1 }
 0x885   : > { %v12229_v25 = vadd.f32 %v12228_v18, %v12227_v31  ;;  %v12230_v11 = vpop.f32.mrb[134].mxu1  ;;  %v17178_v33 = vpack.c.bf16 %v8165_v42, %v8164_v43  ;;  %v7930_v18 = vpop.permute.xlu0 %7929 }
 0x886   : > { %v12231_v3 = vpop.f32.mrb[135].mxu1 }
 0x887   : > { %18114 = vst [vmem:[#allocation94_spill] sm:$0xff] %v17178_v33  ;;  %v8110_v48 = vadd.f32 %v12229_v25, %v7920_v22  ;;  %v12232_v9 = vadd.f32 %v12231_v3, %v12230_v11  ;;  %v7935_v11 = vpop.permute.xlu1 %7934  ;;  %v14732_v3 = vld [vmem:[#allocation7 + $0x2ec] ss:$16 sps:$4 sm:$0xff]  }
 0x888   : > { %8993 = vmatmul.mubr.bf16.gmra.mrb[192].mxu1 %v14721_v56  ;;  %v14727_v56 = vld [vmem:[#allocation7 + $0x2c8] ss:$16 sps:$4 sm:$0xff]  }
 0x889   : > { %9000 = vmatprep.mubr.bf16.mxu1 %v14726_v17  ;;  %v8113_v49 = vadd.f32 %v12232_v9, %v7925_v15  ;;  %v8166_v53 = vmax.f32 %v8110_v48, 0.0 }
 0x88b   : > { %v8167_v2 = vmax.f32 %v8113_v49, 0.0  ;;  %v12233_v32 = vpop.f32.mrb[136].mxu1 }
 0x88c   : > { %v12234_v35 = vpop.f32.mrb[137].mxu1 }
 0x88d   : > { %v12235_v44 = vadd.f32 %v12234_v35, %v12233_v32  ;;  %v12236_v45 = vpop.f32.mrb[138].mxu1  ;;  %v17180_v31 = vpack.c.bf16 %v8167_v2, %v8166_v53  ;;  %v7940_v53 = vpop.permute.xlu0 %7939 }
 0x88e   : > { %v12237_v42 = vpop.f32.mrb[139].mxu1 }
 0x88f   : > { %18115 = vst [vmem:[#allocation30_spill] sm:$0xff] %v17180_v31  ;;  %v8118_v43 = vadd.f32 %v12235_v44, %v7930_v18  ;;  %v12238_v54 = vadd.f32 %v12237_v42, %v12236_v45  ;;  %v7945_v44 = vpop.permute.xlu1 %7944  ;;  %v14730_v18 = vld [vmem:[#allocation7 + $0x2e8] ss:$16 sps:$4 sm:$0xff]  }
 0x890   : > { %9001 = vmatmul.mubr.bf16.gmra.mrb[196].mxu1 %v14724_v51 }
 0x891   : > { %9008 = vmatprep.mubr.bf16.mxu1 %v14729_v5  ;;  %v8121_v25 = vadd.f32 %v12238_v54, %v7935_v11  ;;  %v8168_v17 = vmax.f32 %v8118_v43, 0.0  ;;  %v14735_v43 = vld [vmem:[#allocation7 + $0x30c] ss:$16 sps:$4 sm:$0xff]  }
 0x893   : > { %v8169_v9 = vmax.f32 %v8121_v25, 0.0  ;;  %v12239_v48 = vpop.f32.mrb[140].mxu1 }
 0x894   : > { %v12240_v22 = vpop.f32.mrb[141].mxu1 }
 0x895   : > { %v12241_v15 = vadd.f32 %v12240_v22, %v12239_v48  ;;  %v12242_v49 = vpop.f32.mrb[142].mxu1  ;;  %v17182_v32 = vpack.c.bf16 %v8169_v9, %v8168_v17  ;;  %v7950_v17 = vpop.permute.xlu0 %7949 }
 0x896   : > { %v12243_v2 = vpop.f32.mrb[143].mxu1 }
 0x897   : > { %18116 = vst [vmem:[#allocation95_spill] sm:$0xff] %v17182_v32  ;;  %v8126_v35 = vadd.f32 %v12241_v15, %v7940_v53  ;;  %v12244_v50 = vadd.f32 %v12243_v2, %v12242_v49  ;;  %v7955_v15 = vpop.permute.xlu1 %7954  ;;  %v14733_v53 = vld [vmem:[#allocation7 + $0x308] ss:$16 sps:$4 sm:$0xff]  }
 0x898   : > { %9009 = vmatmul.mubr.bf16.gmra.mrb[200].mxu1 %v14727_v56 }
 0x899   : > { %9016 = vmatprep.mubr.bf16.mxu1 %v14732_v3  ;;  %v8129_v51 = vadd.f32 %v12244_v50, %v7945_v44  ;;  %v8170_v5 = vmax.f32 %v8126_v35, 0.0  ;;  %v14738_v35 = vld [vmem:[#allocation7 + $0x32c] ss:$16 sps:$4 sm:$0xff]  }
 0x89b   : > { %v8171_v54 = vmax.f32 %v8129_v51, 0.0  ;;  %v12245_v45 = vpop.f32.mrb[144].mxu1 }
 0x89c   : > { %v12246_v42 = vpop.f32.mrb[145].mxu1 }
 0x89d   : > { %v12247_v11 = vadd.f32 %v12246_v42, %v12245_v45  ;;  %v12248_v25 = vpop.f32.mrb[146].mxu1  ;;  %v17184_v48 = vpack.c.bf16 %v8171_v54, %v8170_v5  ;;  %v7960_v5 = vpop.permute.xlu0 %7959 }
 0x89e   : > { %v12249_v9 = vpop.f32.mrb[147].mxu1 }
 0x89f   : > { %18117 = vst [vmem:[#allocation96_spill] sm:$0xff] %v17184_v48  ;;  %v8134_v22 = vadd.f32 %v12247_v11, %v7950_v17  ;;  %v12250_v4 = vadd.f32 %v12249_v9, %v12248_v25  ;;  %v7965_v11 = vpop.permute.xlu1 %7964  ;;  %v14736_v17 = vld [vmem:[#allocation7 + $0x328] ss:$16 sps:$4 sm:$0xff]  }
 0x8a0   : > { %9017 = vmatmul.mubr.bf16.gmra.mrb[204].mxu1 %v14730_v18 }
 0x8a1   : > { %9024 = vmatprep.mubr.bf16.mxu1 %v14735_v43  ;;  %v8137_v56 = vadd.f32 %v12250_v4, %v7955_v15  ;;  %v8172_v3 = vmax.f32 %v8134_v22, 0.0  ;;  %v14741_v22 = vld [vmem:[#allocation7 + $0x34c] ss:$16 sps:$4 sm:$0xff]  }
 0x8a3   : > { %v8173_v50 = vmax.f32 %v8137_v56, 0.0  ;;  %v12251_v49 = vpop.f32.mrb[208].mxu1 }
 0x8a4   : > { %v12252_v2 = vpop.f32.mrb[209].mxu1 }
 0x8a5   : > { %v12253_v44 = vadd.f32 %v12252_v2, %v12251_v49  ;;  %v12254_v51 = vpop.f32.mrb[210].mxu1  ;;  %v17186_v45 = vpack.c.bf16 %v8173_v50, %v8172_v3  ;;  %v7970_v3 = vpop.permute.xlu0 %7969 }
 0x8a6   : > { %v12255_v54 = vpop.f32.mrb[211].mxu1 }
 0x8a7   : > { %18118 = vst [vmem:[#allocation47_spill] sm:$0xff] %v17186_v45  ;;  %v8142_v42 = vadd.f32 %v12253_v44, %v7960_v5  ;;  %v12256_v24 = vadd.f32 %v12255_v54, %v12254_v51  ;;  %v7975_v44 = vpop.permute.xlu1 %7974  ;;  %v14739_v5 = vld [vmem:[#allocation7 + $0x348] ss:$16 sps:$4 sm:$0xff]  }
 0x8a8   : > { %9025 = vmatmul.mubr.bf16.gmra.mrb[0].mxu1 %v14733_v53 }
 0x8a9   : > { %9032 = vmatprep.mubr.bf16.mxu1 %v14738_v35  ;;  %v8145_v18 = vadd.f32 %v12256_v24, %v7965_v11  ;;  %v8174_v43 = vmax.f32 %v8142_v42, 0.0  ;;  %v14744_v42 = vld [vmem:[#allocation7 + $0x36c] ss:$16 sps:$4 sm:$0xff]  }
 0x8ab   : > { %v8175_v4 = vmax.f32 %v8145_v18, 0.0  ;;  %v12257_v25 = vpop.f32.mrb[212].mxu1 }
 0x8ac   : > { %v12258_v9 = vpop.f32.mrb[213].mxu1 }
 0x8ad   : > { %v12259_v15 = vadd.f32 %v12258_v9, %v12257_v25  ;;  %v12260_v56 = vpop.f32.mrb[214].mxu1  ;;  %v17188_v49 = vpack.c.bf16 %v8175_v4, %v8174_v43  ;;  %v7980_v43 = vpop.permute.xlu0 %7979 }
 0x8ae   : > { %v12261_v50 = vpop.f32.mrb[215].mxu1 }
 0x8af   : > { %18119 = vst [vmem:[#allocation97_spill] sm:$0xff] %v17188_v49  ;;  %v8150_v2 = vadd.f32 %v12259_v15, %v7970_v3  ;;  %v12262_v29 = vadd.f32 %v12261_v50, %v12260_v56  ;;  %v7985_v15 = vpop.permute.xlu1 %7984  ;;  %v14742_v3 = vld [vmem:[#allocation7 + $0x368] ss:$16 sps:$4 sm:$0xff]  }
 0x8b0   : > { %9033 = vmatmul.mubr.bf16.gmra.mrb[4].mxu1 %v14736_v17 }
 0x8b1   : > { %9040 = vmatprep.mubr.bf16.mxu1 %v14741_v22  ;;  %v8153_v53 = vadd.f32 %v12262_v29, %v7975_v44  ;;  %v8176_v35 = vmax.f32 %v8150_v2, 0.0  ;;  %v14747_v2 = vld [vmem:[#allocation7 + $0x38c] ss:$16 sps:$4 sm:$0xff]  }
 0x8b3   : > { %v8177_v24 = vmax.f32 %v8153_v53, 0.0  ;;  %v12263_v51 = vpop.f32.mrb[216].mxu1 }
 0x8b4   : > { %v12264_v54 = vpop.f32.mrb[217].mxu1 }
 0x8b5   : > { %v12265_v11 = vadd.f32 %v12264_v54, %v12263_v51  ;;  %v12266_v18 = vpop.f32.mrb[218].mxu1  ;;  %v17190_v25 = vpack.c.bf16 %v8177_v24, %v8176_v35  ;;  %v14745_v54 = vld [vmem:[#allocation7 + $0x388] ss:$16 sps:$4 sm:$0xff]  }
 0x8b6   : > { %v12267_v4 = vpop.f32.mrb[219].mxu1 }
 0x8b7   : > { %18120 = vst [vmem:[#allocation148_spill] sm:$0xff] %v17190_v25  ;;  %v8158_v9 = vadd.f32 %v12265_v11, %v7980_v43  ;;  %v12268_v8 = vadd.f32 %v12267_v4, %v12266_v18 }
 0x8b8   : > { %9041 = vmatmul.mubr.bf16.gmra.mrb[8].mxu1 %v14739_v5 }
 0x8b9   : > { %9048 = vmatprep.mubr.bf16.mxu1 %v14744_v42  ;;  %v8161_v17 = vadd.f32 %v12268_v8, %v7985_v15  ;;  %v8178_v22 = vmax.f32 %v8158_v9, 0.0  ;;  %v14750_v8 = vld [vmem:[#allocation7 + $0x3ac] ss:$16 sps:$4 sm:$0xff]   ;;  %v14748_v15 = vld [vmem:[#allocation7 + $0x3a8] ss:$16 sps:$4 sm:$0xff]  }
 0x8bb   : > { %v8179_v29 = vmax.f32 %v8161_v17, 0.0  ;;  %v12285_v56 = vpop.f32.mrb[220].mxu1 }
 0x8bc   : > { %v12286_v50 = vpop.f32.mrb[221].mxu1 }
 0x8bd   : > { %v17192_v44 = vadd.f32 %v12286_v50, %v12285_v56  ;;  %v12288_v53 = vpop.f32.mrb[222].mxu1  ;;  %v17194_v51 = vpack.c.bf16 %v8179_v29, %v8178_v22  ;;  %v14753_v22 = vld [vmem:[#allocation7 + $0x3cc] ss:$16 sps:$4 sm:$0xff]  }
 0x8be   : > { %v12289_v35 = vpop.f32.mrb[223].mxu1 }
 0x8bf   : > { %18121 = vst [vmem:[#allocation48_spill] sm:$0xff] %v17194_v51  ;;  %v17196_v24 = vadd.f32 %v12289_v35, %v12288_v53  ;;  %v14751_v53 = vld [vmem:[#allocation7 + $0x3c8] ss:$16 sps:$4 sm:$0xff]  }
 0x8c0   : > { %9049 = vmatmul.mubr.bf16.gmra.mrb[12].mxu1 %v14742_v3 }
 0x8c1   : > { %9056 = vmatprep.mubr.bf16.mxu1 %v14747_v2 }
 0x8c3   : > { %v12291_v5 = vpop.f32.mrb[224].mxu1 }
 0x8c4   : > { %v12292_v42 = vpop.f32.mrb[225].mxu1 }
 0x8c5   : > { %v17198_v11 = vadd.f32 %v12292_v42, %v12291_v5  ;;  %v12294_v18 = vpop.f32.mrb[226].mxu1  ;;  %v14756_v5 = vld [vmem:[#allocation7 + $0x3ec] ss:$16 sps:$4 sm:$0xff]  }
 0x8c6   : > { %v12295_v43 = vpop.f32.mrb[227].mxu1 }
 0x8c7   : > { %v17200_v4 = vadd.f32 %v12295_v43, %v12294_v18 }
 0x8c8   : > { %9057 = vmatmul.mubr.bf16.gmra.mrb[16].mxu1 %v14745_v54 }
 0x8c9   : > { %9064 = vmatprep.mubr.bf16.mxu1 %v14750_v8 }
 0x8cb   : > { %v12297_v9 = vpop.f32.mrb[228].mxu1 }
 0x8cc   : > { %v12298_v17 = vpop.f32.mrb[229].mxu1 }
 0x8cd   : > { %v17202_v29 = vadd.f32 %v12298_v17, %v12297_v9  ;;  %v12300_v56 = vpop.f32.mrb[230].mxu1  ;;  %v14754_v9 = vld [vmem:[#allocation7 + $0x3e8] ss:$16 sps:$4 sm:$0xff]  }
 0x8ce   : > { %v12301_v3 = vpop.f32.mrb[231].mxu1 }
 0x8cf   : > { %v17204_v50 = vadd.f32 %v12301_v3, %v12300_v56 }
 0x8d0   : > { %9065 = vmatmul.mubr.bf16.gmra.mrb[20].mxu1 %v14748_v15 }
 0x8d1   : > { %9072 = vmatprep.mubr.bf16.mxu1 %v14753_v22 }
 0x8d3   : > { %v12303_v2 = vpop.f32.mrb[232].mxu1 }
 0x8d4   : > { %v12304_v35 = vpop.f32.mrb[233].mxu1 }
 0x8d5   : > { %v17206_v42 = vadd.f32 %v12304_v35, %v12303_v2  ;;  %v12306_v54 = vpop.f32.mrb[234].mxu1 }
 0x8d6   : > { %v12307_v8 = vpop.f32.mrb[235].mxu1 }
 0x8d7   : > { %v17208_v18 = vadd.f32 %v12307_v8, %v12306_v54 }
 0x8d8   : > { %9073 = vmatmul.mubr.bf16.gmra.mrb[24].mxu1 %v14751_v53 }
 0x8d9   : > { %9080 = vmatprep.mubr.bf16.mxu1 %v14756_v5 }
 0x8db   : > { %v12309_v43 = vpop.f32.mrb[236].mxu1 }
 0x8dc   : > { %v12310_v17 = vpop.f32.mrb[237].mxu1 }
 0x8dd   : > { %v17210_v52 = vadd.f32 %v12310_v17, %v12309_v43  ;;  %v12312_v56 = vpop.f32.mrb[238].mxu1 }
 0x8de   : > { %v12313_v15 = vpop.f32.mrb[239].mxu1 }
 0x8df   : > { %v17212_v22 = vadd.f32 %v12313_v15, %v12312_v56 }
 0x8e0   : > { %9081 = vmatmul.mubr.bf16.gmra.mrb[28].mxu1 %v14754_v9 }
 0x8e1   : > { %9363 = vmatprep.mubr.bf16.mxu1 %v14759_v36 }
 0x8e3   : > { %v12315_v3 = vpop.f32.mrb[240].mxu1 }
 0x8e4   : > { %v12316_v60 = vpop.f32.mrb[241].mxu1 }
 0x8e5   : > { %v17214_v2 = vadd.f32 %v12316_v60, %v12315_v3  ;;  %v12318_v35 = vpop.f32.mrb[242].mxu1 }
 0x8e6   : > { %v12319_v51 = vpop.f32.mrb[243].mxu1 }
 0x8e7   : > { %v17216_v54 = vadd.f32 %v12319_v51, %v12318_v35 }
 0x8eb   : > { %v12321_v53 = vpop.f32.mrb[244].mxu1 }
 0x8ec   : > { %v12322_v5 = vpop.f32.mrb[245].mxu1 }
 0x8ed   : > { %v17218_v8 = vadd.f32 %v12322_v5, %v12321_v53  ;;  %v12324_v25 = vpop.f32.mrb[246].mxu1 }
 0x8ee   : > { %v12325_v43 = vpop.f32.mrb[247].mxu1 }
 0x8ef   : > { %v17220_v17 = vadd.f32 %v12325_v43, %v12324_v25 }
 0x8f3   : > { %v12327_v49 = vpop.f32.mrb[248].mxu1 }
 0x8f4   : > { %v12328_v56 = vpop.f32.mrb[249].mxu1 }
 0x8f5   : > { %v17222_v15 = vadd.f32 %v12328_v56, %v12327_v49  ;;  %v12330_v9 = vpop.f32.mrb[250].mxu1 }
 0x8f6   : > { %v12331_v45 = vpop.f32.mrb[251].mxu1 }
 0x8f7   : > { %v17224_v60 = vadd.f32 %v12331_v45, %v12330_v9 }
 0x8fb   : > { %v12333_v3 = vpop.f32.mrb[252].mxu1 }
 0x8fc   : > { %v12334_v48 = vpop.f32.mrb[253].mxu1 }
 0x8fd   : > { %v17226_v51 = vadd.f32 %v12334_v48, %v12333_v3  ;;  %v12336_v35 = vpop.f32.mrb[254].mxu1 }
 0x8fe   : > { %v12337_v32 = vpop.f32.mrb[255].mxu1 }
 0x8ff   : > { %v17228_v53 = vadd.f32 %v12337_v32, %v12336_v35 }
 0x903   : > { %v12339_v5 = vpop.f32.mrb[148].mxu1 }
 0x904   : > { %v12340_v31 = vpop.f32.mrb[149].mxu1 }
 0x905   : > { %v17230_v25 = vadd.f32 %v12340_v31, %v12339_v5  ;;  %v12342_v43 = vpop.f32.mrb[150].mxu1 }
 0x906   : > { %v12343_v33 = vpop.f32.mrb[151].mxu1 }
 0x907   : > { %v17232_v49 = vadd.f32 %v12343_v33, %v12342_v43 }
 0x90b   : > { %v12345_v56 = vpop.f32.mrb[152].mxu1 }
 0x90c   : > { %v12346_v63 = vpop.f32.mrb[153].mxu1 }
 0x90d   : > { %v17234_v45 = vadd.f32 %v12346_v63, %v12345_v56  ;;  %v12348_v9 = vpop.f32.mrb[154].mxu1 }
 0x90e   : > { %v12349_v10 = vpop.f32.mrb[155].mxu1 }
 0x90f   : > { %v17236_v48 = vadd.f32 %v12349_v10, %v12348_v9 }
 0x913   : > { %v12351_v3 = vpop.f32.mrb[156].mxu1 }
 0x914   : > { %v12352_v30 = vpop.f32.mrb[157].mxu1 }
 0x915   : > { %v17238_v32 = vadd.f32 %v12352_v30, %v12351_v3  ;;  %v12354_v35 = vpop.f32.mrb[158].mxu1 }
 0x916   : > { %v12355_v12 = vpop.f32.mrb[159].mxu1 }
 0x917   : > { %v17240_v31 = vadd.f32 %v12355_v12, %v12354_v35 }
 0x91b   : > { %v12357_v5 = vpop.f32.mrb[160].mxu1 }
 0x91c   : > { %v12358_v21 = vpop.f32.mrb[161].mxu1 }
 0x91d   : > { %v17242_v33 = vadd.f32 %v12358_v21, %v12357_v5  ;;  %v12360_v43 = vpop.f32.mrb[162].mxu1 }
 0x91e   : > { %v12361_v1 = vpop.f32.mrb[163].mxu1 }
 0x91f   : > { %v17244_v63 = vadd.f32 %v12361_v1, %v12360_v43 }
 0x923   : > { %v12363_v56 = vpop.f32.mrb[164].mxu1 }
 0x924   : > { %v12364_v41 = vpop.f32.mrb[165].mxu1 }
 0x925   : > { %v17246_v10 = vadd.f32 %v12364_v41, %v12363_v56  ;;  %v12366_v9 = vpop.f32.mrb[166].mxu1 }
 0x926   : > { %v12367_v7 = vpop.f32.mrb[167].mxu1 }
 0x927   : > { %v17248_v30 = vadd.f32 %v12367_v7, %v12366_v9  ;;  %v18125_v7 = vld [vmem:[#allocation32_spill] sm:$0xff] }
 0x928   : > { %v8802_v9 = vadd.f32 %v17192_v44, %v18125_v7  ;;  %v18128_v7 = vld [vmem:[#allocation37_spill] sm:$0xff] }
 0x92b   : > { %v12369_v3 = vpop.f32.mrb[168].mxu1 }
 0x92c   : > { %v12370_v19 = vpop.f32.mrb[169].mxu1 }
 0x92d   : > { %v17250_v12 = vadd.f32 %v12370_v19, %v12369_v3  ;;  %v12372_v35 = vpop.f32.mrb[170].mxu1 }
 0x92e   : > { %v12373_v46 = vpop.f32.mrb[171].mxu1 }
 0x92f   : > { %v17252_v21 = vadd.f32 %v12373_v46, %v12372_v35  ;;  %v8805_v46 = vadd.f32 %v17196_v24, %v18126_v55  ;;  %v8813_v55 = vadd.f32 %v17200_v4, %v18128_v7 }
 0x931   : > { %18122 = vst [vmem:[#allocation98_spill] sm:$0xff] %v17252_v21 }
 0x933   : > { %v12375_v5 = vpop.f32.mrb[172].mxu1 }
 0x934   : > { %v12376_v28 = vpop.f32.mrb[173].mxu1 }
 0x935   : > { %v17254_v1 = vadd.f32 %v12376_v28, %v12375_v5  ;;  %v12378_v43 = vpop.f32.mrb[174].mxu1 }
 0x936   : > { %v12379_v57 = vpop.f32.mrb[175].mxu1 }
 0x937   : > { %18123 = vst [vmem:[#allocation150_spill] sm:$0xff] %v17254_v1  ;;  %v17256_v41 = vadd.f32 %v12379_v57, %v12378_v43 }
 0x939   : > { %18124 = vst [vmem:[#allocation49_spill] sm:$0xff] %v17256_v41  ;;  %v18127_v41 = vld [vmem:[#allocation35_spill] sm:$0xff] }
 0x93a   : > { %v8810_v47 = vadd.f32 %v17198_v11, %v18127_v41 }
 0x93b   : > { %v12397_v56 = vpop.f32.mrb[176].mxu1 }
 0x93c   : > { %v12398_v34 = vpop.f32.mrb[177].mxu1 }
 0x93d   : > { %v12399_v37 = vadd.f32 %v12398_v34, %v12397_v56  ;;  %v12400_v19 = vpop.f32.mrb[178].mxu1 }
 0x93e   : > { %v12401_v3 = vpop.f32.mrb[179].mxu1 }
 0x93f   : > { %v8963_v35 = vadd.f32 %v12399_v37, %v8802_v9  ;;  %v12402_v0 = vadd.f32 %v12401_v3, %v12400_v19 }
 0x941   : > { %v8966_v28 = vadd.f32 %v12402_v0, %v8805_v46  ;;  %v9089_v5 = vmax.f32 %v8963_v35, 0.0  ;;  %v18129_v46 = vld [vmem:[#allocation38_spill] sm:$0xff] }
 0x942   : > { %v8818_v35 = vadd.f32 %v17202_v29, %v18129_v46 }
 0x943   : > { %v9090_v1 = vmax.f32 %v8966_v28, 0.0  ;;  %v12403_v57 = vpop.f32.mrb[180].mxu1 }
 0x944   : > { %v12404_v43 = vpop.f32.mrb[181].mxu1 }
 0x945   : > { %v12405_v21 = vadd.f32 %v12404_v43, %v12403_v57  ;;  %v12406_v44 = vpop.f32.mrb[182].mxu1  ;;  %v17264_v34 = vpack.c.bf16 %v9090_v1, %v9089_v5  ;;  %v18130_v5 = vld [vmem:[#allocation40_spill] sm:$0xff] }
 0x946   : > { %v12407_v56 = vpop.f32.mrb[183].mxu1  ;;  %v8821_v57 = vadd.f32 %v17204_v50, %v18130_v5 }
 0x947   : > { %v8971_v37 = vadd.f32 %v12405_v21, %v8810_v47  ;;  %v12408_v24 = vadd.f32 %v12407_v56, %v12406_v44 }
 0x949   : > { %v8974_v9 = vadd.f32 %v12408_v24, %v8813_v55  ;;  %v9091_v0 = vmax.f32 %v8971_v37, 0.0  ;;  %v18131_v55 = vld [vmem:[#allocation41_spill] sm:$0xff] }
 0x94a   : > { %v8826_v37 = vadd.f32 %v17206_v42, %v18131_v55  ;;  %v8834_v42 = vadd.f32 %v17210_v52, %v17100_v26 }
 0x94b   : > { %v9092_v36 = vmax.f32 %v8974_v9, 0.0  ;;  %v12409_v19 = vpop.f32.mrb[184].mxu1 }
 0x94c   : > { %v12410_v3 = vpop.f32.mrb[185].mxu1 }
 0x94d   : > { %v12411_v28 = vadd.f32 %v12410_v3, %v12409_v19  ;;  %v12412_v11 = vpop.f32.mrb[186].mxu1  ;;  %v17270_v41 = vpack.c.bf16 %v9092_v36, %v9091_v0  ;;  %v8829_v19 = vadd.f32 %v17208_v18, %v17089_v6 }
 0x94e   : > { %v12413_v1 = vpop.f32.mrb[187].mxu1 }
 0x94f   : > { %v8979_v43 = vadd.f32 %v12411_v28, %v8818_v35  ;;  %v12414_v4 = vadd.f32 %v12413_v1, %v12412_v11 }
 0x951   : > { %v8982_v47 = vadd.f32 %v12414_v4, %v8821_v57  ;;  %v9093_v21 = vmax.f32 %v8979_v43, 0.0 }
 0x953   : > { %v9094_v44 = vmax.f32 %v8982_v47, 0.0  ;;  %v12415_v56 = vpop.f32.mrb[188].mxu1  ;;  %v8837_v47 = vadd.f32 %v17212_v22, %v17102_v59 }
 0x954   : > { %v12416_v7 = vpop.f32.mrb[189].mxu1 }
 0x955   : > { %v12417_v24 = vadd.f32 %v12416_v7, %v12415_v56  ;;  %v12418_v29 = vpop.f32.mrb[190].mxu1  ;;  %v17276_v9 = vpack.c.bf16 %v9094_v44, %v9093_v21 }
 0x956   : > { %v12419_v0 = vpop.f32.mrb[191].mxu1 }
 0x957   : > { %v8987_v36 = vadd.f32 %v12417_v24, %v8826_v37  ;;  %v12420_v50 = vadd.f32 %v12419_v0, %v12418_v29  ;;  %v8842_v37 = vadd.f32 %v17214_v2, %v17114_v38  ;;  %v8845_v0 = vadd.f32 %v17216_v54, %v17117_v62 }
 0x959   : > { %v8990_v3 = vadd.f32 %v12420_v50, %v8829_v19  ;;  %v9095_v46 = vmax.f32 %v8987_v36, 0.0 }
 0x95b   : > { %v9096_v35 = vmax.f32 %v8990_v3, 0.0  ;;  %v12421_v28 = vpop.f32.mrb[192].mxu1 }
 0x95c   : > { %v12422_v11 = vpop.f32.mrb[193].mxu1 }
 0x95d   : > { %v17280_v1 = vpack.c.bf16 %v9096_v35, %v9095_v46  ;;  %v12423_v5 = vadd.f32 %v12422_v11, %v12421_v28  ;;  %v12424_v57 = vpop.f32.mrb[194].mxu1  ;;  %v8850_v35 = vadd.f32 %v17218_v8, %v17128_v40 }
 0x95e   : > { %v12425_v43 = vpop.f32.mrb[195].mxu1 }
 0x95f   : > { %v8995_v4 = vadd.f32 %v12423_v5, %v8834_v42  ;;  %v12426_v21 = vadd.f32 %v12425_v43, %v12424_v57  ;;  %v8853_v42 = vadd.f32 %v17220_v17, %v17130_v39 }
 0x961   : > { %v8998_v6 = vadd.f32 %v12426_v21, %v8837_v47  ;;  %v9097_v18 = vmax.f32 %v8995_v4, 0.0  ;;  %v8858_v21 = vadd.f32 %v17222_v15, %v17142_v16 }
 0x963   : > { %v9098_v44 = vmax.f32 %v8998_v6, 0.0  ;;  %v12427_v56 = vpop.f32.mrb[196].mxu1 }
 0x964   : > { %v12428_v7 = vpop.f32.mrb[197].mxu1 }
 0x965   : > { %v17286_v55 = vpack.c.bf16 %v9098_v44, %v9097_v18  ;;  %v12429_v24 = vadd.f32 %v12428_v7, %v12427_v56  ;;  %v12430_v52 = vpop.f32.mrb[198].mxu1  ;;  %v8861_v44 = vadd.f32 %v17224_v60, %v17144_v23 }
 0x966   : > { %v12431_v26 = vpop.f32.mrb[199].mxu1 }
 0x967   : > { %v9003_v29 = vadd.f32 %v12429_v24, %v8842_v37  ;;  %v12432_v36 = vadd.f32 %v12431_v26, %v12430_v52  ;;  %v18132_v26 = vld [vmem:[#allocation146_spill] sm:$0xff] }
 0x969   : > { %v9006_v59 = vadd.f32 %v12432_v36, %v8845_v0  ;;  %v9099_v22 = vmax.f32 %v9003_v29, 0.0  ;;  %v8866_v29 = vadd.f32 %v17226_v51, %v18132_v26 }
 0x96b   : > { %v9100_v19 = vmax.f32 %v9006_v59, 0.0  ;;  %v12433_v50 = vpop.f32.mrb[200].mxu1  ;;  %v18133_v59 = vld [vmem:[#allocation147_spill] sm:$0xff] }
 0x96c   : > { %v12434_v3 = vpop.f32.mrb[201].mxu1 }
 0x96d   : > { %v17292_v46 = vpack.c.bf16 %v9100_v19, %v9099_v22  ;;  %v12435_v28 = vadd.f32 %v12434_v3, %v12433_v50  ;;  %v12436_v38 = vpop.f32.mrb[202].mxu1  ;;  %v8869_v22 = vadd.f32 %v17228_v53, %v18133_v59 }
 0x96e   : > { %v12437_v2 = vpop.f32.mrb[203].mxu1 }
 0x96f   : > { %v9011_v11 = vadd.f32 %v12435_v28, %v8850_v35  ;;  %v12438_v5 = vadd.f32 %v12437_v2, %v12436_v38  ;;  %v18134_v28 = vld [vmem:[#allocation33_spill] sm:$0xff] }
 0x970   : > { %v8874_v38 = vadd.f32 %v17230_v25, %v18134_v28 }
 0x971   : > { %v9014_v62 = vadd.f32 %v12438_v5, %v8853_v42  ;;  %v9101_v54 = vmax.f32 %v9011_v11, 0.0 }
 0x973   : > { %v9102_v57 = vmax.f32 %v9014_v62, 0.0  ;;  %v12439_v43 = vpop.f32.mrb[204].mxu1  ;;  %v18135_v62 = vld [vmem:[#allocation36_spill] sm:$0xff] }
 0x974   : > { %v12440_v4 = vpop.f32.mrb[205].mxu1 }
 0x975   : > { %v17298_v47 = vpack.c.bf16 %v9102_v57, %v9101_v54  ;;  %v12441_v6 = vadd.f32 %v12440_v4, %v12439_v43  ;;  %v12442_v40 = vpop.f32.mrb[206].mxu1  ;;  %v8877_v54 = vadd.f32 %v17232_v49, %v18135_v62 }
 0x976   : > { %v12443_v8 = vpop.f32.mrb[207].mxu1 }
 0x977   : > { %v9019_v18 = vadd.f32 %v12441_v6, %v8858_v21  ;;  %v12444_v56 = vadd.f32 %v12443_v8, %v12442_v40  ;;  %v18136_v40 = vld [vmem:[#allocation149_spill] sm:$0xff] }
 0x978   : > { %v8882_v25 = vadd.f32 %v17234_v45, %v18136_v40 }
 0x979   : > { %v9022_v39 = vadd.f32 %v12444_v56, %v8861_v44  ;;  %v9103_v17 = vmax.f32 %v9019_v18, 0.0 }
 0x97b   : > { %v9104_v7 = vmax.f32 %v9022_v39, 0.0  ;;  %v12445_v37 = vpop.f32.mrb[0].mxu1 }
 0x97c   : > { %v12446_v24 = vpop.f32.mrb[1].mxu1 }
 0x97d   : > { %v17304_v52 = vpack.c.bf16 %v9104_v7, %v9103_v17  ;;  %v12447_v0 = vadd.f32 %v12446_v24, %v12445_v37  ;;  %v12448_v16 = vpop.f32.mrb[2].mxu1  ;;  %v18137_v17 = vld [vmem:[#allocation151_spill] sm:$0xff] }
 0x97e   : > { %v12449_v15 = vpop.f32.mrb[3].mxu1  ;;  %v8885_v49 = vadd.f32 %v17236_v48, %v18137_v17  ;;  %v18140_v17 = vld [vmem:[#allocation98_spill] sm:$0xff] }
 0x97f   : > { %v9027_v36 = vadd.f32 %v12447_v0, %v8866_v29  ;;  %v12450_v19 = vadd.f32 %v12449_v15, %v12448_v16  ;;  %v18138_v0 = vld [vmem:[#allocation39_spill] sm:$0xff] }
 0x980   : > { %v8890_v45 = vadd.f32 %v17238_v32, %v18138_v0  ;;  %v8898_v32 = vadd.f32 %v17242_v33, %v17092_v58  ;;  %v8906_v58 = vadd.f32 %v17246_v10, %v17107_v20  ;;  %v8914_v20 = vadd.f32 %v17250_v12, %v17120_v61 }
 0x981   : > { %v9030_v23 = vadd.f32 %v12450_v19, %v8869_v22  ;;  %v9105_v60 = vmax.f32 %v9027_v36, 0.0  ;;  %v18139_v19 = vld [vmem:[#allocation42_spill] sm:$0xff] }
 0x982   : > { %v8893_v48 = vadd.f32 %v17240_v31, %v18139_v19  ;;  %v8901_v31 = vadd.f32 %v17244_v63, %v17096_v13  ;;  %v8909_v13 = vadd.f32 %v17248_v30, %v17110_v27  ;;  %v8917_v27 = vadd.f32 %v18140_v17, %v17124_v14 }
 0x983   : > { %v9106_v50 = vmax.f32 %v9030_v23, 0.0  ;;  %v12451_v3 = vpop.f32.mrb[4].mxu1 }
 0x984   : > { %v12452_v35 = vpop.f32.mrb[5].mxu1 }
 0x985   : > { %v12453_v2 = vadd.f32 %v12452_v35, %v12451_v3  ;;  %v12454_v11 = vpop.f32.mrb[6].mxu1  ;;  %v9129_v42 = vpack.c.bf16 %v9106_v50, %v9105_v60 }
 0x986   : > { %v12455_v51 = vpop.f32.mrb[7].mxu1 }
 0x987   : > { %v9035_v5 = vadd.f32 %v12453_v2, %v8874_v38  ;;  %v12456_v57 = vadd.f32 %v12455_v51, %v12454_v11  ;;  %12493 = vmatprep.subr.bf16.mxu1 %v9129_v42 }
 0x988   : > { %12494 = vmatpush3.bf16.msra.mxu1 %v17264_v34 }
 0x989   : > { %v9038_v53 = vadd.f32 %v12456_v57, %v8877_v54  ;;  %v9107_v43 = vmax.f32 %v9035_v5, 0.0 }
 0x98b   : > { %v9108_v4 = vmax.f32 %v9038_v53, 0.0  ;;  %v12457_v21 = vpop.f32.mrb[8].mxu1 }
 0x98c   : > { %v12458_v6 = vpop.f32.mrb[9].mxu1 }
 0x98d   : > { %v12459_v8 = vadd.f32 %v12458_v6, %v12457_v21  ;;  %v12460_v18 = vpop.f32.mrb[10].mxu1  ;;  %v9130_v44 = vpack.c.bf16 %v9108_v4, %v9107_v43 }
 0x98e   : > { %v12461_v56 = vpop.f32.mrb[11].mxu1 }
 0x98f   : > { %v9043_v39 = vadd.f32 %v12459_v8, %v8882_v25  ;;  %v12462_v7 = vadd.f32 %v12461_v56, %v12460_v18  ;;  %12495 = vmatprep.subr.bf16.mxu1 %v9130_v44 }
 0x990   : > { %12496 = vmatpush3.bf16.msra.mxu1 %v17270_v41 }
 0x991   : > { %v9046_v34 = vadd.f32 %v12462_v7, %v8885_v49  ;;  %v9109_v37 = vmax.f32 %v9043_v39, 0.0 }
 0x993   : > { %v9110_v24 = vmax.f32 %v9046_v34, 0.0  ;;  %v12463_v26 = vpop.f32.mrb[12].mxu1 }
 0x994   : > { %v12464_v29 = vpop.f32.mrb[13].mxu1 }
 0x995   : > { %v12465_v16 = vadd.f32 %v12464_v29, %v12463_v26  ;;  %v12466_v15 = vpop.f32.mrb[14].mxu1  ;;  %v9131_v36 = vpack.c.bf16 %v9110_v24, %v9109_v37  ;;  %v18141_v24 = vld [vmem:[#allocation134_spill] sm:$0xff] }
 0x996   : > { %v12467_v59 = vpop.f32.mrb[15].mxu1  ;;  %v18142_v26 = vld [vmem:[#allocation150_spill] sm:$0xff] }
 0x997   : > { %v9051_v22 = vadd.f32 %v12465_v16, %v8890_v45  ;;  %v12468_v23 = vadd.f32 %v12467_v59, %v12466_v15  ;;  %12497 = vmatprep.subr.bf16.mxu1 %v9131_v36  ;;  %v8922_v61 = vadd.f32 %v18142_v26, %v18141_v24  ;;  %v18143_v15 = vld [vmem:[#allocation85_spill] sm:$0xff] }
 0x998   : > { %12498 = vmatpush3.bf16.msra.mxu1 %v17276_v9  ;;  %v18144_v36 = vld [vmem:[#allocation49_spill] sm:$0xff] }
 0x999   : > { %v9054_v41 = vadd.f32 %v12468_v23, %v8893_v48  ;;  %v9111_v60 = vmax.f32 %v9051_v22, 0.0  ;;  %v8925_v14 = vadd.f32 %v18144_v36, %v18143_v15  ;;  %v14757_v23 = vld [vmem:[#allocation8 + $0x80] ss:$8 sps:$4 sm:$0xff]  }
 0x99b   : > { %v9112_v50 = vmax.f32 %v9054_v41, 0.0  ;;  %v12469_v3 = vpop.f32.mrb[16].mxu1  ;;  %v14762_v41 = vld [vmem:[#allocation8 + $0x94] ss:$8 sps:$4 sm:$0xff]  }
 0x99c   : > { %v12470_v35 = vpop.f32.mrb[17].mxu1 }
 0x99d   : > { %v12471_v28 = vadd.f32 %v12470_v35, %v12469_v3  ;;  %v12472_v38 = vpop.f32.mrb[18].mxu1  ;;  %v9132_v2 = vpack.c.bf16 %v9112_v50, %v9111_v60  ;;  %v14760_v60 = vld [vmem:[#allocation8 + $0x90] ss:$8 sps:$4 sm:$0xff]   ;;  %v14765_v50 = vld [vmem:[#allocation8 + $0xa4] ss:$8 sps:$4 sm:$0xff]  }
 0x99e   : > { %v12473_v11 = vpop.f32.mrb[19].mxu1  ;;  %v14763_v3 = vld [vmem:[#allocation8 + $0xa0] ss:$8 sps:$4 sm:$0xff]   ;;  %v14768_v35 = vld [vmem:[#allocation8 + $0xb4] ss:$8 sps:$4 sm:$0xff]  }
 0x99f   : > { %v9059_v42 = vadd.f32 %v12471_v28, %v8898_v32  ;;  %v12474_v51 = vadd.f32 %v12473_v11, %v12472_v38  ;;  %12499 = vmatprep.subr.bf16.mxu1 %v9132_v2  ;;  %v14771_v32 = vld [vmem:[#allocation8 + $0xc4] ss:$8 sps:$4 sm:$0xff]   ;;  %v14769_v28 = vld [vmem:[#allocation8 + $0xc0] ss:$8 sps:$4 sm:$0xff]   ;;  %v14774_v38 = vld [vmem:[#allocation8 + $0xd4] ss:$8 sps:$4 sm:$0xff]  }
 0x9a0   : > { %12500 = vmatpush3.bf16.msra.mxu1 %v17280_v1  ;;  %v14777_v2 = vld [vmem:[#allocation8 + $0xe4] ss:$8 sps:$4 sm:$0xff]   ;;  %v14775_v11 = vld [vmem:[#allocation8 + $0xe0] ss:$8 sps:$4 sm:$0xff]  }
 0x9a1   : > { %v9062_v9 = vadd.f32 %v12474_v51, %v8901_v31  ;;  %v9113_v5 = vmax.f32 %v9059_v42, 0.0  ;;  %v14780_v42 = vld [vmem:[#allocation8 + $0xf4] ss:$8 sps:$4 sm:$0xff]   ;;  %v14778_v31 = vld [vmem:[#allocation8 + $0xf0] ss:$8 sps:$4 sm:$0xff]   ;;  %v17677_v51 = vmov 0.0  }
 0x9a3   : > { %v9114_v62 = vmax.f32 %v9062_v9, 0.0  ;;  %v12475_v54 = vpop.f32.mrb[20].mxu1 }
 0x9a4   : > { %v12476_v57 = vpop.f32.mrb[21].mxu1 }
 0x9a5   : > { %v12477_v33 = vadd.f32 %v12476_v57, %v12475_v54  ;;  %v12478_v53 = vpop.f32.mrb[22].mxu1  ;;  %v9133_v43 = vpack.c.bf16 %v9114_v62, %v9113_v5 }
 0x9a6   : > { %v12479_v4 = vpop.f32.mrb[23].mxu1 }
 0x9a7   : > { %v9067_v21 = vadd.f32 %v12477_v33, %v8906_v58  ;;  %v12480_v63 = vadd.f32 %v12479_v4, %v12478_v53  ;;  %12501 = vmatprep.subr.bf16.mxu1 %v9133_v43  ;;  %v18145_v58 = vld [vmem:[#allocation86_spill] sm:$0xff] }
 0x9a8   : > { %12502 = vmatpush3.bf16.msra.mxu1 %v17286_v55  ;;  %v18146_v43 = vld [vmem:[#allocation138_spill] sm:$0xff] }
 0x9a9   : > { %v9070_v1 = vadd.f32 %v12480_v63, %v8909_v13  ;;  %v9115_v6 = vmax.f32 %v9067_v21, 0.0 }
 0x9ab   : > { %v9116_v40 = vmax.f32 %v9070_v1, 0.0  ;;  %v12481_v25 = vpop.f32.mrb[24].mxu1 }
 0x9ac   : > { %v12482_v8 = vpop.f32.mrb[25].mxu1 }
 0x9ad   : > { %v12483_v10 = vadd.f32 %v12482_v8, %v12481_v25  ;;  %v12484_v18 = vpop.f32.mrb[26].mxu1  ;;  %v9134_v44 = vpack.c.bf16 %v9116_v40, %v9115_v6 }
 0x9ae   : > { %v12485_v56 = vpop.f32.mrb[27].mxu1 }
 0x9af   : > { %v9075_v39 = vadd.f32 %v12483_v10, %v8914_v20  ;;  %v12486_v30 = vadd.f32 %v12485_v56, %v12484_v18  ;;  %12503 = vmatprep.subr.bf16.mxu1 %v9134_v44  ;;  %v18147_v20 = vld [vmem:[#allocation87_spill] sm:$0xff]  ;;  %v18148_v44 = vld [vmem:[#allocation141_spill] sm:$0xff] }
 0x9b0   : > { %12504 = vmatpush3.bf16.msra.mxu1 %v17292_v46 }
 0x9b1   : > { %v9078_v55 = vadd.f32 %v12486_v30, %v8917_v27  ;;  %v9117_v49 = vmax.f32 %v9075_v39, 0.0 }
 0x9b3   : > { %v9118_v7 = vmax.f32 %v9078_v55, 0.0  ;;  %v12487_v34 = vpop.f32.mrb[28].mxu1 }
 0x9b4   : > { %v12488_v37 = vpop.f32.mrb[29].mxu1 }
 0x9b5   : > { %v12489_v12 = vadd.f32 %v12488_v37, %v12487_v34  ;;  %v12490_v29 = vpop.f32.mrb[30].mxu1  ;;  %v9135_v0 = vpack.c.bf16 %v9118_v7, %v9117_v49  ;;  %v18149_v37 = vld [vmem:[#allocation88_spill] sm:$0xff] }
 0x9b6   : > { %v12491_v45 = vpop.f32.mrb[31].mxu1 }
 0x9b7   : > { %v9083_v16 = vadd.f32 %v12489_v12, %v8922_v61  ;;  %v12492_v59 = vadd.f32 %v12491_v45, %v12490_v29  ;;  %12505 = vmatprep.subr.bf16.mxu1 %v9135_v0  ;;  %v18150_v61 = vld [vmem:[#allocation142_spill] sm:$0xff] }
 0x9b8   : > { %12506 = vmatpush3.bf16.msra.mxu1 %v17298_v47  ;;  %v14766_v47 = vld [vmem:[#allocation8 + $0xb0] ss:$8 sps:$4 sm:$0xff]  }
 0x9b9   : > { %v9086_v46 = vadd.f32 %v12492_v59, %v8925_v14  ;;  %v9119_v22 = vmax.f32 %v9083_v16, 0.0 }
 0x9bb   : > { %v9120_v19 = vmax.f32 %v9086_v46, 0.0  ;;  %v18151_v46 = vld [vmem:[#allocation89_spill] sm:$0xff] }
 0x9bd   : > { %v9136_v48 = vpack.c.bf16 %v9120_v19, %v9119_v22 }
 0x9bf   : > { %12507 = vmatprep.subr.bf16.mxu1 %v9136_v48  ;;  %v18152_v48 = vld [vmem:[#allocation21_spill] sm:$0xff] }
 0x9c0   : > { %12508 = vmatpush3.bf16.msra.mxu1 %v17304_v52  ;;  %v14772_v52 = vld [vmem:[#allocation8 + $0xd0] ss:$8 sps:$4 sm:$0xff]  }
 0x9c1   : > { %12872 = vmatprep.subr.bf16.mxu1 %v17677_v51 }
 0x9c3   : > { %9364 = vmatmul.mubr.bf16.vlgmr.msra.gmra.mrb[32].mxu1 %v14757_v23 }
 0x9c4   : > { %9371 = vmatprep.mubr.bf16.mxu1 %v14762_v41 }
 0x9cb   : > { %9372 = vmatmul.mubr.bf16.gmra.mrb[36].mxu1 %v14760_v60 }
 0x9cc   : > { %9379 = vmatprep.mubr.bf16.mxu1 %v14765_v50 }
 0x9d3   : > { %9380 = vmatmul.mubr.bf16.gmra.mrb[40].mxu1 %v14763_v3 }
 0x9d4   : > { %9387 = vmatprep.mubr.bf16.mxu1 %v14768_v35 }
 0x9db   : > { %9388 = vmatmul.mubr.bf16.gmra.mrb[44].mxu1 %v14766_v47 }
 0x9dc   : > { %9395 = vmatprep.mubr.bf16.mxu1 %v14771_v32 }
 0x9e3   : > { %9396 = vmatmul.mubr.bf16.gmra.mrb[48].mxu1 %v14769_v28 }
 0x9e4   : > { %9403 = vmatprep.mubr.bf16.mxu1 %v14774_v38  ;;  %v18153_v38 = vld [vmem:[#allocation90_spill] sm:$0xff] }
 0x9eb   : > { %9404 = vmatmul.mubr.bf16.gmra.mrb[52].mxu1 %v14772_v52 }
 0x9ec   : > { %9411 = vmatprep.mubr.bf16.mxu1 %v14777_v2 }
 0x9f3   : > { %9412 = vmatmul.mubr.bf16.gmra.mrb[56].mxu1 %v14775_v11  ;;  %v18154_v11 = vld [vmem:[#allocation24_spill] sm:$0xff] }
 0x9f4   : > { %9419 = vmatprep.mubr.bf16.mxu1 %v14780_v42 }
 0x9fb   : > { %9420 = vmatmul.mubr.bf16.gmra.mrb[60].mxu1 %v14778_v31 }
 0x9fc   : > { %12888 = vmatprep.mubr.msk.bf16.mxu1 %vm15156_vm0, %v17677_v51 }
 0xa96   : > { %v12509_v9 = vpop.f32.mrb[32].mxu1 }
 0xa97   : > { %v12510_v5 = vpop.f32.mrb[33].mxu1 }
 0xa98   : > { %v12511_v62 = vadd.f32 %v12510_v5, %v12509_v9  ;;  %v12512_v54 = vpop.f32.mrb[34].mxu1 }
 0xa99   : > { %v12513_v57 = vpop.f32.mrb[35].mxu1 }
 0xa9a   : > { %v9366_v33 = vadd.f32 %v12511_v62, %v18145_v58  ;;  %v12514_v53 = vadd.f32 %v12513_v57, %v12512_v54 }
 0xa9c   : > { %v9369_v4 = vadd.f32 %v12514_v53, %v18146_v43  ;;  %v9428_v21 = vmax.f32 %v9366_v33, 0.0  ;;  %v18155_v53 = vld [vmem:[#allocation91_spill] sm:$0xff] }
 0xa9e   : > { %v9429_v13 = vmax.f32 %v9369_v4, 0.0  ;;  %v12515_v63 = vpop.f32.mrb[36].mxu1 }
 0xa9f   : > { %v12516_v1 = vpop.f32.mrb[37].mxu1 }
 0xaa0   : > { %v9444_v6 = vpack.c.bf16 %v9429_v13, %v9428_v21  ;;  %v12517_v40 = vadd.f32 %v12516_v1, %v12515_v63  ;;  %v12518_v25 = vpop.f32.mrb[38].mxu1  ;;  %v18156_v21 = vld [vmem:[#allocation144_spill] sm:$0xff] }
 0xaa1   : > { %v12519_v8 = vpop.f32.mrb[39].mxu1 }
 0xaa2   : > { %v9374_v10 = vadd.f32 %v12517_v40, %v18147_v20  ;;  %v12520_v18 = vadd.f32 %v12519_v8, %v12518_v25  ;;  %12873 = vmatpush3.bf16.msra.mxu1 %v9444_v6 }
 0xaa3   : > { %12874 = vmatprep.subr.bf16.mxu1 %v17677_v51 }
 0xaa4   : > { %v9377_v56 = vadd.f32 %v12520_v18, %v18148_v44  ;;  %v9430_v39 = vmax.f32 %v9374_v10, 0.0  ;;  %v18157_v18 = vld [vmem:[#allocation92_spill] sm:$0xff] }
 0xaa6   : > { %v9431_v17 = vmax.f32 %v9377_v56, 0.0  ;;  %v12521_v27 = vpop.f32.mrb[40].mxu1 }
 0xaa7   : > { %v12522_v30 = vpop.f32.mrb[41].mxu1 }
 0xaa8   : > { %v9445_v55 = vpack.c.bf16 %v9431_v17, %v9430_v39  ;;  %v12523_v49 = vadd.f32 %v12522_v30, %v12521_v27  ;;  %v12524_v7 = vpop.f32.mrb[42].mxu1  ;;  %v18158_v39 = vld [vmem:[#allocation145_spill] sm:$0xff] }
 0xaa9   : > { %v12525_v34 = vpop.f32.mrb[43].mxu1 }
 0xaaa   : > { %v9382_v24 = vadd.f32 %v12523_v49, %v18149_v37  ;;  %v12526_v26 = vadd.f32 %v12525_v34, %v12524_v7  ;;  %12875 = vmatpush3.bf16.msra.mxu1 %v9445_v55 }
 0xaab   : > { %12876 = vmatprep.subr.bf16.mxu1 %v17677_v51 }
 0xaac   : > { %v9385_v12 = vadd.f32 %v12526_v26, %v18150_v61  ;;  %v9432_v29 = vmax.f32 %v9382_v24, 0.0  ;;  %v18159_v26 = vld [vmem:[#allocation93_spill] sm:$0xff] }
 0xaae   : > { %v9433_v0 = vmax.f32 %v9385_v12, 0.0  ;;  %v12527_v45 = vpop.f32.mrb[44].mxu1 }
 0xaaf   : > { %v12528_v16 = vpop.f32.mrb[45].mxu1 }
 0xab0   : > { %v9446_v15 = vpack.c.bf16 %v9433_v0, %v9432_v29  ;;  %v12529_v36 = vadd.f32 %v12528_v16, %v12527_v45  ;;  %v12530_v14 = vpop.f32.mrb[46].mxu1  ;;  %v18160_v29 = vld [vmem:[#allocation27_spill] sm:$0xff] }
 0xab1   : > { %v12531_v59 = vpop.f32.mrb[47].mxu1 }
 0xab2   : > { %v9390_v22 = vadd.f32 %v12529_v36, %v18151_v46  ;;  %v12532_v19 = vadd.f32 %v12531_v59, %v12530_v14  ;;  %12877 = vmatpush3.bf16.msra.mxu1 %v9446_v15  ;;  %v9452_v36 = vld [vmem:[#allocation10 + $0x4] sm:$0xf]  ;;  %v18161_v14 = vld [vmem:[#allocation94_spill] sm:$0xff]  ;;  %v18163_v46 = vld [vmem:[#allocation95_spill] sm:$0xff] }
 0xab3   : > { %12878 = vmatprep.subr.bf16.mxu1 %v17677_v51  ;;  %v18162_v59 = vld [vmem:[#allocation30_spill] sm:$0xff] }
 0xab4   : > { %v9393_v23 = vadd.f32 %v12532_v19, %v18152_v48  ;;  %v9434_v41 = vmax.f32 %v9390_v22, 0.0  ;;  %v18164_v22 = vld [vmem:[#allocation96_spill] sm:$0xff]  ;;  %v18165_v19 = vld [vmem:[#allocation47_spill] sm:$0xff]  ;;  %v18166_v48 = vld [vmem:[#allocation97_spill] sm:$0xff] }
 0xab6   : > { %v9435_v60 = vmax.f32 %v9393_v23, 0.0  ;;  %v12533_v50 = vpop.f32.mrb[48].mxu1  ;;  %v18167_v23 = vld [vmem:[#allocation148_spill] sm:$0xff] }
 0xab7   : > { %v12534_v3 = vpop.f32.mrb[49].mxu1 }
 0xab8   : > { %v9447_v35 = vpack.c.bf16 %v9435_v60, %v9434_v41  ;;  %v12535_v47 = vadd.f32 %v12534_v3, %v12533_v50  ;;  %v12536_v32 = vpop.f32.mrb[50].mxu1  ;;  %v18168_v41 = vld [vmem:[#allocation48_spill] sm:$0xff]  ;;  %v8188_v60 = vld [vmem:[#allocation10] sm:$0xf] }
 0xab9   : > { %v12537_v28 = vpop.f32.mrb[51].mxu1  ;;  %v14783_v50 = vld [vmem:[#allocation7 + $0x404] ss:$16 sps:$4 sm:$0xff]  }
 0xaba   : > { %v9398_v52 = vadd.f32 %v12535_v47, %v18153_v38  ;;  %v12538_v2 = vadd.f32 %v12537_v28, %v12536_v32  ;;  %12879 = vmatpush3.bf16.msra.mxu1 %v9447_v35  ;;  %v18169_v3 = vld [vmem:[#allocation76_spill] sm:$0xff]  ;;  %v18170_v35 = vld [vmem:[#allocation23_spill] sm:$0xff]  ;;  %v18174_v38 = vld [vmem:[#allocation74_spill] sm:$0xff] }
 0xabb   : > { %12880 = vmatprep.subr.bf16.mxu1 %v17677_v51  ;;  %v18171_v47 = vld [vmem:[#allocation28_spill] sm:$0xff]  ;;  %v18172_v32 = vld [vmem:[#allocation55_spill] sm:$0xff] }
 0xabc   : > { %v9401_v42 = vadd.f32 %v12538_v2, %v18154_v11  ;;  %v9436_v31 = vmax.f32 %v9398_v52, 0.0  ;;  %v18173_v28 = vld [vmem:[#allocation59_spill] sm:$0xff]  ;;  %v18175_v52 = vld [vmem:[#allocation77_spill] sm:$0xff] }
 0xabd   : > { %v18176_v2 = vld [vmem:[#allocation25_spill] sm:$0xff] }
 0xabe   : > { %v9437_v9 = vmax.f32 %v9401_v42, 0.0  ;;  %v12539_v5 = vpop.f32.mrb[52].mxu1  ;;  %v18177_v11 = vld [vmem:[#allocation29_spill] sm:$0xff]  ;;  %v18178_v42 = vld [vmem:[#allocation56_spill] sm:$0xff] }
 0xabf   : > { %v12540_v62 = vpop.f32.mrb[53].mxu1 }
 0xac0   : > { %v9448_v54 = vpack.c.bf16 %v9437_v9, %v9436_v31  ;;  %v12541_v57 = vadd.f32 %v12540_v62, %v12539_v5  ;;  %v12542_v58 = vpop.f32.mrb[54].mxu1  ;;  %v18179_v31 = vld [vmem:[#allocation61_spill] sm:$0xff]  ;;  %v18180_v9 = vld [vmem:[#allocation75_spill] sm:$0xff]  ;;  %v18181_v5 = vld [vmem:[#allocation78_spill] sm:$0xff] }
 0xac1   : > { %v12543_v33 = vpop.f32.mrb[55].mxu1  ;;  %v18182_v62 = vld [vmem:[#allocation26_spill] sm:$0xff] }
 0xac2   : > { %v9406_v43 = vadd.f32 %v12541_v57, %v18155_v53  ;;  %v12544_v4 = vadd.f32 %v12543_v33, %v12542_v58  ;;  %12881 = vmatpush3.bf16.msra.mxu1 %v9448_v54  ;;  %v18183_v54 = vld [vmem:[#allocation31_spill] sm:$0xff]  ;;  %v18184_v58 = vld [vmem:[#allocation58_spill] sm:$0xff]  ;;  %v18185_v53 = vld [vmem:[#allocation125_spill] sm:$0xff] }
 0xac3   : > { %12882 = vmatprep.subr.bf16.mxu1 %v17677_v51  ;;  %v14781_v57 = vld [vmem:[#allocation7 + $0x400] ss:$16 sps:$4 sm:$0xff]   ;;  %v14786_v33 = vld [vmem:[#allocation7 + $0x424] ss:$16 sps:$4 sm:$0xff]  }
 0xac4   : > { %v9409_v13 = vadd.f32 %v12544_v4, %v18156_v21  ;;  %v9438_v63 = vmax.f32 %v9406_v43, 0.0  ;;  %v18186_v43 = vld [vmem:[#allocation62_spill] sm:$0xff]  ;;  %v14784_v21 = vld [vmem:[#allocation7 + $0x420] ss:$16 sps:$4 sm:$0xff]  }
 0xac5   : > { %v18187_v4 = vld [vmem:[#allocation82_spill] sm:$0xff] }
 0xac6   : > { %v9439_v1 = vmax.f32 %v9409_v13, 0.0  ;;  %v12545_v6 = vpop.f32.mrb[56].mxu1  ;;  %v18188_v13 = vld [vmem:[#allocation79_spill] sm:$0xff] }
 0xac7   : > { %v12546_v40 = vpop.f32.mrb[57].mxu1 }
 0xac8   : > { %v9449_v25 = vpack.c.bf16 %v9439_v1, %v9438_v63  ;;  %v12547_v8 = vadd.f32 %v12546_v40, %v12545_v6  ;;  %v12548_v20 = vpop.f32.mrb[58].mxu1  ;;  %v14789_v63 = vld [vmem:[#allocation7 + $0x444] ss:$16 sps:$4 sm:$0xff]   ;;  %v18190_v6 = vld [vmem:[#allocation121_spill] sm:$0xff]  ;;  %v18191_v40 = vld [vmem:[#allocation67_spill] sm:$0xff] }
 0xac9   : > { %v12549_v10 = vpop.f32.mrb[59].mxu1  ;;  %v18189_v1 = vld [vmem:[#allocation128_spill] sm:$0xff] }
 0xaca   : > { %v9414_v44 = vadd.f32 %v12547_v8, %v18157_v18  ;;  %v12550_v56 = vadd.f32 %v12549_v10, %v12548_v20  ;;  %12883 = vmatpush3.bf16.msra.mxu1 %v9449_v25  ;;  %v14787_v25 = vld [vmem:[#allocation7 + $0x440] ss:$16 sps:$4 sm:$0xff]   ;;  %v18192_v8 = vld [vmem:[#allocation64_spill] sm:$0xff] }
 0xacb   : > { %12884 = vmatprep.subr.bf16.mxu1 %v17677_v51  ;;  %v14792_v20 = vld [vmem:[#allocation7 + $0x464] ss:$16 sps:$4 sm:$0xff]   ;;  %v18193_v10 = vld [vmem:[#allocation83_spill] sm:$0xff] }
 0xacc   : > { %v9417_v17 = vadd.f32 %v12550_v56, %v18158_v39  ;;  %v9440_v27 = vmax.f32 %v9414_v44, 0.0  ;;  %v18194_v18 = vld [vmem:[#allocation80_spill] sm:$0xff]  ;;  %v18195_v44 = vld [vmem:[#allocation131_spill] sm:$0xff] }
 0xacd   : > { %v14790_v56 = vld [vmem:[#allocation7 + $0x460] ss:$16 sps:$4 sm:$0xff]  }
 0xace   : > { %v9441_v30 = vmax.f32 %v9417_v17, 0.0  ;;  %v12551_v55 = vpop.f32.mrb[60].mxu1  ;;  %v18196_v39 = vld [vmem:[#allocation123_spill] sm:$0xff]  ;;  %v14795_v17 = vld [vmem:[#allocation7 + $0x484] ss:$16 sps:$4 sm:$0xff]  }
 0xacf   : > { %v12552_v49 = vpop.f32.mrb[61].mxu1 }
 0xad0   : > { %v9450_v7 = vpack.c.bf16 %v9441_v30, %v9440_v27  ;;  %v12553_v34 = vadd.f32 %v12552_v49, %v12551_v55  ;;  %v12554_v37 = vpop.f32.mrb[62].mxu1  ;;  %v18197_v27 = vld [vmem:[#allocation84_spill] sm:$0xff]  ;;  %v18198_v30 = vld [vmem:[#allocation65_spill] sm:$0xff]  ;;  %v18199_v55 = vld [vmem:[#allocation135_spill] sm:$0xff] }
 0xad1   : > { %v12555_v24 = vpop.f32.mrb[63].mxu1  ;;  %v14793_v49 = vld [vmem:[#allocation7 + $0x480] ss:$16 sps:$4 sm:$0xff]  }
 0xad2   : > { %v9422_v61 = vadd.f32 %v12553_v34, %v18159_v26  ;;  %v12556_v12 = vadd.f32 %v12555_v24, %v12554_v37  ;;  %12885 = vmatpush3.bf16.msra.mxu1 %v9450_v7  ;;  %v18200_v7 = vld [vmem:[#allocation81_spill] sm:$0xff]  ;;  %v14798_v34 = vld [vmem:[#allocation7 + $0x4a4] ss:$16 sps:$4 sm:$0xff]  }
 0xad3   : > { %12886 = vmatprep.subr.bf16.mxu1 %v17677_v51  ;;  %v14796_v37 = vld [vmem:[#allocation7 + $0x4a0] ss:$16 sps:$4 sm:$0xff]   ;;  %v14801_v24 = vld [vmem:[#allocation7 + $0x4c4] ss:$16 sps:$4 sm:$0xff]  }
 0xad4   : > { %v9425_v0 = vadd.f32 %v12556_v12, %v18160_v29  ;;  %v9442_v45 = vmax.f32 %v9422_v61, 0.0  ;;  %v14799_v26 = vld [vmem:[#allocation7 + $0x4c0] ss:$16 sps:$4 sm:$0xff]   ;;  %v14804_v61 = vld [vmem:[#allocation7 + $0x4e4] ss:$16 sps:$4 sm:$0xff]  }
 0xad5   : > { %v14802_v12 = vld [vmem:[#allocation7 + $0x4e0] ss:$16 sps:$4 sm:$0xff]   ;;  %v14807_v29 = vld [vmem:[#allocation7 + $0x504] ss:$16 sps:$4 sm:$0xff]  }
 0xad6   : > { %v9443_v16 = vmax.f32 %v9425_v0, 0.0  ;;  %v14805_v0 = vld [vmem:[#allocation7 + $0x500] ss:$16 sps:$4 sm:$0xff]  }
 0xad8   : > { %v9451_v15 = vpack.c.bf16 %v9443_v16, %v9442_v45  ;;  %v14810_v45 = vld [vmem:[#allocation7 + $0x524] ss:$16 sps:$4 sm:$0xff]   ;;  %v14808_v16 = vld [vmem:[#allocation7 + $0x520] ss:$16 sps:$4 sm:$0xff]  }
 0xada   : > { %12887 = vmatpush3.bf16.msra.mxu1 %v9451_v15  ;;  %v14813_v15 = vld [vmem:[#allocation7 + $0x544] ss:$16 sps:$4 sm:$0xff]  }
 0xadb   : > { %12892 = vmatprep.subr.bf16.mxu1 %v17677_v51 }
 0xadd   : > { %12889 = vmatmul.mubr.bf16.vlgmr.msra.gmra.mrb[64].mxu1 %v9452_v36  ;;  %v14811_v36 = vld [vmem:[#allocation7 + $0x540] ss:$16 sps:$4 sm:$0xff]  }
 0xade   : > { %12893 = vmatpush3.bf16.msra.mxu1 %v18161_v14  ;;  %12908 = vmatprep.mubr.msk.bf16.mxu1 %vm15156_vm0, %v17677_v51  ;;  %v14816_v14 = vld [vmem:[#allocation7 + $0x564] ss:$16 sps:$4 sm:$0xff]  }
 0xadf   : > { %12894 = vmatprep.subr.bf16.mxu1 %v17677_v51 }
 0xae2   : > { %12895 = vmatpush3.bf16.msra.mxu1 %v18162_v59  ;;  %v14814_v59 = vld [vmem:[#allocation7 + $0x560] ss:$16 sps:$4 sm:$0xff]  }
 0xae3   : > { %12896 = vmatprep.subr.bf16.mxu1 %v17677_v51 }
 0xae6   : > { %12897 = vmatpush3.bf16.msra.mxu1 %v18163_v46  ;;  %v14819_v46 = vld [vmem:[#allocation7 + $0x584] ss:$16 sps:$4 sm:$0xff]  }
 0xae7   : > { %12898 = vmatprep.subr.bf16.mxu1 %v17677_v51 }
 0xaea   : > { %12899 = vmatpush3.bf16.msra.mxu1 %v18164_v22  ;;  %v14817_v22 = vld [vmem:[#allocation7 + $0x580] ss:$16 sps:$4 sm:$0xff]  }
 0xaeb   : > { %12900 = vmatprep.subr.bf16.mxu1 %v17677_v51 }
 0xaee   : > { %12901 = vmatpush3.bf16.msra.mxu1 %v18165_v19  ;;  %v14822_v19 = vld [vmem:[#allocation7 + $0x5a4] ss:$16 sps:$4 sm:$0xff]  }
 0xaef   : > { %12902 = vmatprep.subr.bf16.mxu1 %v17677_v51 }
 0xaf2   : > { %12903 = vmatpush3.bf16.msra.mxu1 %v18166_v48  ;;  %v14820_v48 = vld [vmem:[#allocation7 + $0x5a0] ss:$16 sps:$4 sm:$0xff]  }
 0xaf3   : > { %12904 = vmatprep.subr.bf16.mxu1 %v17677_v51 }
 0xaf6   : > { %12905 = vmatpush3.bf16.msra.mxu1 %v18167_v23  ;;  %v14825_v23 = vld [vmem:[#allocation7 + $0x5c4] ss:$16 sps:$4 sm:$0xff]  }
 0xaf7   : > { %12906 = vmatprep.subr.bf16.mxu1 %v17677_v51 }
 0xafa   : > { %12907 = vmatpush3.bf16.msra.mxu1 %v18168_v41  ;;  %v14823_v41 = vld [vmem:[#allocation7 + $0x5c0] ss:$16 sps:$4 sm:$0xff]  }
 0xafb   : > { %12575 = vmatprep.subr.bf16.mxu1 %v18169_v3  ;;  %v14831_v3 = vld [vmem:[#allocation7 + $0x40c] ss:$16 sps:$4 sm:$0xff]  }
 0xafd   : > { %12909 = vmatmul.mubr.bf16.vlgmr.msra.gmra.mrb[68].mxu1 %v8188_v60  ;;  %v14828_v60 = vld [vmem:[#allocation7 + $0x5e4] ss:$16 sps:$4 sm:$0xff]  }
 0xafe   : > { %12576 = vmatpush3.bf16.msra.mxu1 %v18170_v35  ;;  %10143 = vmatprep.mubr.bf16.mxu1 %v14783_v50  ;;  %v14826_v50 = vld [vmem:[#allocation7 + $0x5e0] ss:$16 sps:$4 sm:$0xff]   ;;  %v14829_v35 = vld [vmem:[#allocation7 + $0x408] ss:$16 sps:$4 sm:$0xff]  }
 0xaff   : > { %12577 = vmatprep.subr.bf16.mxu1 %v18171_v47  ;;  %v14834_v47 = vld [vmem:[#allocation7 + $0x42c] ss:$16 sps:$4 sm:$0xff]  }
 0xb02   : > { %12578 = vmatpush3.bf16.msra.mxu1 %v18172_v32  ;;  %v14832_v32 = vld [vmem:[#allocation7 + $0x428] ss:$16 sps:$4 sm:$0xff]  }
 0xb03   : > { %12579 = vmatprep.subr.bf16.mxu1 %v18173_v28  ;;  %v14837_v28 = vld [vmem:[#allocation7 + $0x44c] ss:$16 sps:$4 sm:$0xff]  }
 0xb06   : > { %12580 = vmatpush3.bf16.msra.mxu1 %v18174_v38  ;;  %v14835_v38 = vld [vmem:[#allocation7 + $0x448] ss:$16 sps:$4 sm:$0xff]  }
 0xb07   : > { %12581 = vmatprep.subr.bf16.mxu1 %v18175_v52  ;;  %v14840_v52 = vld [vmem:[#allocation7 + $0x46c] ss:$16 sps:$4 sm:$0xff]  }
 0xb0a   : > { %12582 = vmatpush3.bf16.msra.mxu1 %v18176_v2 }
 0xb0b   : > { %12583 = vmatprep.subr.bf16.mxu1 %v18177_v11  ;;  %v14838_v11 = vld [vmem:[#allocation7 + $0x468] ss:$16 sps:$4 sm:$0xff]  }
 0xb0e   : > { %12584 = vmatpush3.bf16.msra.mxu1 %v18178_v42 }
 0xb0f   : > { %12585 = vmatprep.subr.bf16.mxu1 %v18179_v31  ;;  %v14843_v31 = vld [vmem:[#allocation7 + $0x48c] ss:$16 sps:$4 sm:$0xff]  }
 0xb12   : > { %12586 = vmatpush3.bf16.msra.mxu1 %v18180_v9 }
 0xb13   : > { %12587 = vmatprep.subr.bf16.mxu1 %v18181_v5 }
 0xb16   : > { %12588 = vmatpush3.bf16.msra.mxu1 %v18182_v62  ;;  %v14841_v62 = vld [vmem:[#allocation7 + $0x488] ss:$16 sps:$4 sm:$0xff]  }
 0xb17   : > { %12589 = vmatprep.subr.bf16.mxu1 %v18183_v54  ;;  %v14846_v54 = vld [vmem:[#allocation7 + $0x4ac] ss:$16 sps:$4 sm:$0xff]  }
 0xb1a   : > { %12590 = vmatpush3.bf16.msra.mxu1 %v18184_v58  ;;  %v14849_v58 = vld [vmem:[#allocation7 + $0x4cc] ss:$16 sps:$4 sm:$0xff]  }
 0xb1b   : > { %12687 = vmatprep.subr.bf16.mxu1 %v18185_v53  ;;  %v14852_v53 = vld [vmem:[#allocation7 + $0x4ec] ss:$16 sps:$4 sm:$0xff]  }
 0xb1d   : > { %10144 = vmatmul.mubr.bf16.vlgmr.msra.gmra.mrb[72].mxu1 %v14781_v57  ;;  %v14844_v57 = vld [vmem:[#allocation7 + $0x4a8] ss:$16 sps:$4 sm:$0xff]  }
 0xb1e   : > { %12688 = vmatpush3.bf16.msra.mxu1 %v18186_v43  ;;  %10151 = vmatprep.mubr.bf16.mxu1 %v14786_v33  ;;  %v14847_v33 = vld [vmem:[#allocation7 + $0x4c8] ss:$16 sps:$4 sm:$0xff]  }
 0xb1f   : > { %12689 = vmatprep.subr.bf16.mxu1 %v18187_v4  ;;  %v14850_v4 = vld [vmem:[#allocation7 + $0x4e8] ss:$16 sps:$4 sm:$0xff]  }
 0xb22   : > { %12690 = vmatpush3.bf16.msra.mxu1 %v18188_v13 }
 0xb23   : > { %12691 = vmatprep.subr.bf16.mxu1 %v18189_v1 }
 0xb25   : > { %10152 = vmatmul.mubr.bf16.gmra.mrb[76].mxu1 %v14784_v21 }
 0xb26   : > { %12692 = vmatpush3.bf16.msra.mxu1 %v18190_v6  ;;  %10159 = vmatprep.mubr.bf16.mxu1 %v14789_v63  ;;  %v14855_v63 = vld [vmem:[#allocation7 + $0x50c] ss:$16 sps:$4 sm:$0xff]  }
 0xb27   : > { %12693 = vmatprep.subr.bf16.mxu1 %v18191_v40  ;;  %v14853_v40 = vld [vmem:[#allocation7 + $0x508] ss:$16 sps:$4 sm:$0xff]  }
 0xb2a   : > { %12694 = vmatpush3.bf16.msra.mxu1 %v18192_v8  ;;  %v14856_v8 = vld [vmem:[#allocation7 + $0x528] ss:$16 sps:$4 sm:$0xff]  }
 0xb2b   : > { %12695 = vmatprep.subr.bf16.mxu1 %v18193_v10  ;;  %v14859_v10 = vld [vmem:[#allocation7 + $0x548] ss:$16 sps:$4 sm:$0xff]  }
 0xb2d   : > { %10160 = vmatmul.mubr.bf16.gmra.mrb[80].mxu1 %v14787_v25  ;;  %v14858_v25 = vld [vmem:[#allocation7 + $0x52c] ss:$16 sps:$4 sm:$0xff]  }
 0xb2e   : > { %12696 = vmatpush3.bf16.msra.mxu1 %v18194_v18  ;;  %10167 = vmatprep.mubr.bf16.mxu1 %v14792_v20  ;;  %v14861_v20 = vld [vmem:[#allocation7 + $0x54c] ss:$16 sps:$4 sm:$0xff]  }
 0xb2f   : > { %12697 = vmatprep.subr.bf16.mxu1 %v18195_v44  ;;  %v14864_v18 = vld [vmem:[#allocation7 + $0x56c] ss:$16 sps:$4 sm:$0xff]  }
 0xb32   : > { %12698 = vmatpush3.bf16.msra.mxu1 %v18196_v39  ;;  %v14862_v39 = vld [vmem:[#allocation7 + $0x568] ss:$16 sps:$4 sm:$0xff]  }
 0xb33   : > { %12699 = vmatprep.subr.bf16.mxu1 %v18197_v27 }
 0xb35   : > { %10168 = vmatmul.mubr.bf16.gmra.mrb[84].mxu1 %v14790_v56 }
 0xb36   : > { %12700 = vmatpush3.bf16.msra.mxu1 %v18198_v30  ;;  %10175 = vmatprep.mubr.bf16.mxu1 %v14795_v17  ;;  %v14867_v30 = vld [vmem:[#allocation7 + $0x58c] ss:$16 sps:$4 sm:$0xff]  }
 0xb37   : > { %12701 = vmatprep.subr.bf16.mxu1 %v18199_v55 }
 0xb3a   : > { %12702 = vmatpush3.bf16.msra.mxu1 %v18200_v7 }
 0xb3d   : > { %10176 = vmatmul.mubr.bf16.gmra.mrb[88].mxu1 %v14793_v49 }
 0xb3e   : > { %10183 = vmatprep.mubr.bf16.mxu1 %v14798_v34 }
 0xb45   : > { %10184 = vmatmul.mubr.bf16.gmra.mrb[92].mxu1 %v14796_v37  ;;  %v14865_v37 = vld [vmem:[#allocation7 + $0x588] ss:$16 sps:$4 sm:$0xff]  }
 0xb46   : > { %10191 = vmatprep.mubr.bf16.mxu1 %v14801_v24 }
 0xb4d   : > { %10192 = vmatmul.mubr.bf16.gmra.mrb[96].mxu1 %v14799_v26 }
 0xb4e   : > { %10199 = vmatprep.mubr.bf16.mxu1 %v14804_v61  ;;  %v14870_v61 = vld [vmem:[#allocation7 + $0x5ac] ss:$16 sps:$4 sm:$0xff]  }
 0xb55   : > { %10200 = vmatmul.mubr.bf16.gmra.mrb[100].mxu1 %v14802_v12 }
 0xb56   : > { %10207 = vmatprep.mubr.bf16.mxu1 %v14807_v29 }
 0xb5d   : > { %10208 = vmatmul.mubr.bf16.gmra.mrb[104].mxu1 %v14805_v0 }
 0xb5e   : > { %10215 = vmatprep.mubr.bf16.mxu1 %v14810_v45 }
 0xb65   : > { %10216 = vmatmul.mubr.bf16.gmra.mrb[108].mxu1 %v14808_v16  ;;  %v14868_v16 = vld [vmem:[#allocation7 + $0x5a8] ss:$16 sps:$4 sm:$0xff]  }
 0xb66   : > { %10223 = vmatprep.mubr.bf16.mxu1 %v14813_v15 }
 0xb6d   : > { %10224 = vmatmul.mubr.bf16.gmra.mrb[112].mxu1 %v14811_v36 }
 0xb6e   : > { %10231 = vmatprep.mubr.bf16.mxu1 %v14816_v14  ;;  %v14873_v14 = vld [vmem:[#allocation7 + $0x5cc] ss:$16 sps:$4 sm:$0xff]  }
 0xb75   : > { %10232 = vmatmul.mubr.bf16.gmra.mrb[116].mxu1 %v14814_v59 }
 0xb76   : > { %10239 = vmatprep.mubr.bf16.mxu1 %v14819_v46 }
 0xb7d   : > { %10240 = vmatmul.mubr.bf16.gmra.mrb[120].mxu1 %v14817_v22 }
 0xb7e   : > { %10247 = vmatprep.mubr.bf16.mxu1 %v14822_v19 }
 0xb85   : > { %10248 = vmatmul.mubr.bf16.gmra.mrb[124].mxu1 %v14820_v48  ;;  %v14871_v48 = vld [vmem:[#allocation7 + $0x5c8] ss:$16 sps:$4 sm:$0xff]  }
 0xb86   : > { %10255 = vmatprep.mubr.bf16.mxu1 %v14825_v23 }
 0xb8d   : > { %10256 = vmatmul.mubr.bf16.gmra.mrb[128].mxu1 %v14823_v41 }
 0xb8e   : > { %10263 = vmatprep.mubr.bf16.mxu1 %v14828_v60  ;;  %v14876_v60 = vld [vmem:[#allocation7 + $0x5ec] ss:$16 sps:$4 sm:$0xff]  }
 0xb95   : > { %10264 = vmatmul.mubr.bf16.gmra.mrb[132].mxu1 %v14826_v50 }
 0xb96   : > { %10304 = vmatprep.mubr.bf16.mxu1 %v14831_v3 }
 0xb9d   : > { %10305 = vmatmul.mubr.bf16.vlgmr.msra.gmra.mrb[136].mxu1 %v14829_v35 }
 0xb9e   : > { %10312 = vmatprep.mubr.bf16.mxu1 %v14834_v47 }
 0xba5   : > { %10313 = vmatmul.mubr.bf16.gmra.mrb[140].mxu1 %v14832_v32  ;;  %v14874_v32 = vld [vmem:[#allocation7 + $0x5e8] ss:$16 sps:$4 sm:$0xff]  }
 0xba6   : > { %10320 = vmatprep.mubr.bf16.mxu1 %v14837_v28 }
 0xbad   : > { %10321 = vmatmul.mubr.bf16.gmra.mrb[144].mxu1 %v14835_v38 }
 0xbae   : > { %10328 = vmatprep.mubr.bf16.mxu1 %v14840_v52 }
 0xbb0   : > { %v9487_v2 = vpop.f32.mrb[64].mxu1 }
 0xbb1   : > { %v12890_v42 = vpop.f32.mrb[65].mxu1 }
 0xbb2   : > { %v9490_v9 = vpop.f32.mrb[66].mxu1 }
 0xbb3   : > { %v12891_v5 = vpop.f32.mrb[67].mxu1 }
 0xbb5   : > { %10329 = vmatmul.mubr.bf16.gmra.mrb[208].mxu1 %v14838_v11 }
 0xbb6   : > { %10336 = vmatprep.mubr.bf16.mxu1 %v14843_v31 }
 0xbbd   : > { %10337 = vmatmul.mubr.bf16.gmra.mrb[212].mxu1 %v14841_v62 }
 0xbbe   : > { %10344 = vmatprep.mubr.bf16.mxu1 %v14846_v54 }
 0xbc5   : > { %10345 = vmatmul.mubr.bf16.gmra.mrb[216].mxu1 %v14844_v57 }
 0xbc6   : > { %10352 = vmatprep.mubr.bf16.mxu1 %v14849_v58 }
 0xbcd   : > { %10353 = vmatmul.mubr.bf16.gmra.mrb[220].mxu1 %v14847_v33 }
 0xbce   : > { %10360 = vmatprep.mubr.bf16.mxu1 %v14852_v53 }
 0xbd0   : > { %v9527_v43 = vpop.f32.mrb[68].mxu1 }
 0xbd1   : > { %v17422_v21 = vadd.f32 %v9527_v43, %v9487_v2  ;;  %v12910_v13 = vpop.f32.mrb[69].mxu1 }
 0xbd2   : > { %v9530_v1 = vpop.f32.mrb[70].mxu1 }
 0xbd3   : > { %18201 = vst [vmem:[#allocation99_spill] sm:$0xff] %v17422_v21  ;;  %v12911_v6 = vpop.f32.mrb[71].mxu1 }
 0xbd5   : > { %10361 = vmatmul.mubr.bf16.gmra.mrb[224].mxu1 %v14850_v4 }
 0xbd6   : > { %10368 = vmatprep.mubr.bf16.mxu1 %v14855_v63 }
 0xbdd   : > { %10369 = vmatmul.mubr.bf16.gmra.mrb[228].mxu1 %v14853_v40 }
 0xbde   : > { %10376 = vmatprep.mubr.bf16.mxu1 %v14858_v25 }
 0xbe5   : > { %10377 = vmatmul.mubr.bf16.gmra.mrb[232].mxu1 %v14856_v8 }
 0xbe6   : > { %10384 = vmatprep.mubr.bf16.mxu1 %v14861_v20 }
 0xbed   : > { %10385 = vmatmul.mubr.bf16.gmra.mrb[236].mxu1 %v14859_v10 }
 0xbee   : > { %10392 = vmatprep.mubr.bf16.mxu1 %v14864_v18 }
 0xbf0   : > { %v12591_v44 = vpop.f32.mrb[72].mxu1 }
 0xbf1   : > { %v12592_v56 = vpop.f32.mrb[73].mxu1 }
 0xbf2   : > { %v17424_v17 = vadd.f32 %v12592_v56, %v12591_v44  ;;  %v12594_v27 = vpop.f32.mrb[74].mxu1 }
 0xbf3   : > { %v12595_v55 = vpop.f32.mrb[75].mxu1 }
 0xbf4   : > { %v17426_v49 = vadd.f32 %v12595_v55, %v12594_v27 }
 0xbf5   : > { %10393 = vmatmul.mubr.bf16.gmra.mrb[240].mxu1 %v14862_v39 }
 0xbf6   : > { %10400 = vmatprep.mubr.bf16.mxu1 %v14867_v30 }
 0xbf8   : > { %v12597_v7 = vpop.f32.mrb[76].mxu1 }
 0xbf9   : > { %v12598_v34 = vpop.f32.mrb[77].mxu1 }
 0xbfa   : > { %v17428_v24 = vadd.f32 %v12598_v34, %v12597_v7  ;;  %v12600_v26 = vpop.f32.mrb[78].mxu1 }
 0xbfb   : > { %v12601_v12 = vpop.f32.mrb[79].mxu1 }
 0xbfc   : > { %v17430_v29 = vadd.f32 %v12601_v12, %v12600_v26 }
 0xbfd   : > { %10401 = vmatmul.mubr.bf16.gmra.mrb[244].mxu1 %v14865_v37 }
 0xbfe   : > { %10408 = vmatprep.mubr.bf16.mxu1 %v14870_v61 }
 0xc00   : > { %v12603_v0 = vpop.f32.mrb[80].mxu1 }
 0xc01   : > { %v12604_v45 = vpop.f32.mrb[81].mxu1 }
 0xc02   : > { %v17432_v15 = vadd.f32 %v12604_v45, %v12603_v0  ;;  %v12606_v36 = vpop.f32.mrb[82].mxu1 }
 0xc03   : > { %v12607_v59 = vpop.f32.mrb[83].mxu1 }
 0xc04   : > { %v17434_v46 = vadd.f32 %v12607_v59, %v12606_v36 }
 0xc05   : > { %10409 = vmatmul.mubr.bf16.gmra.mrb[248].mxu1 %v14868_v16 }
 0xc06   : > { %10416 = vmatprep.mubr.bf16.mxu1 %v14873_v14 }
 0xc08   : > { %v12609_v22 = vpop.f32.mrb[84].mxu1 }
 0xc09   : > { %v12610_v19 = vpop.f32.mrb[85].mxu1 }
 0xc0a   : > { %v17436_v23 = vadd.f32 %v12610_v19, %v12609_v22  ;;  %v12612_v41 = vpop.f32.mrb[86].mxu1  ;;  %v17472_v19 = vpop.permute.xlu0 %9713 }
 0xc0b   : > { %v12613_v50 = vpop.f32.mrb[87].mxu1 }
 0xc0c   : > { %v17438_v3 = vadd.f32 %v12613_v50, %v12612_v41  ;;  %v17474_v41 = vpop.permute.xlu1 %9718 }
 0xc0d   : > { %10417 = vmatmul.mubr.bf16.gmra.mrb[252].mxu1 %v14871_v48 }
 0xc0e   : > { %10424 = vmatprep.mubr.bf16.mxu1 %v14876_v60 }
 0xc10   : > { %v12615_v35 = vpop.f32.mrb[88].mxu1 }
 0xc11   : > { %v12616_v47 = vpop.f32.mrb[89].mxu1 }
 0xc12   : > { %v17440_v28 = vadd.f32 %v12616_v47, %v12615_v35  ;;  %v12618_v38 = vpop.f32.mrb[90].mxu1 }
 0xc13   : > { %v12619_v52 = vpop.f32.mrb[91].mxu1 }
 0xc14   : > { %v17442_v2 = vadd.f32 %v12619_v52, %v12618_v38  ;;  %v9634_v38 = vpop.permute.xlu0 %9633  ;;  %v9639_v52 = vpop.permute.xlu1 %9638 }
 0xc15   : > { %10425 = vmatmul.mubr.bf16.gmra.mrb[148].mxu1 %v14874_v32 }
 0xc18   : > { %v12621_v11 = vpop.f32.mrb[92].mxu1 }
 0xc19   : > { %v12622_v42 = vpop.f32.mrb[93].mxu1 }
 0xc1a   : > { %v17444_v31 = vadd.f32 %v12622_v42, %v12621_v11  ;;  %v12624_v9 = vpop.f32.mrb[94].mxu1 }
 0xc1b   : > { %v12625_v5 = vpop.f32.mrb[95].mxu1 }
 0xc1c   : > { %v17446_v62 = vadd.f32 %v12625_v5, %v12624_v9 }
 0xc20   : > { %v12627_v54 = vpop.f32.mrb[96].mxu1 }
 0xc21   : > { %v12628_v57 = vpop.f32.mrb[97].mxu1 }
 0xc22   : > { %v17448_v58 = vadd.f32 %v12628_v57, %v12627_v54  ;;  %v12630_v33 = vpop.f32.mrb[98].mxu1  ;;  %v17482_v54 = vpop.permute.xlu0 %9723 }
 0xc23   : > { %v12631_v53 = vpop.f32.mrb[99].mxu1 }
 0xc24   : > { %v17450_v43 = vadd.f32 %v12631_v53, %v12630_v33  ;;  %v17486_v53 = vpop.permute.xlu1 %9728 }
 0xc28   : > { %v12633_v4 = vpop.f32.mrb[100].mxu1 }
 0xc29   : > { %v12634_v13 = vpop.f32.mrb[101].mxu1 }
 0xc2a   : > { %v17452_v63 = vadd.f32 %v12634_v13, %v12633_v4  ;;  %v12636_v1 = vpop.f32.mrb[102].mxu1  ;;  %v9644_v13 = vpop.permute.xlu0 %9643 }
 0xc2b   : > { %v12637_v6 = vpop.f32.mrb[103].mxu1 }
 0xc2c   : > { %v17454_v40 = vadd.f32 %v12637_v6, %v12636_v1 }
 0xc30   : > { %v12639_v25 = vpop.f32.mrb[104].mxu1 }
 0xc31   : > { %v12640_v8 = vpop.f32.mrb[105].mxu1 }
 0xc32   : > { %v17456_v20 = vadd.f32 %v12640_v8, %v12639_v25  ;;  %v12642_v10 = vpop.f32.mrb[106].mxu1  ;;  %v9649_v8 = vpop.permute.xlu1 %9648 }
 0xc33   : > { %v12643_v18 = vpop.f32.mrb[107].mxu1 }
 0xc34   : > { %v17458_v44 = vadd.f32 %v12643_v18, %v12642_v10 }
 0xc38   : > { %v12645_v56 = vpop.f32.mrb[108].mxu1 }
 0xc39   : > { %v12646_v39 = vpop.f32.mrb[109].mxu1 }
 0xc3a   : > { %v17460_v27 = vadd.f32 %v12646_v39, %v12645_v56  ;;  %v12648_v30 = vpop.f32.mrb[110].mxu1  ;;  %v17492_v56 = vpop.permute.xlu0 %9733 }
 0xc3b   : > { %v12649_v55 = vpop.f32.mrb[111].mxu1 }
 0xc3c   : > { %v17462_v7 = vadd.f32 %v12649_v55, %v12648_v30  ;;  %v17494_v30 = vpop.permute.xlu1 %9738 }
 0xc40   : > { %v12651_v34 = vpop.f32.mrb[112].mxu1 }
 0xc41   : > { %v12652_v37 = vpop.f32.mrb[113].mxu1 }
 0xc42   : > { %v17464_v26 = vadd.f32 %v12652_v37, %v12651_v34  ;;  %v12654_v61 = vpop.f32.mrb[114].mxu1 }
 0xc43   : > { %v12655_v12 = vpop.f32.mrb[115].mxu1 }
 0xc44   : > { %v17466_v0 = vadd.f32 %v12655_v12, %v12654_v61 }
 0xc48   : > { %v12657_v45 = vpop.f32.mrb[116].mxu1 }
 0xc49   : > { %v12658_v16 = vpop.f32.mrb[117].mxu1 }
 0xc4a   : > { %v17468_v36 = vadd.f32 %v12658_v16, %v12657_v45  ;;  %v12660_v14 = vpop.f32.mrb[118].mxu1  ;;  %v9654_v45 = vpop.permute.xlu0 %9653 }
 0xc4b   : > { %v12661_v59 = vpop.f32.mrb[119].mxu1  ;;  %v9659_v16 = vpop.permute.xlu1 %9658 }
 0xc4c   : > { %v17470_v22 = vadd.f32 %v12661_v59, %v12660_v14 }
 0xc50   : > { %v12663_v48 = vpop.f32.mrb[120].mxu1 }
 0xc51   : > { %v12664_v60 = vpop.f32.mrb[121].mxu1 }
 0xc52   : > { %v17476_v50 = vadd.f32 %v12664_v60, %v12663_v48  ;;  %v12666_v35 = vpop.f32.mrb[122].mxu1  ;;  %v10146_v48 = vadd.f32 %v17424_v17, %v9634_v38  ;;  %v10154_v17 = vadd.f32 %v17428_v24, %v9644_v13  ;;  %v10162_v24 = vadd.f32 %v17432_v15, %v9654_v45 }
 0xc53   : > { %v12667_v47 = vpop.f32.mrb[123].mxu1 }
 0xc54   : > { %v17478_v32 = vadd.f32 %v12667_v47, %v12666_v35  ;;  %v17501_v47 = vpop.permute.xlu0 %9743 }
 0xc58   : > { %v12669_v11 = vpop.f32.mrb[124].mxu1 }
 0xc59   : > { %v12670_v42 = vpop.f32.mrb[125].mxu1 }
 0xc5a   : > { %v17480_v9 = vadd.f32 %v12670_v42, %v12669_v11  ;;  %v12672_v5 = vpop.f32.mrb[126].mxu1  ;;  %v10149_v42 = vadd.f32 %v17426_v49, %v9639_v52  ;;  %v10157_v52 = vadd.f32 %v17430_v29, %v9649_v8  ;;  %v10165_v29 = vadd.f32 %v17434_v46, %v9659_v16 }
 0xc5b   : > { %v12673_v57 = vpop.f32.mrb[127].mxu1 }
 0xc5c   : > { %v17484_v33 = vadd.f32 %v12673_v57, %v12672_v5 }
 0xc60   : > { %v12675_v4 = vpop.f32.mrb[128].mxu1 }
 0xc61   : > { %v12676_v1 = vpop.f32.mrb[129].mxu1 }
 0xc62   : > { %v17488_v6 = vadd.f32 %v12676_v1, %v12675_v4  ;;  %v12678_v25 = vpop.f32.mrb[130].mxu1  ;;  %v17504_v4 = vpop.permute.xlu1 %9748  ;;  %v14879_v1 = vld [vmem:[#allocation8 + $0x104] ss:$8 sps:$4 sm:$0xff]  }
 0xc63   : > { %v12679_v10 = vpop.f32.mrb[131].mxu1  ;;  %10707 = vmatprep.mubr.bf16.mxu1 %v14879_v1 }
 0xc64   : > { %v17490_v18 = vadd.f32 %v12679_v10, %v12678_v25 }
 0xc66   : > { %v9669_v51 = vpop.permute.xlu1 %9668 }
 0xc67   : > { %v10173_v46 = vadd.f32 %v17438_v3, %v9669_v51 }
 0xc68   : > { %v12681_v39 = vpop.f32.mrb[132].mxu1 }
 0xc69   : > { %v12682_v55 = vpop.f32.mrb[133].mxu1 }
 0xc6a   : > { %v17496_v34 = vadd.f32 %v12682_v55, %v12681_v39  ;;  %v12684_v37 = vpop.f32.mrb[134].mxu1  ;;  %v17512_v1 = vpop.permute.xlu1 %9758 }
 0xc6b   : > { %v12685_v61 = vpop.f32.mrb[135].mxu1 }
 0xc6c   : > { %v17498_v12 = vadd.f32 %v12685_v61, %v12684_v37  ;;  %v9664_v37 = vpop.permute.xlu0 %9663 }
 0xc70   : > { %v12703_v14 = vpop.f32.mrb[136].mxu1 }
 0xc71   : > { %v12704_v59 = vpop.f32.mrb[137].mxu1 }
 0xc72   : > { %v12705_v60 = vadd.f32 %v12704_v59, %v12703_v14  ;;  %v12706_v35 = vpop.f32.mrb[138].mxu1 }
 0xc73   : > { %v12707_v11 = vpop.f32.mrb[139].mxu1 }
 0xc74   : > { %v10307_v5 = vadd.f32 %v12705_v60, %v10146_v48  ;;  %v12708_v57 = vadd.f32 %v12707_v11, %v12706_v35  ;;  %v17510_v11 = vpop.permute.xlu0 %9753 }
 0xc76   : > { %v10310_v25 = vadd.f32 %v12708_v57, %v10149_v42  ;;  %v10433_v10 = vmax.f32 %v10307_v5, 0.0 }
 0xc78   : > { %v10434_v39 = vmax.f32 %v10310_v25, 0.0  ;;  %v12709_v55 = vpop.f32.mrb[140].mxu1 }
 0xc79   : > { %v12710_v61 = vpop.f32.mrb[141].mxu1 }
 0xc7a   : > { %v17507_v38 = vpack.c.bf16 %v10434_v39, %v10433_v10  ;;  %v12711_v14 = vadd.f32 %v12710_v61, %v12709_v55  ;;  %v12712_v59 = vpop.f32.mrb[142].mxu1 }
 0xc7b   : > { %v12713_v49 = vpop.f32.mrb[143].mxu1 }
 0xc7c   : > { %v10315_v48 = vadd.f32 %v12711_v14, %v10154_v17  ;;  %v12714_v60 = vadd.f32 %v12713_v49, %v12712_v59  ;;  %v9674_v17 = vpop.permute.xlu0 %9673  ;;  %v9679_v59 = vpop.permute.xlu1 %9678 }
 0xc7d   : > { %v10181_v51 = vadd.f32 %v17442_v2, %v9679_v59 }
 0xc7e   : > { %v10318_v35 = vadd.f32 %v12714_v60, %v10157_v52  ;;  %v10435_v42 = vmax.f32 %v10315_v48, 0.0 }
 0xc80   : > { %v10436_v5 = vmax.f32 %v10318_v35, 0.0  ;;  %v12715_v57 = vpop.f32.mrb[144].mxu1  ;;  %v10170_v35 = vadd.f32 %v17436_v23, %v9664_v37  ;;  %v10178_v23 = vadd.f32 %v17440_v28, %v9674_v17 }
 0xc81   : > { %v12716_v25 = vpop.f32.mrb[145].mxu1 }
 0xc82   : > { %v17515_v13 = vpack.c.bf16 %v10436_v5, %v10435_v42  ;;  %v12717_v10 = vadd.f32 %v12716_v25, %v12715_v57  ;;  %v12718_v39 = vpop.f32.mrb[146].mxu1  ;;  %v17521_v42 = vpop.permute.xlu0 %9763 }
 0xc83   : > { %v12719_v55 = vpop.f32.mrb[147].mxu1  ;;  %v17524_v25 = vpop.permute.xlu1 %9768 }
 0xc84   : > { %v10323_v8 = vadd.f32 %v12717_v10, %v10162_v24  ;;  %v12720_v61 = vadd.f32 %v12719_v55, %v12718_v39 }
 0xc86   : > { %v10326_v14 = vadd.f32 %v12720_v61, %v10165_v29  ;;  %v10437_v49 = vmax.f32 %v10323_v8, 0.0  ;;  %v9684_v29 = vpop.permute.xlu0 %9683 }
 0xc87   : > { %v10186_v28 = vadd.f32 %v17444_v31, %v9684_v29 }
 0xc88   : > { %v10438_v52 = vmax.f32 %v10326_v14, 0.0  ;;  %v12721_v48 = vpop.f32.mrb[208].mxu1 }
 0xc89   : > { %v12722_v60 = vpop.f32.mrb[209].mxu1 }
 0xc8a   : > { %v17519_v21 = vpack.c.bf16 %v10438_v52, %v10437_v49  ;;  %v12723_v15 = vadd.f32 %v12722_v60, %v12721_v48  ;;  %v12724_v45 = vpop.f32.mrb[210].mxu1  ;;  %v9689_v49 = vpop.permute.xlu1 %9688 }
 0xc8b   : > { %v12725_v5 = vpop.f32.mrb[211].mxu1  ;;  %v10189_v2 = vadd.f32 %v17446_v62, %v9689_v49 }
 0xc8c   : > { %v10331_v16 = vadd.f32 %v12723_v15, %v10170_v35  ;;  %v12726_v57 = vadd.f32 %v12725_v5, %v12724_v45  ;;  %v17530_v35 = vpop.permute.xlu0 %9773 }
 0xc8e   : > { %v10334_v24 = vadd.f32 %v12726_v57, %v10173_v46  ;;  %v10439_v10 = vmax.f32 %v10331_v16, 0.0  ;;  %v17532_v46 = vpop.permute.xlu1 %9778 }
 0xc90   : > { %v10440_v39 = vmax.f32 %v10334_v24, 0.0  ;;  %v12727_v55 = vpop.f32.mrb[212].mxu1 }
 0xc91   : > { %v12728_v8 = vpop.f32.mrb[213].mxu1 }
 0xc92   : > { %v17527_v37 = vpack.c.bf16 %v10440_v39, %v10439_v10  ;;  %v12729_v61 = vadd.f32 %v12728_v8, %v12727_v55  ;;  %v12730_v14 = vpop.f32.mrb[214].mxu1  ;;  %v9694_v55 = vpop.permute.xlu0 %9693 }
 0xc93   : > { %v12731_v52 = vpop.f32.mrb[215].mxu1 }
 0xc94   : > { %v10339_v3 = vadd.f32 %v12729_v61, %v10178_v23  ;;  %v12732_v48 = vadd.f32 %v12731_v52, %v12730_v14  ;;  %v9699_v23 = vpop.permute.xlu1 %9698 }
 0xc95   : > { %v10197_v62 = vadd.f32 %v17450_v43, %v9699_v23 }
 0xc96   : > { %v10342_v60 = vadd.f32 %v12732_v48, %v10181_v51  ;;  %v10441_v15 = vmax.f32 %v10339_v3, 0.0  ;;  %v10194_v3 = vadd.f32 %v17448_v58, %v9694_v55 }
 0xc98   : > { %v10442_v45 = vmax.f32 %v10342_v60, 0.0  ;;  %v12733_v5 = vpop.f32.mrb[216].mxu1  ;;  %v17541_v60 = vpop.permute.xlu0 %9783 }
 0xc99   : > { %v12734_v16 = vpop.f32.mrb[217].mxu1 }
 0xc9a   : > { %v17535_v17 = vpack.c.bf16 %v10442_v45, %v10441_v15  ;;  %v12735_v57 = vadd.f32 %v12734_v16, %v12733_v5  ;;  %v12736_v24 = vpop.f32.mrb[218].mxu1  ;;  %v17544_v5 = vpop.permute.xlu1 %9788 }
 0xc9b   : > { %v12737_v10 = vpop.f32.mrb[219].mxu1 }
 0xc9c   : > { %v10347_v59 = vadd.f32 %v12735_v57, %v10186_v28  ;;  %v12738_v39 = vadd.f32 %v12737_v10, %v12736_v24  ;;  %v9704_v10 = vpop.permute.xlu0 %9703 }
 0xc9d   : > { %v10202_v58 = vadd.f32 %v17452_v63, %v9704_v10 }
 0xc9e   : > { %v10350_v8 = vadd.f32 %v12738_v39, %v10189_v2  ;;  %v10443_v61 = vmax.f32 %v10347_v59, 0.0 }
 0xca0   : > { %v10444_v14 = vmax.f32 %v10350_v8, 0.0  ;;  %v12739_v52 = vpop.f32.mrb[220].mxu1  ;;  %v9709_v8 = vpop.permute.xlu1 %9708 }
 0xca1   : > { %v12740_v51 = vpop.f32.mrb[221].mxu1  ;;  %v10205_v43 = vadd.f32 %v17454_v40, %v9709_v8 }
 0xca2   : > { %v17539_v48 = vpack.c.bf16 %v10444_v14, %v10443_v61  ;;  %v12741_v31 = vadd.f32 %v12740_v51, %v12739_v52  ;;  %v12742_v29 = vpop.f32.mrb[222].mxu1 }
 0xca3   : > { %v12743_v15 = vpop.f32.mrb[223].mxu1 }
 0xca4   : > { %v10355_v49 = vadd.f32 %v12741_v31, %v10194_v3  ;;  %v12744_v45 = vadd.f32 %v12743_v15, %v12742_v29  ;;  %v10210_v15 = vadd.f32 %v17456_v20, %v17472_v19 }
 0xca6   : > { %v10358_v16 = vadd.f32 %v12744_v45, %v10197_v62  ;;  %v10445_v28 = vmax.f32 %v10355_v49, 0.0 }
 0xca8   : > { %v10446_v57 = vmax.f32 %v10358_v16, 0.0  ;;  %v12745_v24 = vpop.f32.mrb[224].mxu1  ;;  %v10213_v16 = vadd.f32 %v17458_v44, %v17474_v41 }
 0xca9   : > { %v12746_v2 = vpop.f32.mrb[225].mxu1 }
 0xcaa   : > { %v17547_v59 = vpack.c.bf16 %v10446_v57, %v10445_v28  ;;  %v12747_v39 = vadd.f32 %v12746_v2, %v12745_v24  ;;  %v12748_v55 = vpop.f32.mrb[226].mxu1 }
 0xcab   : > { %v12749_v61 = vpop.f32.mrb[227].mxu1 }
 0xcac   : > { %v10363_v23 = vadd.f32 %v12747_v39, %v10202_v58  ;;  %v12750_v14 = vadd.f32 %v12749_v61, %v12748_v55  ;;  %v10218_v39 = vadd.f32 %v17460_v27, %v17482_v54  ;;  %v10221_v61 = vadd.f32 %v17462_v7, %v17486_v53 }
 0xcad   : > { %v10226_v27 = vadd.f32 %v17464_v26, %v17492_v56  ;;  %v10229_v7 = vadd.f32 %v17466_v0, %v17494_v30  ;;  %v10234_v26 = vadd.f32 %v17468_v36, %v17501_v47  ;;  %v10237_v0 = vadd.f32 %v17470_v22, %v17504_v4 }
 0xcae   : > { %v10366_v52 = vadd.f32 %v12750_v14, %v10205_v43  ;;  %v10447_v51 = vmax.f32 %v10363_v23, 0.0  ;;  %v10242_v36 = vadd.f32 %v17476_v50, %v17510_v11  ;;  %v10245_v22 = vadd.f32 %v17478_v32, %v17512_v1 }
 0xcaf   : > { %v10250_v50 = vadd.f32 %v17480_v9, %v17521_v42  ;;  %v10253_v32 = vadd.f32 %v17484_v33, %v17524_v25  ;;  %v10258_v9 = vadd.f32 %v17488_v6, %v17530_v35  ;;  %v10261_v33 = vadd.f32 %v17490_v18, %v17532_v46 }
 0xcb0   : > { %v10448_v3 = vmax.f32 %v10366_v52, 0.0  ;;  %v12751_v31 = vpop.f32.mrb[228].mxu1  ;;  %v10266_v6 = vadd.f32 %v17496_v34, %v17541_v60  ;;  %v10269_v18 = vadd.f32 %v17498_v12, %v17544_v5  ;;  %v14882_v34 = vld [vmem:[#allocation8 + $0x114] ss:$8 sps:$4 sm:$0xff]   ;;  %v18202_v60 = vmov 0.0  }
 0xcb1   : > { %v12752_v29 = vpop.f32.mrb[229].mxu1  ;;  %v14885_v12 = vld [vmem:[#allocation8 + $0x124] ss:$8 sps:$4 sm:$0xff]   ;;  %v14883_v5 = vld [vmem:[#allocation8 + $0x120] ss:$8 sps:$4 sm:$0xff]  }
 0xcb2   : > { %v17552_v62 = vpack.c.bf16 %v10448_v3, %v10447_v51  ;;  %v12753_v63 = vadd.f32 %v12752_v29, %v12751_v31  ;;  %v12754_v49 = vpop.f32.mrb[230].mxu1 }
 0xcb3   : > { %v12755_v45 = vpop.f32.mrb[231].mxu1 }
 0xcb4   : > { %v10371_v28 = vadd.f32 %v12753_v63, %v10210_v15  ;;  %v12756_v40 = vadd.f32 %v12755_v45, %v12754_v49 }
 0xcb6   : > { %v10374_v57 = vadd.f32 %v12756_v40, %v10213_v16  ;;  %v10449_v24 = vmax.f32 %v10371_v28, 0.0 }
 0xcb8   : > { %v10450_v10 = vmax.f32 %v10374_v57, 0.0  ;;  %v12757_v2 = vpop.f32.mrb[232].mxu1 }
 0xcb9   : > { %v12758_v58 = vpop.f32.mrb[233].mxu1 }
 0xcba   : > { %v12759_v55 = vadd.f32 %v12758_v58, %v12757_v2  ;;  %v12760_v20 = vpop.f32.mrb[234].mxu1  ;;  %v10473_v19 = vpack.c.bf16 %v10450_v10, %v10449_v24 }
 0xcbb   : > { %v12761_v8 = vpop.f32.mrb[235].mxu1 }
 0xcbc   : > { %v10379_v43 = vadd.f32 %v12759_v55, %v10218_v39  ;;  %v12762_v23 = vadd.f32 %v12761_v8, %v12760_v20  ;;  %12799 = vmatprep.subr.bf16.mxu1 %v10473_v19 }
 0xcbd   : > { %12800 = vmatpush3.bf16.msra.mxu1 %v17507_v38 }
 0xcbe   : > { %v10382_v44 = vadd.f32 %v12762_v23, %v10221_v61  ;;  %v10451_v41 = vmax.f32 %v10379_v43, 0.0 }
 0xcc0   : > { %v10452_v14 = vmax.f32 %v10382_v44, 0.0  ;;  %v12763_v52 = vpop.f32.mrb[236].mxu1 }
 0xcc1   : > { %v12764_v51 = vpop.f32.mrb[237].mxu1 }
 0xcc2   : > { %v12765_v54 = vadd.f32 %v12764_v51, %v12763_v52  ;;  %v12766_v3 = vpop.f32.mrb[238].mxu1  ;;  %v10474_v31 = vpack.c.bf16 %v10452_v14, %v10451_v41 }
 0xcc3   : > { %v12767_v29 = vpop.f32.mrb[239].mxu1 }
 0xcc4   : > { %v10387_v53 = vadd.f32 %v12765_v54, %v10226_v27  ;;  %v12768_v15 = vadd.f32 %v12767_v29, %v12766_v3  ;;  %12801 = vmatprep.subr.bf16.mxu1 %v10474_v31 }
 0xcc5   : > { %12802 = vmatpush3.bf16.msra.mxu1 %v17515_v13 }
 0xcc6   : > { %v10390_v38 = vadd.f32 %v12768_v15, %v10229_v7  ;;  %v10453_v63 = vmax.f32 %v10387_v53, 0.0 }
 0xcc8   : > { %v10454_v49 = vmax.f32 %v10390_v38, 0.0  ;;  %v12769_v45 = vpop.f32.mrb[240].mxu1 }
 0xcc9   : > { %v12770_v16 = vpop.f32.mrb[241].mxu1 }
 0xcca   : > { %v12771_v56 = vadd.f32 %v12770_v16, %v12769_v45  ;;  %v12772_v28 = vpop.f32.mrb[242].mxu1  ;;  %v10475_v40 = vpack.c.bf16 %v10454_v49, %v10453_v63 }
 0xccb   : > { %v12773_v57 = vpop.f32.mrb[243].mxu1 }
 0xccc   : > { %v10395_v30 = vadd.f32 %v12771_v56, %v10234_v26  ;;  %v12774_v24 = vadd.f32 %v12773_v57, %v12772_v28  ;;  %12803 = vmatprep.subr.bf16.mxu1 %v10475_v40 }
 0xccd   : > { %12804 = vmatpush3.bf16.msra.mxu1 %v17519_v21 }
 0xcce   : > { %v10398_v13 = vadd.f32 %v12774_v24, %v10237_v0  ;;  %v10455_v10 = vmax.f32 %v10395_v30, 0.0  ;;  %v14877_v30 = vld [vmem:[#allocation8 + $0x100] ss:$8 sps:$4 sm:$0xff]   ;;  %v14880_v24 = vld [vmem:[#allocation8 + $0x110] ss:$8 sps:$4 sm:$0xff]  }
 0xcd0   : > { %v10456_v2 = vmax.f32 %v10398_v13, 0.0  ;;  %v12775_v58 = vpop.f32.mrb[244].mxu1  ;;  %v14888_v13 = vld [vmem:[#allocation8 + $0x134] ss:$8 sps:$4 sm:$0xff]  }
 0xcd1   : > { %v12776_v39 = vpop.f32.mrb[245].mxu1 }
 0xcd2   : > { %v12777_v47 = vadd.f32 %v12776_v39, %v12775_v58  ;;  %v12778_v55 = vpop.f32.mrb[246].mxu1  ;;  %v10476_v20 = vpack.c.bf16 %v10456_v2, %v10455_v10  ;;  %v14891_v10 = vld [vmem:[#allocation8 + $0x144] ss:$8 sps:$4 sm:$0xff]   ;;  %v14889_v2 = vld [vmem:[#allocation8 + $0x140] ss:$8 sps:$4 sm:$0xff]  }
 0xcd3   : > { %v12779_v19 = vpop.f32.mrb[247].mxu1  ;;  %v14894_v58 = vld [vmem:[#allocation8 + $0x154] ss:$8 sps:$4 sm:$0xff]   ;;  %v14897_v39 = vld [vmem:[#allocation8 + $0x164] ss:$8 sps:$4 sm:$0xff]  }
 0xcd4   : > { %v10403_v4 = vadd.f32 %v12777_v47, %v10242_v36  ;;  %v12780_v8 = vadd.f32 %v12779_v19, %v12778_v55  ;;  %12805 = vmatprep.subr.bf16.mxu1 %v10476_v20  ;;  %v14895_v36 = vld [vmem:[#allocation8 + $0x160] ss:$8 sps:$4 sm:$0xff]   ;;  %v14900_v47 = vld [vmem:[#allocation8 + $0x174] ss:$8 sps:$4 sm:$0xff]   ;;  %v14898_v55 = vld [vmem:[#allocation8 + $0x170] ss:$8 sps:$4 sm:$0xff]  }
 0xcd5   : > { %12806 = vmatpush3.bf16.msra.mxu1 %v17527_v37 }
 0xcd6   : > { %v10406_v21 = vadd.f32 %v12780_v8, %v10245_v22  ;;  %v10457_v61 = vmax.f32 %v10403_v4, 0.0  ;;  %v10518_v8 = vpop.permute.xlu0 %10517 }
 0xcd8   : > { %v10458_v43 = vmax.f32 %v10406_v21, 0.0  ;;  %v12781_v23 = vpop.f32.mrb[248].mxu1 }
 0xcd9   : > { %v12782_v44 = vpop.f32.mrb[249].mxu1 }
 0xcda   : > { %v12783_v11 = vadd.f32 %v12782_v44, %v12781_v23  ;;  %v12784_v41 = vpop.f32.mrb[250].mxu1  ;;  %v10477_v14 = vpack.c.bf16 %v10458_v43, %v10457_v61  ;;  %v10523_v23 = vpop.permute.xlu1 %10522 }
 0xcdb   : > { %v12785_v52 = vpop.f32.mrb[251].mxu1 }
 0xcdc   : > { %v10411_v1 = vadd.f32 %v12783_v11, %v10250_v50  ;;  %v12786_v51 = vadd.f32 %v12785_v52, %v12784_v41  ;;  %12807 = vmatprep.subr.bf16.mxu1 %v10477_v14 }
 0xcdd   : > { %12808 = vmatpush3.bf16.msra.mxu1 %v17535_v17 }
 0xcde   : > { %v10414_v37 = vadd.f32 %v12786_v51, %v10253_v32  ;;  %v10459_v27 = vmax.f32 %v10411_v1, 0.0  ;;  %v10528_v51 = vpop.permute.xlu0 %10527 }
 0xce0   : > { %v10460_v54 = vmax.f32 %v10414_v37, 0.0  ;;  %v12787_v3 = vpop.f32.mrb[252].mxu1 }
 0xce1   : > { %v12788_v31 = vpop.f32.mrb[253].mxu1 }
 0xce2   : > { %v12789_v42 = vadd.f32 %v12788_v31, %v12787_v3  ;;  %v12790_v29 = vpop.f32.mrb[254].mxu1  ;;  %v10478_v7 = vpack.c.bf16 %v10460_v54, %v10459_v27  ;;  %v10533_v3 = vpop.permute.xlu1 %10532 }
 0xce3   : > { %v12791_v53 = vpop.f32.mrb[255].mxu1 }
 0xce4   : > { %v10419_v25 = vadd.f32 %v12789_v42, %v10258_v9  ;;  %v12792_v15 = vadd.f32 %v12791_v53, %v12790_v29  ;;  %12809 = vmatprep.subr.bf16.mxu1 %v10478_v7 }
 0xce5   : > { %12810 = vmatpush3.bf16.msra.mxu1 %v17539_v48 }
 0xce6   : > { %v10422_v17 = vadd.f32 %v12792_v15, %v10261_v33  ;;  %v10461_v38 = vmax.f32 %v10419_v25, 0.0  ;;  %v10538_v15 = vpop.permute.xlu0 %10537 }
 0xce8   : > { %v10462_v63 = vmax.f32 %v10422_v17, 0.0  ;;  %v12793_v49 = vpop.f32.mrb[148].mxu1 }
 0xce9   : > { %v12794_v45 = vpop.f32.mrb[149].mxu1 }
 0xcea   : > { %v12795_v35 = vadd.f32 %v12794_v45, %v12793_v49  ;;  %v12796_v16 = vpop.f32.mrb[150].mxu1  ;;  %v10479_v26 = vpack.c.bf16 %v10462_v63, %v10461_v38  ;;  %v10543_v49 = vpop.permute.xlu1 %10542 }
 0xceb   : > { %v12797_v56 = vpop.f32.mrb[151].mxu1 }
 0xcec   : > { %v10427_v46 = vadd.f32 %v12795_v35, %v10266_v6  ;;  %v12798_v28 = vadd.f32 %v12797_v56, %v12796_v16  ;;  %12811 = vmatprep.subr.bf16.mxu1 %v10479_v26 }
 0xced   : > { %12812 = vmatpush3.bf16.msra.mxu1 %v17547_v59  ;;  %v14886_v59 = vld [vmem:[#allocation8 + $0x130] ss:$8 sps:$4 sm:$0xff]  }
 0xcee   : > { %v10430_v48 = vadd.f32 %v12798_v28, %v10269_v18  ;;  %v10463_v40 = vmax.f32 %v10427_v46, 0.0  ;;  %v10548_v28 = vpop.permute.xlu0 %10547 }
 0xcf0   : > { %v10464_v57 = vmax.f32 %v10430_v48, 0.0 }
 0xcf2   : > { %v10480_v0 = vpack.c.bf16 %v10464_v57, %v10463_v40 }
 0xcf4   : > { %12813 = vmatprep.subr.bf16.mxu1 %v10480_v0  ;;  %v10553_v0 = vpop.permute.xlu1 %10552 }
 0xcf5   : > { %12814 = vmatpush3.bf16.msra.mxu1 %v17552_v62  ;;  %v14892_v62 = vld [vmem:[#allocation8 + $0x150] ss:$8 sps:$4 sm:$0xff]  }
 0xcf6   : > { %12912 = vmatprep.subr.bf16.mxu1 %v18202_v60 }
 0xcf8   : > { %10708 = vmatmul.mubr.bf16.vlgmr.msra.gmra.mrb[152].mxu1 %v14877_v30 }
 0xcf9   : > { %10715 = vmatprep.mubr.bf16.mxu1 %v14882_v34 }
 0xd00   : > { %10716 = vmatmul.mubr.bf16.gmra.mrb[156].mxu1 %v14880_v24 }
 0xd01   : > { %10723 = vmatprep.mubr.bf16.mxu1 %v14885_v12 }
 0xd08   : > { %10724 = vmatmul.mubr.bf16.gmra.mrb[160].mxu1 %v14883_v5 }
 0xd09   : > { %10731 = vmatprep.mubr.bf16.mxu1 %v14888_v13 }
 0xd10   : > { %10732 = vmatmul.mubr.bf16.gmra.mrb[164].mxu1 %v14886_v59 }
 0xd11   : > { %10739 = vmatprep.mubr.bf16.mxu1 %v14891_v10 }
 0xd18   : > { %10740 = vmatmul.mubr.bf16.gmra.mrb[168].mxu1 %v14889_v2  ;;  %v10558_v2 = vpop.permute.xlu0 %10557 }
 0xd19   : > { %10747 = vmatprep.mubr.bf16.mxu1 %v14894_v58 }
 0xd20   : > { %10748 = vmatmul.mubr.bf16.gmra.mrb[172].mxu1 %v14892_v62 }
 0xd21   : > { %10755 = vmatprep.mubr.bf16.mxu1 %v14897_v39 }
 0xd28   : > { %10756 = vmatmul.mubr.bf16.gmra.mrb[176].mxu1 %v14895_v36  ;;  %v10563_v36 = vpop.permute.xlu1 %10562 }
 0xd29   : > { %10763 = vmatprep.mubr.bf16.mxu1 %v14900_v47 }
 0xd30   : > { %10764 = vmatmul.mubr.bf16.gmra.mrb[180].mxu1 %v14898_v55 }
 0xd31   : > { %12928 = vmatprep.mubr.msk.bf16.mxu1 %vm15156_vm0, %v18202_v60 }
 0xdcb   : > { %v12815_v20 = vpop.f32.mrb[152].mxu1 }
 0xdcc   : > { %v12816_v19 = vpop.f32.mrb[153].mxu1 }
 0xdcd   : > { %v12817_v22 = vadd.f32 %v12816_v19, %v12815_v20  ;;  %v12818_v4 = vpop.f32.mrb[154].mxu1 }
 0xdce   : > { %v12819_v21 = vpop.f32.mrb[155].mxu1 }
 0xdcf   : > { %v10710_v61 = vadd.f32 %v12817_v22, %v10518_v8  ;;  %v12820_v43 = vadd.f32 %v12819_v21, %v12818_v4 }
 0xdd1   : > { %v10713_v44 = vadd.f32 %v12820_v43, %v10523_v23  ;;  %v10772_v50 = vmax.f32 %v10710_v61, 0.0  ;;  %v10568_v61 = vpop.permute.xlu0 %10567 }
 0xdd3   : > { %v10773_v11 = vmax.f32 %v10713_v44, 0.0  ;;  %v12821_v41 = vpop.f32.mrb[156].mxu1 }
 0xdd4   : > { %v12822_v14 = vpop.f32.mrb[157].mxu1 }
 0xdd5   : > { %v10788_v52 = vpack.c.bf16 %v10773_v11, %v10772_v50  ;;  %v12823_v32 = vadd.f32 %v12822_v14, %v12821_v41  ;;  %v12824_v1 = vpop.f32.mrb[158].mxu1  ;;  %v10573_v50 = vpop.permute.xlu1 %10572 }
 0xdd6   : > { %v12825_v37 = vpop.f32.mrb[159].mxu1 }
 0xdd7   : > { %v10718_v27 = vadd.f32 %v12823_v32, %v10528_v51  ;;  %v12826_v54 = vadd.f32 %v12825_v37, %v12824_v1  ;;  %12913 = vmatpush3.bf16.msra.mxu1 %v10788_v52 }
 0xdd8   : > { %12914 = vmatprep.subr.bf16.mxu1 %v18202_v60 }
 0xdd9   : > { %v10721_v31 = vadd.f32 %v12826_v54, %v10533_v3  ;;  %v10774_v9 = vmax.f32 %v10718_v27, 0.0  ;;  %v10578_v27 = vpop.permute.xlu0 %10577 }
 0xddb   : > { %v10775_v42 = vmax.f32 %v10721_v31, 0.0  ;;  %v12827_v29 = vpop.f32.mrb[160].mxu1 }
 0xddc   : > { %v12828_v7 = vpop.f32.mrb[161].mxu1 }
 0xddd   : > { %v10789_v53 = vpack.c.bf16 %v10775_v42, %v10774_v9  ;;  %v12829_v33 = vadd.f32 %v12828_v7, %v12827_v29  ;;  %v12830_v25 = vpop.f32.mrb[162].mxu1  ;;  %v10583_v9 = vpop.permute.xlu1 %10582 }
 0xdde   : > { %v12831_v17 = vpop.f32.mrb[163].mxu1 }
 0xddf   : > { %v10726_v38 = vadd.f32 %v12829_v33, %v10538_v15  ;;  %v12832_v63 = vadd.f32 %v12831_v17, %v12830_v25  ;;  %12915 = vmatpush3.bf16.msra.mxu1 %v10789_v53 }
 0xde0   : > { %12916 = vmatprep.subr.bf16.mxu1 %v18202_v60 }
 0xde1   : > { %v10729_v45 = vadd.f32 %v12832_v63, %v10543_v49  ;;  %v10776_v6 = vmax.f32 %v10726_v38, 0.0  ;;  %v10588_v38 = vpop.permute.xlu0 %10587 }
 0xde3   : > { %v10777_v35 = vmax.f32 %v10729_v45, 0.0  ;;  %v12833_v16 = vpop.f32.mrb[164].mxu1 }
 0xde4   : > { %v12834_v26 = vpop.f32.mrb[165].mxu1 }
 0xde5   : > { %v10790_v56 = vpack.c.bf16 %v10777_v35, %v10776_v6  ;;  %v12835_v18 = vadd.f32 %v12834_v26, %v12833_v16  ;;  %v12836_v46 = vpop.f32.mrb[166].mxu1  ;;  %v10593_v6 = vpop.permute.xlu1 %10592 }
 0xde6   : > { %v12837_v48 = vpop.f32.mrb[167].mxu1 }
 0xde7   : > { %v10734_v40 = vadd.f32 %v12835_v18, %v10548_v28  ;;  %v12838_v57 = vadd.f32 %v12837_v48, %v12836_v46  ;;  %12917 = vmatpush3.bf16.msra.mxu1 %v10790_v56  ;;  %v10796_v18 = vld [vmem:[#allocation10 + $0x8] sm:$0xf]  ;;  %v10845_v46 = vlaneseq }
 0xde8   : > { %12918 = vmatprep.subr.bf16.mxu1 %v18202_v60 }
 0xde9   : > { %v10737_v30 = vadd.f32 %v12838_v57, %v10553_v0  ;;  %v10778_v34 = vmax.f32 %v10734_v40, 0.0  ;;  %v10846_v48 = vshrl.u32 %v10845_v46, 7  ;;  %v18203_v40 = vld [vmem:[#allocation99_spill] sm:$0xff] }
 0xdeb   : > { %v10779_v24 = vmax.f32 %v10737_v30, 0.0  ;;  %v12839_v12 = vpop.f32.mrb[168].mxu1  ;;  %v10842_v30 = vpop.permute.xlu0 %10841  ;;  %vm10847_vm1 = vcmp.lt.s32.totalorder %v10846_v48, 4  ;;  %vm10848_vm2 = vcmp.eq.s32.totalorder %v10846_v48, 7 }
 0xdec   : > { %v12840_v5 = vpop.f32.mrb[169].mxu1 }
 0xded   : > { %v10791_v13 = vpack.c.bf16 %v10779_v24, %v10778_v34  ;;  %v12841_v59 = vadd.f32 %v12840_v5, %v12839_v12  ;;  %v12842_v10 = vpop.f32.mrb[170].mxu1 }
 0xdee   : > { %v12843_v58 = vpop.f32.mrb[171].mxu1 }
 0xdef   : > { %v10742_v62 = vadd.f32 %v12841_v59, %v10558_v2  ;;  %v12844_v39 = vadd.f32 %v12843_v58, %v12842_v10  ;;  %12919 = vmatpush3.bf16.msra.mxu1 %v10791_v13 }
 0xdf0   : > { %12920 = vmatprep.subr.bf16.mxu1 %v18202_v60 }
 0xdf1   : > { %v10745_v47 = vadd.f32 %v12844_v39, %v10563_v36  ;;  %v10780_v55 = vmax.f32 %v10742_v62, 0.0 }
 0xdf3   : > { %v10781_v20 = vmax.f32 %v10745_v47, 0.0  ;;  %v12845_v19 = vpop.f32.mrb[172].mxu1 }
 0xdf4   : > { %v12846_v22 = vpop.f32.mrb[173].mxu1 }
 0xdf5   : > { %v10792_v4 = vpack.c.bf16 %v10781_v20, %v10780_v55  ;;  %v12847_v8 = vadd.f32 %v12846_v22, %v12845_v19  ;;  %v12848_v21 = vpop.f32.mrb[174].mxu1 }
 0xdf6   : > { %v12849_v43 = vpop.f32.mrb[175].mxu1 }
 0xdf7   : > { %v10750_v23 = vadd.f32 %v12847_v8, %v10568_v61  ;;  %v12850_v44 = vadd.f32 %v12849_v43, %v12848_v21  ;;  %12921 = vmatpush3.bf16.msra.mxu1 %v10792_v4 }
 0xdf8   : > { %12922 = vmatprep.subr.bf16.mxu1 %v18202_v60 }
 0xdf9   : > { %v10753_v11 = vadd.f32 %v12850_v44, %v10573_v50  ;;  %v10782_v41 = vmax.f32 %v10750_v23, 0.0 }
 0xdfb   : > { %v10783_v14 = vmax.f32 %v10753_v11, 0.0  ;;  %v12851_v52 = vpop.f32.mrb[176].mxu1 }
 0xdfc   : > { %v12852_v32 = vpop.f32.mrb[177].mxu1 }
 0xdfd   : > { %v10793_v1 = vpack.c.bf16 %v10783_v14, %v10782_v41  ;;  %v12853_v51 = vadd.f32 %v12852_v32, %v12851_v52  ;;  %v12854_v37 = vpop.f32.mrb[178].mxu1 }
 0xdfe   : > { %v12855_v54 = vpop.f32.mrb[179].mxu1 }
 0xdff   : > { %v10758_v3 = vadd.f32 %v12853_v51, %v10578_v27  ;;  %v12856_v31 = vadd.f32 %v12855_v54, %v12854_v37  ;;  %12923 = vmatpush3.bf16.msra.mxu1 %v10793_v1 }
 0xe00   : > { %12924 = vmatprep.subr.bf16.mxu1 %v18202_v60 }
 0xe01   : > { %v10761_v42 = vadd.f32 %v12856_v31, %v10583_v9  ;;  %v10784_v29 = vmax.f32 %v10758_v3, 0.0 }
 0xe03   : > { %v10785_v7 = vmax.f32 %v10761_v42, 0.0  ;;  %v12857_v53 = vpop.f32.mrb[180].mxu1 }
 0xe04   : > { %v12858_v33 = vpop.f32.mrb[181].mxu1 }
 0xe05   : > { %v10794_v25 = vpack.c.bf16 %v10785_v7, %v10784_v29  ;;  %v12859_v15 = vadd.f32 %v12858_v33, %v12857_v53  ;;  %v12860_v17 = vpop.f32.mrb[182].mxu1 }
 0xe06   : > { %v12861_v63 = vpop.f32.mrb[183].mxu1 }
 0xe07   : > { %v10766_v49 = vadd.f32 %v12859_v15, %v10588_v38  ;;  %v12862_v45 = vadd.f32 %v12861_v63, %v12860_v17  ;;  %12925 = vmatpush3.bf16.msra.mxu1 %v10794_v25 }
 0xe08   : > { %12926 = vmatprep.subr.bf16.mxu1 %v18202_v60 }
 0xe09   : > { %v10769_v35 = vadd.f32 %v12862_v45, %v10593_v6  ;;  %v10786_v16 = vmax.f32 %v10766_v49, 0.0 }
 0xe0b   : > { %v10787_v26 = vmax.f32 %v10769_v35, 0.0 }
 0xe0d   : > { %v10795_v56 = vpack.c.bf16 %v10787_v26, %v10786_v16 }
 0xe0f   : > { %12927 = vmatpush3.bf16.msra.mxu1 %v10795_v56 }
 0xe12   : > { %12929 = vmatmul.mubr.bf16.vlgmr.msra.gmra.mrb[184].mxu1 %v10796_v18 }
 0xee5   : > { %v10831_v28 = vpop.f32.mrb[184].mxu1 }
 0xee6   : > { %v10837_v57 = vadd.f32 %v10831_v28, %v18203_v40  ;;  %v12930_v0 = vpop.f32.mrb[185].mxu1 }
 0xee7   : > { %v10834_v34 = vpop.f32.mrb[186].mxu1 }
 0xee8   : > { %v10844_v24 = vadd.f32 %v10842_v30, %v10837_v57  ;;  %v12931_v12 = vpop.f32.mrb[187].mxu1 }
 0xeea   : > { %v10849_v5 = vmul.f32 %v10844_v24, %v10844_v24  ;;  %v10859_v60 = vsub.f32 0.0, %v10844_v24 }
 0xeec   : > { %v10860_v13 = vmul.f32 1.442695, %v10859_v60  ;;  %v10850_v59 = vsel %vm10847_vm1, %v10849_v5, 0.0 }
 0xeed   : > { %v10851_v10 = vrot.slane %v10850_v59, 4 }
 0xeee   : > { %14901 = vpow2.f32 %v10860_v13 }
 0xeef   : > { %v10852_v2 = vadd.f32 %v10851_v10, %v10850_v59 }
 0xef1   : > { %v10853_v58 = vrot.slane %v10852_v2, 2 }
 0xef3   : > { %v10854_v62 = vadd.f32 %v10853_v58, %v10852_v2 }
 0xef5   : > { %v10855_v39 = vrot.slane %v10854_v62, 1 }
 0xef7   : > { %v10856_v36 = vadd.f32 %v10855_v39, %v10854_v62 }
 0xef8   : > { %v14902_v47 = vpop.eup %14901 }
 0xef9   : > { %v10862_v55 = vadd.f32 1.0, %v14902_v47  ;;  %v10857_v20 = vadd.f32 1e-12, %v10856_v36 }
 0xefb   : > { %14903 = vrcp.f32 %v10862_v55 }
 0xefc   : > { %14905 = vrsqrt.f32 %v10857_v20 }
 0xf05   : > { %v14904_v19 = vpop.eup %14903 }
 0xf06   : > { %v14906_v22 = vpop.eup %14905  ;;  %v10865_v4 = vsel %vm10848_vm2, %v14904_v19, %v10844_v24 }
 0xf07   : > { %v10864_v8 = vmul.f32 %v14906_v22, %v10844_v24 }
 0xf09   : > { %v10866_v21 = vsel %vm10847_vm1, %v10864_v8, %v10865_v4 }
 0xf0a   : > { %10867 = vst [vmem:[%s396_s22] sm:$0xff] %v10866_v21 }
 0xf0b   : > { %15062 = shalt.err (!%p15059_p0)
}
 0xf0c   : > { %s15063_s1 = scalar_lea.hbm %s17609_s19, 128  ;;  %s15067_s17 = scalar_lea.hbm %s18205_s14, 256 }
 0xf0d   : > { %p15064_p4 = scmp.ne.s32.totalorder %s17609_s19, %s15063_s1  ;;  %p15068_p12 = scmp.lt.u32.totalorder %s17609_s19, %s18205_s14 }
 0xf0e   : > { %p15069_p1 = scmp.lt.u32.totalorder %s15067_s17, %s15063_s1  ;;  %p15071_p8 = scmp.lt.u32.totalorder %s15063_s1, %s17609_s19 }
 0xf0f   : > { %p15065_p13 = pnand %p15064_p4, %p15372_p5 }
 0xf10   : > { %p15070_p11 = por %p15069_p1, %p15068_p12 }
 0xf11   : > { %p15066_p2 = pneg %p15065_p13 }
 0xf12   : > { %p15072_p6 = por %p15071_p8, %p15070_p11 }
 0xf14   : > { %p15073_p10 = pnand %p15072_p6, %p15066_p2 }
 0xf16   : > { %15076 = shalt.err (!%p15073_p10)
}
 0xf17   : > { %13531 = dma.vmem_to_hbm [thread:$0]  (%p15372_p5), %s17611_s25, 128, %s17609_s19, %s10869_s8  }
 0xf18 PF: > { %s18206_s22 = sld [smem:[#allocation16_spill]]  ;;  %s18207_s16 = sld [smem:[#allocation18_spill]] }
 0xf19   : > { %p18209_p7 = scmp.ge.s32.totalorder %s15139_s10, 2 }
 0xf1e   : > { %s10895_s21 = sand.u32 1, %s18206_s22   ;;  %p18208_p3 = scmp.ne.s32.totalorder %s18207_s16, 0 }
 0xf1f   : > { %s10896_s27 = scalar_lea.sflag [#allocation4], %s10895_s21 }
 0xf20   : > { %p13551_p9 = pnand %p18209_p7, %p18208_p3 }
 0xf22   : > { %15114 = dma.done.wait (!%p13551_p9), %s10896_s27, 128  }
 0xf23   : > { %15116 = vsyncadd (!%p13551_p9), %s10896_s27, 4294967168  ;;  %s26_s10 = sadd.s32 1, %s15139_s10   ;;  %s18210_s27 = smov %s15123_s28 }
 0xf24   : > { %p23_p0 = scmp.ge.s32.totalorder %s26_s10, 4   ;;  %s18211_s28 = smov %s15127_s29 }
 0xf25   : > { %s18212_s29 = smov %s15384_s11  ;;  %s18213_s30 = smov %s15135_s9 }
 0xf26   : > { %s18214_s9 = smov %s18216_s12  ;;  %25 = sbr.rel (!%p23_p0) target bundleno = 11 (0xb), region = 121 }
 0xf2d   :  { %10901 = vsyncpa [#allocation3], 1 }
 0xf2e   :  { %10903 = vsyncpa [#allocation3 + $0x1], 1 }
 0xf2f   :  { %10904 = vsyncpa [#allocation6], 1 }
 0xf30   :  { %10905 = vsyncpa [#allocation9], 1 }
 0xf31   :  { %10906 = vsyncpa [#allocation4], 1 }
 0xf32   :  { %10908 = vsyncpa [#allocation4 + $0x1], 1 }

</bundles_post_ra>
